<compile_context>
chip_gen: v7x
topology: tpu7x:2x2x1
jax: 0.10.0
libtpu: 0.0.40
codegen_flags: <defaults>
</compile_context>

<pallas_src>
import jax
import jax.numpy as jnp
from jax.experimental import pallas as pl
from jax.experimental.pallas import tpu as pltpu

RES = 16                 # scaled down from Decoder.resolution = 128
ENC_CH = [4, 8, 16]      # scaled down from Encoder.CHANNELS = [16, 64, 512]
DEC_CH = [16, 8, 4]      # scaled down from Decoder.CHANNELS = [512, 64, 16]
BN_EPS = 1e-5


# ---------------- Pallas kernels ----------------

def _mm_bn_elu_mask_kernel(x_ref, w_ref, s_ref, t_ref, m_ref, o_ref):
    # bf16 matmul on the MXU, f32 epilogue on the VPU:
    #   y = ELU((X @ W) * scale + shift) * occupancy
    acc = jnp.dot(x_ref[...], w_ref[...], preferred_element_type=jnp.float32)
    y = acc * s_ref[...] + t_ref[...]
    # ELU negative branch as exp(min(y,0)) - 1 (kept on guaranteed lowerings).
    y = jnp.where(y > 0, y, jnp.exp(jnp.minimum(y, 0.0)) - 1.0)
    o_ref[...] = (y * m_ref[...]).astype(o_ref.dtype)


def _mm_bn_elu_mask_cls_kernel(x_ref, w_ref, s_ref, t_ref, m_ref,
                               cw_ref, cb_ref, o_ref, c_ref):
    # Same as above, plus the fused 1x1 classifier head (N=1) computed as a VPU
    # channel (lane) reduce on the already-masked activation.
    acc = jnp.dot(x_ref[...], w_ref[...], preferred_element_type=jnp.float32)
    y = acc * s_ref[...] + t_ref[...]
    y = jnp.where(y > 0, y, jnp.exp(jnp.minimum(y, 0.0)) - 1.0)
    y = y * m_ref[...]
    o_ref[...] = y.astype(o_ref.dtype)
    cls = jnp.sum(y * cw_ref[...], axis=-1, keepdims=True) + cb_ref[...]
    c_ref[...] = cls * m_ref[...]


def _pool_linear_kernel(f_ref, m_ref, w_ref, b_ref, o_ref):
    # MinkowskiGlobalPooling (mean over active voxels) fused with the mean /
    # log_var linear heads (their weights concatenated along N).
    m = m_ref[...]                                              # (B, S, 1)
    s = jnp.sum(f_ref[...].astype(jnp.float32) * m, axis=1)     # (B, C)
    cnt = jnp.sum(m, axis=1)                                    # (B, 1)
    pooled = s * pl.reciprocal(jnp.maximum(cnt, 1.0), approx=True)
    o_ref[...] = (jnp.dot(pooled, w_ref[...],
                          preferred_element_type=jnp.float32) + b_ref[...])


# ---------------- kernel wrappers ----------------

def _pick_row_tile(m):
    for t in (512, 256, 128, 64, 32, 16, 8):
        if m % t == 0:
            return t
    return m  # block dim == full array dim is always legal


def fused_mm(x2d, w, scale, shift, mask2d, cls_w=None, cls_b=None):
    """ELU((X @ W) * scale + shift) * mask, optionally with a fused N=1 head.

    X:(M,K), W:(K,N), scale/shift:(N,), mask:(M,1).  Rows tiled with a
    'parallel' grid; K and N are full-array blocks (no host padding)."""
    M, K = x2d.shape
    N = w.shape[1]
    TM = _pick_row_tile(M)
    grid = (M // TM,)
    xb = x2d.astype(jnp.bfloat16)
    wb = w.astype(jnp.bfloat16)
    s = scale.reshape(1, N).astype(jnp.float32)
    t = shift.reshape(1, N).astype(jnp.float32)
    mk = mask2d.astype(jnp.float32)
    in_specs = [
        pl.BlockSpec((TM, K), lambda i: (i, 0)),
        pl.BlockSpec((K, N), lambda i: (0, 0)),
        pl.BlockSpec((1, N), lambda i: (0, 0)),
        pl.BlockSpec((1, N), lambda i: (0, 0)),
        pl.BlockSpec((TM, 1), lambda i: (i, 0)),
    ]
    cparams = pltpu.CompilerParams(dimension_semantics=("parallel",))
    if cls_w is None:
        return pl.pallas_call(
            _mm_bn_elu_mask_kernel,
            out_shape=jax.ShapeDtypeStruct((M, N), jnp.bfloat16),
            grid=grid,
            in_specs=in_specs,
            out_specs=pl.BlockSpec((TM, N), lambda i: (i, 0)),
            compiler_params=cparams,
        )(xb, wb, s, t, mk)
    cw = cls_w.reshape(1, N).astype(jnp.float32)
    cb = cls_b.reshape(1, 1).astype(jnp.float32)
    return pl.pallas_call(
        _mm_bn_elu_mask_cls_kernel,
        out_shape=(jax.ShapeDtypeStruct((M, N), jnp.bfloat16),
                   jax.ShapeDtypeStruct((M, 1), jnp.float32)),
        grid=grid,
        in_specs=in_specs + [pl.BlockSpec((1, N), lambda i: (0, 0)),
                             pl.BlockSpec((1, 1), lambda i: (0, 0))],
        out_specs=(pl.BlockSpec((TM, N), lambda i: (i, 0)),
                   pl.BlockSpec((TM, 1), lambda i: (i, 0))),
        compiler_params=cparams,
    )(xb, wb, s, t, mk, cw, cb)


def pool_linear(feats, mask, w, b):
    """Fused MinkowskiGlobalPooling + linear_mean/linear_log_var (one call)."""
    B, S, C = feats.shape
    N = w.shape[1]
    return pl.pallas_call(
        _pool_linear_kernel,
        out_shape=jax.ShapeDtypeStruct((B, N), jnp.float32),
        grid=(1,),
        in_specs=[pl.BlockSpec((B, S, C), lambda i: (0, 0, 0)),
                  pl.BlockSpec((B, S, 1), lambda i: (0, 0, 0)),
                  pl.BlockSpec((C, N), lambda i: (0, 0)),
                  pl.BlockSpec((1, N), lambda i: (0, 0))],
        out_specs=pl.BlockSpec((B, N), lambda i: (0, 0)),
    )(feats, mask.astype(jnp.float32),
      w.astype(jnp.float32), b.reshape(1, N).astype(jnp.float32))


# ---------------- sparse-conv-on-dense-grid glue ----------------

def bn_scale_shift(bn):
    gamma, beta, mean, var = bn
    scale = gamma / jnp.sqrt(var + BN_EPS)
    shift = beta - mean * scale
    return scale, shift


def im2col3d(x, k, stride):
    # TODO(synk): replace with in-kernel tap accumulation (pl.ANY + manual DMA)
    # at production scale; at this demo scale the XLA concat is negligible.
    B, D, H, W, C = x.shape
    pad = (k - 1) // 2
    xp = jnp.pad(x, ((0, 0), (pad, pad), (pad, pad), (pad, pad), (0, 0)))
    Do = (D + 2 * pad - k) // stride + 1
    Ho = (H + 2 * pad - k) // stride + 1
    Wo = (W + 2 * pad - k) // stride + 1
    cols = []
    for dz in range(k):
        for dy in range(k):
            for dx in range(k):
                cols.append(xp[:, dz:dz + stride * Do:stride,
                               dy:dy + stride * Ho:stride,
                               dx:dx + stride * Wo:stride, :])
    return jnp.concatenate(cols, axis=-1)


def conv_bn_elu(x, occ_out, w, bn, stride=1, cls_w=None, cls_b=None):
    """MinkowskiConvolution(k=3) + BatchNorm + ELU (+ optional 1x1 cls head),
    all in a single fused Pallas call.  Inactive voxels hold zeros so a dense
    conv matches the sparse gather; outputs only exist at active coords."""
    B = x.shape[0]
    Cout = w.shape[1]
    patches = im2col3d(x.astype(jnp.bfloat16), 3, stride)
    Do, Ho, Wo = patches.shape[1:4]
    M = B * Do * Ho * Wo
    p2 = patches.reshape(M, patches.shape[-1])
    m2 = occ_out.reshape(M, 1)
    scale, shift = bn_scale_shift(bn)
    if cls_w is None:
        y = fused_mm(p2, w, scale, shift, m2)
        return y.reshape(B, Do, Ho, Wo, Cout)
    y, c = fused_mm(p2, w, scale, shift, m2, cls_w, cls_b)
    return y.reshape(B, Do, Ho, Wo, Cout), c.reshape(B, Do, Ho, Wo, 1)


def tconv_bn_elu(x, occ_in, w, bn):
    """MinkowskiGenerativeConvolutionTranspose(k=2, s=2) + BatchNorm + ELU,
    fused.  Every active parent emits all 8 children; w: (Cin, 8*Cout) with
    offsets ordered (dz, dy, dx).  BN/ELU/mask run inside the matmul kernel on
    the (parents, 8*Cout) layout; one host reshape/transpose scatters children."""
    B, D, H, W, Cin = x.shape
    Cout = w.shape[1] // 8
    scale, shift = bn_scale_shift(bn)
    scale8 = jnp.tile(scale, 8)
    shift8 = jnp.tile(shift, 8)
    M = B * D * H * W
    y = fused_mm(x.reshape(M, Cin), w, scale8, shift8, occ_in.reshape(M, 1))
    y = y.reshape(B, D, H, W, 2, 2, 2, Cout)
    y = y.transpose(0, 1, 4, 2, 5, 3, 6, 7).reshape(B, 2 * D, 2 * H, 2 * W, Cout)
    occ_out = jnp.broadcast_to(
        occ_in.reshape(B, D, 1, H, 1, W, 1, 1),
        (B, D, 2, H, 2, W, 2, 1)).reshape(B, 2 * D, 2 * H, 2 * W, 1)
    return y, occ_out


def maxpool_occ(occ, f):
    B, D, H, W, _ = occ.shape
    return occ.reshape(B, D // f, f, H // f, f, W // f, f, 1).max(axis=(2, 4, 6))


# ---------------- deterministic parameter initialization ----------------

def _bn_params(c):
    # weight=1, bias=0, running_mean=0, running_var=1 (matches module init)
    return (jnp.ones((c,), jnp.float32), jnp.zeros((c,), jnp.float32),
            jnp.zeros((c,), jnp.float32), jnp.ones((c,), jnp.float32))


def init_params(key):
    ks = iter(jax.random.split(key, 64))

    def conv_w(cin, cout, k=3):  # kaiming_normal_(mode='fan_out')
        fan_out = cout * k ** 3
        return jax.random.normal(next(ks), (k ** 3 * cin, cout),
                                 jnp.float32) * (2.0 / fan_out) ** 0.5

    def lin_w(cin, cout):
        return jax.random.normal(next(ks), (cin, cout),
                                 jnp.float32) * (1.0 / cin) ** 0.5

    def convT_w(cin, cout):
        return jax.random.normal(next(ks), (cin, 8 * cout),
                                 jnp.float32) * (2.0 / (8 * cout)) ** 0.5

    e, d = ENC_CH, DEC_CH
    return {
        # encoder
        'e1c1': conv_w(1, e[0]), 'e1bn1': _bn_params(e[0]),
        'e1c2': conv_w(e[0], e[0]), 'e1bn2': _bn_params(e[0]),
        'e2c1': conv_w(e[0], e[1]), 'e2bn1': _bn_params(e[1]),
        'e2c2': conv_w(e[1], e[1]), 'e2bn2': _bn_params(e[1]),
        'e3c1': conv_w(e[1], e[2]), 'e3bn1': _bn_params(e[2]),
        'e3c2': conv_w(e[2], e[2]), 'e3bn2': _bn_params(e[2]),
        'w_mean': lin_w(e[2], e[2]), 'b_mean': jnp.zeros((e[2],), jnp.float32),
        'w_lv': lin_w(e[2], e[2]), 'b_lv': jnp.zeros((e[2],), jnp.float32),
        # decoder block1
        'd1t1': convT_w(d[0], d[0]), 'd1bn1': _bn_params(d[0]),
        'd1c1': conv_w(d[0], d[0]), 'd1bn2': _bn_params(d[0]),
        'd1t2': convT_w(d[0], d[1]), 'd1bn3': _bn_params(d[1]),
        'd1c2': conv_w(d[1], d[1]), 'd1bn4': _bn_params(d[1]),
        'cls1_w': lin_w(d[1], 1), 'cls1_b': jnp.zeros((1,), jnp.float32),
        # decoder block2
        'd2t1': convT_w(d[1], d[2]), 'd2bn1': _bn_params(d[2]),
        'd2c1': conv_w(d[2], d[2]), 'd2bn2': _bn_params(d[2]),
        'cls2_w': lin_w(d[2], 1), 'cls2_b': jnp.zeros((1,), jnp.float32),
    }


# ---------------- model forward ----------------

def encoder_forward(p, sinput):
    occ0 = (sinput != 0).astype(jnp.float32)
    x = sinput * occ0

    occ1 = maxpool_occ(occ0, 2)                                    # 16 -> 8
    h = conv_bn_elu(x, occ1, p['e1c1'], p['e1bn1'], stride=2)
    h = conv_bn_elu(h, occ1, p['e1c2'], p['e1bn2'], stride=1)

    occ2 = maxpool_occ(occ1, 2)                                    # 8 -> 4
    h = conv_bn_elu(h, occ2, p['e2c1'], p['e2bn1'], stride=2)
    h = conv_bn_elu(h, occ2, p['e2c2'], p['e2bn2'], stride=1)

    occ3 = maxpool_occ(occ2, 2)                                    # 4 -> 2
    h = conv_bn_elu(h, occ3, p['e3c1'], p['e3bn1'], stride=2)
    h = conv_bn_elu(h, occ3, p['e3c2'], p['e3bn2'], stride=1)

    B, C = h.shape[0], ENC_CH[2]
    w_ml = jnp.concatenate([p['w_mean'], p['w_lv']], axis=1)       # (C, 2C)
    b_ml = jnp.concatenate([p['b_mean'], p['b_lv']])               # (2C,)
    ml = pool_linear(h.reshape(B, -1, C), occ3.reshape(B, -1, 1), w_ml, b_ml)
    mean, log_var = ml[:, :C], ml[:, C:]
    return mean, log_var


def decoder_forward(p, zs, gt_occ):
    B, C = zs.shape
    x = zs.reshape(B, 1, 1, 1, C)                 # z at tensor_stride = RES
    occ = jnp.ones((B, 1, 1, 1, 1), jnp.float32)

    # block1
    h, occ = tconv_bn_elu(x, occ, p['d1t1'], p['d1bn1'])           # (B,2,2,2,d0)
    h = conv_bn_elu(h, occ, p['d1c1'], p['d1bn2'])
    h, occ = tconv_bn_elu(h, occ, p['d1t2'], p['d1bn3'])           # (B,4,4,4,d1)
    h, cls1 = conv_bn_elu(h, occ, p['d1c2'], p['d1bn4'],
                          cls_w=p['cls1_w'], cls_b=p['cls1_b'])
    out1, occ1 = h, occ                       # cls1 already masked by occ1

    # TODO(synk): coordinate_manager.kernel_map / stride target lookup has no
    # Pallas equivalent; approximated by max-pooling the gt occupancy grid.
    target1 = maxpool_occ(gt_occ, RES // out1.shape[1]) * occ1

    keep1 = ((cls1 > 0) & (occ1 > 0)).astype(jnp.float32)   # eval: no target union
    # MinkowskiPruning: only the occupancy mask needs updating; children of
    # pruned parents are zeroed inside the next fused tconv kernel via the mask.
    occ = occ1 * keep1

    # block2
    h, occ = tconv_bn_elu(out1, occ, p['d2t1'], p['d2bn1'])        # (B,8,8,8,d2)
    h, cls2 = conv_bn_elu(h, occ, p['d2c1'], p['d2bn2'],
                          cls_w=p['cls2_w'], cls_b=p['cls2_b'])
    out2, occ2 = h, occ
    target2 = maxpool_occ(gt_occ, RES // out2.shape[1]) * occ2

    keep2 = ((cls2 > 0) & (occ2 > 0)).astype(jnp.float32)
    has_any = jnp.sum(keep2) > 0                            # "if keep2.sum() > 0"
    out2f = out2.astype(jnp.float32)
    sout_feat = jnp.where(has_any, out2f * keep2, out2f)
    sout_occ = jnp.where(has_any, occ2 * keep2, occ2)

    return (cls1, cls2), (target1, target2), (sout_feat, sout_occ)


def vae_forward(p, sinput, gt_occ):
    means, log_vars = encoder_forward(p, sinput)
    # TODO(synk): training-mode reparameterization noise not applied (eval mode).
    zs = means
    out_cls, targets, sout = decoder_forward(p, zs, gt_occ)
    return out_cls, targets, sout, means, log_vars, zs


if __name__ == "__main__":
    key = jax.random.PRNGKey(0)
    kp, kin, kgt = jax.random.split(key, 3)
    params = init_params(kp)

    B = 2
    occ_in = jax.random.bernoulli(kin, 0.3, (B, RES, RES, RES, 1)).astype(jnp.float32)
    sinput = occ_in                 # Minkowski input: feature 1.0 at occupied voxels
    gt_occ = jax.random.bernoulli(kgt, 0.3, (B, RES, RES, RES, 1)).astype(jnp.float32)

    outs = jax.jit(vae_forward)(params, sinput, gt_occ)
    jax.block_until_ready(outs)
    print("KERNEL_OK")
</pallas_src>

<mosaic_0001>
module attributes {stable_mosaic.version = 11 : i64} {
  func.func @_mm_bn_elu_mask_kernel(%arg0: i32, %arg1: memref<512x27xbf16, #tpu.memory_space<vmem>>, %arg2: memref<27x4xbf16, #tpu.memory_space<vmem>>, %arg3: memref<1x4xf32, #tpu.memory_space<vmem>>, %arg4: memref<1x4xf32, #tpu.memory_space<vmem>>, %arg5: memref<512x1xf32, #tpu.memory_space<vmem>>, %arg6: memref<512x4xbf16, #tpu.memory_space<vmem>>) attributes {dimension_semantics = [#tpu.dimension_semantics<parallel>], iteration_bounds = array<i64: 2>, scalar_prefetch = 0 : i64, scratch_operands = 0 : i64, tpu.core_type = #tpu.core_type<tc>, window_params = [{transform_indices = @transform_0, window_bounds = array<i64: 512, 27>}, {pipeline_mode = #tpu.pipeline_mode<synchronous>, transform_indices = @transform_1, window_bounds = array<i64: 27, 4>}, {pipeline_mode = #tpu.pipeline_mode<synchronous>, transform_indices = @transform_2, window_bounds = array<i64: 1, 4>}, {pipeline_mode = #tpu.pipeline_mode<synchronous>, transform_indices = @transform_3, window_bounds = array<i64: 1, 4>}, {transform_indices = @transform_4, window_bounds = array<i64: 512, 1>}, {transform_indices = @transform_5, window_bounds = array<i64: 512, 4>}]} {
    %c0 = arith.constant 0 : index
    %c0_0 = arith.constant 0 : index
    %0 = vector.load %arg1[%c0, %c0_0] : memref<512x27xbf16, #tpu.memory_space<vmem>>, vector<512x27xbf16>
    %c0_1 = arith.constant 0 : index
    %c0_2 = arith.constant 0 : index
    %1 = vector.load %arg2[%c0_1, %c0_2] : memref<27x4xbf16, #tpu.memory_space<vmem>>, vector<27x4xbf16>
    %cst = arith.constant dense<0.000000e+00> : vector<512x4xf32>
    %2 = tpu.matmul %0, %1, %cst {dimension_numbers = #tpu.dot_dimension_numbers<[1], [0], [0], [1], [0, 0, 1, 1], [], []>} : vector<512x27xbf16>, vector<27x4xbf16>, vector<512x4xf32> -> vector<512x4xf32>
    %c0_3 = arith.constant 0 : index
    %c0_4 = arith.constant 0 : index
    %3 = vector.load %arg3[%c0_3, %c0_4] : memref<1x4xf32, #tpu.memory_space<vmem>>, vector<1x4xf32>
    %4 = vector.broadcast %3 : vector<1x4xf32> to vector<512x4xf32>
    %5 = arith.mulf %2, %4 : vector<512x4xf32>
    %c0_5 = arith.constant 0 : index
    %c0_6 = arith.constant 0 : index
    %6 = vector.load %arg4[%c0_5, %c0_6] : memref<1x4xf32, #tpu.memory_space<vmem>>, vector<1x4xf32>
    %7 = vector.broadcast %6 : vector<1x4xf32> to vector<512x4xf32>
    %8 = arith.addf %5, %7 : vector<512x4xf32>
    %cst_7 = arith.constant 0.000000e+00 : f32
    %9 = vector.broadcast %cst_7 : f32 to vector<512x4xf32>
    %10 = arith.cmpf ogt, %8, %9 : vector<512x4xf32>
    %cst_8 = arith.constant 0.000000e+00 : f32
    %11 = vector.broadcast %cst_8 : f32 to vector<512x4xf32>
    %12 = arith.minimumf %8, %11 : vector<512x4xf32>
    %13 = math.exp %12 : vector<512x4xf32>
    %cst_9 = arith.constant 1.000000e+00 : f32
    %14 = vector.broadcast %cst_9 : f32 to vector<512x4xf32>
    %15 = arith.subf %13, %14 : vector<512x4xf32>
    %16 = arith.select %10, %8, %15 : vector<512x4xi1>, vector<512x4xf32>
    %c0_10 = arith.constant 0 : index
    %c0_11 = arith.constant 0 : index
    %17 = vector.load %arg5[%c0_10, %c0_11] : memref<512x1xf32, #tpu.memory_space<vmem>>, vector<512x1xf32>
    %18 = vector.broadcast %17 : vector<512x1xf32> to vector<512x4xf32>
    %19 = arith.mulf %16, %18 : vector<512x4xf32>
    %20 = arith.truncf %19 : vector<512x4xf32> to vector<512x4xbf16>
    %c0_12 = arith.constant 0 : index
    %c0_13 = arith.constant 0 : index
    %21 = vector.load %arg6[%c0_12, %c0_13] : memref<512x4xbf16, #tpu.memory_space<vmem>>, vector<512x4xbf16>
    tpu.vector_store %arg6[%c0_12, %c0_13], %20 {strides = array<i32>} : memref<512x4xbf16, #tpu.memory_space<vmem>>, vector<512x4xbf16>,
    return
  }
  func.func @transform_0(%arg0: i32) -> (i32, i32) {
    %c0_i32 = arith.constant 0 : i32
    %c0_i32_0 = arith.constant 0 : i32
    return %arg0, %c0_i32 : i32, i32
  }
  func.func @transform_1(%arg0: i32) -> (i32, i32) {
    %c0_i32 = arith.constant 0 : i32
    %c0_i32_0 = arith.constant 0 : i32
    %c0_i32_1 = arith.constant 0 : i32
    return %c0_i32, %c0_i32_0 : i32, i32
  }
  func.func @transform_2(%arg0: i32) -> (i32, i32) {
    %c0_i32 = arith.constant 0 : i32
    %c0_i32_0 = arith.constant 0 : i32
    %c0_i32_1 = arith.constant 0 : i32
    return %c0_i32, %c0_i32_0 : i32, i32
  }
  func.func @transform_3(%arg0: i32) -> (i32, i32) {
    %c0_i32 = arith.constant 0 : i32
    %c0_i32_0 = arith.constant 0 : i32
    %c0_i32_1 = arith.constant 0 : i32
    return %c0_i32, %c0_i32_0 : i32, i32
  }
  func.func @transform_4(%arg0: i32) -> (i32, i32) {
    %c0_i32 = arith.constant 0 : i32
    %c0_i32_0 = arith.constant 0 : i32
    return %arg0, %c0_i32 : i32, i32
  }
  func.func @transform_5(%arg0: i32) -> (i32, i32) {
    %c0_i32 = arith.constant 0 : i32
    %c0_i32_0 = arith.constant 0 : i32
    return %arg0, %c0_i32 : i32, i32
  }
}

module attributes {stable_mosaic.version = 11 : i64} {
  func.func @_mm_bn_elu_mask_kernel(%arg0: i32, %arg1: memref<512x108xbf16, #tpu.memory_space<vmem>>, %arg2: memref<108x4xbf16, #tpu.memory_space<vmem>>, %arg3: memref<1x4xf32, #tpu.memory_space<vmem>>, %arg4: memref<1x4xf32, #tpu.memory_space<vmem>>, %arg5: memref<512x1xf32, #tpu.memory_space<vmem>>, %arg6: memref<512x4xbf16, #tpu.memory_space<vmem>>) attributes {dimension_semantics = [#tpu.dimension_semantics<parallel>], iteration_bounds = array<i64: 2>, scalar_prefetch = 0 : i64, scratch_operands = 0 : i64, tpu.core_type = #tpu.core_type<tc>, window_params = [{transform_indices = @transform_0, window_bounds = array<i64: 512, 108>}, {pipeline_mode = #tpu.pipeline_mode<synchronous>, transform_indices = @transform_1, window_bounds = array<i64: 108, 4>}, {pipeline_mode = #tpu.pipeline_mode<synchronous>, transform_indices = @transform_2, window_bounds = array<i64: 1, 4>}, {pipeline_mode = #tpu.pipeline_mode<synchronous>, transform_indices = @transform_3, window_bounds = array<i64: 1, 4>}, {transform_indices = @transform_4, window_bounds = array<i64: 512, 1>}, {transform_indices = @transform_5, window_bounds = array<i64: 512, 4>}]} {
    %c0 = arith.constant 0 : index
    %c0_0 = arith.constant 0 : index
    %0 = vector.load %arg1[%c0, %c0_0] : memref<512x108xbf16, #tpu.memory_space<vmem>>, vector<512x108xbf16>
    %c0_1 = arith.constant 0 : index
    %c0_2 = arith.constant 0 : index
    %1 = vector.load %arg2[%c0_1, %c0_2] : memref<108x4xbf16, #tpu.memory_space<vmem>>, vector<108x4xbf16>
    %cst = arith.constant dense<0.000000e+00> : vector<512x4xf32>
    %2 = tpu.matmul %0, %1, %cst {dimension_numbers = #tpu.dot_dimension_numbers<[1], [0], [0], [1], [0, 0, 1, 1], [], []>} : vector<512x108xbf16>, vector<108x4xbf16>, vector<512x4xf32> -> vector<512x4xf32>
    %c0_3 = arith.constant 0 : index
    %c0_4 = arith.constant 0 : index
    %3 = vector.load %arg3[%c0_3, %c0_4] : memref<1x4xf32, #tpu.memory_space<vmem>>, vector<1x4xf32>
    %4 = vector.broadcast %3 : vector<1x4xf32> to vector<512x4xf32>
    %5 = arith.mulf %2, %4 : vector<512x4xf32>
    %c0_5 = arith.constant 0 : index
    %c0_6 = arith.constant 0 : index
    %6 = vector.load %arg4[%c0_5, %c0_6] : memref<1x4xf32, #tpu.memory_space<vmem>>, vector<1x4xf32>
    %7 = vector.broadcast %6 : vector<1x4xf32> to vector<512x4xf32>
    %8 = arith.addf %5, %7 : vector<512x4xf32>
    %cst_7 = arith.constant 0.000000e+00 : f32
    %9 = vector.broadcast %cst_7 : f32 to vector<512x4xf32>
    %10 = arith.cmpf ogt, %8, %9 : vector<512x4xf32>
    %cst_8 = arith.constant 0.000000e+00 : f32
    %11 = vector.broadcast %cst_8 : f32 to vector<512x4xf32>
    %12 = arith.minimumf %8, %11 : vector<512x4xf32>
    %13 = math.exp %12 : vector<512x4xf32>
    %cst_9 = arith.constant 1.000000e+00 : f32
    %14 = vector.broadcast %cst_9 : f32 to vector<512x4xf32>
    %15 = arith.subf %13, %14 : vector<512x4xf32>
    %16 = arith.select %10, %8, %15 : vector<512x4xi1>, vector<512x4xf32>
    %c0_10 = arith.constant 0 : index
    %c0_11 = arith.constant 0 : index
    %17 = vector.load %arg5[%c0_10, %c0_11] : memref<512x1xf32, #tpu.memory_space<vmem>>, vector<512x1xf32>
    %18 = vector.broadcast %17 : vector<512x1xf32> to vector<512x4xf32>
    %19 = arith.mulf %16, %18 : vector<512x4xf32>
    %20 = arith.truncf %19 : vector<512x4xf32> to vector<512x4xbf16>
    %c0_12 = arith.constant 0 : index
    %c0_13 = arith.constant 0 : index
    %21 = vector.load %arg6[%c0_12, %c0_13] : memref<512x4xbf16, #tpu.memory_space<vmem>>, vector<512x4xbf16>
    tpu.vector_store %arg6[%c0_12, %c0_13], %20 {strides = array<i32>} : memref<512x4xbf16, #tpu.memory_space<vmem>>, vector<512x4xbf16>,
    return
  }
  func.func @transform_0(%arg0: i32) -> (i32, i32) {
    %c0_i32 = arith.constant 0 : i32
    %c0_i32_0 = arith.constant 0 : i32
    return %arg0, %c0_i32 : i32, i32
  }
  func.func @transform_1(%arg0: i32) -> (i32, i32) {
    %c0_i32 = arith.constant 0 : i32
    %c0_i32_0 = arith.constant 0 : i32
    %c0_i32_1 = arith.constant 0 : i32
    return %c0_i32, %c0_i32_0 : i32, i32
  }
  func.func @transform_2(%arg0: i32) -> (i32, i32) {
    %c0_i32 = arith.constant 0 : i32
    %c0_i32_0 = arith.constant 0 : i32
    %c0_i32_1 = arith.constant 0 : i32
    return %c0_i32, %c0_i32_0 : i32, i32
  }
  func.func @transform_3(%arg0: i32) -> (i32, i32) {
    %c0_i32 = arith.constant 0 : i32
    %c0_i32_0 = arith.constant 0 : i32
    %c0_i32_1 = arith.constant 0 : i32
    return %c0_i32, %c0_i32_0 : i32, i32
  }
  func.func @transform_4(%arg0: i32) -> (i32, i32) {
    %c0_i32 = arith.constant 0 : i32
    %c0_i32_0 = arith.constant 0 : i32
    return %arg0, %c0_i32 : i32, i32
  }
  func.func @transform_5(%arg0: i32) -> (i32, i32) {
    %c0_i32 = arith.constant 0 : i32
    %c0_i32_0 = arith.constant 0 : i32
    return %arg0, %c0_i32 : i32, i32
  }
}

module attributes {stable_mosaic.version = 11 : i64} {
  func.func @_mm_bn_elu_mask_kernel(%arg0: i32, %arg1: memref<128x108xbf16, #tpu.memory_space<vmem>>, %arg2: memref<108x8xbf16, #tpu.memory_space<vmem>>, %arg3: memref<1x8xf32, #tpu.memory_space<vmem>>, %arg4: memref<1x8xf32, #tpu.memory_space<vmem>>, %arg5: memref<128x1xf32, #tpu.memory_space<vmem>>, %arg6: memref<128x8xbf16, #tpu.memory_space<vmem>>) attributes {dimension_semantics = [#tpu.dimension_semantics<parallel>], iteration_bounds = array<i64: 1>, scalar_prefetch = 0 : i64, scratch_operands = 0 : i64, tpu.core_type = #tpu.core_type<tc>, window_params = [{transform_indices = @transform_0, window_bounds = array<i64: 128, 108>}, {pipeline_mode = #tpu.pipeline_mode<synchronous>, transform_indices = @transform_1, window_bounds = array<i64: 108, 8>}, {pipeline_mode = #tpu.pipeline_mode<synchronous>, transform_indices = @transform_2, window_bounds = array<i64: 1, 8>}, {pipeline_mode = #tpu.pipeline_mode<synchronous>, transform_indices = @transform_3, window_bounds = array<i64: 1, 8>}, {transform_indices = @transform_4, window_bounds = array<i64: 128, 1>}, {transform_indices = @transform_5, window_bounds = array<i64: 128, 8>}]} {
    %c0 = arith.constant 0 : index
    %c0_0 = arith.constant 0 : index
    %0 = vector.load %arg1[%c0, %c0_0] : memref<128x108xbf16, #tpu.memory_space<vmem>>, vector<128x108xbf16>
    %c0_1 = arith.constant 0 : index
    %c0_2 = arith.constant 0 : index
    %1 = vector.load %arg2[%c0_1, %c0_2] : memref<108x8xbf16, #tpu.memory_space<vmem>>, vector<108x8xbf16>
    %cst = arith.constant dense<0.000000e+00> : vector<128x8xf32>
    %2 = tpu.matmul %0, %1, %cst {dimension_numbers = #tpu.dot_dimension_numbers<[1], [0], [0], [1], [0, 0, 1, 1], [], []>} : vector<128x108xbf16>, vector<108x8xbf16>, vector<128x8xf32> -> vector<128x8xf32>
    %c0_3 = arith.constant 0 : index
    %c0_4 = arith.constant 0 : index
    %3 = vector.load %arg3[%c0_3, %c0_4] : memref<1x8xf32, #tpu.memory_space<vmem>>, vector<1x8xf32>
    %4 = vector.broadcast %3 : vector<1x8xf32> to vector<128x8xf32>
    %5 = arith.mulf %2, %4 : vector<128x8xf32>
    %c0_5 = arith.constant 0 : index
    %c0_6 = arith.constant 0 : index
    %6 = vector.load %arg4[%c0_5, %c0_6] : memref<1x8xf32, #tpu.memory_space<vmem>>, vector<1x8xf32>
    %7 = vector.broadcast %6 : vector<1x8xf32> to vector<128x8xf32>
    %8 = arith.addf %5, %7 : vector<128x8xf32>
    %cst_7 = arith.constant 0.000000e+00 : f32
    %9 = vector.broadcast %cst_7 : f32 to vector<128x8xf32>
    %10 = arith.cmpf ogt, %8, %9 : vector<128x8xf32>
    %cst_8 = arith.constant 0.000000e+00 : f32
    %11 = vector.broadcast %cst_8 : f32 to vector<128x8xf32>
    %12 = arith.minimumf %8, %11 : vector<128x8xf32>
    %13 = math.exp %12 : vector<128x8xf32>
    %cst_9 = arith.constant 1.000000e+00 : f32
    %14 = vector.broadcast %cst_9 : f32 to vector<128x8xf32>
    %15 = arith.subf %13, %14 : vector<128x8xf32>
    %16 = arith.select %10, %8, %15 : vector<128x8xi1>, vector<128x8xf32>
    %c0_10 = arith.constant 0 : index
    %c0_11 = arith.constant 0 : index
    %17 = vector.load %arg5[%c0_10, %c0_11] : memref<128x1xf32, #tpu.memory_space<vmem>>, vector<128x1xf32>
    %18 = vector.broadcast %17 : vector<128x1xf32> to vector<128x8xf32>
    %19 = arith.mulf %16, %18 : vector<128x8xf32>
    %20 = arith.truncf %19 : vector<128x8xf32> to vector<128x8xbf16>
    %c0_12 = arith.constant 0 : index
    %c0_13 = arith.constant 0 : index
    %21 = vector.load %arg6[%c0_12, %c0_13] : memref<128x8xbf16, #tpu.memory_space<vmem>>, vector<128x8xbf16>
    tpu.vector_store %arg6[%c0_12, %c0_13], %20 {strides = array<i32>} : memref<128x8xbf16, #tpu.memory_space<vmem>>, vector<128x8xbf16>,
    return
  }
  func.func @transform_0(%arg0: i32) -> (i32, i32) {
    %c0_i32 = arith.constant 0 : i32
    %c0_i32_0 = arith.constant 0 : i32
    return %arg0, %c0_i32 : i32, i32
  }
  func.func @transform_1(%arg0: i32) -> (i32, i32) {
    %c0_i32 = arith.constant 0 : i32
    %c0_i32_0 = arith.constant 0 : i32
    %c0_i32_1 = arith.constant 0 : i32
    return %c0_i32, %c0_i32_0 : i32, i32
  }
  func.func @transform_2(%arg0: i32) -> (i32, i32) {
    %c0_i32 = arith.constant 0 : i32
    %c0_i32_0 = arith.constant 0 : i32
    %c0_i32_1 = arith.constant 0 : i32
    return %c0_i32, %c0_i32_0 : i32, i32
  }
  func.func @transform_3(%arg0: i32) -> (i32, i32) {
    %c0_i32 = arith.constant 0 : i32
    %c0_i32_0 = arith.constant 0 : i32
    %c0_i32_1 = arith.constant 0 : i32
    return %c0_i32, %c0_i32_0 : i32, i32
  }
  func.func @transform_4(%arg0: i32) -> (i32, i32) {
    %c0_i32 = arith.constant 0 : i32
    %c0_i32_0 = arith.constant 0 : i32
    return %arg0, %c0_i32 : i32, i32
  }
  func.func @transform_5(%arg0: i32) -> (i32, i32) {
    %c0_i32 = arith.constant 0 : i32
    %c0_i32_0 = arith.constant 0 : i32
    return %arg0, %c0_i32 : i32, i32
  }
}

module attributes {stable_mosaic.version = 11 : i64} {
  func.func @_mm_bn_elu_mask_kernel(%arg0: i32, %arg1: memref<128x216xbf16, #tpu.memory_space<vmem>>, %arg2: memref<216x8xbf16, #tpu.memory_space<vmem>>, %arg3: memref<1x8xf32, #tpu.memory_space<vmem>>, %arg4: memref<1x8xf32, #tpu.memory_space<vmem>>, %arg5: memref<128x1xf32, #tpu.memory_space<vmem>>, %arg6: memref<128x8xbf16, #tpu.memory_space<vmem>>) attributes {dimension_semantics = [#tpu.dimension_semantics<parallel>], iteration_bounds = array<i64: 1>, scalar_prefetch = 0 : i64, scratch_operands = 0 : i64, tpu.core_type = #tpu.core_type<tc>, window_params = [{transform_indices = @transform_0, window_bounds = array<i64: 128, 216>}, {pipeline_mode = #tpu.pipeline_mode<synchronous>, transform_indices = @transform_1, window_bounds = array<i64: 216, 8>}, {pipeline_mode = #tpu.pipeline_mode<synchronous>, transform_indices = @transform_2, window_bounds = array<i64: 1, 8>}, {pipeline_mode = #tpu.pipeline_mode<synchronous>, transform_indices = @transform_3, window_bounds = array<i64: 1, 8>}, {transform_indices = @transform_4, window_bounds = array<i64: 128, 1>}, {transform_indices = @transform_5, window_bounds = array<i64: 128, 8>}]} {
    %c0 = arith.constant 0 : index
    %c0_0 = arith.constant 0 : index
    %0 = vector.load %arg1[%c0, %c0_0] : memref<128x216xbf16, #tpu.memory_space<vmem>>, vector<128x216xbf16>
    %c0_1 = arith.constant 0 : index
    %c0_2 = arith.constant 0 : index
    %1 = vector.load %arg2[%c0_1, %c0_2] : memref<216x8xbf16, #tpu.memory_space<vmem>>, vector<216x8xbf16>
    %cst = arith.constant dense<0.000000e+00> : vector<128x8xf32>
    %2 = tpu.matmul %0, %1, %cst {dimension_numbers = #tpu.dot_dimension_numbers<[1], [0], [0], [1], [0, 0, 1, 1], [], []>} : vector<128x216xbf16>, vector<216x8xbf16>, vector<128x8xf32> -> vector<128x8xf32>
    %c0_3 = arith.constant 0 : index
    %c0_4 = arith.constant 0 : index
    %3 = vector.load %arg3[%c0_3, %c0_4] : memref<1x8xf32, #tpu.memory_space<vmem>>, vector<1x8xf32>
    %4 = vector.broadcast %3 : vector<1x8xf32> to vector<128x8xf32>
    %5 = arith.mulf %2, %4 : vector<128x8xf32>
    %c0_5 = arith.constant 0 : index
    %c0_6 = arith.constant 0 : index
    %6 = vector.load %arg4[%c0_5, %c0_6] : memref<1x8xf32, #tpu.memory_space<vmem>>, vector<1x8xf32>
    %7 = vector.broadcast %6 : vector<1x8xf32> to vector<128x8xf32>
    %8 = arith.addf %5, %7 : vector<128x8xf32>
    %cst_7 = arith.constant 0.000000e+00 : f32
    %9 = vector.broadcast %cst_7 : f32 to vector<128x8xf32>
    %10 = arith.cmpf ogt, %8, %9 : vector<128x8xf32>
    %cst_8 = arith.constant 0.000000e+00 : f32
    %11 = vector.broadcast %cst_8 : f32 to vector<128x8xf32>
    %12 = arith.minimumf %8, %11 : vector<128x8xf32>
    %13 = math.exp %12 : vector<128x8xf32>
    %cst_9 = arith.constant 1.000000e+00 : f32
    %14 = vector.broadcast %cst_9 : f32 to vector<128x8xf32>
    %15 = arith.subf %13, %14 : vector<128x8xf32>
    %16 = arith.select %10, %8, %15 : vector<128x8xi1>, vector<128x8xf32>
    %c0_10 = arith.constant 0 : index
    %c0_11 = arith.constant 0 : index
    %17 = vector.load %arg5[%c0_10, %c0_11] : memref<128x1xf32, #tpu.memory_space<vmem>>, vector<128x1xf32>
    %18 = vector.broadcast %17 : vector<128x1xf32> to vector<128x8xf32>
    %19 = arith.mulf %16, %18 : vector<128x8xf32>
    %20 = arith.truncf %19 : vector<128x8xf32> to vector<128x8xbf16>
    %c0_12 = arith.constant 0 : index
    %c0_13 = arith.constant 0 : index
    %21 = vector.load %arg6[%c0_12, %c0_13] : memref<128x8xbf16, #tpu.memory_space<vmem>>, vector<128x8xbf16>
    tpu.vector_store %arg6[%c0_12, %c0_13], %20 {strides = array<i32>} : memref<128x8xbf16, #tpu.memory_space<vmem>>, vector<128x8xbf16>,
    return
  }
  func.func @transform_0(%arg0: i32) -> (i32, i32) {
    %c0_i32 = arith.constant 0 : i32
    %c0_i32_0 = arith.constant 0 : i32
    return %arg0, %c0_i32 : i32, i32
  }
  func.func @transform_1(%arg0: i32) -> (i32, i32) {
    %c0_i32 = arith.constant 0 : i32
    %c0_i32_0 = arith.constant 0 : i32
    %c0_i32_1 = arith.constant 0 : i32
    return %c0_i32, %c0_i32_0 : i32, i32
  }
  func.func @transform_2(%arg0: i32) -> (i32, i32) {
    %c0_i32 = arith.constant 0 : i32
    %c0_i32_0 = arith.constant 0 : i32
    %c0_i32_1 = arith.constant 0 : i32
    return %c0_i32, %c0_i32_0 : i32, i32
  }
  func.func @transform_3(%arg0: i32) -> (i32, i32) {
    %c0_i32 = arith.constant 0 : i32
    %c0_i32_0 = arith.constant 0 : i32
    %c0_i32_1 = arith.constant 0 : i32
    return %c0_i32, %c0_i32_0 : i32, i32
  }
  func.func @transform_4(%arg0: i32) -> (i32, i32) {
    %c0_i32 = arith.constant 0 : i32
    %c0_i32_0 = arith.constant 0 : i32
    return %arg0, %c0_i32 : i32, i32
  }
  func.func @transform_5(%arg0: i32) -> (i32, i32) {
    %c0_i32 = arith.constant 0 : i32
    %c0_i32_0 = arith.constant 0 : i32
    return %arg0, %c0_i32 : i32, i32
  }
}

module attributes {stable_mosaic.version = 11 : i64} {
  func.func @_mm_bn_elu_mask_kernel(%arg0: i32, %arg1: memref<16x216xbf16, #tpu.memory_space<vmem>>, %arg2: memref<216x16xbf16, #tpu.memory_space<vmem>>, %arg3: memref<1x16xf32, #tpu.memory_space<vmem>>, %arg4: memref<1x16xf32, #tpu.memory_space<vmem>>, %arg5: memref<16x1xf32, #tpu.memory_space<vmem>>, %arg6: memref<16x16xbf16, #tpu.memory_space<vmem>>) attributes {dimension_semantics = [#tpu.dimension_semantics<parallel>], iteration_bounds = array<i64: 1>, scalar_prefetch = 0 : i64, scratch_operands = 0 : i64, tpu.core_type = #tpu.core_type<tc>, window_params = [{transform_indices = @transform_0, window_bounds = array<i64: 16, 216>}, {pipeline_mode = #tpu.pipeline_mode<synchronous>, transform_indices = @transform_1, window_bounds = array<i64: 216, 16>}, {pipeline_mode = #tpu.pipeline_mode<synchronous>, transform_indices = @transform_2, window_bounds = array<i64: 1, 16>}, {pipeline_mode = #tpu.pipeline_mode<synchronous>, transform_indices = @transform_3, window_bounds = array<i64: 1, 16>}, {transform_indices = @transform_4, window_bounds = array<i64: 16, 1>}, {transform_indices = @transform_5, window_bounds = array<i64: 16, 16>}]} {
    %c0 = arith.constant 0 : index
    %c0_0 = arith.constant 0 : index
    %0 = vector.load %arg1[%c0, %c0_0] : memref<16x216xbf16, #tpu.memory_space<vmem>>, vector<16x216xbf16>
    %c0_1 = arith.constant 0 : index
    %c0_2 = arith.constant 0 : index
    %1 = vector.load %arg2[%c0_1, %c0_2] : memref<216x16xbf16, #tpu.memory_space<vmem>>, vector<216x16xbf16>
    %cst = arith.constant dense<0.000000e+00> : vector<16x16xf32>
    %2 = tpu.matmul %0, %1, %cst {dimension_numbers = #tpu.dot_dimension_numbers<[1], [0], [0], [1], [0, 0, 1, 1], [], []>} : vector<16x216xbf16>, vector<216x16xbf16>, vector<16x16xf32> -> vector<16x16xf32>
    %c0_3 = arith.constant 0 : index
    %c0_4 = arith.constant 0 : index
    %3 = vector.load %arg3[%c0_3, %c0_4] : memref<1x16xf32, #tpu.memory_space<vmem>>, vector<1x16xf32>
    %4 = vector.broadcast %3 : vector<1x16xf32> to vector<16x16xf32>
    %5 = arith.mulf %2, %4 : vector<16x16xf32>
    %c0_5 = arith.constant 0 : index
    %c0_6 = arith.constant 0 : index
    %6 = vector.load %arg4[%c0_5, %c0_6] : memref<1x16xf32, #tpu.memory_space<vmem>>, vector<1x16xf32>
    %7 = vector.broadcast %6 : vector<1x16xf32> to vector<16x16xf32>
    %8 = arith.addf %5, %7 : vector<16x16xf32>
    %cst_7 = arith.constant 0.000000e+00 : f32
    %9 = vector.broadcast %cst_7 : f32 to vector<16x16xf32>
    %10 = arith.cmpf ogt, %8, %9 : vector<16x16xf32>
    %cst_8 = arith.constant 0.000000e+00 : f32
    %11 = vector.broadcast %cst_8 : f32 to vector<16x16xf32>
    %12 = arith.minimumf %8, %11 : vector<16x16xf32>
    %13 = math.exp %12 : vector<16x16xf32>
    %cst_9 = arith.constant 1.000000e+00 : f32
    %14 = vector.broadcast %cst_9 : f32 to vector<16x16xf32>
    %15 = arith.subf %13, %14 : vector<16x16xf32>
    %16 = arith.select %10, %8, %15 : vector<16x16xi1>, vector<16x16xf32>
    %c0_10 = arith.constant 0 : index
    %c0_11 = arith.constant 0 : index
    %17 = vector.load %arg5[%c0_10, %c0_11] : memref<16x1xf32, #tpu.memory_space<vmem>>, vector<16x1xf32>
    %18 = vector.broadcast %17 : vector<16x1xf32> to vector<16x16xf32>
    %19 = arith.mulf %16, %18 : vector<16x16xf32>
    %20 = arith.truncf %19 : vector<16x16xf32> to vector<16x16xbf16>
    %c0_12 = arith.constant 0 : index
    %c0_13 = arith.constant 0 : index
    %21 = vector.load %arg6[%c0_12, %c0_13] : memref<16x16xbf16, #tpu.memory_space<vmem>>, vector<16x16xbf16>
    tpu.vector_store %arg6[%c0_12, %c0_13], %20 {strides = array<i32>} : memref<16x16xbf16, #tpu.memory_space<vmem>>, vector<16x16xbf16>,
    return
  }
  func.func @transform_0(%arg0: i32) -> (i32, i32) {
    %c0_i32 = arith.constant 0 : i32
    %c0_i32_0 = arith.constant 0 : i32
    return %arg0, %c0_i32 : i32, i32
  }
  func.func @transform_1(%arg0: i32) -> (i32, i32) {
    %c0_i32 = arith.constant 0 : i32
    %c0_i32_0 = arith.constant 0 : i32
    %c0_i32_1 = arith.constant 0 : i32
    return %c0_i32, %c0_i32_0 : i32, i32
  }
  func.func @transform_2(%arg0: i32) -> (i32, i32) {
    %c0_i32 = arith.constant 0 : i32
    %c0_i32_0 = arith.constant 0 : i32
    %c0_i32_1 = arith.constant 0 : i32
    return %c0_i32, %c0_i32_0 : i32, i32
  }
  func.func @transform_3(%arg0: i32) -> (i32, i32) {
    %c0_i32 = arith.constant 0 : i32
    %c0_i32_0 = arith.constant 0 : i32
    %c0_i32_1 = arith.constant 0 : i32
    return %c0_i32, %c0_i32_0 : i32, i32
  }
  func.func @transform_4(%arg0: i32) -> (i32, i32) {
    %c0_i32 = arith.constant 0 : i32
    %c0_i32_0 = arith.constant 0 : i32
    return %arg0, %c0_i32 : i32, i32
  }
  func.func @transform_5(%arg0: i32) -> (i32, i32) {
    %c0_i32 = arith.constant 0 : i32
    %c0_i32_0 = arith.constant 0 : i32
    return %arg0, %c0_i32 : i32, i32
  }
}

module attributes {stable_mosaic.version = 11 : i64} {
  func.func @_mm_bn_elu_mask_kernel(%arg0: i32, %arg1: memref<16x432xbf16, #tpu.memory_space<vmem>>, %arg2: memref<432x16xbf16, #tpu.memory_space<vmem>>, %arg3: memref<1x16xf32, #tpu.memory_space<vmem>>, %arg4: memref<1x16xf32, #tpu.memory_space<vmem>>, %arg5: memref<16x1xf32, #tpu.memory_space<vmem>>, %arg6: memref<16x16xbf16, #tpu.memory_space<vmem>>) attributes {dimension_semantics = [#tpu.dimension_semantics<parallel>], iteration_bounds = array<i64: 1>, scalar_prefetch = 0 : i64, scratch_operands = 0 : i64, tpu.core_type = #tpu.core_type<tc>, window_params = [{transform_indices = @transform_0, window_bounds = array<i64: 16, 432>}, {pipeline_mode = #tpu.pipeline_mode<synchronous>, transform_indices = @transform_1, window_bounds = array<i64: 432, 16>}, {pipeline_mode = #tpu.pipeline_mode<synchronous>, transform_indices = @transform_2, window_bounds = array<i64: 1, 16>}, {pipeline_mode = #tpu.pipeline_mode<synchronous>, transform_indices = @transform_3, window_bounds = array<i64: 1, 16>}, {transform_indices = @transform_4, window_bounds = array<i64: 16, 1>}, {transform_indices = @transform_5, window_bounds = array<i64: 16, 16>}]} {
    %c0 = arith.constant 0 : index
    %c0_0 = arith.constant 0 : index
    %0 = vector.load %arg1[%c0, %c0_0] : memref<16x432xbf16, #tpu.memory_space<vmem>>, vector<16x432xbf16>
    %c0_1 = arith.constant 0 : index
    %c0_2 = arith.constant 0 : index
    %1 = vector.load %arg2[%c0_1, %c0_2] : memref<432x16xbf16, #tpu.memory_space<vmem>>, vector<432x16xbf16>
    %cst = arith.constant dense<0.000000e+00> : vector<16x16xf32>
    %2 = tpu.matmul %0, %1, %cst {dimension_numbers = #tpu.dot_dimension_numbers<[1], [0], [0], [1], [0, 0, 1, 1], [], []>} : vector<16x432xbf16>, vector<432x16xbf16>, vector<16x16xf32> -> vector<16x16xf32>
    %c0_3 = arith.constant 0 : index
    %c0_4 = arith.constant 0 : index
    %3 = vector.load %arg3[%c0_3, %c0_4] : memref<1x16xf32, #tpu.memory_space<vmem>>, vector<1x16xf32>
    %4 = vector.broadcast %3 : vector<1x16xf32> to vector<16x16xf32>
    %5 = arith.mulf %2, %4 : vector<16x16xf32>
    %c0_5 = arith.constant 0 : index
    %c0_6 = arith.constant 0 : index
    %6 = vector.load %arg4[%c0_5, %c0_6] : memref<1x16xf32, #tpu.memory_space<vmem>>, vector<1x16xf32>
    %7 = vector.broadcast %6 : vector<1x16xf32> to vector<16x16xf32>
    %8 = arith.addf %5, %7 : vector<16x16xf32>
    %cst_7 = arith.constant 0.000000e+00 : f32
    %9 = vector.broadcast %cst_7 : f32 to vector<16x16xf32>
    %10 = arith.cmpf ogt, %8, %9 : vector<16x16xf32>
    %cst_8 = arith.constant 0.000000e+00 : f32
    %11 = vector.broadcast %cst_8 : f32 to vector<16x16xf32>
    %12 = arith.minimumf %8, %11 : vector<16x16xf32>
    %13 = math.exp %12 : vector<16x16xf32>
    %cst_9 = arith.constant 1.000000e+00 : f32
    %14 = vector.broadcast %cst_9 : f32 to vector<16x16xf32>
    %15 = arith.subf %13, %14 : vector<16x16xf32>
    %16 = arith.select %10, %8, %15 : vector<16x16xi1>, vector<16x16xf32>
    %c0_10 = arith.constant 0 : index
    %c0_11 = arith.constant 0 : index
    %17 = vector.load %arg5[%c0_10, %c0_11] : memref<16x1xf32, #tpu.memory_space<vmem>>, vector<16x1xf32>
    %18 = vector.broadcast %17 : vector<16x1xf32> to vector<16x16xf32>
    %19 = arith.mulf %16, %18 : vector<16x16xf32>
    %20 = arith.truncf %19 : vector<16x16xf32> to vector<16x16xbf16>
    %c0_12 = arith.constant 0 : index
    %c0_13 = arith.constant 0 : index
    %21 = vector.load %arg6[%c0_12, %c0_13] : memref<16x16xbf16, #tpu.memory_space<vmem>>, vector<16x16xbf16>
    tpu.vector_store %arg6[%c0_12, %c0_13], %20 {strides = array<i32>} : memref<16x16xbf16, #tpu.memory_space<vmem>>, vector<16x16xbf16>,
    return
  }
  func.func @transform_0(%arg0: i32) -> (i32, i32) {
    %c0_i32 = arith.constant 0 : i32
    %c0_i32_0 = arith.constant 0 : i32
    return %arg0, %c0_i32 : i32, i32
  }
  func.func @transform_1(%arg0: i32) -> (i32, i32) {
    %c0_i32 = arith.constant 0 : i32
    %c0_i32_0 = arith.constant 0 : i32
    %c0_i32_1 = arith.constant 0 : i32
    return %c0_i32, %c0_i32_0 : i32, i32
  }
  func.func @transform_2(%arg0: i32) -> (i32, i32) {
    %c0_i32 = arith.constant 0 : i32
    %c0_i32_0 = arith.constant 0 : i32
    %c0_i32_1 = arith.constant 0 : i32
    return %c0_i32, %c0_i32_0 : i32, i32
  }
  func.func @transform_3(%arg0: i32) -> (i32, i32) {
    %c0_i32 = arith.constant 0 : i32
    %c0_i32_0 = arith.constant 0 : i32
    %c0_i32_1 = arith.constant 0 : i32
    return %c0_i32, %c0_i32_0 : i32, i32
  }
  func.func @transform_4(%arg0: i32) -> (i32, i32) {
    %c0_i32 = arith.constant 0 : i32
    %c0_i32_0 = arith.constant 0 : i32
    return %arg0, %c0_i32 : i32, i32
  }
  func.func @transform_5(%arg0: i32) -> (i32, i32) {
    %c0_i32 = arith.constant 0 : i32
    %c0_i32_0 = arith.constant 0 : i32
    return %arg0, %c0_i32 : i32, i32
  }
}

module attributes {stable_mosaic.version = 11 : i64} {
  func.func @_pool_linear_kernel(%arg0: i32, %arg1: memref<2x8x16xbf16, #tpu.memory_space<vmem>>, %arg2: memref<2x8x1xf32, #tpu.memory_space<vmem>>, %arg3: memref<16x32xf32, #tpu.memory_space<vmem>>, %arg4: memref<1x32xf32, #tpu.memory_space<vmem>>, %arg5: memref<2x32xf32, #tpu.memory_space<vmem>>) attributes {dimension_semantics = [#tpu.dimension_semantics<arbitrary>], iteration_bounds = array<i64: 1>, scalar_prefetch = 0 : i64, scratch_operands = 0 : i64, tpu.core_type = #tpu.core_type<tc>, window_params = [{pipeline_mode = #tpu.pipeline_mode<synchronous>, transform_indices = @transform_0, window_bounds = array<i64: 2, 8, 16>}, {pipeline_mode = #tpu.pipeline_mode<synchronous>, transform_indices = @transform_1, window_bounds = array<i64: 2, 8, 1>}, {pipeline_mode = #tpu.pipeline_mode<synchronous>, transform_indices = @transform_2, window_bounds = array<i64: 16, 32>}, {pipeline_mode = #tpu.pipeline_mode<synchronous>, transform_indices = @transform_3, window_bounds = array<i64: 1, 32>}, {pipeline_mode = #tpu.pipeline_mode<synchronous>, transform_indices = @transform_4, window_bounds = array<i64: 2, 32>}]} {
    %c0 = arith.constant 0 : index
    %c0_0 = arith.constant 0 : index
    %c0_1 = arith.constant 0 : index
    %0 = vector.load %arg2[%c0, %c0_0, %c0_1] : memref<2x8x1xf32, #tpu.memory_space<vmem>>, vector<2x8x1xf32>
    %c0_2 = arith.constant 0 : index
    %c0_3 = arith.constant 0 : index
    %c0_4 = arith.constant 0 : index
    %1 = vector.load %arg1[%c0_2, %c0_3, %c0_4] : memref<2x8x16xbf16, #tpu.memory_space<vmem>>, vector<2x8x16xbf16>
    %2 = arith.extf %1 : vector<2x8x16xbf16> to vector<2x8x16xf32>
    %3 = vector.broadcast %0 : vector<2x8x1xf32> to vector<2x8x16xf32>
    %4 = arith.mulf %2, %3 : vector<2x8x16xf32>
    %cst = arith.constant dense<0.000000e+00> : vector<2x16xf32>
    %5 = vector.multi_reduction <add>, %4, %cst [1] : vector<2x8x16xf32> to vector<2x16xf32>
    %cst_5 = arith.constant dense<0.000000e+00> : vector<2x1xf32>
    %6 = vector.multi_reduction <add>, %0, %cst_5 [1] : vector<2x8x1xf32> to vector<2x1xf32>
    %cst_6 = arith.constant 1.000000e+00 : f32
    %7 = vector.broadcast %cst_6 : f32 to vector<2x1xf32>
    %8 = arith.maximumf %6, %7 : vector<2x1xf32>
    %9 = tpu.reciprocal %8 {approx = true} : vector<2x1xf32> -> vector<2x1xf32>
    %10 = vector.broadcast %9 : vector<2x1xf32> to vector<2x16xf32>
    %11 = arith.mulf %5, %10 : vector<2x16xf32>
    %c0_7 = arith.constant 0 : index
    %c0_8 = arith.constant 0 : index
    %12 = vector.load %arg3[%c0_7, %c0_8] : memref<16x32xf32, #tpu.memory_space<vmem>>, vector<16x32xf32>
    %cst_9 = arith.constant dense<0.000000e+00> : vector<2x32xf32>
    %13 = tpu.matmul %11, %12, %cst_9 {dimension_numbers = #tpu.dot_dimension_numbers<[1], [0], [0], [1], [0, 0, 1, 1], [], []>} : vector<2x16xf32>, vector<16x32xf32>, vector<2x32xf32> -> vector<2x32xf32>
    %c0_10 = arith.constant 0 : index
    %c0_11 = arith.constant 0 : index
    %14 = vector.load %arg4[%c0_10, %c0_11] : memref<1x32xf32, #tpu.memory_space<vmem>>, vector<1x32xf32>
    %15 = vector.broadcast %14 : vector<1x32xf32> to vector<2x32xf32>
    %16 = arith.addf %13, %15 : vector<2x32xf32>
    %c0_12 = arith.constant 0 : index
    %c0_13 = arith.constant 0 : index
    %17 = vector.load %arg5[%c0_12, %c0_13] : memref<2x32xf32, #tpu.memory_space<vmem>>, vector<2x32xf32>
    tpu.vector_store %arg5[%c0_12, %c0_13], %16 {strides = array<i32>} : memref<2x32xf32, #tpu.memory_space<vmem>>, vector<2x32xf32>,
    return
  }
  func.func @transform_0(%arg0: i32) -> (i32, i32, i32) {
    %c0_i32 = arith.constant 0 : i32
    %c0_i32_0 = arith.constant 0 : i32
    %c0_i32_1 = arith.constant 0 : i32
    %c0_i32_2 = arith.constant 0 : i32
    return %c0_i32, %c0_i32_0, %c0_i32_1 : i32, i32, i32
  }
  func.func @transform_1(%arg0: i32) -> (i32, i32, i32) {
    %c0_i32 = arith.constant 0 : i32
    %c0_i32_0 = arith.constant 0 : i32
    %c0_i32_1 = arith.constant 0 : i32
    %c0_i32_2 = arith.constant 0 : i32
    return %c0_i32, %c0_i32_0, %c0_i32_1 : i32, i32, i32
  }
  func.func @transform_2(%arg0: i32) -> (i32, i32) {
    %c0_i32 = arith.constant 0 : i32
    %c0_i32_0 = arith.constant 0 : i32
    %c0_i32_1 = arith.constant 0 : i32
    return %c0_i32, %c0_i32_0 : i32, i32
  }
  func.func @transform_3(%arg0: i32) -> (i32, i32) {
    %c0_i32 = arith.constant 0 : i32
    %c0_i32_0 = arith.constant 0 : i32
    %c0_i32_1 = arith.constant 0 : i32
    return %c0_i32, %c0_i32_0 : i32, i32
  }
  func.func @transform_4(%arg0: i32) -> (i32, i32) {
    %c0_i32 = arith.constant 0 : i32
    %c0_i32_0 = arith.constant 0 : i32
    %c0_i32_1 = arith.constant 0 : i32
    return %c0_i32, %c0_i32_0 : i32, i32
  }
}

module attributes {stable_mosaic.version = 11 : i64} {
  func.func @_mm_bn_elu_mask_kernel(%arg0: i32, %arg1: memref<2x16xbf16, #tpu.memory_space<vmem>>, %arg2: memref<16x128xbf16, #tpu.memory_space<vmem>>, %arg3: memref<1x128xf32, #tpu.memory_space<vmem>>, %arg4: memref<1x128xf32, #tpu.memory_space<vmem>>, %arg5: memref<2x1xf32, #tpu.memory_space<vmem>>, %arg6: memref<2x128xbf16, #tpu.memory_space<vmem>>) attributes {dimension_semantics = [#tpu.dimension_semantics<parallel>], iteration_bounds = array<i64: 1>, scalar_prefetch = 0 : i64, scratch_operands = 0 : i64, tpu.core_type = #tpu.core_type<tc>, window_params = [{transform_indices = @transform_0, window_bounds = array<i64: 2, 16>}, {pipeline_mode = #tpu.pipeline_mode<synchronous>, transform_indices = @transform_1, window_bounds = array<i64: 16, 128>}, {pipeline_mode = #tpu.pipeline_mode<synchronous>, transform_indices = @transform_2, window_bounds = array<i64: 1, 128>}, {pipeline_mode = #tpu.pipeline_mode<synchronous>, transform_indices = @transform_3, window_bounds = array<i64: 1, 128>}, {transform_indices = @transform_4, window_bounds = array<i64: 2, 1>}, {transform_indices = @transform_5, window_bounds = array<i64: 2, 128>}]} {
    %c0 = arith.constant 0 : index
    %c0_0 = arith.constant 0 : index
    %0 = vector.load %arg1[%c0, %c0_0] : memref<2x16xbf16, #tpu.memory_space<vmem>>, vector<2x16xbf16>
    %c0_1 = arith.constant 0 : index
    %c0_2 = arith.constant 0 : index
    %1 = vector.load %arg2[%c0_1, %c0_2] : memref<16x128xbf16, #tpu.memory_space<vmem>>, vector<16x128xbf16>
    %cst = arith.constant dense<0.000000e+00> : vector<2x128xf32>
    %2 = tpu.matmul %0, %1, %cst {dimension_numbers = #tpu.dot_dimension_numbers<[1], [0], [0], [1], [0, 0, 1, 1], [], []>} : vector<2x16xbf16>, vector<16x128xbf16>, vector<2x128xf32> -> vector<2x128xf32>
    %c0_3 = arith.constant 0 : index
    %c0_4 = arith.constant 0 : index
    %3 = vector.load %arg3[%c0_3, %c0_4] : memref<1x128xf32, #tpu.memory_space<vmem>>, vector<1x128xf32>
    %4 = vector.broadcast %3 : vector<1x128xf32> to vector<2x128xf32>
    %5 = arith.mulf %2, %4 : vector<2x128xf32>
    %c0_5 = arith.constant 0 : index
    %c0_6 = arith.constant 0 : index
    %6 = vector.load %arg4[%c0_5, %c0_6] : memref<1x128xf32, #tpu.memory_space<vmem>>, vector<1x128xf32>
    %7 = vector.broadcast %6 : vector<1x128xf32> to vector<2x128xf32>
    %8 = arith.addf %5, %7 : vector<2x128xf32>
    %cst_7 = arith.constant 0.000000e+00 : f32
    %9 = vector.broadcast %cst_7 : f32 to vector<2x128xf32>
    %10 = arith.cmpf ogt, %8, %9 : vector<2x128xf32>
    %cst_8 = arith.constant 0.000000e+00 : f32
    %11 = vector.broadcast %cst_8 : f32 to vector<2x128xf32>
    %12 = arith.minimumf %8, %11 : vector<2x128xf32>
    %13 = math.exp %12 : vector<2x128xf32>
    %cst_9 = arith.constant 1.000000e+00 : f32
    %14 = vector.broadcast %cst_9 : f32 to vector<2x128xf32>
    %15 = arith.subf %13, %14 : vector<2x128xf32>
    %16 = arith.select %10, %8, %15 : vector<2x128xi1>, vector<2x128xf32>
    %c0_10 = arith.constant 0 : index
    %c0_11 = arith.constant 0 : index
    %17 = vector.load %arg5[%c0_10, %c0_11] : memref<2x1xf32, #tpu.memory_space<vmem>>, vector<2x1xf32>
    %18 = vector.broadcast %17 : vector<2x1xf32> to vector<2x128xf32>
    %19 = arith.mulf %16, %18 : vector<2x128xf32>
    %20 = arith.truncf %19 : vector<2x128xf32> to vector<2x128xbf16>
    %c0_12 = arith.constant 0 : index
    %c0_13 = arith.constant 0 : index
    %21 = vector.load %arg6[%c0_12, %c0_13] : memref<2x128xbf16, #tpu.memory_space<vmem>>, vector<2x128xbf16>
    tpu.vector_store %arg6[%c0_12, %c0_13], %20 {strides = array<i32>} : memref<2x128xbf16, #tpu.memory_space<vmem>>, vector<2x128xbf16>,
    return
  }
  func.func @transform_0(%arg0: i32) -> (i32, i32) {
    %c0_i32 = arith.constant 0 : i32
    %c0_i32_0 = arith.constant 0 : i32
    return %arg0, %c0_i32 : i32, i32
  }
  func.func @transform_1(%arg0: i32) -> (i32, i32) {
    %c0_i32 = arith.constant 0 : i32
    %c0_i32_0 = arith.constant 0 : i32
    %c0_i32_1 = arith.constant 0 : i32
    return %c0_i32, %c0_i32_0 : i32, i32
  }
  func.func @transform_2(%arg0: i32) -> (i32, i32) {
    %c0_i32 = arith.constant 0 : i32
    %c0_i32_0 = arith.constant 0 : i32
    %c0_i32_1 = arith.constant 0 : i32
    return %c0_i32, %c0_i32_0 : i32, i32
  }
  func.func @transform_3(%arg0: i32) -> (i32, i32) {
    %c0_i32 = arith.constant 0 : i32
    %c0_i32_0 = arith.constant 0 : i32
    %c0_i32_1 = arith.constant 0 : i32
    return %c0_i32, %c0_i32_0 : i32, i32
  }
  func.func @transform_4(%arg0: i32) -> (i32, i32) {
    %c0_i32 = arith.constant 0 : i32
    %c0_i32_0 = arith.constant 0 : i32
    return %arg0, %c0_i32 : i32, i32
  }
  func.func @transform_5(%arg0: i32) -> (i32, i32) {
    %c0_i32 = arith.constant 0 : i32
    %c0_i32_0 = arith.constant 0 : i32
    return %arg0, %c0_i32 : i32, i32
  }
}

module attributes {stable_mosaic.version = 11 : i64} {
  func.func @_mm_bn_elu_mask_kernel(%arg0: i32, %arg1: memref<16x16xbf16, #tpu.memory_space<vmem>>, %arg2: memref<16x64xbf16, #tpu.memory_space<vmem>>, %arg3: memref<1x64xf32, #tpu.memory_space<vmem>>, %arg4: memref<1x64xf32, #tpu.memory_space<vmem>>, %arg5: memref<16x1xf32, #tpu.memory_space<vmem>>, %arg6: memref<16x64xbf16, #tpu.memory_space<vmem>>) attributes {dimension_semantics = [#tpu.dimension_semantics<parallel>], iteration_bounds = array<i64: 1>, scalar_prefetch = 0 : i64, scratch_operands = 0 : i64, tpu.core_type = #tpu.core_type<tc>, window_params = [{transform_indices = @transform_0, window_bounds = array<i64: 16, 16>}, {pipeline_mode = #tpu.pipeline_mode<synchronous>, transform_indices = @transform_1, window_bounds = array<i64: 16, 64>}, {pipeline_mode = #tpu.pipeline_mode<synchronous>, transform_indices = @transform_2, window_bounds = array<i64: 1, 64>}, {pipeline_mode = #tpu.pipeline_mode<synchronous>, transform_indices = @transform_3, window_bounds = array<i64: 1, 64>}, {transform_indices = @transform_4, window_bounds = array<i64: 16, 1>}, {transform_indices = @transform_5, window_bounds = array<i64: 16, 64>}]} {
    %c0 = arith.constant 0 : index
    %c0_0 = arith.constant 0 : index
    %0 = vector.load %arg1[%c0, %c0_0] : memref<16x16xbf16, #tpu.memory_space<vmem>>, vector<16x16xbf16>
    %c0_1 = arith.constant 0 : index
    %c0_2 = arith.constant 0 : index
    %1 = vector.load %arg2[%c0_1, %c0_2] : memref<16x64xbf16, #tpu.memory_space<vmem>>, vector<16x64xbf16>
    %cst = arith.constant dense<0.000000e+00> : vector<16x64xf32>
    %2 = tpu.matmul %0, %1, %cst {dimension_numbers = #tpu.dot_dimension_numbers<[1], [0], [0], [1], [0, 0, 1, 1], [], []>} : vector<16x16xbf16>, vector<16x64xbf16>, vector<16x64xf32> -> vector<16x64xf32>
    %c0_3 = arith.constant 0 : index
    %c0_4 = arith.constant 0 : index
    %3 = vector.load %arg3[%c0_3, %c0_4] : memref<1x64xf32, #tpu.memory_space<vmem>>, vector<1x64xf32>
    %4 = vector.broadcast %3 : vector<1x64xf32> to vector<16x64xf32>
    %5 = arith.mulf %2, %4 : vector<16x64xf32>
    %c0_5 = arith.constant 0 : index
    %c0_6 = arith.constant 0 : index
    %6 = vector.load %arg4[%c0_5, %c0_6] : memref<1x64xf32, #tpu.memory_space<vmem>>, vector<1x64xf32>
    %7 = vector.broadcast %6 : vector<1x64xf32> to vector<16x64xf32>
    %8 = arith.addf %5, %7 : vector<16x64xf32>
    %cst_7 = arith.constant 0.000000e+00 : f32
    %9 = vector.broadcast %cst_7 : f32 to vector<16x64xf32>
    %10 = arith.cmpf ogt, %8, %9 : vector<16x64xf32>
    %cst_8 = arith.constant 0.000000e+00 : f32
    %11 = vector.broadcast %cst_8 : f32 to vector<16x64xf32>
    %12 = arith.minimumf %8, %11 : vector<16x64xf32>
    %13 = math.exp %12 : vector<16x64xf32>
    %cst_9 = arith.constant 1.000000e+00 : f32
    %14 = vector.broadcast %cst_9 : f32 to vector<16x64xf32>
    %15 = arith.subf %13, %14 : vector<16x64xf32>
    %16 = arith.select %10, %8, %15 : vector<16x64xi1>, vector<16x64xf32>
    %c0_10 = arith.constant 0 : index
    %c0_11 = arith.constant 0 : index
    %17 = vector.load %arg5[%c0_10, %c0_11] : memref<16x1xf32, #tpu.memory_space<vmem>>, vector<16x1xf32>
    %18 = vector.broadcast %17 : vector<16x1xf32> to vector<16x64xf32>
    %19 = arith.mulf %16, %18 : vector<16x64xf32>
    %20 = arith.truncf %19 : vector<16x64xf32> to vector<16x64xbf16>
    %c0_12 = arith.constant 0 : index
    %c0_13 = arith.constant 0 : index
    %21 = vector.load %arg6[%c0_12, %c0_13] : memref<16x64xbf16, #tpu.memory_space<vmem>>, vector<16x64xbf16>
    tpu.vector_store %arg6[%c0_12, %c0_13], %20 {strides = array<i32>} : memref<16x64xbf16, #tpu.memory_space<vmem>>, vector<16x64xbf16>,
    return
  }
  func.func @transform_0(%arg0: i32) -> (i32, i32) {
    %c0_i32 = arith.constant 0 : i32
    %c0_i32_0 = arith.constant 0 : i32
    return %arg0, %c0_i32 : i32, i32
  }
  func.func @transform_1(%arg0: i32) -> (i32, i32) {
    %c0_i32 = arith.constant 0 : i32
    %c0_i32_0 = arith.constant 0 : i32
    %c0_i32_1 = arith.constant 0 : i32
    return %c0_i32, %c0_i32_0 : i32, i32
  }
  func.func @transform_2(%arg0: i32) -> (i32, i32) {
    %c0_i32 = arith.constant 0 : i32
    %c0_i32_0 = arith.constant 0 : i32
    %c0_i32_1 = arith.constant 0 : i32
    return %c0_i32, %c0_i32_0 : i32, i32
  }
  func.func @transform_3(%arg0: i32) -> (i32, i32) {
    %c0_i32 = arith.constant 0 : i32
    %c0_i32_0 = arith.constant 0 : i32
    %c0_i32_1 = arith.constant 0 : i32
    return %c0_i32, %c0_i32_0 : i32, i32
  }
  func.func @transform_4(%arg0: i32) -> (i32, i32) {
    %c0_i32 = arith.constant 0 : i32
    %c0_i32_0 = arith.constant 0 : i32
    return %arg0, %c0_i32 : i32, i32
  }
  func.func @transform_5(%arg0: i32) -> (i32, i32) {
    %c0_i32 = arith.constant 0 : i32
    %c0_i32_0 = arith.constant 0 : i32
    return %arg0, %c0_i32 : i32, i32
  }
}

module attributes {stable_mosaic.version = 11 : i64} {
  func.func @_mm_bn_elu_mask_cls_kernel(%arg0: i32, %arg1: memref<128x216xbf16, #tpu.memory_space<vmem>>, %arg2: memref<216x8xbf16, #tpu.memory_space<vmem>>, %arg3: memref<1x8xf32, #tpu.memory_space<vmem>>, %arg4: memref<1x8xf32, #tpu.memory_space<vmem>>, %arg5: memref<128x1xf32, #tpu.memory_space<vmem>>, %arg6: memref<1x8xf32, #tpu.memory_space<vmem>>, %arg7: memref<1x1xf32, #tpu.memory_space<vmem>>, %arg8: memref<128x8xbf16, #tpu.memory_space<vmem>>, %arg9: memref<128x1xf32, #tpu.memory_space<vmem>>) attributes {dimension_semantics = [#tpu.dimension_semantics<parallel>], iteration_bounds = array<i64: 1>, scalar_prefetch = 0 : i64, scratch_operands = 0 : i64, tpu.core_type = #tpu.core_type<tc>, window_params = [{transform_indices = @transform_0, window_bounds = array<i64: 128, 216>}, {pipeline_mode = #tpu.pipeline_mode<synchronous>, transform_indices = @transform_1, window_bounds = array<i64: 216, 8>}, {pipeline_mode = #tpu.pipeline_mode<synchronous>, transform_indices = @transform_2, window_bounds = array<i64: 1, 8>}, {pipeline_mode = #tpu.pipeline_mode<synchronous>, transform_indices = @transform_3, window_bounds = array<i64: 1, 8>}, {transform_indices = @transform_4, window_bounds = array<i64: 128, 1>}, {pipeline_mode = #tpu.pipeline_mode<synchronous>, transform_indices = @transform_5, window_bounds = array<i64: 1, 8>}, {pipeline_mode = #tpu.pipeline_mode<synchronous>, transform_indices = @transform_6, window_bounds = array<i64: 1, 1>}, {transform_indices = @transform_7, window_bounds = array<i64: 128, 8>}, {transform_indices = @transform_8, window_bounds = array<i64: 128, 1>}]} {
    %c0 = arith.constant 0 : index
    %c0_0 = arith.constant 0 : index
    %0 = vector.load %arg1[%c0, %c0_0] : memref<128x216xbf16, #tpu.memory_space<vmem>>, vector<128x216xbf16>
    %c0_1 = arith.constant 0 : index
    %c0_2 = arith.constant 0 : index
    %1 = vector.load %arg2[%c0_1, %c0_2] : memref<216x8xbf16, #tpu.memory_space<vmem>>, vector<216x8xbf16>
    %cst = arith.constant dense<0.000000e+00> : vector<128x8xf32>
    %2 = tpu.matmul %0, %1, %cst {dimension_numbers = #tpu.dot_dimension_numbers<[1], [0], [0], [1], [0, 0, 1, 1], [], []>} : vector<128x216xbf16>, vector<216x8xbf16>, vector<128x8xf32> -> vector<128x8xf32>
    %c0_3 = arith.constant 0 : index
    %c0_4 = arith.constant 0 : index
    %3 = vector.load %arg3[%c0_3, %c0_4] : memref<1x8xf32, #tpu.memory_space<vmem>>, vector<1x8xf32>
    %4 = vector.broadcast %3 : vector<1x8xf32> to vector<128x8xf32>
    %5 = arith.mulf %2, %4 : vector<128x8xf32>
    %c0_5 = arith.constant 0 : index
    %c0_6 = arith.constant 0 : index
    %6 = vector.load %arg4[%c0_5, %c0_6] : memref<1x8xf32, #tpu.memory_space<vmem>>, vector<1x8xf32>
    %7 = vector.broadcast %6 : vector<1x8xf32> to vector<128x8xf32>
    %8 = arith.addf %5, %7 : vector<128x8xf32>
    %cst_7 = arith.constant 0.000000e+00 : f32
    %9 = vector.broadcast %cst_7 : f32 to vector<128x8xf32>
    %10 = arith.cmpf ogt, %8, %9 : vector<128x8xf32>
    %cst_8 = arith.constant 0.000000e+00 : f32
    %11 = vector.broadcast %cst_8 : f32 to vector<128x8xf32>
    %12 = arith.minimumf %8, %11 : vector<128x8xf32>
    %13 = math.exp %12 : vector<128x8xf32>
    %cst_9 = arith.constant 1.000000e+00 : f32
    %14 = vector.broadcast %cst_9 : f32 to vector<128x8xf32>
    %15 = arith.subf %13, %14 : vector<128x8xf32>
    %16 = arith.select %10, %8, %15 : vector<128x8xi1>, vector<128x8xf32>
    %c0_10 = arith.constant 0 : index
    %c0_11 = arith.constant 0 : index
    %17 = vector.load %arg5[%c0_10, %c0_11] : memref<128x1xf32, #tpu.memory_space<vmem>>, vector<128x1xf32>
    %18 = vector.broadcast %17 : vector<128x1xf32> to vector<128x8xf32>
    %19 = arith.mulf %16, %18 : vector<128x8xf32>
    %20 = arith.truncf %19 : vector<128x8xf32> to vector<128x8xbf16>
    %c0_12 = arith.constant 0 : index
    %c0_13 = arith.constant 0 : index
    %21 = vector.load %arg8[%c0_12, %c0_13] : memref<128x8xbf16, #tpu.memory_space<vmem>>, vector<128x8xbf16>
    tpu.vector_store %arg8[%c0_12, %c0_13], %20 {strides = array<i32>} : memref<128x8xbf16, #tpu.memory_space<vmem>>, vector<128x8xbf16>,
    %c0_14 = arith.constant 0 : index
    %c0_15 = arith.constant 0 : index
    %22 = vector.load %arg6[%c0_14, %c0_15] : memref<1x8xf32, #tpu.memory_space<vmem>>, vector<1x8xf32>
    %23 = vector.broadcast %22 : vector<1x8xf32> to vector<128x8xf32>
    %24 = arith.mulf %19, %23 : vector<128x8xf32>
    %cst_16 = arith.constant dense<0.000000e+00> : vector<128xf32>
    %25 = vector.multi_reduction <add>, %24, %cst_16 [1] : vector<128x8xf32> to vector<128xf32>
    %26 = vector.shape_cast %25 : vector<128xf32> to vector<128x1xf32>
    %c0_17 = arith.constant 0 : index
    %c0_18 = arith.constant 0 : index
    %27 = vector.load %arg7[%c0_17, %c0_18] : memref<1x1xf32, #tpu.memory_space<vmem>>, vector<1x1xf32>
    %28 = vector.broadcast %27 : vector<1x1xf32> to vector<128x1xf32>
    %29 = arith.addf %26, %28 : vector<128x1xf32>
    %c0_19 = arith.constant 0 : index
    %c0_20 = arith.constant 0 : index
    %30 = vector.load %arg5[%c0_19, %c0_20] : memref<128x1xf32, #tpu.memory_space<vmem>>, vector<128x1xf32>
    %31 = arith.mulf %29, %30 : vector<128x1xf32>
    %c0_21 = arith.constant 0 : index
    %c0_22 = arith.constant 0 : index
    %32 = vector.load %arg9[%c0_21, %c0_22] : memref<128x1xf32, #tpu.memory_space<vmem>>, vector<128x1xf32>
    tpu.vector_store %arg9[%c0_21, %c0_22], %31 {strides = array<i32>} : memref<128x1xf32, #tpu.memory_space<vmem>>, vector<128x1xf32>,
    return
  }
  func.func @transform_0(%arg0: i32) -> (i32, i32) {
    %c0_i32 = arith.constant 0 : i32
    %c0_i32_0 = arith.constant 0 : i32
    return %arg0, %c0_i32 : i32, i32
  }
  func.func @transform_1(%arg0: i32) -> (i32, i32) {
    %c0_i32 = arith.constant 0 : i32
    %c0_i32_0 = arith.constant 0 : i32
    %c0_i32_1 = arith.constant 0 : i32
    return %c0_i32, %c0_i32_0 : i32, i32
  }
  func.func @transform_2(%arg0: i32) -> (i32, i32) {
    %c0_i32 = arith.constant 0 : i32
    %c0_i32_0 = arith.constant 0 : i32
    %c0_i32_1 = arith.constant 0 : i32
    return %c0_i32, %c0_i32_0 : i32, i32
  }
  func.func @transform_3(%arg0: i32) -> (i32, i32) {
    %c0_i32 = arith.constant 0 : i32
    %c0_i32_0 = arith.constant 0 : i32
    %c0_i32_1 = arith.constant 0 : i32
    return %c0_i32, %c0_i32_0 : i32, i32
  }
  func.func @transform_4(%arg0: i32) -> (i32, i32) {
    %c0_i32 = arith.constant 0 : i32
    %c0_i32_0 = arith.constant 0 : i32
    return %arg0, %c0_i32 : i32, i32
  }
  func.func @transform_5(%arg0: i32) -> (i32, i32) {
    %c0_i32 = arith.constant 0 : i32
    %c0_i32_0 = arith.constant 0 : i32
    %c0_i32_1 = arith.constant 0 : i32
    return %c0_i32, %c0_i32_0 : i32, i32
  }
  func.func @transform_6(%arg0: i32) -> (i32, i32) {
    %c0_i32 = arith.constant 0 : i32
    %c0_i32_0 = arith.constant 0 : i32
    %c0_i32_1 = arith.constant 0 : i32
    return %c0_i32, %c0_i32_0 : i32, i32
  }
  func.func @transform_7(%arg0: i32) -> (i32, i32) {
    %c0_i32 = arith.constant 0 : i32
    %c0_i32_0 = arith.constant 0 : i32
    return %arg0, %c0_i32 : i32, i32
  }
  func.func @transform_8(%arg0: i32) -> (i32, i32) {
    %c0_i32 = arith.constant 0 : i32
    %c0_i32_0 = arith.constant 0 : i32
    return %arg0, %c0_i32 : i32, i32
  }
}

module attributes {stable_mosaic.version = 11 : i64} {
  func.func @_mm_bn_elu_mask_kernel(%arg0: i32, %arg1: memref<128x8xbf16, #tpu.memory_space<vmem>>, %arg2: memref<8x32xbf16, #tpu.memory_space<vmem>>, %arg3: memref<1x32xf32, #tpu.memory_space<vmem>>, %arg4: memref<1x32xf32, #tpu.memory_space<vmem>>, %arg5: memref<128x1xf32, #tpu.memory_space<vmem>>, %arg6: memref<128x32xbf16, #tpu.memory_space<vmem>>) attributes {dimension_semantics = [#tpu.dimension_semantics<parallel>], iteration_bounds = array<i64: 1>, scalar_prefetch = 0 : i64, scratch_operands = 0 : i64, tpu.core_type = #tpu.core_type<tc>, window_params = [{transform_indices = @transform_0, window_bounds = array<i64: 128, 8>}, {pipeline_mode = #tpu.pipeline_mode<synchronous>, transform_indices = @transform_1, window_bounds = array<i64: 8, 32>}, {pipeline_mode = #tpu.pipeline_mode<synchronous>, transform_indices = @transform_2, window_bounds = array<i64: 1, 32>}, {pipeline_mode = #tpu.pipeline_mode<synchronous>, transform_indices = @transform_3, window_bounds = array<i64: 1, 32>}, {transform_indices = @transform_4, window_bounds = array<i64: 128, 1>}, {transform_indices = @transform_5, window_bounds = array<i64: 128, 32>}]} {
    %c0 = arith.constant 0 : index
    %c0_0 = arith.constant 0 : index
    %0 = vector.load %arg1[%c0, %c0_0] : memref<128x8xbf16, #tpu.memory_space<vmem>>, vector<128x8xbf16>
    %c0_1 = arith.constant 0 : index
    %c0_2 = arith.constant 0 : index
    %1 = vector.load %arg2[%c0_1, %c0_2] : memref<8x32xbf16, #tpu.memory_space<vmem>>, vector<8x32xbf16>
    %cst = arith.constant dense<0.000000e+00> : vector<128x32xf32>
    %2 = tpu.matmul %0, %1, %cst {dimension_numbers = #tpu.dot_dimension_numbers<[1], [0], [0], [1], [0, 0, 1, 1], [], []>} : vector<128x8xbf16>, vector<8x32xbf16>, vector<128x32xf32> -> vector<128x32xf32>
    %c0_3 = arith.constant 0 : index
    %c0_4 = arith.constant 0 : index
    %3 = vector.load %arg3[%c0_3, %c0_4] : memref<1x32xf32, #tpu.memory_space<vmem>>, vector<1x32xf32>
    %4 = vector.broadcast %3 : vector<1x32xf32> to vector<128x32xf32>
    %5 = arith.mulf %2, %4 : vector<128x32xf32>
    %c0_5 = arith.constant 0 : index
    %c0_6 = arith.constant 0 : index
    %6 = vector.load %arg4[%c0_5, %c0_6] : memref<1x32xf32, #tpu.memory_space<vmem>>, vector<1x32xf32>
    %7 = vector.broadcast %6 : vector<1x32xf32> to vector<128x32xf32>
    %8 = arith.addf %5, %7 : vector<128x32xf32>
    %cst_7 = arith.constant 0.000000e+00 : f32
    %9 = vector.broadcast %cst_7 : f32 to vector<128x32xf32>
    %10 = arith.cmpf ogt, %8, %9 : vector<128x32xf32>
    %cst_8 = arith.constant 0.000000e+00 : f32
    %11 = vector.broadcast %cst_8 : f32 to vector<128x32xf32>
    %12 = arith.minimumf %8, %11 : vector<128x32xf32>
    %13 = math.exp %12 : vector<128x32xf32>
    %cst_9 = arith.constant 1.000000e+00 : f32
    %14 = vector.broadcast %cst_9 : f32 to vector<128x32xf32>
    %15 = arith.subf %13, %14 : vector<128x32xf32>
    %16 = arith.select %10, %8, %15 : vector<128x32xi1>, vector<128x32xf32>
    %c0_10 = arith.constant 0 : index
    %c0_11 = arith.constant 0 : index
    %17 = vector.load %arg5[%c0_10, %c0_11] : memref<128x1xf32, #tpu.memory_space<vmem>>, vector<128x1xf32>
    %18 = vector.broadcast %17 : vector<128x1xf32> to vector<128x32xf32>
    %19 = arith.mulf %16, %18 : vector<128x32xf32>
    %20 = arith.truncf %19 : vector<128x32xf32> to vector<128x32xbf16>
    %c0_12 = arith.constant 0 : index
    %c0_13 = arith.constant 0 : index
    %21 = vector.load %arg6[%c0_12, %c0_13] : memref<128x32xbf16, #tpu.memory_space<vmem>>, vector<128x32xbf16>
    tpu.vector_store %arg6[%c0_12, %c0_13], %20 {strides = array<i32>} : memref<128x32xbf16, #tpu.memory_space<vmem>>, vector<128x32xbf16>,
    return
  }
  func.func @transform_0(%arg0: i32) -> (i32, i32) {
    %c0_i32 = arith.constant 0 : i32
    %c0_i32_0 = arith.constant 0 : i32
    return %arg0, %c0_i32 : i32, i32
  }
  func.func @transform_1(%arg0: i32) -> (i32, i32) {
    %c0_i32 = arith.constant 0 : i32
    %c0_i32_0 = arith.constant 0 : i32
    %c0_i32_1 = arith.constant 0 : i32
    return %c0_i32, %c0_i32_0 : i32, i32
  }
  func.func @transform_2(%arg0: i32) -> (i32, i32) {
    %c0_i32 = arith.constant 0 : i32
    %c0_i32_0 = arith.constant 0 : i32
    %c0_i32_1 = arith.constant 0 : i32
    return %c0_i32, %c0_i32_0 : i32, i32
  }
  func.func @transform_3(%arg0: i32) -> (i32, i32) {
    %c0_i32 = arith.constant 0 : i32
    %c0_i32_0 = arith.constant 0 : i32
    %c0_i32_1 = arith.constant 0 : i32
    return %c0_i32, %c0_i32_0 : i32, i32
  }
  func.func @transform_4(%arg0: i32) -> (i32, i32) {
    %c0_i32 = arith.constant 0 : i32
    %c0_i32_0 = arith.constant 0 : i32
    return %arg0, %c0_i32 : i32, i32
  }
  func.func @transform_5(%arg0: i32) -> (i32, i32) {
    %c0_i32 = arith.constant 0 : i32
    %c0_i32_0 = arith.constant 0 : i32
    return %arg0, %c0_i32 : i32, i32
  }
}

module attributes {stable_mosaic.version = 11 : i64} {
  func.func @_mm_bn_elu_mask_cls_kernel(%arg0: i32, %arg1: memref<512x108xbf16, #tpu.memory_space<vmem>>, %arg2: memref<108x4xbf16, #tpu.memory_space<vmem>>, %arg3: memref<1x4xf32, #tpu.memory_space<vmem>>, %arg4: memref<1x4xf32, #tpu.memory_space<vmem>>, %arg5: memref<512x1xf32, #tpu.memory_space<vmem>>, %arg6: memref<1x4xf32, #tpu.memory_space<vmem>>, %arg7: memref<1x1xf32, #tpu.memory_space<vmem>>, %arg8: memref<512x4xbf16, #tpu.memory_space<vmem>>, %arg9: memref<512x1xf32, #tpu.memory_space<vmem>>) attributes {dimension_semantics = [#tpu.dimension_semantics<parallel>], iteration_bounds = array<i64: 2>, scalar_prefetch = 0 : i64, scratch_operands = 0 : i64, tpu.core_type = #tpu.core_type<tc>, window_params = [{transform_indices = @transform_0, window_bounds = array<i64: 512, 108>}, {pipeline_mode = #tpu.pipeline_mode<synchronous>, transform_indices = @transform_1, window_bounds = array<i64: 108, 4>}, {pipeline_mode = #tpu.pipeline_mode<synchronous>, transform_indices = @transform_2, window_bounds = array<i64: 1, 4>}, {pipeline_mode = #tpu.pipeline_mode<synchronous>, transform_indices = @transform_3, window_bounds = array<i64: 1, 4>}, {transform_indices = @transform_4, window_bounds = array<i64: 512, 1>}, {pipeline_mode = #tpu.pipeline_mode<synchronous>, transform_indices = @transform_5, window_bounds = array<i64: 1, 4>}, {pipeline_mode = #tpu.pipeline_mode<synchronous>, transform_indices = @transform_6, window_bounds = array<i64: 1, 1>}, {transform_indices = @transform_7, window_bounds = array<i64: 512, 4>}, {transform_indices = @transform_8, window_bounds = array<i64: 512, 1>}]} {
    %c0 = arith.constant 0 : index
    %c0_0 = arith.constant 0 : index
    %0 = vector.load %arg1[%c0, %c0_0] : memref<512x108xbf16, #tpu.memory_space<vmem>>, vector<512x108xbf16>
    %c0_1 = arith.constant 0 : index
    %c0_2 = arith.constant 0 : index
    %1 = vector.load %arg2[%c0_1, %c0_2] : memref<108x4xbf16, #tpu.memory_space<vmem>>, vector<108x4xbf16>
    %cst = arith.constant dense<0.000000e+00> : vector<512x4xf32>
    %2 = tpu.matmul %0, %1, %cst {dimension_numbers = #tpu.dot_dimension_numbers<[1], [0], [0], [1], [0, 0, 1, 1], [], []>} : vector<512x108xbf16>, vector<108x4xbf16>, vector<512x4xf32> -> vector<512x4xf32>
    %c0_3 = arith.constant 0 : index
    %c0_4 = arith.constant 0 : index
    %3 = vector.load %arg3[%c0_3, %c0_4] : memref<1x4xf32, #tpu.memory_space<vmem>>, vector<1x4xf32>
    %4 = vector.broadcast %3 : vector<1x4xf32> to vector<512x4xf32>
    %5 = arith.mulf %2, %4 : vector<512x4xf32>
    %c0_5 = arith.constant 0 : index
    %c0_6 = arith.constant 0 : index
    %6 = vector.load %arg4[%c0_5, %c0_6] : memref<1x4xf32, #tpu.memory_space<vmem>>, vector<1x4xf32>
    %7 = vector.broadcast %6 : vector<1x4xf32> to vector<512x4xf32>
    %8 = arith.addf %5, %7 : vector<512x4xf32>
    %cst_7 = arith.constant 0.000000e+00 : f32
    %9 = vector.broadcast %cst_7 : f32 to vector<512x4xf32>
    %10 = arith.cmpf ogt, %8, %9 : vector<512x4xf32>
    %cst_8 = arith.constant 0.000000e+00 : f32
    %11 = vector.broadcast %cst_8 : f32 to vector<512x4xf32>
    %12 = arith.minimumf %8, %11 : vector<512x4xf32>
    %13 = math.exp %12 : vector<512x4xf32>
    %cst_9 = arith.constant 1.000000e+00 : f32
    %14 = vector.broadcast %cst_9 : f32 to vector<512x4xf32>
    %15 = arith.subf %13, %14 : vector<512x4xf32>
    %16 = arith.select %10, %8, %15 : vector<512x4xi1>, vector<512x4xf32>
    %c0_10 = arith.constant 0 : index
    %c0_11 = arith.constant 0 : index
    %17 = vector.load %arg5[%c0_10, %c0_11] : memref<512x1xf32, #tpu.memory_space<vmem>>, vector<512x1xf32>
    %18 = vector.broadcast %17 : vector<512x1xf32> to vector<512x4xf32>
    %19 = arith.mulf %16, %18 : vector<512x4xf32>
    %20 = arith.truncf %19 : vector<512x4xf32> to vector<512x4xbf16>
    %c0_12 = arith.constant 0 : index
    %c0_13 = arith.constant 0 : index
    %21 = vector.load %arg8[%c0_12, %c0_13] : memref<512x4xbf16, #tpu.memory_space<vmem>>, vector<512x4xbf16>
    tpu.vector_store %arg8[%c0_12, %c0_13], %20 {strides = array<i32>} : memref<512x4xbf16, #tpu.memory_space<vmem>>, vector<512x4xbf16>,
    %c0_14 = arith.constant 0 : index
    %c0_15 = arith.constant 0 : index
    %22 = vector.load %arg6[%c0_14, %c0_15] : memref<1x4xf32, #tpu.memory_space<vmem>>, vector<1x4xf32>
    %23 = vector.broadcast %22 : vector<1x4xf32> to vector<512x4xf32>
    %24 = arith.mulf %19, %23 : vector<512x4xf32>
    %cst_16 = arith.constant dense<0.000000e+00> : vector<512xf32>
    %25 = vector.multi_reduction <add>, %24, %cst_16 [1] : vector<512x4xf32> to vector<512xf32>
    %26 = vector.shape_cast %25 : vector<512xf32> to vector<512x1xf32>
    %c0_17 = arith.constant 0 : index
    %c0_18 = arith.constant 0 : index
    %27 = vector.load %arg7[%c0_17, %c0_18] : memref<1x1xf32, #tpu.memory_space<vmem>>, vector<1x1xf32>
    %28 = vector.broadcast %27 : vector<1x1xf32> to vector<512x1xf32>
    %29 = arith.addf %26, %28 : vector<512x1xf32>
    %c0_19 = arith.constant 0 : index
    %c0_20 = arith.constant 0 : index
    %30 = vector.load %arg5[%c0_19, %c0_20] : memref<512x1xf32, #tpu.memory_space<vmem>>, vector<512x1xf32>
    %31 = arith.mulf %29, %30 : vector<512x1xf32>
    %c0_21 = arith.constant 0 : index
    %c0_22 = arith.constant 0 : index
    %32 = vector.load %arg9[%c0_21, %c0_22] : memref<512x1xf32, #tpu.memory_space<vmem>>, vector<512x1xf32>
    tpu.vector_store %arg9[%c0_21, %c0_22], %31 {strides = array<i32>} : memref<512x1xf32, #tpu.memory_space<vmem>>, vector<512x1xf32>,
    return
  }
  func.func @transform_0(%arg0: i32) -> (i32, i32) {
    %c0_i32 = arith.constant 0 : i32
    %c0_i32_0 = arith.constant 0 : i32
    return %arg0, %c0_i32 : i32, i32
  }
  func.func @transform_1(%arg0: i32) -> (i32, i32) {
    %c0_i32 = arith.constant 0 : i32
    %c0_i32_0 = arith.constant 0 : i32
    %c0_i32_1 = arith.constant 0 : i32
    return %c0_i32, %c0_i32_0 : i32, i32
  }
  func.func @transform_2(%arg0: i32) -> (i32, i32) {
    %c0_i32 = arith.constant 0 : i32
    %c0_i32_0 = arith.constant 0 : i32
    %c0_i32_1 = arith.constant 0 : i32
    return %c0_i32, %c0_i32_0 : i32, i32
  }
  func.func @transform_3(%arg0: i32) -> (i32, i32) {
    %c0_i32 = arith.constant 0 : i32
    %c0_i32_0 = arith.constant 0 : i32
    %c0_i32_1 = arith.constant 0 : i32
    return %c0_i32, %c0_i32_0 : i32, i32
  }
  func.func @transform_4(%arg0: i32) -> (i32, i32) {
    %c0_i32 = arith.constant 0 : i32
    %c0_i32_0 = arith.constant 0 : i32
    return %arg0, %c0_i32 : i32, i32
  }
  func.func @transform_5(%arg0: i32) -> (i32, i32) {
    %c0_i32 = arith.constant 0 : i32
    %c0_i32_0 = arith.constant 0 : i32
    %c0_i32_1 = arith.constant 0 : i32
    return %c0_i32, %c0_i32_0 : i32, i32
  }
  func.func @transform_6(%arg0: i32) -> (i32, i32) {
    %c0_i32 = arith.constant 0 : i32
    %c0_i32_0 = arith.constant 0 : i32
    %c0_i32_1 = arith.constant 0 : i32
    return %c0_i32, %c0_i32_0 : i32, i32
  }
  func.func @transform_7(%arg0: i32) -> (i32, i32) {
    %c0_i32 = arith.constant 0 : i32
    %c0_i32_0 = arith.constant 0 : i32
    return %arg0, %c0_i32 : i32, i32
  }
  func.func @transform_8(%arg0: i32) -> (i32, i32) {
    %c0_i32 = arith.constant 0 : i32
    %c0_i32_0 = arith.constant 0 : i32
    return %arg0, %c0_i32 : i32, i32
  }
}

</mosaic_0001>

<bundles_post_ra>
// kernel: vae_forward.13
= control target key start
LH: loop header
LB: loop body
LE: loop exit
PB: predicated region body
PF: predicated region fallthrough
CT: control target
= control target key end

     0   :  { %s2841_s18 = smov 0   ;;  %s3978_s0 = inlined_call_operand.vmem [shape: bf16[1024,27], index: 0, kind: input, shape index: {}]   ;;  %s3979_s1 = inlined_call_operand.vmem [shape: bf16[27,4], index: 1, kind: input, shape index: {}]   ;;  %s3980_s2 = inlined_call_operand.vmem [shape: f32[1,4], index: 2, kind: input, shape index: {}]   ;;  %s3981_s3 = inlined_call_operand.vmem [shape: f32[1,4], index: 3, kind: input, shape index: {}]   ;;  %s3982_s4 = inlined_call_operand.vmem [shape: f32[1024,1], index: 4, kind: input, shape index: {}]   ;;  %s3983_s5 = inlined_call_operand.vmem [shape: bf16[1024,4], index: 5, kind: output, shape index: {}]  }
   0x1 LB: > { %s2246_s19 = sadd.s32 4294967295, %s2807_s18   ;;  %p2250_p0 = scmp.ge.s32.totalorder %s2807_s18, 1  ;;  %s2807_s18 = sphi %s2841_s18, %s15_s18  }
   0x2   : > { %p199_p1 = scmp.lt.s32.totalorder %s2807_s18, 3 }
   0x4   : > { %p200_p2 = pnand %p2250_p0, %p199_p1 }
   0x6   : > { %203 = sbr.rel (%p200_p2) target bundleno = 411 (0x19b), region = 40 }
   0xd   : > { %v2637_v0 = vld [vmem:[%s3979_s1] sm:$0xff]   ;;  %v2809_v1 = vmov 0   ;;  %v2638_v2 = vld [vmem:[%s3979_s1 + $0x8] sm:$0x3f]   ;;  %vm587_vm0 = vcmask 1044480   ;;  %vm588_vm1 = vcmask 1045504  }
   0xe   : > { %2636 = vset.pattern.permute.xlu1 %v2809_v1  ;;  %2635 = vset.pattern.permute.xlu0 %v2809_v1  ;;  %s2251_s24 = sshll.u32 %s2246_s19, 6  ;;  %v2810_v3 = vmov 65535   ;;  %vm490_vm2 = vcmask 220160   ;;  %vm2113_vm5 = vcmask 27648  }
   0xf   : > { %2553 = vmatprep.subr.bf16.mxu0 %v2637_v0  ;;  %2621 = vmatprep.subr.bf16.mxu1 %v2637_v0  ;;  %v589_v4 = vsel %vm587_vm0, 4294967295, %v2810_v3  ;;  %p233_p3 = scmp.lt.s32.totalorder %s2251_s24, 127 }
  0x10   : > { %2554 = vmatpush3.bf16.msra.mxu0 %v2637_v0  ;;  %2623 = vmatpush3.bf16.msra.mxu1 %v2637_v0  ;;  %v590_v5 = vsel %vm588_vm1, %v589_v4, 0 }
  0x11   : > { %v592_v6 = vand.u32 %v2638_v2, %v590_v5  ;;  %s4035_s24 = smov (!%p233_p3, %s2251_s24), 127 }
  0x12   : > { %s2254_s25 = sshll.u32 %s4035_s24, 3  ;;  %s2252_s26 = sshll.u32 %s4035_s24, 2 }
  0x13   : > { %2555 = vmatprep.subr.bf16.mxu0 %v592_v6  ;;  %2622 = vmatprep.subr.bf16.mxu1 %v592_v6  ;;  %s2862_s29 = scalar_lea.vmem %s3982_s4, %s2254_s25  ;;  %s2869_s7 = scalar_lea.vmem %s3978_s0, %s2252_s26 }
  0x14   : > { %2556 = vmatpush3.bf16.msra.mxu0 %v592_v6  ;;  %2624 = vmatpush3.bf16.msra.mxu1 %v592_v6  ;;  %v1411_v7 = vld [vmem:[%s2862_s29 + $0x10] sm:$0xff]  ;;  %v1409_v8 = vld [vmem:[%s2862_s29] sm:$0xff]  ;;  %v2641_v11 = vld [vmem:[%s2869_s7 + $0x8] sm:$0xff]   ;;  %s3183_s14 = scalar_lea.vmem %s3983_s5, %s2252_s26 }
  0x15   : > { %1485 = vperm.xlu1 %2636, %v1411_v7   ;;  %1475 = vperm.xlu0 %2635, %v1409_v8   ;;  %v2639_v9 = vld [vmem:[%s2869_s7] sm:$0xff]   ;;  %v2642_v12 = vld [vmem:[%s2869_s7 + $0x88] sm:$0xff]   ;;  %v1412_v13 = vld [vmem:[%s2862_s29 + $0x18] sm:$0xff] }
  0x16   : > { %v2640_v10 = vld [vmem:[%s2869_s7 + $0x80] sm:$0xff]   ;;  %2557 = vmatprep.mubr.msk.bf16.mxu0 %vm490_vm2, %v2639_v9  ;;  %v1410_v14 = vld [vmem:[%s2862_s29 + $0x8] sm:$0xff]  ;;  %v2643_v17 = vld [vmem:[%s2869_s7 + $0x10] sm:$0xff]  }
  0x17   : > { %2589 = vmatprep.mubr.msk.bf16.mxu1 %vm490_vm2, %v2640_v10  ;;  %2558 = vmatmul.mubr.msk.bf16.vlgmr.msra.gmra.mrb[0].mxu0 %vm490_vm2, %v2641_v11  ;;  %v1414_v15 = vld [vmem:[%s2862_s29 + $0x28] sm:$0xff]  ;;  %v1413_v16 = vld [vmem:[%s2862_s29 + $0x20] sm:$0xff]  ;;  %v2644_v18 = vld [vmem:[%s2869_s7 + $0x90] sm:$0xff]  }
  0x18   : > { %2590 = vmatmul.mubr.msk.bf16.vlgmr.msra.gmra.mrb[0].mxu1 %vm490_vm2, %v2642_v12  ;;  %2561 = vmatprep.mubr.msk.bf16.mxu0 %vm490_vm2, %v2643_v17  ;;  %v2645_v19 = vld [vmem:[%s2869_s7 + $0x18] sm:$0xff]   ;;  %v1415_v22 = vld [vmem:[%s2862_s29 + $0x30] sm:$0xff]  ;;  %v2647_v23 = vld [vmem:[%s2869_s7 + $0x20] sm:$0xff]  }
  0x19   : > { %1490 = vperm.xlu1 %2636, %v1412_v13   ;;  %1480 = vperm.xlu0 %2635, %v1410_v14   ;;  %v2646_v20 = vld [vmem:[%s2869_s7 + $0x98] sm:$0xff]   ;;  %v2648_v24 = vld [vmem:[%s2869_s7 + $0xa0] sm:$0xff]   ;;  %v1418_v25 = vld [vmem:[%s2862_s29 + $0x48] sm:$0xff] }
  0x1a   : > { %2593 = vmatprep.mubr.msk.bf16.mxu1 %vm490_vm2, %v2644_v18  ;;  %v1416_v21 = vld [vmem:[%s2862_s29 + $0x38] sm:$0xff]  ;;  %v1417_v26 = vld [vmem:[%s2862_s29 + $0x40] sm:$0xff]  ;;  %v2649_v27 = vld [vmem:[%s2869_s7 + $0x28] sm:$0xff]  }
  0x1b   : > { %v2650_v28 = vld [vmem:[%s2869_s7 + $0xa8] sm:$0xff]   ;;  %v1420_v29 = vld [vmem:[%s2862_s29 + $0x58] sm:$0xff]  ;;  %v1419_v30 = vld [vmem:[%s2862_s29 + $0x50] sm:$0xff] }
  0x1c   : > { %v2651_v31 = vld [vmem:[%s2869_s7 + $0x30] sm:$0xff]   ;;  %v1422_v33 = vld [vmem:[%s2862_s29 + $0x68] sm:$0xff]  ;;  %v1421_v34 = vld [vmem:[%s2862_s29 + $0x60] sm:$0xff] }
  0x1d   : > { %1500 = vperm.xlu1 %2636, %v1414_v15   ;;  %1495 = vperm.xlu0 %2635, %v1413_v16   ;;  %v2652_v32 = vld [vmem:[%s2869_s7 + $0xb0] sm:$0xff]   ;;  %v2653_v35 = vld [vmem:[%s2869_s7 + $0x38] sm:$0xff]   ;;  %v2655_v39 = vld [vmem:[%s2869_s7 + $0x40] sm:$0xff]  }
  0x1e   : > { %v2654_v36 = vld [vmem:[%s2869_s7 + $0xb8] sm:$0xff]   ;;  %v1423_v38 = vld [vmem:[%s2862_s29 + $0x70] sm:$0xff]  ;;  %v2656_v40 = vld [vmem:[%s2869_s7 + $0xc0] sm:$0xff]  }
  0x1f   : > { %2562 = vmatmul.mubr.msk.bf16.gmra.mrb[4].mxu0 %vm490_vm2, %v2645_v19  ;;  %v1424_v37 = vld [vmem:[%s2862_s29 + $0x78] sm:$0xff]  ;;  %v1426_v41 = vld [vmem:[%s2862_s29 + $0x88] sm:$0xff]  ;;  %v1425_v42 = vld [vmem:[%s2862_s29 + $0x80] sm:$0xff] }
  0x20   : > { %2594 = vmatmul.mubr.msk.bf16.gmra.mrb[4].mxu1 %vm490_vm2, %v2646_v20  ;;  %2565 = vmatprep.mubr.msk.bf16.mxu0 %vm490_vm2, %v2647_v23  ;;  %v2657_v43 = vld [vmem:[%s2869_s7 + $0x48] sm:$0xff]   ;;  %v1428_v45 = vld [vmem:[%s2862_s29 + $0x98] sm:$0xff]  ;;  %v1427_v46 = vld [vmem:[%s2862_s29 + $0x90] sm:$0xff] }
  0x21   : > { %1510 = vperm.xlu1 %2636, %v1416_v21   ;;  %1505 = vperm.xlu0 %2635, %v1415_v22   ;;  %v2658_v44 = vld [vmem:[%s2869_s7 + $0xc8] sm:$0xff]   ;;  %v2659_v47 = vld [vmem:[%s2869_s7 + $0x50] sm:$0xff]   ;;  %v1429_v50 = vld [vmem:[%s2862_s29 + $0xa0] sm:$0xff] }
  0x22   : > { %2597 = vmatprep.mubr.msk.bf16.mxu1 %vm490_vm2, %v2648_v24  ;;  %v2660_v48 = vld [vmem:[%s2869_s7 + $0xd0] sm:$0xff]   ;;  %v1430_v49 = vld [vmem:[%s2862_s29 + $0xa8] sm:$0xff]  ;;  %v2661_v51 = vld [vmem:[%s2869_s7 + $0x58] sm:$0xff]  }
  0x23   : > { %v2662_v52 = vld [vmem:[%s2869_s7 + $0xd8] sm:$0xff]   ;;  %v1431_v54 = vld [vmem:[%s2862_s29 + $0xb0] sm:$0xff]  ;;  %v2663_v55 = vld [vmem:[%s2869_s7 + $0x60] sm:$0xff]  }
  0x24   : > { %v1432_v53 = vld [vmem:[%s2862_s29 + $0xb8] sm:$0xff]  ;;  %v2664_v56 = vld [vmem:[%s2869_s7 + $0xe0] sm:$0xff]   ;;  %v1434_v57 = vld [vmem:[%s2862_s29 + $0xc8] sm:$0xff] }
  0x25   : > { %1520 = vperm.xlu1 %2636, %v1418_v25   ;;  %1515 = vperm.xlu0 %2635, %v1417_v26   ;;  %v1433_v58 = vld [vmem:[%s2862_s29 + $0xc0] sm:$0xff]  ;;  %v2665_v59 = vld [vmem:[%s2869_s7 + $0x68] sm:$0xff]   ;;  %v1436_v61 = vld [vmem:[%s2862_s29 + $0xd8] sm:$0xff] }
  0x26   : > { %v2666_v60 = vld [vmem:[%s2869_s7 + $0xe8] sm:$0xff]   ;;  %v1435_v62 = vld [vmem:[%s2862_s29 + $0xd0] sm:$0xff]  ;;  %v1437_v2 = vld [vmem:[%s2862_s29 + $0xe0] sm:$0xff] }
  0x27   : > { %2566 = vmatmul.mubr.msk.bf16.gmra.mrb[8].mxu0 %vm490_vm2, %v2649_v27  ;;  %v2667_v63 = vld [vmem:[%s2869_s7 + $0x70] sm:$0xff]   ;;  %v1438_v1 = vld [vmem:[%s2862_s29 + $0xe8] sm:$0xff]  ;;  %v2669_v3 = vld [vmem:[%s2869_s7 + $0x78] sm:$0xff]  }
  0x28   : > { %2598 = vmatmul.mubr.msk.bf16.gmra.mrb[8].mxu1 %vm490_vm2, %v2650_v28  ;;  %2569 = vmatprep.mubr.msk.bf16.mxu0 %vm490_vm2, %v2651_v31  ;;  %v2668_v0 = vld [vmem:[%s2869_s7 + $0xf0] sm:$0xff]   ;;  %v2670_v4 = vld [vmem:[%s2869_s7 + $0xf8] sm:$0xff]   ;;  %v1442_v7 = vld [vmem:[%s2862_s29 + $0x108] sm:$0xff] }
  0x29   : > { %1530 = vperm.xlu1 %2636, %v1420_v29   ;;  %1525 = vperm.xlu0 %2635, %v1419_v30   ;;  %v1440_v5 = vld [vmem:[%s2862_s29 + $0xf8] sm:$0xff]  ;;  %v1439_v6 = vld [vmem:[%s2862_s29 + $0xf0] sm:$0xff]  ;;  %v1441_v8 = vld [vmem:[%s2862_s29 + $0x100] sm:$0xff] }
  0x2a   : > { %2601 = vmatprep.mubr.msk.bf16.mxu1 %vm490_vm2, %v2652_v32  ;;  %v1444_v9 = vld [vmem:[%s2862_s29 + $0x118] sm:$0xff]  ;;  %v1443_v10 = vld [vmem:[%s2862_s29 + $0x110] sm:$0xff]  ;;  %v1446_v11 = vld [vmem:[%s2862_s29 + $0x128] sm:$0xff] }
  0x2b   : > { %v1445_v12 = vld [vmem:[%s2862_s29 + $0x120] sm:$0xff]  ;;  %v1448_v13 = vld [vmem:[%s2862_s29 + $0x138] sm:$0xff]  ;;  %v1447_v14 = vld [vmem:[%s2862_s29 + $0x130] sm:$0xff] }
  0x2c   : > { %v1450_v15 = vld [vmem:[%s2862_s29 + $0x148] sm:$0xff]  ;;  %v1449_v16 = vld [vmem:[%s2862_s29 + $0x140] sm:$0xff]  ;;  %v1452_v17 = vld [vmem:[%s2862_s29 + $0x158] sm:$0xff] }
  0x2d   : > { %1540 = vperm.xlu1 %2636, %v1422_v33   ;;  %1535 = vperm.xlu0 %2635, %v1421_v34   ;;  %v1451_v18 = vld [vmem:[%s2862_s29 + $0x150] sm:$0xff]  ;;  %v1454_v19 = vld [vmem:[%s2862_s29 + $0x168] sm:$0xff]  ;;  %v1453_v20 = vld [vmem:[%s2862_s29 + $0x160] sm:$0xff] }
  0x2e   : > { %v1456_v21 = vld [vmem:[%s2862_s29 + $0x178] sm:$0xff]  ;;  %v1455_v22 = vld [vmem:[%s2862_s29 + $0x170] sm:$0xff]  ;;  %v1458_v23 = vld [vmem:[%s2862_s29 + $0x188] sm:$0xff] }
  0x2f   : > { %2570 = vmatmul.mubr.msk.bf16.gmra.mrb[12].mxu0 %vm490_vm2, %v2653_v35  ;;  %v1457_v24 = vld [vmem:[%s2862_s29 + $0x180] sm:$0xff]  ;;  %v1460_v25 = vld [vmem:[%s2862_s29 + $0x198] sm:$0xff]  ;;  %v1459_v26 = vld [vmem:[%s2862_s29 + $0x190] sm:$0xff] }
  0x30   : > { %2602 = vmatmul.mubr.msk.bf16.gmra.mrb[12].mxu1 %vm490_vm2, %v2654_v36  ;;  %2573 = vmatprep.mubr.msk.bf16.mxu0 %vm490_vm2, %v2655_v39  ;;  %v1462_v27 = vld [vmem:[%s2862_s29 + $0x1a8] sm:$0xff]  ;;  %v1461_v28 = vld [vmem:[%s2862_s29 + $0x1a0] sm:$0xff]  ;;  %v1464_v29 = vld [vmem:[%s2862_s29 + $0x1b8] sm:$0xff] }
  0x31   : > { %1550 = vperm.xlu1 %2636, %v1424_v37   ;;  %1545 = vperm.xlu0 %2635, %v1423_v38   ;;  %v1463_v30 = vld [vmem:[%s2862_s29 + $0x1b0] sm:$0xff]  ;;  %v1466_v31 = vld [vmem:[%s2862_s29 + $0x1c8] sm:$0xff]  ;;  %v1465_v32 = vld [vmem:[%s2862_s29 + $0x1c0] sm:$0xff] }
  0x32   : > { %2605 = vmatprep.mubr.msk.bf16.mxu1 %vm490_vm2, %v2656_v40  ;;  %v1468_v33 = vld [vmem:[%s2862_s29 + $0x1d8] sm:$0xff]  ;;  %v1467_v34 = vld [vmem:[%s2862_s29 + $0x1d0] sm:$0xff]  ;;  %v1470_v35 = vld [vmem:[%s2862_s29 + $0x1e8] sm:$0xff] }
  0x33   : > { %v1469_v36 = vld [vmem:[%s2862_s29 + $0x1e0] sm:$0xff]  ;;  %v1472_v37 = vld [vmem:[%s2862_s29 + $0x1f8] sm:$0xff]  ;;  %v1471_v38 = vld [vmem:[%s2862_s29 + $0x1f0] sm:$0xff] }
  0x35   : > { %1560 = vperm.xlu1 %2636, %v1426_v41   ;;  %1555 = vperm.xlu0 %2635, %v1425_v42  }
  0x37   : > { %2574 = vmatmul.mubr.msk.bf16.gmra.mrb[16].mxu0 %vm490_vm2, %v2657_v43 }
  0x38   : > { %2606 = vmatmul.mubr.msk.bf16.gmra.mrb[16].mxu1 %vm490_vm2, %v2658_v44  ;;  %2577 = vmatprep.mubr.msk.bf16.mxu0 %vm490_vm2, %v2659_v47 }
  0x39   : > { %1570 = vperm.xlu1 %2636, %v1428_v45   ;;  %1565 = vperm.xlu0 %2635, %v1427_v46  }
  0x3a   : > { %2609 = vmatprep.mubr.msk.bf16.mxu1 %vm490_vm2, %v2660_v48 }
  0x3d   : > { %1580 = vperm.xlu1 %2636, %v1430_v49   ;;  %1575 = vperm.xlu0 %2635, %v1429_v50  }
  0x3f   : > { %2578 = vmatmul.mubr.msk.bf16.gmra.mrb[20].mxu0 %vm490_vm2, %v2661_v51 }
  0x40   : > { %2610 = vmatmul.mubr.msk.bf16.gmra.mrb[20].mxu1 %vm490_vm2, %v2662_v52  ;;  %2581 = vmatprep.mubr.msk.bf16.mxu0 %vm490_vm2, %v2663_v55 }
  0x41   : > { %1590 = vperm.xlu1 %2636, %v1432_v53   ;;  %1585 = vperm.xlu0 %2635, %v1431_v54  }
  0x42   : > { %2613 = vmatprep.mubr.msk.bf16.mxu1 %vm490_vm2, %v2664_v56 }
  0x45   : > { %1600 = vperm.xlu1 %2636, %v1434_v57   ;;  %1595 = vperm.xlu0 %2635, %v1433_v58  }
  0x47   : > { %2582 = vmatmul.mubr.msk.bf16.gmra.mrb[24].mxu0 %vm490_vm2, %v2665_v59 }
  0x48   : > { %2614 = vmatmul.mubr.msk.bf16.gmra.mrb[24].mxu1 %vm490_vm2, %v2666_v60  ;;  %2585 = vmatprep.mubr.msk.bf16.mxu0 %vm490_vm2, %v2667_v63 }
  0x49   : > { %1610 = vperm.xlu1 %2636, %v1436_v61   ;;  %1605 = vperm.xlu0 %2635, %v1435_v62  }
  0x4a   : > { %2617 = vmatprep.mubr.msk.bf16.mxu1 %vm490_vm2, %v2668_v0 }
  0x4d   : > { %1620 = vperm.xlu1 %2636, %v1438_v1   ;;  %1615 = vperm.xlu0 %2635, %v1437_v2  }
  0x4f   : > { %2586 = vmatmul.mubr.msk.bf16.gmra.mrb[28].mxu0 %vm490_vm2, %v2669_v3 }
  0x50   : > { %2618 = vmatmul.mubr.msk.bf16.gmra.mrb[28].mxu1 %vm490_vm2, %v2670_v4  ;;  %v3060_v4 = vld [vmem:[%s3980_s2] ss:$0 sm:$0xff] }
  0x51   : > { %1630 = vperm.xlu1 %2636, %v1440_v5   ;;  %1625 = vperm.xlu0 %2635, %v1439_v6  }
  0x55   : > { %1640 = vperm.xlu1 %2636, %v1442_v7   ;;  %1635 = vperm.xlu0 %2635, %v1441_v8   ;;  %v3067_v7 = vld [vmem:[%s3981_s3] ss:$0 sm:$0xff] }
  0x59   : > { %1650 = vperm.xlu1 %2636, %v1444_v9   ;;  %1645 = vperm.xlu0 %2635, %v1443_v10  }
  0x5d   : > { %1660 = vperm.xlu1 %2636, %v1446_v11   ;;  %1655 = vperm.xlu0 %2635, %v1445_v12  }
  0x61   : > { %1670 = vperm.xlu1 %2636, %v1448_v13   ;;  %1665 = vperm.xlu0 %2635, %v1447_v14  }
  0x65   : > { %1680 = vperm.xlu1 %2636, %v1450_v15   ;;  %1675 = vperm.xlu0 %2635, %v1449_v16  }
  0x69   : > { %1690 = vperm.xlu1 %2636, %v1452_v17   ;;  %1685 = vperm.xlu0 %2635, %v1451_v18  }
  0x6d   : > { %1700 = vperm.xlu1 %2636, %v1454_v19   ;;  %1695 = vperm.xlu0 %2635, %v1453_v20  }
  0x71   : > { %1710 = vperm.xlu1 %2636, %v1456_v21   ;;  %1705 = vperm.xlu0 %2635, %v1455_v22  }
  0x75   : > { %1720 = vperm.xlu1 %2636, %v1458_v23   ;;  %1715 = vperm.xlu0 %2635, %v1457_v24  }
  0x79   : > { %1730 = vperm.xlu1 %2636, %v1460_v25   ;;  %1725 = vperm.xlu0 %2635, %v1459_v26  }
  0x7d   : > { %1740 = vperm.xlu1 %2636, %v1462_v27   ;;  %1735 = vperm.xlu0 %2635, %v1461_v28  }
  0x81   : > { %1750 = vperm.xlu1 %2636, %v1464_v29   ;;  %1745 = vperm.xlu0 %2635, %v1463_v30  }
  0x85   : > { %1760 = vperm.xlu1 %2636, %v1466_v31   ;;  %1755 = vperm.xlu0 %2635, %v1465_v32  }
  0x89   : > { %1770 = vperm.xlu1 %2636, %v1468_v33   ;;  %1765 = vperm.xlu0 %2635, %v1467_v34  }
  0x8d   : > { %1780 = vperm.xlu1 %2636, %v1470_v35   ;;  %1775 = vperm.xlu0 %2635, %v1469_v36  }
  0x91   : > { %1790 = vperm.xlu1 %2636, %v1472_v37   ;;  %1785 = vperm.xlu0 %2635, %v1471_v38  }
  0x94   : > { %v2999_v39 = vpop.permute.xlu0 %1475  ;;  %v3001_v40 = vpop.permute.xlu1 %1485 }
  0x98   : > { %v3003_v41 = vpop.permute.xlu0 %1480  ;;  %v3005_v42 = vpop.permute.xlu1 %1490 }
  0x9c   : > { %v3007_v43 = vpop.permute.xlu0 %1495  ;;  %v3009_v44 = vpop.permute.xlu1 %1500 }
  0xa0   : > { %v3011_v45 = vpop.permute.xlu0 %1505  ;;  %v3013_v46 = vpop.permute.xlu1 %1510 }
  0xa4   : > { %v3015_v47 = vpop.permute.xlu0 %1515  ;;  %v3017_v48 = vpop.permute.xlu1 %1520 }
  0xa8   : > { %v3019_v49 = vpop.permute.xlu0 %1525  ;;  %v3021_v50 = vpop.permute.xlu1 %1530 }
  0xac   : > { %v3023_v51 = vpop.permute.xlu0 %1535  ;;  %v3025_v52 = vpop.permute.xlu1 %1540 }
  0xb0   : > { %v3027_v53 = vpop.permute.xlu0 %1545  ;;  %v3029_v54 = vpop.permute.xlu1 %1550 }
  0xb4   : > { %v3031_v55 = vpop.permute.xlu0 %1555  ;;  %v3033_v56 = vpop.permute.xlu1 %1560 }
  0xb5   : > { %3984 = vst [vmem:[#allocation2_spill] sm:$0xff] %v3033_v56 }
  0xb8   : > { %v3035_v57 = vpop.permute.xlu0 %1565  ;;  %v3037_v58 = vpop.permute.xlu1 %1570 }
  0xbc   : > { %v3039_v59 = vpop.permute.xlu0 %1575  ;;  %v3041_v60 = vpop.permute.xlu1 %1580 }
  0xbd   : > { %3985 = vst [vmem:[#allocation3_spill] sm:$0xff] %v3039_v59  ;;  %3986 = vst [vmem:[#allocation4_spill] sm:$0xff] %v3041_v60 }
  0xc0   : > { %v3043_v61 = vpop.permute.xlu0 %1585  ;;  %v3045_v62 = vpop.permute.xlu1 %1590 }
  0xc1   : > { %3987 = vst [vmem:[#allocation5_spill] sm:$0xff] %v3043_v61  ;;  %3988 = vst [vmem:[#allocation6_spill] sm:$0xff] %v3045_v62 }
  0xc4   : > { %v3047_v63 = vpop.permute.xlu0 %1595  ;;  %v3049_v0 = vpop.permute.xlu1 %1600 }
  0xc5   : > { %3989 = vst [vmem:[#allocation7_spill] sm:$0xff] %v3047_v63  ;;  %3990 = vst [vmem:[#allocation8_spill] sm:$0xff] %v3049_v0 }
  0xc8   : > { %v3051_v1 = vpop.permute.xlu0 %1605  ;;  %v3053_v2 = vpop.permute.xlu1 %1610 }
  0xc9   : > { %3991 = vst [vmem:[#allocation9_spill] sm:$0xff] %v3051_v1  ;;  %3992 = vst [vmem:[#allocation10_spill] sm:$0xff] %v3053_v2 }
  0xcc   : > { %v3055_v3 = vpop.permute.xlu0 %1615  ;;  %v3062_v5 = vpop.permute.xlu1 %1620 }
  0xcd   : > { %3993 = vst [vmem:[#allocation11_spill] sm:$0xff] %v3055_v3  ;;  %3994 = vst [vmem:[#allocation12_spill] sm:$0xff] %v3062_v5 }
  0xd0   : > { %v3069_v8 = vpop.permute.xlu0 %1625  ;;  %v3100_v36 = vpop.permute.xlu1 %1630 }
  0xd1   : > { %3995 = vst [vmem:[#allocation13_spill] sm:$0xff] %v3069_v8  ;;  %3996 = vst [vmem:[#allocation14_spill] sm:$0xff] %v3100_v36 }
  0xea   : > { %v2559_v6 = vpop.f32.mrb[0].mxu0 }
  0xeb   : > { %v892_v9 = vmul.f32 %v2559_v6, %v3060_v4  ;;  %v2591_v10 = vpop.f32.mrb[0].mxu1  ;;  %v628_v12 = vpop.f32.mrb[1].mxu0 }
  0xec   : > { %v924_v11 = vmul.f32 %v2591_v10, %v3060_v4  ;;  %v756_v13 = vpop.f32.mrb[1].mxu1  ;;  %v890_v15 = vmul.f32 %v3060_v4, %v628_v12  ;;  %v2560_v17 = vpop.f32.mrb[2].mxu0 }
  0xed   : > { %v3074_v14 = vadd.f32 %v3067_v7, %v892_v9  ;;  %v922_v16 = vmul.f32 %v3060_v4, %v756_v13  ;;  %v2592_v18 = vpop.f32.mrb[2].mxu1  ;;  %v893_v20 = vmul.f32 %v2560_v17, %v3060_v4  ;;  %v631_v22 = vpop.f32.mrb[3].mxu0 }
  0xee   : > { %v3079_v19 = vadd.f32 %v3067_v7, %v924_v11  ;;  %v925_v21 = vmul.f32 %v2592_v18, %v3060_v4  ;;  %v759_v23 = vpop.f32.mrb[3].mxu1  ;;  %v3085_v25 = vadd.f32 %v3067_v7, %v890_v15  ;;  %v3103_v9 = vpop.permute.xlu0 %1635  ;;  %v891_v12 = vmul.f32 %v3060_v4, %v631_v22 }
  0xef   : > { %v1091_v24 = vmin.f32 %v3074_v14, 0.0  ;;  %v3088_v26 = vadd.f32 %v3067_v7, %v922_v16  ;;  %v3092_v28 = vadd.f32 %v3067_v7, %v893_v20  ;;  %v923_v16 = vmul.f32 %v3060_v4, %v759_v23 }
  0xf0   : > { %v1123_v27 = vmin.f32 %v3079_v19, 0.0  ;;  %v3095_v29 = vadd.f32 %v3067_v7, %v925_v21  ;;  %v1089_v31 = vmin.f32 %v3085_v25, 0.0  ;;  %v3109_v21 = vadd.f32 %v3067_v7, %v891_v12 }
  0xf1   : > { %v1157_v30 = vmul.f32 1.442695, %v1091_v24  ;;  %v1121_v33 = vmin.f32 %v3088_v26, 0.0  ;;  %v1092_v34 = vmin.f32 %v3092_v28, 0.0  ;;  %v3116_v22 = vadd.f32 %v3067_v7, %v923_v16 }
  0xf2   : > { %v1221_v32 = vmul.f32 1.442695, %v1123_v27  ;;  %v2563_v35 = vpop.f32.mrb[4].mxu0  ;;  %v1153_v37 = vmul.f32 1.442695, %v1089_v31  ;;  %v1124_v38 = vmin.f32 %v3095_v29, 0.0  ;;  %v1646_v5 = vpop.permute.xlu0 %1645 }
  0xf3   : > { %2671 = vpow2.f32 %v1157_v30  ;;  %v2595_v6 = vpop.f32.mrb[4].mxu1  ;;  %v1217_v10 = vmul.f32 1.442695, %v1121_v33  ;;  %v1159_v11 = vmul.f32 1.442695, %v1092_v34  ;;  %v644_v13 = vpop.f32.mrb[5].mxu0  ;;  %v896_v17 = vmul.f32 %v2563_v35, %v3060_v4 }
  0xf4   : > { %2673 = vpow2.f32 %v1221_v32  ;;  %v1223_v15 = vmul.f32 1.442695, %v1124_v38  ;;  %v772_v18 = vpop.f32.mrb[5].mxu1  ;;  %v2564_v20 = vpop.f32.mrb[6].mxu0  ;;  %v928_v24 = vmul.f32 %v2595_v6, %v3060_v4  ;;  %v894_v27 = vmul.f32 %v3060_v4, %v644_v13 }
  0xf5   : > { %2675 = vpow2.f32 %v1153_v37  ;;  %v2596_v30 = vpop.f32.mrb[6].mxu1  ;;  %v3113_v31 = vpop.f32.mrb[7].mxu0  ;;  %v3119_v23 = vadd.f32 %v3067_v7, %v896_v17  ;;  %v926_v32 = vmul.f32 %v3060_v4, %v772_v18  ;;  %v1090_v34 = vmin.f32 %v3109_v21, 0.0 }
  0xf6   : > { %2677 = vpow2.f32 %v1217_v10  ;;  %v3122_v33 = vpop.f32.mrb[7].mxu1  ;;  %v3126_v35 = vadd.f32 %v3067_v7, %v928_v24  ;;  %vm1027_vm3 = vcmp.gt.f32.partialorder %v3074_v14, 0.0  ;;  %vm1059_vm4 = vcmp.gt.f32.partialorder %v3079_v19, 0.0  ;;  %v3139_v13 = vpop.permute.xlu1 %1640 }
  0xf7   : > { %2679 = vpow2.f32 %v1159_v11  ;;  %v1122_v37 = vmin.f32 %v3116_v22, 0.0  ;;  %v1095_v38 = vmin.f32 %v3119_v23, 0.0  ;;  %vm1025_vm6 = vcmp.gt.f32.partialorder %v3085_v25, 0.0 }
  0xf8   : > { %2681 = vpow2.f32 %v1223_v15  ;;  %v1155_v6 = vmul.f32 1.442695, %v1090_v34  ;;  %v1127_v10 = vmin.f32 %v3126_v35, 0.0  ;;  %v3135_v11 = vadd.f32 %v3067_v7, %v894_v27 }
  0xf9   : > { %v1219_v15 = vmul.f32 1.442695, %v1122_v37  ;;  %v1165_v16 = vmul.f32 1.442695, %v1095_v38  ;;  %v3142_v17 = vadd.f32 %v3067_v7, %v926_v32  ;;  %v897_v18 = vmul.f32 %v2564_v20, %v3060_v4 }
  0xfa   : > { %v3137_v12 = vpop.f32.mrb[8].mxu0  ;;  %vm1057_vm7 = vcmp.gt.f32.partialorder %v3088_v26, 0.0  ;;  %2683 = vpow2.f32 %v1155_v6  ;;  %v1229_v34 = vmul.f32 1.442695, %v1127_v10  ;;  %v1093_v27 = vmin.f32 %v3135_v11, 0.0 }
  0xfb   : > { %v3145_v24 = vpop.f32.mrb[8].mxu1  ;;  %v3149_v36 = vpop.f32.mrb[9].mxu0  ;;  %vm1028_vm8 = vcmp.gt.f32.partialorder %v3092_v28, 0.0  ;;  %2685 = vpow2.f32 %v1219_v15  ;;  %v1125_v32 = vmin.f32 %v3142_v17, 0.0  ;;  %v3154_v37 = vadd.f32 %v3067_v7, %v897_v18 }
  0xfc   : > { %v3156_v20 = vpop.f32.mrb[9].mxu1  ;;  %v3158_v38 = vpop.f32.mrb[10].mxu0  ;;  %vm1060_vm9 = vcmp.gt.f32.partialorder %v3095_v29, 0.0  ;;  %2687 = vpow2.f32 %v1165_v16  ;;  %v1161_v10 = vmul.f32 1.442695, %v1093_v27  ;;  %v929_v18 = vmul.f32 %v2596_v30, %v3060_v4 }
  0xfd   : > { %v2672_v3 = vpop.eup %2671  ;;  %v3161_v0 = vpop.f32.mrb[10].mxu1  ;;  %2689 = vpow2.f32 %v1229_v34  ;;  %v1225_v1 = vmul.f32 1.442695, %v1125_v32  ;;  %vm1026_vm10 = vcmp.gt.f32.partialorder %v3109_v21, 0.0  ;;  %v1096_v27 = vmin.f32 %v3154_v37, 0.0 }
  0xfe   : > { %v2674_v8 = vpop.eup %2673  ;;  %v2327_v6 = vadd.f32 -1.0, %v2672_v3  ;;  %v3163_v2 = vpop.f32.mrb[11].mxu0  ;;  %2691 = vpow2.f32 %v1161_v10  ;;  %vm1058_vm11 = vcmp.gt.f32.partialorder %v3116_v22, 0.0  ;;  %vm1031_vm12 = vcmp.gt.f32.partialorder %v3119_v23, 0.0 }
  0xff   : > { %v2676_v15 = vpop.eup %2675  ;;  %v2359_v63 = vadd.f32 -1.0, %v2674_v8  ;;  %v3166_v60 = vpop.f32.mrb[11].mxu1  ;;  %2693 = vpow2.f32 %v1225_v1  ;;  %vm1063_vm13 = vcmp.gt.f32.partialorder %v3126_v35, 0.0  ;;  %vm1029_vm14 = vcmp.gt.f32.partialorder %v3135_v11, 0.0 }
 0x100   : > { %v2678_v62 = vpop.eup %2677  ;;  %v1347_v3 = vsel %vm1027_vm3, %v3074_v14, %v2327_v6  ;;  %v2325_v16 = vadd.f32 -1.0, %v2676_v15  ;;  %v1651_v1 = vpop.permute.xlu1 %1650  ;;  %vm1061_vm15 = vcmp.gt.f32.partialorder %v3142_v17, 0.0  ;;  %vm1032_vm0 = vcmp.gt.f32.partialorder %v3154_v37, 0.0 }
 0x101   : > { %v2680_v59 = vpop.eup %2679  ;;  %v1795_v8 = vmul.f32 %v3001_v40, %v1347_v3  ;;  %v1379_v30 = vsel %vm1059_vm4, %v3079_v19, %v2359_v63  ;;  %v2357_v34 = vadd.f32 -1.0, %v2678_v62  ;;  %v1167_v62 = vmul.f32 1.442695, %v1096_v27 }
 0x102   : > { %v2682_v32 = vpop.eup %2681  ;;  %v1827_v14 = vmul.f32 %v1646_v5, %v1379_v30  ;;  %v1345_v40 = vsel %vm1025_vm6, %v3085_v25, %v2325_v16  ;;  %v2328_v6 = vadd.f32 -1.0, %v2680_v59  ;;  %v3189_v63 = vpop.f32.mrb[12].mxu0 }
 0x103   : > { %v2457_v19 = vpack.c.bf16 %v1795_v8, %v1795_v8  ;;  %v1793_v10 = vmul.f32 %v2999_v39, %v1345_v40  ;;  %v1377_v15 = vsel %vm1057_vm7, %v3088_v26, %v2357_v34  ;;  %v2360_v5 = vadd.f32 -1.0, %v2682_v32  ;;  %v3196_v25 = vpop.f32.mrb[12].mxu1  ;;  %v3198_v59 = vpop.permute.xlu0 %1655 }
 0x104   : > { %v2489_v3 = vpack.c.bf16 %v1827_v14, %v1827_v14  ;;  %v1825_v16 = vmul.f32 %v3103_v9, %v1377_v15  ;;  %v1348_v27 = vsel %vm1028_vm8, %v3092_v28, %v2328_v6  ;;  %2695 = vpow2.f32 %v1167_v62  ;;  %v3204_v39 = vpop.f32.mrb[13].mxu0  ;;  %v3215_v9 = vpop.f32.mrb[13].mxu1 }
 0x105   : > { %2116 = vst.msk [vmem:[%s3183_s14 + $0x8] sm:$0xf] %vm2113_vm5, %v2457_v19  ;;  %v2455_v26 = vpack.c.bf16 %v1793_v10, %v1793_v10  ;;  %v1796_v8 = vmul.f32 %v3005_v42, %v1348_v27  ;;  %v1380_v30 = vsel %vm1060_vm9, %v3095_v29, %v2360_v5  ;;  %v3213_v34 = vadd.f32 %v3067_v7, %v929_v18  ;;  %v3217_v32 = vpop.f32.mrb[14].mxu0  ;;  %v2684_v28 = vpop.eup %2683 }
 0x106   : > { %2148 = vst.msk [vmem:[%s3183_s14 + $0x88] sm:$0xf] %vm2113_vm5, %v2489_v3  ;;  %v2487_v14 = vpack.c.bf16 %v1825_v16, %v1825_v16  ;;  %v1828_v40 = vmul.f32 %v1651_v1, %v1380_v30  ;;  %v895_v42 = vmul.f32 %v3060_v4, %v3113_v31  ;;  %v927_v6 = vmul.f32 %v3060_v4, %v3122_v33  ;;  %v3225_v29 = vpop.f32.mrb[14].mxu1  ;;  %v3227_v18 = vpop.f32.mrb[15].mxu0 }
 0x107   : > { %v2686_v62 = vpop.eup %2685  ;;  %2114 = vst.msk [vmem:[%s3183_s14] sm:$0xf] %vm2113_vm5, %v2455_v26  ;;  %v2458_v19 = vpack.c.bf16 %v1796_v8, %v1796_v8  ;;  %v2326_v10 = vadd.f32 -1.0, %v2684_v28  ;;  %v1128_v1 = vmin.f32 %v3213_v34, 0.0  ;;  %v3233_v15 = vpop.f32.mrb[15].mxu1  ;;  %vm1064_vm1 = vcmp.gt.f32.partialorder %v3213_v34, 0.0 }
 0x108   : > { %v2688_v31 = vpop.eup %2687  ;;  %2146 = vst.msk [vmem:[%s3183_s14 + $0x80] sm:$0xf] %vm2113_vm5, %v2487_v14  ;;  %v2490_v33 = vpack.c.bf16 %v1828_v40, %v1828_v40  ;;  %v2358_v5 = vadd.f32 -1.0, %v2686_v62  ;;  %v3239_v3 = vadd.f32 %v3067_v7, %v895_v42  ;;  %v3247_v30 = vadd.f32 %v3067_v7, %v927_v6 }
 0x109   : > { %v2690_v16 = vpop.eup %2689  ;;  %2117 = vst.msk [vmem:[%s3183_s14 + $0xc] sm:$0xf] %vm2113_vm5, %v2458_v19  ;;  %v1346_v27 = vsel %vm1026_vm10, %v3109_v21, %v2326_v10  ;;  %v2331_v26 = vadd.f32 -1.0, %v2688_v31  ;;  %v1231_v8 = vmul.f32 1.442695, %v1128_v1  ;;  %v900_v62 = vmul.f32 %v3137_v12, %v3060_v4  ;;  %v1666_v31 = vpop.permute.xlu0 %1665 }
 0x10a   : > { %v2692_v28 = vpop.eup %2691  ;;  %2149 = vst.msk [vmem:[%s3183_s14 + $0x8c] sm:$0xf] %vm2113_vm5, %v2490_v33  ;;  %v1794_v14 = vmul.f32 %v3003_v41, %v1346_v27  ;;  %v1378_v40 = vsel %vm1058_vm11, %v3116_v22, %v2358_v5  ;;  %v2363_v42 = vadd.f32 -1.0, %v2690_v16  ;;  %v3257_v19 = vpop.f32.mrb[16].mxu0  ;;  %vm1030_vm2 = vcmp.gt.f32.partialorder %v3239_v3, 0.0 }
 0x10b   : > { %v2694_v21 = vpop.eup %2693  ;;  %v1826_v10 = vmul.f32 %v3139_v13, %v1378_v40  ;;  %v1351_v6 = vsel %vm1031_vm12, %v3119_v23, %v2331_v26  ;;  %v2329_v1 = vadd.f32 -1.0, %v2692_v28  ;;  %2697 = vpow2.f32 %v1231_v8  ;;  %v3263_v41 = vpop.f32.mrb[16].mxu1 }
 0x10c   : > { %v2456_v22 = vpack.c.bf16 %v1794_v14, %v1794_v14  ;;  %v1799_v33 = vmul.f32 %v3011_v45, %v1351_v6  ;;  %v1383_v12 = vsel %vm1063_vm13, %v3126_v35, %v2363_v42  ;;  %v2361_v5 = vadd.f32 -1.0, %v2694_v21  ;;  %v3269_v13 = vpop.f32.mrb[17].mxu0  ;;  %v3275_v8 = vpop.f32.mrb[17].mxu1 }
 0x10d   : > { %v2488_v16 = vpack.c.bf16 %v1826_v10, %v1826_v10  ;;  %v1831_v27 = vmul.f32 %v1666_v31, %v1383_v12  ;;  %v1349_v23 = vsel %vm1029_vm14, %v3135_v11, %v2329_v1  ;;  %v1094_v26 = vmin.f32 %v3239_v3, 0.0  ;;  %v3277_v45 = vpop.f32.mrb[18].mxu0  ;;  %v3286_v11 = vpop.f32.mrb[18].mxu1 }
 0x10e   : > { %v2696_v28 = vpop.eup %2695  ;;  %2115 = vst.msk [vmem:[%s3183_s14 + $0x4] sm:$0xf] %vm2113_vm5, %v2456_v22  ;;  %v2461_v35 = vpack.c.bf16 %v1799_v33, %v1799_v33  ;;  %v1797_v14 = vmul.f32 %v3007_v43, %v1349_v23  ;;  %v1381_v40 = vsel %vm1061_vm15, %v3142_v17, %v2361_v5  ;;  %v3288_v42 = vpop.f32.mrb[19].mxu0  ;;  %v1126_v31 = vmin.f32 %v3247_v30, 0.0 }
 0x10f   : > { %2147 = vst.msk [vmem:[%s3183_s14 + $0x84] sm:$0xf] %vm2113_vm5, %v2488_v16  ;;  %v2493_v21 = vpack.c.bf16 %v1831_v27, %v1831_v27  ;;  %v1829_v10 = vmul.f32 %v3198_v59, %v1381_v40  ;;  %v2332_v6 = vadd.f32 -1.0, %v2696_v28  ;;  %v1163_v1 = vmul.f32 1.442695, %v1094_v26  ;;  %v3293_v43 = vpop.f32.mrb[19].mxu1  ;;  %v3310_v16 = vpop.permute.xlu1 %1660 }
 0x110   : > { %2120 = vst.msk [vmem:[%s3183_s14 + $0x18] sm:$0xf] %vm2113_vm5, %v2461_v35  ;;  %v2459_v17 = vpack.c.bf16 %v1797_v14, %v1797_v14  ;;  %v3299_v22 = vadd.f32 %v3067_v7, %v900_v62  ;;  %v932_v33 = vmul.f32 %v3145_v24, %v3060_v4  ;;  %v898_v5 = vmul.f32 %v3060_v4, %v3149_v36 }
 0x111   : > { %2152 = vst.msk [vmem:[%s3183_s14 + $0x98] sm:$0xf] %vm2113_vm5, %v2493_v21  ;;  %v2491_v12 = vpack.c.bf16 %v1829_v10, %v1829_v10  ;;  %v1352_v59 = vsel %vm1032_vm0, %v3154_v37, %v2332_v6  ;;  %2699 = vpow2.f32 %v1163_v1  ;;  %v1227_v27 = vmul.f32 1.442695, %v1126_v31 }
 0x112   : > { %2118 = vst.msk [vmem:[%s3183_s14 + $0x10] sm:$0xf] %vm2113_vm5, %v2459_v17  ;;  %v1800_v62 = vmul.f32 %v3013_v46, %v1352_v59  ;;  %v1099_v24 = vmin.f32 %v3299_v22, 0.0  ;;  %v3316_v23 = vpop.f32.mrb[20].mxu0  ;;  %v3321_v26 = vadd.f32 %v3067_v7, %v932_v33  ;;  %v3324_v37 = vadd.f32 %v3067_v7, %v898_v5 }
 0x113   : > { %2150 = vst.msk [vmem:[%s3183_s14 + $0x90] sm:$0xf] %vm2113_vm5, %v2491_v12  ;;  %v930_v36 = vmul.f32 %v3060_v4, %v3156_v20  ;;  %v901_v46 = vmul.f32 %v3158_v38, %v3060_v4  ;;  %v3330_v28 = vpop.f32.mrb[20].mxu1  ;;  %v3332_v35 = vpop.f32.mrb[21].mxu0  ;;  %2701 = vpow2.f32 %v1227_v27  ;;  %v933_v21 = vmul.f32 %v3161_v0, %v3060_v4 }
 0x114   : > { %v2462_v14 = vpack.c.bf16 %v1800_v62, %v1800_v62  ;;  %v1173_v40 = vmul.f32 1.442695, %v1099_v24  ;;  %v3336_v10 = vpop.f32.mrb[21].mxu1  ;;  %v3338_v6 = vpop.f32.mrb[22].mxu0  ;;  %v1131_v20 = vmin.f32 %v3321_v26, 0.0  ;;  %v1097_v38 = vmin.f32 %v3324_v37, 0.0 }
 0x115   : > { %v2698_v1 = vpop.eup %2697  ;;  %v3343_v17 = vpop.f32.mrb[22].mxu1  ;;  %v3350_v0 = vadd.f32 %v3067_v7, %v930_v36  ;;  %v3353_v12 = vadd.f32 %v3067_v7, %v901_v46  ;;  %v3358_v27 = vadd.f32 %v3067_v7, %v933_v21  ;;  %v899_v24 = vmul.f32 %v3060_v4, %v3163_v2 }
 0x116   : > { %v3345_v31 = vpop.f32.mrb[23].mxu0  ;;  %2121 = vst.msk [vmem:[%s3183_s14 + $0x1c] sm:$0xf] %vm2113_vm5, %v2462_v14  ;;  %v2364_v33 = vadd.f32 -1.0, %v2698_v1  ;;  %2703 = vpow2.f32 %v1173_v40  ;;  %v3355_v59 = vpop.f32.mrb[23].mxu1  ;;  %vm1062_vm3 = vcmp.gt.f32.partialorder %v3247_v30, 0.0 }
 0x117   : > { %v1237_v5 = vmul.f32 1.442695, %v1131_v20  ;;  %v1169_v62 = vmul.f32 1.442695, %v1097_v38  ;;  %v1671_v61 = vpop.permute.xlu1 %1670  ;;  %v1129_v36 = vmin.f32 %v3350_v0, 0.0  ;;  %v1100_v40 = vmin.f32 %v3353_v12, 0.0 }
 0x118   : > { %v1384_v14 = vsel %vm1064_vm1, %v3213_v34, %v2364_v33  ;;  %v1132_v1 = vmin.f32 %v3358_v27, 0.0  ;;  %v3371_v2 = vadd.f32 %v3067_v7, %v899_v24  ;;  %vm1035_vm4 = vcmp.gt.f32.partialorder %v3299_v22, 0.0 }
 0x119   : > { %v1832_v46 = vmul.f32 %v1671_v61, %v1384_v14  ;;  %2705 = vpow2.f32 %v1237_v5  ;;  %v1233_v21 = vmul.f32 1.442695, %v1129_v36  ;;  %v1175_v33 = vmul.f32 1.442695, %v1100_v40 }
 0x11a   : > { %2707 = vpow2.f32 %v1169_v62  ;;  %v3373_v20 = vpop.f32.mrb[24].mxu0  ;;  %v931_v61 = vmul.f32 %v3060_v4, %v3166_v60  ;;  %v904_v5 = vmul.f32 %v3189_v63, %v3060_v4  ;;  %v1239_v24 = vmul.f32 1.442695, %v1132_v1 }
 0x11b   : > { %3997 = vst [vmem:[#allocation15_spill] sm:$0xff] %v3373_v20  ;;  %v2700_v34 = vpop.eup %2699  ;;  %v2494_v38 = vpack.c.bf16 %v1832_v46, %v1832_v46  ;;  %v3379_v14 = vpop.f32.mrb[24].mxu1  ;;  %2709 = vpow2.f32 %v1233_v21  ;;  %vm1067_vm6 = vcmp.gt.f32.partialorder %v3321_v26, 0.0  ;;  %v1098_v60 = vmin.f32 %v3371_v2, 0.0 }
 0x11c   : > { %v3381_v62 = vpop.f32.mrb[25].mxu0  ;;  %v2330_v36 = vadd.f32 -1.0, %v2700_v34  ;;  %v3384_v56 = vpop.f32.mrb[25].mxu1  ;;  %2711 = vpow2.f32 %v1175_v33  ;;  %v3393_v63 = vadd.f32 %v3067_v7, %v931_v61  ;;  %v3396_v46 = vadd.f32 %v3067_v7, %v904_v5 }
 0x11d   : > { %3998 = vst [vmem:[#allocation16_spill] sm:$0xff] %v3381_v62  ;;  %3999 = vst [vmem:[#allocation17_spill] sm:$0xff] %v3384_v56  ;;  %v3386_v20 = vpop.f32.mrb[26].mxu0  ;;  %v3398_v40 = vpop.f32.mrb[26].mxu1  ;;  %vm1033_vm7 = vcmp.gt.f32.partialorder %v3324_v37, 0.0  ;;  %2713 = vpow2.f32 %v1239_v24  ;;  %vm1065_vm8 = vcmp.gt.f32.partialorder %v3350_v0, 0.0 }
 0x11e   : > { %4000 = vst [vmem:[#allocation18_spill] sm:$0xff] %v3386_v20  ;;  %2153 = vst.msk [vmem:[%s3183_s14 + $0x9c] sm:$0xf] %vm2113_vm5, %v2494_v38  ;;  %v3400_v21 = vpop.f32.mrb[27].mxu0  ;;  %v2702_v1 = vpop.eup %2701  ;;  %v1350_v34 = vsel %vm1030_vm2, %v3239_v3, %v2330_v36  ;;  %v936_v38 = vmul.f32 %v3196_v25, %v3060_v4  ;;  %v1171_v20 = vmul.f32 1.442695, %v1098_v60 }
 0x11f   : > { %4001 = vst [vmem:[#allocation19_spill] sm:$0xff] %v3398_v40  ;;  %4002 = vst [vmem:[#allocation20_spill] sm:$0xff] %v3400_v21  ;;  %v3408_v33 = vpop.f32.mrb[27].mxu1  ;;  %v1798_v61 = vmul.f32 %v3009_v44, %v1350_v34  ;;  %v2362_v5 = vadd.f32 -1.0, %v2702_v1  ;;  %v902_v21 = vmul.f32 %v3060_v4, %v3204_v39  ;;  %v1676_v56 = vpop.permute.xlu0 %1675  ;;  %v1130_v3 = vmin.f32 %v3393_v63, 0.0 }
 0x120   : > { %4003 = vst [vmem:[#allocation21_spill] sm:$0xff] %v3408_v33  ;;  %v2704_v40 = vpop.eup %2703  ;;  %v1103_v36 = vmin.f32 %v3396_v46, 0.0  ;;  %v3417_v25 = vadd.f32 %v3067_v7, %v936_v38  ;;  %vm1036_vm9 = vcmp.gt.f32.partialorder %v3353_v12, 0.0  ;;  %2715 = vpow2.f32 %v1171_v20  ;;  %v3423_v39 = vpop.permute.xlu1 %1680 }
 0x121   : > { %v2460_v24 = vpack.c.bf16 %v1798_v61, %v1798_v61  ;;  %v1382_v44 = vsel %vm1062_vm3, %v3247_v30, %v2362_v5  ;;  %v2335_v60 = vadd.f32 -1.0, %v2704_v40  ;;  %vm1068_vm10 = vcmp.gt.f32.partialorder %v3358_v27, 0.0 }
 0x122   : > { %v1830_v1 = vmul.f32 %v3310_v16, %v1382_v44  ;;  %v1235_v34 = vmul.f32 1.442695, %v1130_v3  ;;  %v1181_v33 = vmul.f32 1.442695, %v1103_v36  ;;  %v3427_v62 = vpop.f32.mrb[28].mxu0  ;;  %v1135_v40 = vmin.f32 %v3417_v25, 0.0 }
 0x123   : > { %4004 = vst [vmem:[#allocation22_spill] sm:$0xff] %v3427_v62  ;;  %v2706_v38 = vpop.eup %2705  ;;  %2119 = vst.msk [vmem:[%s3183_s14 + $0x14] sm:$0xf] %vm2113_vm5, %v2460_v24  ;;  %v1355_v30 = vsel %vm1035_vm4, %v3299_v22, %v2335_v60  ;;  %v3436_v20 = vadd.f32 %v3067_v7, %v902_v21  ;;  %v934_v16 = vmul.f32 %v3060_v4, %v3215_v9  ;;  %v3440_v61 = vpop.f32.mrb[28].mxu1  ;;  %vm1034_vm11 = vcmp.gt.f32.partialorder %v3371_v2, 0.0 }
 0x124   : > { %4005 = vst [vmem:[#allocation23_spill] sm:$0xff] %v3440_v61  ;;  %v3442_v5 = vpop.f32.mrb[29].mxu0  ;;  %v2708_v3 = vpop.eup %2707  ;;  %v2492_v36 = vpack.c.bf16 %v1830_v1, %v1830_v1  ;;  %v1803_v24 = vmul.f32 %v3019_v49, %v1355_v30  ;;  %v2367_v44 = vadd.f32 -1.0, %v2706_v38  ;;  %2717 = vpow2.f32 %v1235_v34 }
 0x125   : > { %4006 = vst [vmem:[#allocation24_spill] sm:$0xff] %v3442_v5  ;;  %v3445_v22 = vpop.f32.mrb[29].mxu1  ;;  %v3447_v60 = vpop.f32.mrb[30].mxu0  ;;  %v2333_v21 = vadd.f32 -1.0, %v2708_v3  ;;  %2719 = vpow2.f32 %v1181_v33  ;;  %v1245_v9 = vmul.f32 1.442695, %v1135_v40  ;;  %v3461_v30 = vadd.f32 %v3067_v7, %v934_v16 }
 0x126   : > { %v3450_v62 = vpop.f32.mrb[30].mxu1  ;;  %v3452_v5 = vpop.f32.mrb[31].mxu0  ;;  %2151 = vst.msk [vmem:[%s3183_s14 + $0x94] sm:$0xf] %vm2113_vm5, %v2492_v36  ;;  %v2465_v49 = vpack.c.bf16 %v1803_v24, %v1803_v24  ;;  %v1387_v34 = vsel %vm1067_vm6, %v3321_v26, %v2367_v44  ;;  %v1101_v38 = vmin.f32 %v3436_v20, 0.0  ;;  %vm1066_vm12 = vcmp.gt.f32.partialorder %v3393_v63, 0.0 }
 0x127   : > { %4007 = vst [vmem:[#allocation25_spill] sm:$0xff] %v3450_v62  ;;  %4008 = vst [vmem:[#allocation26_spill] sm:$0xff] %v3452_v5  ;;  %v2710_v61 = vpop.eup %2709  ;;  %v1686_v1 = vpop.permute.xlu0 %1685  ;;  %v1353_v5 = vsel %vm1033_vm7, %v3324_v37, %v2333_v21  ;;  %2721 = vpow2.f32 %v1245_v9  ;;  %v1133_v37 = vmin.f32 %v3461_v30, 0.0  ;;  %vm1039_vm13 = vcmp.gt.f32.partialorder %v3396_v46, 0.0 }
 0x128   : > { %v3463_v33 = vpop.f32.mrb[31].mxu1  ;;  %v2712_v40 = vpop.eup %2711  ;;  %v1835_v3 = vmul.f32 %v1686_v1, %v1387_v34  ;;  %v2365_v62 = vadd.f32 -1.0, %v2710_v61  ;;  %2124 = vst.msk [vmem:[%s3183_s14 + $0x28] sm:$0xf] %vm2113_vm5, %v2465_v49  ;;  %v1801_v26 = vmul.f32 %v3015_v47, %v1353_v5  ;;  %v1177_v16 = vmul.f32 1.442695, %v1101_v38 }
 0x129   : > { %v2714_v36 = vpop.eup %2713  ;;  %v2336_v24 = vadd.f32 -1.0, %v2712_v40  ;;  %v1691_v5 = vpop.permute.xlu1 %1690  ;;  %vm1071_vm14 = vcmp.gt.f32.partialorder %v3417_v25, 0.0  ;;  %vm1037_vm15 = vcmp.gt.f32.partialorder %v3436_v20, 0.0  ;;  %vm1069_vm0 = vcmp.gt.f32.partialorder %v3461_v30, 0.0 }
 0x12a   : > { %v2497_v44 = vpack.c.bf16 %v1835_v3, %v1835_v3  ;;  %v1385_v1 = vsel %vm1065_vm8, %v3350_v0, %v2365_v62  ;;  %v2368_v34 = vadd.f32 -1.0, %v2714_v36  ;;  %v2463_v61 = vpack.c.bf16 %v1801_v26, %v1801_v26  ;;  %v2716_v47 = vpop.eup %2715 }
 0x12b   : > { %v1833_v21 = vmul.f32 %v1676_v56, %v1385_v1  ;;  %v1356_v9 = vsel %vm1036_vm9, %v3353_v12, %v2336_v24  ;;  %2723 = vpow2.f32 %v1177_v16  ;;  %v1241_v62 = vmul.f32 1.442695, %v1133_v37 }
 0x12c   : > { %2156 = vst.msk [vmem:[%s3183_s14 + $0xa8] sm:$0xf] %vm2113_vm5, %v2497_v44  ;;  %v1804_v49 = vmul.f32 %v3021_v50, %v1356_v9  ;;  %v1388_v0 = vsel %vm1068_vm10, %v3358_v27, %v2368_v34  ;;  %v905_v56 = vmul.f32 %v3217_v32, %v3060_v4  ;;  %2122 = vst.msk [vmem:[%s3183_s14 + $0x20] sm:$0xf] %vm2113_vm5, %v2463_v61  ;;  %v2334_v40 = vadd.f32 -1.0, %v2716_v47  ;;  %v3496_v32 = vpop.permute.xlu0 %1695 }
 0x12d   : > { %v2495_v38 = vpack.c.bf16 %v1833_v21, %v1833_v21  ;;  %v1836_v12 = vmul.f32 %v1691_v5, %v1388_v0  ;;  %v937_v3 = vmul.f32 %v3225_v29, %v3060_v4  ;;  %2725 = vpow2.f32 %v1241_v62 }
 0x12e   : > { %v2466_v36 = vpack.c.bf16 %v1804_v49, %v1804_v49  ;;  %v3492_v50 = vadd.f32 %v3067_v7, %v905_v56  ;;  %v903_v27 = vmul.f32 %v3060_v4, %v3227_v18  ;;  %v2718_v26 = vpop.eup %2717  ;;  %v1354_v16 = vsel %vm1034_vm11, %v3371_v2, %v2334_v40 }
 0x12f   : > { %2154 = vst.msk [vmem:[%s3183_s14 + $0xa0] sm:$0xf] %vm2113_vm5, %v2495_v38  ;;  %v2498_v24 = vpack.c.bf16 %v1836_v12, %v1836_v12  ;;  %v3504_v29 = vadd.f32 %v3067_v7, %v937_v3  ;;  %v935_v44 = vmul.f32 %v3060_v4, %v3233_v15  ;;  %v2720_v1 = vpop.eup %2719  ;;  %v1802_v18 = vmul.f32 %v3017_v48, %v1354_v16 }
 0x130   : > { %2125 = vst.msk [vmem:[%s3183_s14 + $0x2c] sm:$0xf] %vm2113_vm5, %v2466_v36  ;;  %v2366_v34 = vadd.f32 -1.0, %v2718_v26  ;;  %v1104_v37 = vmin.f32 %v3492_v50, 0.0  ;;  %v2339_v2 = vadd.f32 -1.0, %v2720_v1  ;;  %v3518_v15 = vadd.f32 %v3067_v7, %v903_v27  ;;  %v1706_v40 = vpop.permute.xlu0 %1705 }
 0x131   : > { %2157 = vst.msk [vmem:[%s3183_s14 + $0xac] sm:$0xf] %vm2113_vm5, %v2498_v24  ;;  %v1136_v61 = vmin.f32 %v3504_v29, 0.0  ;;  %v2722_v21 = vpop.eup %2721  ;;  %v2464_v9 = vpack.c.bf16 %v1802_v18, %v1802_v18  ;;  %v3524_v5 = vadd.f32 %v3067_v7, %v935_v44  ;;  %v908_v24 = vmul.f32 %v3257_v19, %v3060_v4 }
 0x132   : > { %v1386_v48 = vsel %vm1066_vm12, %v3393_v63, %v2366_v34  ;;  %v1183_v47 = vmul.f32 1.442695, %v1104_v37  ;;  %v1359_v0 = vsel %vm1039_vm13, %v3396_v46, %v2339_v2  ;;  %v2371_v62 = vadd.f32 -1.0, %v2722_v21 }
 0x133   : > { %v1834_v49 = vmul.f32 %v3423_v39, %v1386_v48  ;;  %v1247_v56 = vmul.f32 1.442695, %v1136_v61  ;;  %2123 = vst.msk [vmem:[%s3183_s14 + $0x24] sm:$0xf] %vm2113_vm5, %v2464_v9  ;;  %v1807_v38 = vmul.f32 %v3027_v53, %v1359_v0  ;;  %v1102_v63 = vmin.f32 %v3518_v15, 0.0  ;;  %v3573_v9 = vpop.permute.xlu1 %1700 }
 0x134   : > { %2727 = vpow2.f32 %v1183_v47  ;;  %v1391_v46 = vsel %vm1071_vm14, %v3417_v25, %v2371_v62  ;;  %v1134_v26 = vmin.f32 %v3524_v5, 0.0  ;;  %v940_v16 = vmul.f32 %v3263_v41, %v3060_v4 }
 0x135   : > { %v2724_v12 = vpop.eup %2723  ;;  %v2496_v3 = vpack.c.bf16 %v1834_v49, %v1834_v49  ;;  %2729 = vpow2.f32 %v1247_v56  ;;  %v2469_v39 = vpack.c.bf16 %v1807_v38, %v1807_v38  ;;  %v1839_v36 = vmul.f32 %v1706_v40, %v1391_v46 }
 0x136   : > { %v2337_v27 = vadd.f32 -1.0, %v2724_v12  ;;  %v1179_v53 = vmul.f32 1.442695, %v1102_v63  ;;  %v906_v25 = vmul.f32 %v3060_v4, %v3269_v13  ;;  %v938_v34 = vmul.f32 %v3060_v4, %v3275_v8 }
 0x137   : > { %2155 = vst.msk [vmem:[%s3183_s14 + $0xa4] sm:$0xf] %vm2113_vm5, %v2496_v3  ;;  %v2726_v44 = vpop.eup %2725  ;;  %2128 = vst.msk [vmem:[%s3183_s14 + $0x38] sm:$0xf] %vm2113_vm5, %v2469_v39  ;;  %v2501_v1 = vpack.c.bf16 %v1839_v36, %v1839_v36  ;;  %v1243_v41 = vmul.f32 1.442695, %v1134_v26  ;;  %v3555_v2 = vadd.f32 %v3067_v7, %v908_v24  ;;  %v3560_v13 = vadd.f32 %v3067_v7, %v940_v16  ;;  %v1711_v24 = vpop.permute.xlu1 %1710 }
 0x138   : > { %v1357_v18 = vsel %vm1037_vm15, %v3436_v20, %v2337_v27  ;;  %2731 = vpow2.f32 %v1179_v53  ;;  %v2369_v37 = vadd.f32 -1.0, %v2726_v44  ;;  %v3563_v61 = vadd.f32 %v3067_v7, %v906_v25 }
 0x139   : > { %v1805_v19 = vmul.f32 %v3023_v51, %v1357_v18  ;;  %2160 = vst.msk [vmem:[%s3183_s14 + $0xb8] sm:$0xf] %vm2113_vm5, %v2501_v1  ;;  %v3566_v20 = vadd.f32 %v3067_v7, %v938_v34  ;;  %v909_v51 = vmul.f32 %v3277_v45, %v3060_v4  ;;  %2733 = vpow2.f32 %v1243_v41 }
 0x13a   : > { %v1389_v21 = vsel %vm1069_vm0, %v3461_v30, %v2369_v37  ;;  %v1107_v47 = vmin.f32 %v3555_v2, 0.0  ;;  %v1139_v49 = vmin.f32 %v3560_v13, 0.0  ;;  %vm1040_vm1 = vcmp.gt.f32.partialorder %v3492_v50, 0.0 }
 0x13b   : > { %v2467_v8 = vpack.c.bf16 %v1805_v19, %v1805_v19  ;;  %v1837_v48 = vmul.f32 %v3496_v32, %v1389_v21  ;;  %vm1072_vm2 = vcmp.gt.f32.partialorder %v3504_v29, 0.0  ;;  %v1105_v45 = vmin.f32 %v3563_v61, 0.0 }
 0x13c   : > { %v1137_v30 = vmin.f32 %v3566_v20, 0.0  ;;  %v1189_v56 = vmul.f32 1.442695, %v1107_v47  ;;  %v1253_v38 = vmul.f32 1.442695, %v1139_v49  ;;  %v3585_v32 = vadd.f32 %v3067_v7, %v909_v51  ;;  %v1716_v47 = vpop.permute.xlu0 %1715 }
 0x13d   : > { %2126 = vst.msk [vmem:[%s3183_s14 + $0x30] sm:$0xf] %vm2113_vm5, %v2467_v8  ;;  %v2499_v62 = vpack.c.bf16 %v1837_v48, %v1837_v48  ;;  %v1185_v40 = vmul.f32 1.442695, %v1105_v45  ;;  %v941_v46 = vmul.f32 %v3286_v11, %v3060_v4  ;;  %vm1038_vm3 = vcmp.gt.f32.partialorder %v3518_v15, 0.0 }
 0x13e   : > { %v2728_v0 = vpop.eup %2727  ;;  %v1249_v3 = vmul.f32 1.442695, %v1137_v30  ;;  %2735 = vpow2.f32 %v1189_v56  ;;  %v1108_v36 = vmin.f32 %v3585_v32, 0.0  ;;  %v907_v26 = vmul.f32 %v3060_v4, %v3288_v42 }
 0x13f   : > { %v2730_v63 = vpop.eup %2729  ;;  %v2340_v12 = vadd.f32 -1.0, %v2728_v0  ;;  %2158 = vst.msk [vmem:[%s3183_s14 + $0xb0] sm:$0xf] %vm2113_vm5, %v2499_v62  ;;  %2737 = vpow2.f32 %v1253_v38  ;;  %v3597_v53 = vadd.f32 %v3067_v7, %v941_v46  ;;  %vm1070_vm4 = vcmp.gt.f32.partialorder %v3524_v5, 0.0 }
 0x140   : > { %v2372_v39 = vadd.f32 -1.0, %v2730_v63  ;;  %2739 = vpow2.f32 %v1185_v40  ;;  %v1191_v44 = vmul.f32 1.442695, %v1108_v36  ;;  %vm1043_vm6 = vcmp.gt.f32.partialorder %v3555_v2, 0.0 }
 0x141   : > { %v1360_v27 = vsel %vm1040_vm1, %v3492_v50, %v2340_v12  ;;  %2741 = vpow2.f32 %v1249_v3  ;;  %v1140_v42 = vmin.f32 %v3597_v53, 0.0  ;;  %v939_v37 = vmul.f32 %v3060_v4, %v3293_v43 }
 0x142   : > { %v2732_v11 = vpop.eup %2731  ;;  %v1808_v16 = vmul.f32 %v3029_v54, %v1360_v27  ;;  %v1392_v25 = vsel %vm1072_vm2, %v3504_v29, %v2372_v39  ;;  %2743 = vpow2.f32 %v1191_v44  ;;  %v3609_v54 = vadd.f32 %v3067_v7, %v907_v26  ;;  %v3668_v44 = vpop.permute.xlu1 %1720 }
 0x143   : > { %v1840_v1 = vmul.f32 %v1711_v24, %v1392_v25  ;;  %v2338_v50 = vadd.f32 -1.0, %v2732_v11  ;;  %v2734_v34 = vpop.eup %2733  ;;  %v912_v41 = vmul.f32 %v3316_v23, %v3060_v4  ;;  %vm1075_vm7 = vcmp.gt.f32.partialorder %v3560_v13, 0.0  ;;  %v1726_v11 = vpop.permute.xlu0 %1725 }
 0x144   : > { %v2470_v18 = vpack.c.bf16 %v1808_v16, %v1808_v16  ;;  %v2370_v8 = vadd.f32 -1.0, %v2734_v34  ;;  %v1255_v21 = vmul.f32 1.442695, %v1140_v42  ;;  %v1106_v48 = vmin.f32 %v3609_v54, 0.0 }
 0x145   : > { %v2502_v29 = vpack.c.bf16 %v1840_v1, %v1840_v1  ;;  %v1358_v19 = vsel %vm1038_vm3, %v3518_v15, %v2338_v50  ;;  %v3626_v15 = vadd.f32 %v3067_v7, %v939_v37  ;;  %v3629_v43 = vadd.f32 %v3067_v7, %v912_v41 }
 0x146   : > { %2129 = vst.msk [vmem:[%s3183_s14 + $0x3c] sm:$0xf] %vm2113_vm5, %v2470_v18  ;;  %v1806_v51 = vmul.f32 %v3025_v52, %v1358_v19  ;;  %v944_v23 = vmul.f32 %v3330_v28, %v3060_v4  ;;  %v1390_v49 = vsel %vm1070_vm4, %v3524_v5, %v2370_v8  ;;  %2745 = vpow2.f32 %v1255_v21 }
 0x147   : > { %2161 = vst.msk [vmem:[%s3183_s14 + $0xbc] sm:$0xf] %vm2113_vm5, %v2502_v29  ;;  %v910_v45 = vmul.f32 %v3060_v4, %v3332_v35  ;;  %v1838_v30 = vmul.f32 %v3573_v9, %v1390_v49  ;;  %vm1041_vm8 = vcmp.gt.f32.partialorder %v3563_v61, 0.0  ;;  %v1187_v0 = vmul.f32 1.442695, %v1106_v48 }
 0x148   : > { %v2468_v52 = vpack.c.bf16 %v1806_v51, %v1806_v51  ;;  %v1138_v7 = vmin.f32 %v3626_v15, 0.0  ;;  %v2736_v62 = vpop.eup %2735  ;;  %vm1073_vm9 = vcmp.gt.f32.partialorder %v3566_v20, 0.0  ;;  %vm1044_vm10 = vcmp.gt.f32.partialorder %v3585_v32, 0.0  ;;  %v3649_v4 = vld [vmem:[%s3981_s3] ss:$0 sm:$0xff] }
 0x149   : > { %v1111_v28 = vmin.f32 %v3629_v43, 0.0  ;;  %v3652_v35 = vadd.f32 %v3649_v4, %v944_v23  ;;  %v2738_v5 = vpop.eup %2737  ;;  %v2500_v9 = vpack.c.bf16 %v1838_v30, %v1838_v30  ;;  %v2343_v56 = vadd.f32 -1.0, %v2736_v62 }
 0x14a   : > { %2127 = vst.msk [vmem:[%s3183_s14 + $0x34] sm:$0xf] %vm2113_vm5, %v2468_v52  ;;  %2747 = vpow2.f32 %v1187_v0  ;;  %v1251_v38 = vmul.f32 1.442695, %v1138_v7  ;;  %v2740_v63 = vpop.eup %2739  ;;  %v2375_v12 = vadd.f32 -1.0, %v2738_v5  ;;  %v3656_v46 = vadd.f32 %v3649_v4, %v910_v45  ;;  %v1731_v52 = vpop.permute.xlu1 %1730 }
 0x14b   : > { %v1197_v40 = vmul.f32 1.442695, %v1111_v28  ;;  %v1143_v3 = vmin.f32 %v3652_v35, 0.0  ;;  %v2742_v39 = vpop.eup %2741  ;;  %2159 = vst.msk [vmem:[%s3183_s14 + $0xb4] sm:$0xf] %vm2113_vm5, %v2500_v9  ;;  %v1363_v36 = vsel %vm1043_vm6, %v3555_v2, %v2343_v56  ;;  %v2341_v27 = vadd.f32 -1.0, %v2740_v63  ;;  %v3725_v9 = vpop.permute.xlu0 %1735 }
 0x14c   : > { %vm1076_vm11 = vcmp.gt.f32.partialorder %v3597_v53, 0.0  ;;  %2749 = vpow2.f32 %v1251_v38  ;;  %v2744_v26 = vpop.eup %2743  ;;  %v1811_v24 = vmul.f32 %v3035_v57, %v1363_v36  ;;  %v1395_v16 = vsel %vm1075_vm7, %v3560_v13, %v2375_v12  ;;  %v4009_v12 = vld [vmem:[#allocation2_spill] sm:$0xff] }
 0x14d   : > { %v2373_v25 = vadd.f32 -1.0, %v2742_v39  ;;  %2751 = vpow2.f32 %v1197_v40  ;;  %v1843_v1 = vmul.f32 %v1726_v11, %v1395_v16  ;;  %v1361_v2 = vsel %vm1041_vm8, %v3563_v61, %v2341_v27 }
 0x14e   : > { %v2344_v50 = vadd.f32 -1.0, %v2744_v26  ;;  %v1261_v18 = vmul.f32 1.442695, %v1143_v3  ;;  %v2473_v42 = vpack.c.bf16 %v1811_v24, %v1811_v24  ;;  %v1809_v57 = vmul.f32 %v3031_v55, %v1361_v2 }
 0x14f   : > { %v1393_v13 = vsel %vm1073_vm9, %v3566_v20, %v2373_v25  ;;  %v1109_v34 = vmin.f32 %v3656_v46, 0.0  ;;  %v2505_v29 = vpack.c.bf16 %v1843_v1, %v1843_v1  ;;  %v3687_v20 = vld [vmem:[%s3980_s2] ss:$0 sm:$0xff]  ;;  %vm1042_vm12 = vcmp.gt.f32.partialorder %v3609_v54, 0.0  ;;  %v4010_v1 = vld [vmem:[#allocation5_spill] sm:$0xff] }
 0x150   : > { %v1841_v19 = vmul.f32 %v1716_v47, %v1393_v13  ;;  %v1364_v37 = vsel %vm1044_vm10, %v3585_v32, %v2344_v50  ;;  %2753 = vpow2.f32 %v1261_v18  ;;  %v2746_v61 = vpop.eup %2745  ;;  %2132 = vst.msk [vmem:[%s3183_s14 + $0x48] sm:$0xf] %vm2113_vm5, %v2473_v42  ;;  %v2471_v41 = vpack.c.bf16 %v1809_v57, %v1809_v57 }
 0x151   : > { %v1812_v55 = vmul.f32 %v3037_v58, %v1364_v37  ;;  %v1193_v51 = vmul.f32 1.442695, %v1109_v34  ;;  %v942_v8 = vmul.f32 %v3687_v20, %v3336_v10  ;;  %2164 = vst.msk [vmem:[%s3183_s14 + $0xc8] sm:$0xf] %vm2113_vm5, %v2505_v29  ;;  %v2376_v21 = vadd.f32 -1.0, %v2746_v61  ;;  %v4011_v34 = vld [vmem:[#allocation15_spill] sm:$0xff] }
 0x152   : > { %v2503_v32 = vpack.c.bf16 %v1841_v19, %v1841_v19  ;;  %v913_v48 = vmul.f32 %v3687_v20, %v3338_v6  ;;  %v945_v58 = vmul.f32 %v3687_v20, %v3343_v17  ;;  %2130 = vst.msk [vmem:[%s3183_s14 + $0x40] sm:$0xf] %vm2113_vm5, %v2471_v41  ;;  %v911_v45 = vmul.f32 %v3687_v20, %v3345_v31 }
 0x153   : > { %v2474_v23 = vpack.c.bf16 %v1812_v55, %v1812_v55  ;;  %2755 = vpow2.f32 %v1193_v51  ;;  %v3701_v47 = vadd.f32 %v3649_v4, %v942_v8  ;;  %v1396_v6 = vsel %vm1076_vm11, %v3597_v53, %v2376_v21  ;;  %v4012_v8 = vld [vmem:[#allocation16_spill] sm:$0xff]  ;;  %v4013_v21 = vld [vmem:[#allocation17_spill] sm:$0xff] }
 0x154   : > { %v2748_v10 = vpop.eup %2747  ;;  %2162 = vst.msk [vmem:[%s3183_s14 + $0xc0] sm:$0xf] %vm2113_vm5, %v2503_v32  ;;  %v3709_v49 = vadd.f32 %v3649_v4, %v913_v48  ;;  %v3712_v17 = vadd.f32 %v3649_v4, %v945_v58  ;;  %v1844_v30 = vmul.f32 %v1731_v52, %v1396_v6  ;;  %v943_v62 = vmul.f32 %v3687_v20, %v3355_v59  ;;  %v4015_v52 = vld [vmem:[#allocation3_spill] sm:$0xff] }
 0x155   : > { %2133 = vst.msk [vmem:[%s3183_s14 + $0x4c] sm:$0xf] %vm2113_vm5, %v2474_v23  ;;  %v2342_v0 = vadd.f32 -1.0, %v2748_v10  ;;  %v1141_v7 = vmin.f32 %v3701_v47, 0.0  ;;  %vm1074_vm13 = vcmp.gt.f32.partialorder %v3626_v15, 0.0  ;;  %vm1047_vm14 = vcmp.gt.f32.partialorder %v3629_v43, 0.0 }
 0x156   : > { %v2750_v53 = vpop.eup %2749  ;;  %v1112_v28 = vmin.f32 %v3709_v49, 0.0  ;;  %v1144_v5 = vmin.f32 %v3712_v17, 0.0  ;;  %v2506_v56 = vpack.c.bf16 %v1844_v30, %v1844_v30  ;;  %v3735_v26 = vadd.f32 %v3649_v4, %v911_v45  ;;  %v4014_v23 = vld [vmem:[#allocation18_spill] sm:$0xff]  ;;  %v3777_v30 = vpop.permute.xlu1 %1740 }
 0x157   : > { %v2752_v31 = vpop.eup %2751  ;;  %v1362_v38 = vsel %vm1042_vm12, %v3609_v54, %v2342_v0  ;;  %v2374_v63 = vadd.f32 -1.0, %v2750_v53  ;;  %v1257_v59 = vmul.f32 1.442695, %v1141_v7  ;;  %v3738_v11 = vadd.f32 %v3649_v4, %v943_v62 }
 0x158   : > { %v1810_v40 = vmul.f32 %v4009_v12, %v1362_v38  ;;  %v2347_v3 = vadd.f32 -1.0, %v2752_v31  ;;  %v1199_v39 = vmul.f32 1.442695, %v1112_v28  ;;  %v1263_v36 = vmul.f32 1.442695, %v1144_v5 }
 0x159   : > { %2165 = vst.msk [vmem:[%s3183_s14 + $0xcc] sm:$0xf] %vm2113_vm5, %v2506_v56  ;;  %v1394_v27 = vsel %vm1074_vm13, %v3626_v15, %v2374_v63  ;;  %2757 = vpow2.f32 %v1257_v59  ;;  %vm1079_vm15 = vcmp.gt.f32.partialorder %v3652_v35, 0.0  ;;  %vm1045_vm0 = vcmp.gt.f32.partialorder %v3656_v46, 0.0 }
 0x15a   : > { %v2754_v54 = vpop.eup %2753  ;;  %v2472_v24 = vpack.c.bf16 %v1810_v40, %v1810_v40  ;;  %v1842_v16 = vmul.f32 %v3668_v44, %v1394_v27  ;;  %v1367_v25 = vsel %vm1047_vm14, %v3629_v43, %v2347_v3  ;;  %2759 = vpow2.f32 %v1199_v39  ;;  %v1746_v43 = vpop.permute.xlu0 %1745  ;;  %v4016_v3 = vld [vmem:[#allocation19_spill] sm:$0xff] }
 0x15b   : > { %v1815_v2 = vmul.f32 %v4010_v1, %v1367_v25  ;;  %v2379_v15 = vadd.f32 -1.0, %v2754_v54  ;;  %2761 = vpow2.f32 %v1263_v36  ;;  %v1110_v44 = vmin.f32 %v3735_v26, 0.0  ;;  %v1751_v1 = vpop.permute.xlu1 %1750 }
 0x15c   : > { %2131 = vst.msk [vmem:[%s3183_s14 + $0x44] sm:$0xf] %vm2113_vm5, %v2472_v24  ;;  %v2504_v50 = vpack.c.bf16 %v1842_v16, %v1842_v16  ;;  %v1142_v18 = vmin.f32 %v3738_v11, 0.0  ;;  %v916_v29 = vmul.f32 %v3687_v20, %v4011_v34  ;;  %v948_v19 = vmul.f32 %v3687_v20, %v3379_v14  ;;  %v4019_v34 = vld [vmem:[#allocation21_spill] sm:$0xff] }
 0x15d   : > { %v2756_v42 = vpop.eup %2755  ;;  %v2477_v57 = vpack.c.bf16 %v1815_v2, %v1815_v2  ;;  %v1399_v13 = vsel %vm1079_vm15, %v3652_v35, %v2379_v15  ;;  %v1195_v41 = vmul.f32 1.442695, %v1110_v44  ;;  %v914_v32 = vmul.f32 %v3687_v20, %v4012_v8  ;;  %v4017_v2 = vld [vmem:[#allocation6_spill] sm:$0xff] }
 0x15e   : > { %2163 = vst.msk [vmem:[%s3183_s14 + $0xc4] sm:$0xf] %vm2113_vm5, %v2504_v50  ;;  %v1847_v37 = vmul.f32 %v1746_v43, %v1399_v13  ;;  %v2345_v61 = vadd.f32 -1.0, %v2756_v42  ;;  %v1259_v55 = vmul.f32 1.442695, %v1142_v18  ;;  %v3761_v51 = vadd.f32 %v3649_v4, %v916_v29 }
 0x15f   : > { %2136 = vst.msk [vmem:[%s3183_s14 + $0x58] sm:$0xf] %vm2113_vm5, %v2477_v57  ;;  %v3764_v35 = vadd.f32 %v3649_v4, %v948_v19  ;;  %v946_v14 = vmul.f32 %v3687_v20, %v4013_v21  ;;  %2763 = vpow2.f32 %v1195_v41  ;;  %v917_v10 = vmul.f32 %v3687_v20, %v4014_v23  ;;  %v4018_v57 = vld [vmem:[#allocation20_spill] sm:$0xff]  ;;  %v4021_v23 = vld [vmem:[#allocation23_spill] sm:$0xff] }
 0x160   : > { %v2509_v48 = vpack.c.bf16 %v1847_v37, %v1847_v37  ;;  %v1365_v58 = vsel %vm1045_vm0, %v3656_v46, %v2345_v61  ;;  %2765 = vpow2.f32 %v1259_v55  ;;  %v1115_v45 = vmin.f32 %v3761_v51, 0.0 }
 0x161   : > { %v1813_v6 = vmul.f32 %v4015_v52, %v1365_v58  ;;  %vm1077_vm1 = vcmp.gt.f32.partialorder %v3701_v47, 0.0  ;;  %v1147_v0 = vmin.f32 %v3764_v35, 0.0  ;;  %v3784_v46 = vadd.f32 %v3649_v4, %v914_v32  ;;  %v1756_v32 = vpop.permute.xlu0 %1755  ;;  %v4022_v52 = vld [vmem:[#allocation4_spill] sm:$0xff] }
 0x162   : > { %2168 = vst.msk [vmem:[%s3183_s14 + $0xd8] sm:$0xf] %vm2113_vm5, %v2509_v48  ;;  %v3787_v7 = vadd.f32 %v3649_v4, %v946_v14  ;;  %vm1048_vm2 = vcmp.gt.f32.partialorder %v3709_v49, 0.0  ;;  %vm1080_vm3 = vcmp.gt.f32.partialorder %v3712_v17, 0.0  ;;  %v1205_v28 = vmul.f32 1.442695, %v1115_v45 }
 0x163   : > { %v2758_v62 = vpop.eup %2757  ;;  %v2475_v53 = vpack.c.bf16 %v1813_v6, %v1813_v6  ;;  %vm1046_vm4 = vcmp.gt.f32.partialorder %v3735_v26, 0.0  ;;  %v1269_v56 = vmul.f32 1.442695, %v1147_v0  ;;  %v1113_v38 = vmin.f32 %v3784_v46, 0.0  ;;  %v4020_v48 = vld [vmem:[#allocation22_spill] sm:$0xff] }
 0x164   : > { %v2760_v5 = vpop.eup %2759  ;;  %v2377_v31 = vadd.f32 -1.0, %v2758_v62  ;;  %v3794_v63 = vadd.f32 %v3649_v4, %v917_v10  ;;  %2767 = vpow2.f32 %v1205_v28  ;;  %v1145_v40 = vmin.f32 %v3787_v7, 0.0 }
 0x165   : > { %v2762_v59 = vpop.eup %2761  ;;  %2134 = vst.msk [vmem:[%s3183_s14 + $0x50] sm:$0xf] %vm2113_vm5, %v2475_v53  ;;  %v2348_v12 = vadd.f32 -1.0, %v2760_v5  ;;  %v949_v39 = vmul.f32 %v3687_v20, %v4016_v3  ;;  %2769 = vpow2.f32 %v1269_v56  ;;  %v1201_v54 = vmul.f32 1.442695, %v1113_v38 }
 0x166   : > { %v1397_v36 = vsel %vm1077_vm1, %v3701_v47, %v2377_v31  ;;  %v2380_v27 = vadd.f32 -1.0, %v2762_v59  ;;  %vm1078_vm6 = vcmp.gt.f32.partialorder %v3738_v11, 0.0  ;;  %v1265_v25 = vmul.f32 1.442695, %v1145_v40 }
 0x167   : > { %v1845_v24 = vmul.f32 %v3725_v9, %v1397_v36  ;;  %v1368_v16 = vsel %vm1048_vm2, %v3709_v49, %v2348_v12  ;;  %2771 = vpow2.f32 %v1201_v54  ;;  %v1116_v50 = vmin.f32 %v3794_v63, 0.0  ;;  %v4023_v54 = vld [vmem:[#allocation9_spill] sm:$0xff] }
 0x168   : > { %v1816_v15 = vmul.f32 %v4017_v2, %v1368_v16  ;;  %v1400_v47 = vsel %vm1080_vm3, %v3712_v17, %v2380_v27  ;;  %2773 = vpow2.f32 %v1265_v25  ;;  %v3815_v49 = vadd.f32 %v3649_v4, %v949_v39  ;;  %v1766_v27 = vpop.permute.xlu0 %1765 }
 0x169   : > { %v2507_v9 = vpack.c.bf16 %v1845_v24, %v1845_v24  ;;  %v1848_v44 = vmul.f32 %v1751_v1, %v1400_v47  ;;  %v2764_v18 = vpop.eup %2763  ;;  %v1207_v43 = vmul.f32 1.442695, %v1116_v50  ;;  %v915_v13 = vmul.f32 %v3687_v20, %v4018_v57 }
 0x16a   : > { %v2478_v42 = vpack.c.bf16 %v1816_v15, %v1816_v15  ;;  %v947_v17 = vmul.f32 %v3687_v20, %v4019_v34  ;;  %v2766_v29 = vpop.eup %2765  ;;  %v2346_v37 = vadd.f32 -1.0, %v2764_v18  ;;  %vm1051_vm7 = vcmp.gt.f32.partialorder %v3761_v51, 0.0  ;;  %v1761_v18 = vpop.permute.xlu1 %1760 }
 0x16b   : > { %2166 = vst.msk [vmem:[%s3183_s14 + $0xd0] sm:$0xf] %vm2113_vm5, %v2507_v9  ;;  %v2510_v19 = vpack.c.bf16 %v1848_v44, %v1848_v44  ;;  %v1148_v61 = vmin.f32 %v3815_v49, 0.0  ;;  %v2378_v41 = vadd.f32 -1.0, %v2766_v29  ;;  %2775 = vpow2.f32 %v1207_v43  ;;  %v4024_v9 = vld [vmem:[#allocation24_spill] sm:$0xff]  ;;  %v4025_v43 = vld [vmem:[#allocation7_spill] sm:$0xff] }
 0x16c   : > { %2137 = vst.msk [vmem:[%s3183_s14 + $0x5c] sm:$0xf] %vm2113_vm5, %v2478_v42  ;;  %v3828_v55 = vadd.f32 %v3649_v4, %v915_v13  ;;  %v3831_v8 = vadd.f32 %v3649_v4, %v947_v17  ;;  %v1366_v21 = vsel %vm1046_vm4, %v3735_v26, %v2346_v37  ;;  %v920_v58 = vmul.f32 %v3687_v20, %v4020_v48  ;;  %v4027_v48 = vld [vmem:[#allocation10_spill] sm:$0xff] }
 0x16d   : > { %2169 = vst.msk [vmem:[%s3183_s14 + $0xdc] sm:$0xf] %vm2113_vm5, %v2510_v19  ;;  %v1271_v14 = vmul.f32 1.442695, %v1148_v61  ;;  %v952_v10 = vmul.f32 %v3687_v20, %v4021_v23  ;;  %v1814_v6 = vmul.f32 %v4022_v52, %v1366_v21  ;;  %v1398_v45 = vsel %vm1078_vm6, %v3738_v11, %v2378_v41  ;;  %v4026_v61 = vld [vmem:[#allocation25_spill] sm:$0xff] }
 0x16e   : > { %vm1083_vm8 = vcmp.gt.f32.partialorder %v3764_v35, 0.0  ;;  %v1114_v0 = vmin.f32 %v3828_v55, 0.0  ;;  %v2768_v62 = vpop.eup %2767  ;;  %v1846_v26 = vmul.f32 %v3777_v30, %v1398_v45  ;;  %vm1049_vm9 = vcmp.gt.f32.partialorder %v3784_v46, 0.0 }
 0x16f   : > { %2777 = vpow2.f32 %v1271_v14  ;;  %v1146_v53 = vmin.f32 %v3831_v8, 0.0  ;;  %v2770_v28 = vpop.eup %2769  ;;  %v2476_v5 = vpack.c.bf16 %v1814_v6, %v1814_v6  ;;  %v2351_v31 = vadd.f32 -1.0, %v2768_v62  ;;  %v1771_v6 = vpop.permute.xlu1 %1770 }
 0x170   : > { %v1203_v56 = vmul.f32 1.442695, %v1114_v0  ;;  %v3852_v11 = vadd.f32 %v3649_v4, %v920_v58  ;;  %v2508_v38 = vpack.c.bf16 %v1846_v26, %v1846_v26  ;;  %v2383_v59 = vadd.f32 -1.0, %v2770_v28  ;;  %v4028_v26 = vld [vmem:[#allocation26_spill] sm:$0xff] }
 0x171   : > { %v1267_v12 = vmul.f32 1.442695, %v1146_v53  ;;  %v3855_v40 = vadd.f32 %v3649_v4, %v952_v10  ;;  %v2772_v30 = vpop.eup %2771  ;;  %2135 = vst.msk [vmem:[%s3183_s14 + $0x54] sm:$0xf] %vm2113_vm5, %v2476_v5  ;;  %v1371_v3 = vsel %vm1051_vm7, %v3761_v51, %v2351_v31  ;;  %vm1081_vm10 = vcmp.gt.f32.partialorder %v3787_v7, 0.0 }
 0x172   : > { %2779 = vpow2.f32 %v1203_v56  ;;  %v1119_v39 = vmin.f32 %v3852_v11, 0.0  ;;  %v2774_v36 = vpop.eup %2773  ;;  %2167 = vst.msk [vmem:[%s3183_s14 + $0xd4] sm:$0xf] %vm2113_vm5, %v2508_v38  ;;  %v1819_v24 = vmul.f32 %v4023_v54, %v1371_v3  ;;  %v1403_v16 = vsel %vm1083_vm8, %v3764_v35, %v2383_v59  ;;  %v4029_v54 = vld [vmem:[#allocation8_spill] sm:$0xff] }
 0x173   : > { %v2349_v25 = vadd.f32 -1.0, %v2772_v30  ;;  %2781 = vpow2.f32 %v1267_v12  ;;  %v1851_v1 = vmul.f32 %v1766_v27, %v1403_v16  ;;  %v2381_v51 = vadd.f32 -1.0, %v2774_v36  ;;  %v1776_v27 = vpop.permute.xlu0 %1775 }
 0x174   : > { %vm1052_vm11 = vcmp.gt.f32.partialorder %v3794_v63, 0.0  ;;  %v1213_v2 = vmul.f32 1.442695, %v1119_v39  ;;  %v2481_v15 = vpack.c.bf16 %v1819_v24, %v1819_v24  ;;  %v1151_v50 = vmin.f32 %v3855_v40, 0.0 }
 0x175   : > { %v1369_v47 = vsel %vm1049_vm9, %v3784_v46, %v2349_v25  ;;  %v918_v44 = vmul.f32 %v3687_v20, %v4024_v9  ;;  %v2776_v35 = vpop.eup %2775  ;;  %v2513_v42 = vpack.c.bf16 %v1851_v1, %v1851_v1  ;;  %v1401_v13 = vsel %vm1081_vm10, %v3787_v7, %v2381_v51  ;;  %v4030_v9 = vld [vmem:[#allocation13_spill] sm:$0xff] }
 0x176   : > { %v1817_v57 = vmul.f32 %v4025_v43, %v1369_v47  ;;  %2783 = vpow2.f32 %v1213_v2  ;;  %2140 = vst.msk [vmem:[%s3183_s14 + $0x68] sm:$0xf] %vm2113_vm5, %v2481_v15  ;;  %v1849_v34 = vmul.f32 %v1756_v32, %v1401_v13  ;;  %v2352_v46 = vadd.f32 -1.0, %v2776_v35 }
 0x177   : > { %v1277_v17 = vmul.f32 1.442695, %v1151_v50  ;;  %v3884_v29 = vadd.f32 %v3649_v4, %v918_v44  ;;  %2172 = vst.msk [vmem:[%s3183_s14 + $0xe8] sm:$0xf] %vm2113_vm5, %v2513_v42  ;;  %v950_v37 = vmul.f32 %v3687_v20, %v3445_v22  ;;  %v921_v7 = vmul.f32 %v3687_v20, %v3447_v60  ;;  %v1786_v43 = vpop.permute.xlu0 %1785 }
 0x178   : > { %v2479_v19 = vpack.c.bf16 %v1817_v57, %v1817_v57  ;;  %v953_v41 = vmul.f32 %v3687_v20, %v4026_v61  ;;  %v2511_v32 = vpack.c.bf16 %v1849_v34, %v1849_v34  ;;  %v1372_v14 = vsel %vm1052_vm11, %v3794_v63, %v2352_v46 }
 0x179   : > { %v2778_v21 = vpop.eup %2777  ;;  %2785 = vpow2.f32 %v1277_v17  ;;  %v1820_v58 = vmul.f32 %v4027_v48, %v1372_v14  ;;  %v1117_v22 = vmin.f32 %v3884_v29, 0.0  ;;  %v3902_v10 = vadd.f32 %v3649_v4, %v950_v37 }
 0x17a   : > { %2138 = vst.msk [vmem:[%s3183_s14 + $0x60] sm:$0xf] %vm2113_vm5, %v2479_v19  ;;  %v2384_v23 = vadd.f32 -1.0, %v2778_v21  ;;  %2170 = vst.msk [vmem:[%s3183_s14 + $0xe0] sm:$0xf] %vm2113_vm5, %v2511_v32  ;;  %vm1084_vm12 = vcmp.gt.f32.partialorder %v3815_v49, 0.0  ;;  %v3909_v60 = vadd.f32 %v3649_v4, %v921_v7  ;;  %v3912_v63 = vadd.f32 %v3649_v4, %v953_v41  ;;  %v1781_v19 = vpop.permute.xlu1 %1780 }
 0x17b   : > { %vm1050_vm13 = vcmp.gt.f32.partialorder %v3828_v55, 0.0  ;;  %v2482_v45 = vpack.c.bf16 %v1820_v58, %v1820_v58  ;;  %v1209_v62 = vmul.f32 1.442695, %v1117_v22  ;;  %v919_v53 = vmul.f32 %v3687_v20, %v4028_v26 }
 0x17c   : > { %v2780_v52 = vpop.eup %2779  ;;  %v1404_v0 = vsel %vm1084_vm12, %v3815_v49, %v2384_v23  ;;  %vm1082_vm14 = vcmp.gt.f32.partialorder %v3831_v8, 0.0  ;;  %v1149_v56 = vmin.f32 %v3902_v10, 0.0  ;;  %v1120_v59 = vmin.f32 %v3909_v60, 0.0 }
 0x17d   : > { %v2782_v28 = vpop.eup %2781  ;;  %v1852_v5 = vmul.f32 %v1771_v6, %v1404_v0  ;;  %v2350_v31 = vadd.f32 -1.0, %v2780_v52  ;;  %2141 = vst.msk [vmem:[%s3183_s14 + $0x6c] sm:$0xf] %vm2113_vm5, %v2482_v45  ;;  %2787 = vpow2.f32 %v1209_v62  ;;  %v951_v49 = vmul.f32 %v3687_v20, %v3463_v33  ;;  %v4032_v45 = vld [vmem:[#allocation14_spill] sm:$0xff] }
 0x17e   : > { %v2382_v38 = vadd.f32 -1.0, %v2782_v28  ;;  %v1273_v3 = vmul.f32 1.442695, %v1149_v56  ;;  %v1152_v39 = vmin.f32 %v3912_v63, 0.0  ;;  %v1215_v25 = vmul.f32 1.442695, %v1120_v59  ;;  %v1791_v6 = vpop.permute.xlu1 %1790 }
 0x17f   : > { %v2514_v12 = vpack.c.bf16 %v1852_v5, %v1852_v5  ;;  %v1370_v30 = vsel %vm1050_vm13, %v3828_v55, %v2350_v31  ;;  %v3931_v1 = vadd.f32 %v3649_v4, %v919_v53  ;;  %vm1055_vm15 = vcmp.gt.f32.partialorder %v3852_v11, 0.0  ;;  %v4033_v56 = vld [vmem:[#allocation12_spill] sm:$0xff] }
 0x180   : > { %v2784_v36 = vpop.eup %2783  ;;  %v1818_v24 = vmul.f32 %v4029_v54, %v1370_v30  ;;  %v1402_v16 = vsel %vm1082_vm14, %v3831_v8, %v2382_v38  ;;  %2789 = vpow2.f32 %v1273_v3  ;;  %v1279_v55 = vmul.f32 1.442695, %v1152_v39 }
 0x181   : > { %2173 = vst.msk [vmem:[%s3183_s14 + $0xec] sm:$0xf] %vm2113_vm5, %v2514_v12  ;;  %v1850_v33 = vmul.f32 %v1761_v18, %v1402_v16  ;;  %v2355_v20 = vadd.f32 -1.0, %v2784_v36  ;;  %2791 = vpow2.f32 %v1215_v25  ;;  %v1118_v2 = vmin.f32 %v3931_v1, 0.0 }
 0x182   : > { %v2480_v51 = vpack.c.bf16 %v1818_v24, %v1818_v24  ;;  %2793 = vpow2.f32 %v1279_v55  ;;  %v1022_v50 = vadd.f32 %v3649_v4, %v951_v49  ;;  %vm1087_vm0 = vcmp.gt.f32.partialorder %v3855_v40, 0.0 }
 0x183   : > { %v2786_v15 = vpop.eup %2785  ;;  %v2512_v8 = vpack.c.bf16 %v1850_v33, %v1850_v33  ;;  %v1375_v47 = vsel %vm1055_vm15, %v3852_v11, %v2355_v20  ;;  %v1211_v18 = vmul.f32 1.442695, %v1118_v2  ;;  %vm1053_vm1 = vcmp.gt.f32.partialorder %v3884_v29, 0.0 }
 0x184   : > { %2139 = vst.msk [vmem:[%s3183_s14 + $0x64] sm:$0xf] %vm2113_vm5, %v2480_v51  ;;  %v1823_v44 = vmul.f32 %v4030_v9, %v1375_v47  ;;  %v2387_v35 = vadd.f32 -1.0, %v2786_v15  ;;  %v1150_v42 = vmin.f32 %v1022_v50, 0.0  ;;  %vm1085_vm2 = vcmp.gt.f32.partialorder %v3902_v10, 0.0 }
 0x185   : > { %2171 = vst.msk [vmem:[%s3183_s14 + $0xe4] sm:$0xf] %vm2113_vm5, %v2512_v8  ;;  %2795 = vpow2.f32 %v1211_v18  ;;  %vm1056_vm3 = vcmp.gt.f32.partialorder %v3909_v60, 0.0  ;;  %vm1088_vm4 = vcmp.gt.f32.partialorder %v3912_v63, 0.0  ;;  %vm1054_vm6 = vcmp.gt.f32.partialorder %v3931_v1, 0.0 }
 0x186   : > { %v2485_v57 = vpack.c.bf16 %v1823_v44, %v1823_v44  ;;  %v1407_v11 = vsel %vm1087_vm0, %v3855_v40, %v2387_v35  ;;  %v1275_v34 = vmul.f32 1.442695, %v1150_v42  ;;  %v4031_v40 = vld [vmem:[#allocation11_spill] sm:$0xff]  ;;  %vm1086_vm7 = vcmp.gt.f32.partialorder %v1022_v50, 0.0 }
 0x187   : > { %v1855_v13 = vmul.f32 %v1786_v43, %v1407_v11  ;;  %v2788_v4 = vpop.eup %2787 }
 0x188   : > { %2144 = vst.msk [vmem:[%s3183_s14 + $0x78] sm:$0xf] %vm2113_vm5, %v2485_v57  ;;  %v2353_v17 = vadd.f32 -1.0, %v2788_v4  ;;  %2797 = vpow2.f32 %v1275_v34 }
 0x189   : > { %v2517_v46 = vpack.c.bf16 %v1855_v13, %v1855_v13 }
 0x18a   : > { %v2790_v37 = vpop.eup %2789  ;;  %v1373_v7 = vsel %vm1053_vm1, %v3884_v29, %v2353_v17 }
 0x18b   : > { %2176 = vst.msk [vmem:[%s3183_s14 + $0xf8] sm:$0xf] %vm2113_vm5, %v2517_v46  ;;  %v2792_v61 = vpop.eup %2791  ;;  %v1821_v41 = vmul.f32 %v4031_v40, %v1373_v7  ;;  %v2385_v21 = vadd.f32 -1.0, %v2790_v37 }
 0x18c   : > { %v2794_v32 = vpop.eup %2793  ;;  %v2356_v14 = vadd.f32 -1.0, %v2792_v61 }
 0x18d   : > { %v2483_v48 = vpack.c.bf16 %v1821_v41, %v1821_v41  ;;  %v1405_v58 = vsel %vm1085_vm2, %v3902_v10, %v2385_v21  ;;  %v2388_v23 = vadd.f32 -1.0, %v2794_v32 }
 0x18e   : > { %v1853_v22 = vmul.f32 %v1776_v27, %v1405_v58  ;;  %v1376_v52 = vsel %vm1056_vm3, %v3909_v60, %v2356_v14 }
 0x18f   : > { %v2796_v29 = vpop.eup %2795  ;;  %2142 = vst.msk [vmem:[%s3183_s14 + $0x70] sm:$0xf] %vm2113_vm5, %v2483_v48  ;;  %v1824_v0 = vmul.f32 %v4032_v45, %v1376_v52  ;;  %v1408_v62 = vsel %vm1088_vm4, %v3912_v63, %v2388_v23 }
 0x190   : > { %v2515_v10 = vpack.c.bf16 %v1853_v22, %v1853_v22  ;;  %v1856_v26 = vmul.f32 %v1791_v6, %v1408_v62  ;;  %v2354_v53 = vadd.f32 -1.0, %v2796_v29 }
 0x191   : > { %v2486_v28 = vpack.c.bf16 %v1824_v0, %v1824_v0 }
 0x192   : > { %v2798_v60 = vpop.eup %2797  ;;  %2174 = vst.msk [vmem:[%s3183_s14 + $0xf0] sm:$0xf] %vm2113_vm5, %v2515_v10  ;;  %v2518_v5 = vpack.c.bf16 %v1856_v26, %v1856_v26  ;;  %v1374_v31 = vsel %vm1054_vm6, %v3931_v1, %v2354_v53 }
 0x193   : > { %2145 = vst.msk [vmem:[%s3183_s14 + $0x7c] sm:$0xf] %vm2113_vm5, %v2486_v28  ;;  %v1822_v38 = vmul.f32 %v4033_v56, %v1374_v31  ;;  %v2386_v59 = vadd.f32 -1.0, %v2798_v60 }
 0x194   : > { %2177 = vst.msk [vmem:[%s3183_s14 + $0xfc] sm:$0xf] %vm2113_vm5, %v2518_v5 }
 0x195   : > { %v2484_v63 = vpack.c.bf16 %v1822_v38, %v1822_v38  ;;  %v1406_v49 = vsel %vm1086_vm7, %v1022_v50, %v2386_v59 }
 0x196   : > { %v1854_v12 = vmul.f32 %v1781_v19, %v1406_v49 }
 0x197   : > { %2143 = vst.msk [vmem:[%s3183_s14 + $0x74] sm:$0xf] %vm2113_vm5, %v2484_v63 }
 0x198   : > { %v2516_v30 = vpack.c.bf16 %v1854_v12, %v1854_v12 }
 0x19a   : > { %2175 = vst.msk [vmem:[%s3183_s14 + $0xf4] sm:$0xf] %vm2113_vm5, %v2516_v30 }
 0x19b PF: > { %s15_s18 = sadd.s32 1, %s2807_s18  }
 0x19c   : > { %p12_p4 = scmp.ge.s32.totalorder %s15_s18, 4  }
 0x19e   :  { %14 = sbr.rel (!%p12_p4) target bundleno = 1 (0x1), region = 73 }

// kernel: vae_forward.14
= control target key start
LH: loop header
LB: loop body
LE: loop exit
PB: predicated region body
PF: predicated region fallthrough
CT: control target
= control target key end

     0   :  { %s2913_s18 = smov 0   ;;  %s4066_s0 = inlined_call_operand.vmem [shape: bf16[1024,108], index: 0, kind: input, shape index: {}]   ;;  %s4067_s1 = inlined_call_operand.vmem [shape: bf16[108,4], index: 1, kind: input, shape index: {}]   ;;  %s4068_s2 = inlined_call_operand.vmem [shape: f32[1,4], index: 2, kind: input, shape index: {}]   ;;  %s4069_s3 = inlined_call_operand.vmem [shape: f32[1,4], index: 3, kind: input, shape index: {}]   ;;  %s4070_s4 = inlined_call_operand.vmem [shape: f32[1024,1], index: 4, kind: input, shape index: {}]   ;;  %s4071_s5 = inlined_call_operand.vmem [shape: bf16[1024,4], index: 5, kind: output, shape index: {}]  }
   0x1 LB: > { %s2283_s19 = sadd.s32 4294967295, %s2880_s18   ;;  %p2287_p0 = scmp.ge.s32.totalorder %s2880_s18, 1  ;;  %s2880_s18 = sphi %s2913_s18, %s15_s18  }
   0x2   : > { %p199_p1 = scmp.lt.s32.totalorder %s2880_s18, 3 }
   0x4   : > { %p200_p2 = pnand %p2287_p0, %p199_p1 }
   0x6   : > { %203 = sbr.rel (%p200_p2) target bundleno = 429 (0x1ad), region = 40 }
   0xd   : > { %v2705_v0 = vld [vmem:[%s4067_s1] sm:$0xff]   ;;  %v2882_v1 = vmov 0   ;;  %v2706_v2 = vld [vmem:[%s4067_s1 + $0x8] sm:$0xff]   ;;  %s2288_s24 = sshll.u32 %s2283_s19, 6  ;;  %v2707_v3 = vld [vmem:[%s4067_s1 + $0x10] sm:$0xff]   ;;  %vm530_vm0 = vcmask 883712  }
   0xe   : > { %2704 = vset.pattern.permute.xlu1 %v2882_v1  ;;  %2703 = vset.pattern.permute.xlu0 %v2882_v1  ;;  %p233_p3 = scmp.lt.s32.totalorder %s2288_s24, 127  ;;  %v2708_v6 = vld [vmem:[%s4067_s1 + $0x18] sm:$0xff]   ;;  %v2709_v9 = vld [vmem:[%s4067_s1 + $0x20] sm:$0xff]   ;;  %v2710_v14 = vld [vmem:[%s4067_s1 + $0x28] sm:$0xff]   ;;  %vm627_vm1 = vcmask 1045504   ;;  %vm2150_vm5 = vcmask 27648  }
   0xf   : > { %2600 = vmatprep.subr.bf16.mxu0 %v2705_v0  ;;  %2678 = vmatprep.subr.bf16.mxu1 %v2705_v0  ;;  %v2711_v17 = vld [vmem:[%s4067_s1 + $0x30] sm:$0x3f]  }
  0x10   : > { %2601 = vmatpush3.bf16.msra.mxu0 %v2705_v0  ;;  %2685 = vmatpush3.bf16.msra.mxu1 %v2705_v0  ;;  %s4125_s24 = smov (!%p233_p3, %s2288_s24), 127  ;;  %v629_v20 = vsel %vm627_vm1, %v2711_v17, 0 }
  0x11   : > { %2602 = vmatprep.subr.bf16.mxu0 %v2706_v2  ;;  %2679 = vmatprep.subr.bf16.mxu1 %v2706_v2  ;;  %s2291_s27 = sshll.u32 %s4125_s24, 3  ;;  %s2289_s28 = sshll.u32 %s4125_s24, 2 }
  0x12   : > { %s2937_s6 = scalar_lea.vmem %s4070_s4, %s2291_s27  ;;  %s2949_s11 = scalar_lea.vmem %s4066_s0, %s2289_s28 }
  0x13   : > { %v1448_v4 = vld [vmem:[%s2937_s6 + $0x10] sm:$0xff]  ;;  %v1446_v5 = vld [vmem:[%s2937_s6] sm:$0xff]  ;;  %v1449_v7 = vld [vmem:[%s2937_s6 + $0x18] sm:$0xff]  ;;  %s3276_s26 = scalar_lea.vmem %s4071_s5, %s2289_s28 }
  0x14   : > { %2603 = vmatpush3.bf16.msra.mxu0 %v2706_v2  ;;  %2686 = vmatpush3.bf16.msra.mxu1 %v2706_v2  ;;  %v1447_v8 = vld [vmem:[%s2937_s6 + $0x8] sm:$0xff]  ;;  %v2712_v11 = vld [vmem:[%s2949_s11] sm:$0xff]   ;;  %v1453_v15 = vld [vmem:[%s2937_s6 + $0x38] sm:$0xff] }
  0x15   : > { %2604 = vmatprep.subr.bf16.mxu0 %v2707_v3  ;;  %2680 = vmatprep.subr.bf16.mxu1 %v2707_v3  ;;  %v1451_v10 = vld [vmem:[%s2937_s6 + $0x28] sm:$0xff]  ;;  %v1450_v12 = vld [vmem:[%s2937_s6 + $0x20] sm:$0xff]  ;;  %v1452_v16 = vld [vmem:[%s2937_s6 + $0x30] sm:$0xff] }
  0x16   : > { %1522 = vperm.xlu1 %2704, %v1448_v4   ;;  %1512 = vperm.xlu0 %2703, %v1446_v5   ;;  %v2713_v13 = vld [vmem:[%s2949_s11 + $0x80] sm:$0xff]   ;;  %v1455_v18 = vld [vmem:[%s2937_s6 + $0x48] sm:$0xff]  ;;  %v1457_v21 = vld [vmem:[%s2937_s6 + $0x58] sm:$0xff] }
  0x17   : > { %2614 = vmatprep.mubr.msk.bf16.mxu0 %vm530_vm0, %v2712_v11  ;;  %2646 = vmatprep.mubr.msk.bf16.mxu1 %vm530_vm0, %v2713_v13  ;;  %v1454_v19 = vld [vmem:[%s2937_s6 + $0x40] sm:$0xff]  ;;  %v1456_v22 = vld [vmem:[%s2937_s6 + $0x50] sm:$0xff]  ;;  %v2714_v23 = vld [vmem:[%s2949_s11 + $0x8] sm:$0xff]  }
  0x18   : > { %2605 = vmatpush3.bf16.msra.mxu0 %v2707_v3  ;;  %2687 = vmatpush3.bf16.msra.mxu1 %v2707_v3  ;;  %v2715_v24 = vld [vmem:[%s2949_s11 + $0x88] sm:$0xff]   ;;  %v2716_v25 = vld [vmem:[%s2949_s11 + $0x10] sm:$0xff]   ;;  %v1458_v28 = vld [vmem:[%s2937_s6 + $0x60] sm:$0xff] }
  0x19   : > { %2606 = vmatprep.subr.bf16.mxu0 %v2708_v6  ;;  %2681 = vmatprep.subr.bf16.mxu1 %v2708_v6  ;;  %v2717_v26 = vld [vmem:[%s2949_s11 + $0x90] sm:$0xff]   ;;  %v1459_v27 = vld [vmem:[%s2937_s6 + $0x68] sm:$0xff]  ;;  %v1461_v29 = vld [vmem:[%s2937_s6 + $0x78] sm:$0xff] }
  0x1a   : > { %1527 = vperm.xlu1 %2704, %v1449_v7   ;;  %1517 = vperm.xlu0 %2703, %v1447_v8   ;;  %v1460_v30 = vld [vmem:[%s2937_s6 + $0x70] sm:$0xff]  ;;  %v2718_v31 = vld [vmem:[%s2949_s11 + $0x18] sm:$0xff]   ;;  %v2720_v33 = vld [vmem:[%s2949_s11 + $0x20] sm:$0xff]  }
  0x1b   : > { %v2719_v32 = vld [vmem:[%s2949_s11 + $0x98] sm:$0xff]   ;;  %v2721_v34 = vld [vmem:[%s2949_s11 + $0xa0] sm:$0xff]   ;;  %v1463_v35 = vld [vmem:[%s2937_s6 + $0x88] sm:$0xff] }
  0x1c   : > { %2607 = vmatpush3.bf16.msra.mxu0 %v2708_v6  ;;  %2688 = vmatpush3.bf16.msra.mxu1 %v2708_v6  ;;  %v1462_v36 = vld [vmem:[%s2937_s6 + $0x80] sm:$0xff]  ;;  %v1465_v37 = vld [vmem:[%s2937_s6 + $0x98] sm:$0xff]  ;;  %v1464_v38 = vld [vmem:[%s2937_s6 + $0x90] sm:$0xff] }
  0x1d   : > { %2608 = vmatprep.subr.bf16.mxu0 %v2709_v9  ;;  %2682 = vmatprep.subr.bf16.mxu1 %v2709_v9  ;;  %v2722_v39 = vld [vmem:[%s2949_s11 + $0x28] sm:$0xff]   ;;  %v2724_v41 = vld [vmem:[%s2949_s11 + $0x30] sm:$0xff]   ;;  %v1466_v44 = vld [vmem:[%s2937_s6 + $0xa0] sm:$0xff] }
  0x1e   : > { %1537 = vperm.xlu1 %2704, %v1451_v10   ;;  %1532 = vperm.xlu0 %2703, %v1450_v12   ;;  %v2723_v40 = vld [vmem:[%s2949_s11 + $0xa8] sm:$0xff]   ;;  %v2725_v42 = vld [vmem:[%s2949_s11 + $0xb0] sm:$0xff]   ;;  %v1469_v45 = vld [vmem:[%s2937_s6 + $0xb8] sm:$0xff] }
  0x1f   : > { %v1467_v43 = vld [vmem:[%s2937_s6 + $0xa8] sm:$0xff]  ;;  %v1468_v46 = vld [vmem:[%s2937_s6 + $0xb0] sm:$0xff]  ;;  %v2726_v47 = vld [vmem:[%s2949_s11 + $0x38] sm:$0xff]  }
  0x20   : > { %2609 = vmatpush3.bf16.msra.mxu0 %v2709_v9  ;;  %2689 = vmatpush3.bf16.msra.mxu1 %v2709_v9  ;;  %v2727_v48 = vld [vmem:[%s2949_s11 + $0xb8] sm:$0xff]   ;;  %v2728_v49 = vld [vmem:[%s2949_s11 + $0x40] sm:$0xff]   ;;  %v1471_v51 = vld [vmem:[%s2937_s6 + $0xc8] sm:$0xff] }
  0x21   : > { %2610 = vmatprep.subr.bf16.mxu0 %v2710_v14  ;;  %2683 = vmatprep.subr.bf16.mxu1 %v2710_v14  ;;  %v2729_v50 = vld [vmem:[%s2949_s11 + $0xc0] sm:$0xff]   ;;  %v1473_v53 = vld [vmem:[%s2937_s6 + $0xd8] sm:$0xff]  ;;  %v1472_v54 = vld [vmem:[%s2937_s6 + $0xd0] sm:$0xff] }
  0x22   : > { %1547 = vperm.xlu1 %2704, %v1453_v15   ;;  %1542 = vperm.xlu0 %2703, %v1452_v16   ;;  %v1470_v52 = vld [vmem:[%s2937_s6 + $0xc0] sm:$0xff]  ;;  %v2730_v55 = vld [vmem:[%s2949_s11 + $0x48] sm:$0xff]   ;;  %v2732_v57 = vld [vmem:[%s2949_s11 + $0x50] sm:$0xff]  }
  0x23   : > { %v2731_v56 = vld [vmem:[%s2949_s11 + $0xc8] sm:$0xff]   ;;  %v2733_v58 = vld [vmem:[%s2949_s11 + $0xd0] sm:$0xff]   ;;  %v1474_v60 = vld [vmem:[%s2937_s6 + $0xe0] sm:$0xff] }
  0x24   : > { %2611 = vmatpush3.bf16.msra.mxu0 %v2710_v14  ;;  %2690 = vmatpush3.bf16.msra.mxu1 %v2710_v14  ;;  %v1475_v59 = vld [vmem:[%s2937_s6 + $0xe8] sm:$0xff]  ;;  %v1477_v61 = vld [vmem:[%s2937_s6 + $0xf8] sm:$0xff]  ;;  %v1476_v62 = vld [vmem:[%s2937_s6 + $0xf0] sm:$0xff] }
  0x25   : > { %2692 = vmatprep.subr.msk.bf16.mxu0 %vm627_vm1, %v2711_v17  ;;  %2693 = vmatprep.subr.msk.bf16.mxu1 %vm627_vm1, %v2711_v17  ;;  %v2734_v63 = vld [vmem:[%s2949_s11 + $0x58] sm:$0xff]   ;;  %v2736_v1 = vld [vmem:[%s2949_s11 + $0x60] sm:$0xff]   ;;  %v1479_v3 = vld [vmem:[%s2937_s6 + $0x108] sm:$0xff] }
  0x26   : > { %1557 = vperm.xlu1 %2704, %v1455_v18   ;;  %1552 = vperm.xlu0 %2703, %v1454_v19   ;;  %v2735_v0 = vld [vmem:[%s2949_s11 + $0xd8] sm:$0xff]   ;;  %v2737_v2 = vld [vmem:[%s2949_s11 + $0xe0] sm:$0xff]   ;;  %v1480_v6 = vld [vmem:[%s2937_s6 + $0x110] sm:$0xff] }
  0x27   : > { %v1478_v4 = vld [vmem:[%s2937_s6 + $0x100] sm:$0xff]  ;;  %v1481_v5 = vld [vmem:[%s2937_s6 + $0x118] sm:$0xff]  ;;  %v2738_v7 = vld [vmem:[%s2949_s11 + $0x68] sm:$0xff]  }
  0x28   : > { %2613 = vmatpush3.bf16.msra.mxu0 %v629_v20  ;;  %2691 = vmatpush3.bf16.msra.mxu1 %v629_v20  ;;  %v2739_v8 = vld [vmem:[%s2949_s11 + $0xe8] sm:$0xff]   ;;  %v2740_v9 = vld [vmem:[%s2949_s11 + $0x70] sm:$0xff]   ;;  %v1482_v12 = vld [vmem:[%s2937_s6 + $0x120] sm:$0xff] }
  0x29   : > { %v2741_v10 = vld [vmem:[%s2949_s11 + $0xf0] sm:$0xff]   ;;  %v1483_v11 = vld [vmem:[%s2937_s6 + $0x128] sm:$0xff]  ;;  %v1485_v13 = vld [vmem:[%s2937_s6 + $0x138] sm:$0xff] }
  0x2a   : > { %1567 = vperm.xlu1 %2704, %v1457_v21   ;;  %1562 = vperm.xlu0 %2703, %v1456_v22   ;;  %v1484_v14 = vld [vmem:[%s2937_s6 + $0x130] sm:$0xff]  ;;  %v2742_v15 = vld [vmem:[%s2949_s11 + $0x78] sm:$0xff]   ;;  %v1487_v17 = vld [vmem:[%s2937_s6 + $0x148] sm:$0xff] }
  0x2b   : > { %2615 = vmatmul.mubr.msk.bf16.vlgmr.msra.gmra.mrb[0].mxu0 %vm530_vm0, %v2714_v23  ;;  %2647 = vmatmul.mubr.msk.bf16.vlgmr.msra.gmra.mrb[0].mxu1 %vm530_vm0, %v2715_v24  ;;  %v2743_v16 = vld [vmem:[%s2949_s11 + $0xf8] sm:$0xff]   ;;  %v1486_v18 = vld [vmem:[%s2937_s6 + $0x140] sm:$0xff]  ;;  %v1488_v20 = vld [vmem:[%s2937_s6 + $0x150] sm:$0xff] }
  0x2c   : > { %2618 = vmatprep.mubr.msk.bf16.mxu0 %vm530_vm0, %v2716_v25  ;;  %2650 = vmatprep.mubr.msk.bf16.mxu1 %vm530_vm0, %v2717_v26  ;;  %v1489_v19 = vld [vmem:[%s2937_s6 + $0x158] sm:$0xff]  ;;  %v1491_v21 = vld [vmem:[%s2937_s6 + $0x168] sm:$0xff]  ;;  %v1490_v22 = vld [vmem:[%s2937_s6 + $0x160] sm:$0xff] }
  0x2d   : > { %v1493_v23 = vld [vmem:[%s2937_s6 + $0x178] sm:$0xff]  ;;  %v1492_v24 = vld [vmem:[%s2937_s6 + $0x170] sm:$0xff]  ;;  %v1495_v25 = vld [vmem:[%s2937_s6 + $0x188] sm:$0xff] }
  0x2e   : > { %1577 = vperm.xlu1 %2704, %v1459_v27   ;;  %1572 = vperm.xlu0 %2703, %v1458_v28   ;;  %v1494_v26 = vld [vmem:[%s2937_s6 + $0x180] sm:$0xff]  ;;  %v1497_v27 = vld [vmem:[%s2937_s6 + $0x198] sm:$0xff]  ;;  %v1496_v28 = vld [vmem:[%s2937_s6 + $0x190] sm:$0xff] }
  0x32   : > { %1587 = vperm.xlu1 %2704, %v1461_v29   ;;  %1582 = vperm.xlu0 %2703, %v1460_v30   ;;  %v1499_v29 = vld [vmem:[%s2937_s6 + $0x1a8] sm:$0xff]  ;;  %v1498_v30 = vld [vmem:[%s2937_s6 + $0x1a0] sm:$0xff] }
  0x33   : > { %2619 = vmatmul.mubr.msk.bf16.gmra.mrb[4].mxu0 %vm530_vm0, %v2718_v31  ;;  %2651 = vmatmul.mubr.msk.bf16.gmra.mrb[4].mxu1 %vm530_vm0, %v2719_v32  ;;  %v1501_v31 = vld [vmem:[%s2937_s6 + $0x1b8] sm:$0xff]  ;;  %v1500_v32 = vld [vmem:[%s2937_s6 + $0x1b0] sm:$0xff] }
  0x34   : > { %2622 = vmatprep.mubr.msk.bf16.mxu0 %vm530_vm0, %v2720_v33  ;;  %2654 = vmatprep.mubr.msk.bf16.mxu1 %vm530_vm0, %v2721_v34  ;;  %v1503_v33 = vld [vmem:[%s2937_s6 + $0x1c8] sm:$0xff]  ;;  %v1502_v34 = vld [vmem:[%s2937_s6 + $0x1c0] sm:$0xff] }
  0x36   : > { %1597 = vperm.xlu1 %2704, %v1463_v35   ;;  %1592 = vperm.xlu0 %2703, %v1462_v36   ;;  %v1505_v35 = vld [vmem:[%s2937_s6 + $0x1d8] sm:$0xff]  ;;  %v1504_v36 = vld [vmem:[%s2937_s6 + $0x1d0] sm:$0xff] }
  0x3a   : > { %1607 = vperm.xlu1 %2704, %v1465_v37   ;;  %1602 = vperm.xlu0 %2703, %v1464_v38   ;;  %v1507_v37 = vld [vmem:[%s2937_s6 + $0x1e8] sm:$0xff]  ;;  %v1506_v38 = vld [vmem:[%s2937_s6 + $0x1e0] sm:$0xff] }
  0x3b   : > { %2623 = vmatmul.mubr.msk.bf16.gmra.mrb[8].mxu0 %vm530_vm0, %v2722_v39  ;;  %2655 = vmatmul.mubr.msk.bf16.gmra.mrb[8].mxu1 %vm530_vm0, %v2723_v40  ;;  %v1509_v39 = vld [vmem:[%s2937_s6 + $0x1f8] sm:$0xff]  ;;  %v1508_v40 = vld [vmem:[%s2937_s6 + $0x1f0] sm:$0xff] }
  0x3c   : > { %2626 = vmatprep.mubr.msk.bf16.mxu0 %vm530_vm0, %v2724_v41  ;;  %2658 = vmatprep.mubr.msk.bf16.mxu1 %vm530_vm0, %v2725_v42 }
  0x3e   : > { %1617 = vperm.xlu1 %2704, %v1467_v43   ;;  %1612 = vperm.xlu0 %2703, %v1466_v44  }
  0x42   : > { %1627 = vperm.xlu1 %2704, %v1469_v45   ;;  %1622 = vperm.xlu0 %2703, %v1468_v46  }
  0x43   : > { %2627 = vmatmul.mubr.msk.bf16.gmra.mrb[12].mxu0 %vm530_vm0, %v2726_v47  ;;  %2659 = vmatmul.mubr.msk.bf16.gmra.mrb[12].mxu1 %vm530_vm0, %v2727_v48 }
  0x44   : > { %2630 = vmatprep.mubr.msk.bf16.mxu0 %vm530_vm0, %v2728_v49  ;;  %2662 = vmatprep.mubr.msk.bf16.mxu1 %vm530_vm0, %v2729_v50 }
  0x46   : > { %1637 = vperm.xlu1 %2704, %v1471_v51   ;;  %1632 = vperm.xlu0 %2703, %v1470_v52  }
  0x4a   : > { %1647 = vperm.xlu1 %2704, %v1473_v53   ;;  %1642 = vperm.xlu0 %2703, %v1472_v54  }
  0x4b   : > { %2631 = vmatmul.mubr.msk.bf16.gmra.mrb[16].mxu0 %vm530_vm0, %v2730_v55  ;;  %2663 = vmatmul.mubr.msk.bf16.gmra.mrb[16].mxu1 %vm530_vm0, %v2731_v56 }
  0x4c   : > { %2634 = vmatprep.mubr.msk.bf16.mxu0 %vm530_vm0, %v2732_v57  ;;  %2666 = vmatprep.mubr.msk.bf16.mxu1 %vm530_vm0, %v2733_v58 }
  0x4e   : > { %1657 = vperm.xlu1 %2704, %v1475_v59   ;;  %1652 = vperm.xlu0 %2703, %v1474_v60  }
  0x52   : > { %1667 = vperm.xlu1 %2704, %v1477_v61   ;;  %1662 = vperm.xlu0 %2703, %v1476_v62  }
  0x53   : > { %2635 = vmatmul.mubr.msk.bf16.gmra.mrb[20].mxu0 %vm530_vm0, %v2734_v63  ;;  %2667 = vmatmul.mubr.msk.bf16.gmra.mrb[20].mxu1 %vm530_vm0, %v2735_v0 }
  0x54   : > { %2638 = vmatprep.mubr.msk.bf16.mxu0 %vm530_vm0, %v2736_v1  ;;  %2670 = vmatprep.mubr.msk.bf16.mxu1 %vm530_vm0, %v2737_v2 }
  0x56   : > { %1677 = vperm.xlu1 %2704, %v1479_v3   ;;  %1672 = vperm.xlu0 %2703, %v1478_v4  }
  0x5a   : > { %1687 = vperm.xlu1 %2704, %v1481_v5   ;;  %1682 = vperm.xlu0 %2703, %v1480_v6   ;;  %v3147_v6 = vld [vmem:[%s4068_s2] ss:$0 sm:$0xff] }
  0x5b   : > { %2639 = vmatmul.mubr.msk.bf16.gmra.mrb[24].mxu0 %vm530_vm0, %v2738_v7  ;;  %2671 = vmatmul.mubr.msk.bf16.gmra.mrb[24].mxu1 %vm530_vm0, %v2739_v8 }
  0x5c   : > { %2642 = vmatprep.mubr.msk.bf16.mxu0 %vm530_vm0, %v2740_v9  ;;  %2674 = vmatprep.mubr.msk.bf16.mxu1 %vm530_vm0, %v2741_v10  ;;  %v3156_v10 = vld [vmem:[%s4069_s3] ss:$0 sm:$0xff] }
  0x5e   : > { %1697 = vperm.xlu1 %2704, %v1483_v11   ;;  %1692 = vperm.xlu0 %2703, %v1482_v12  }
  0x62   : > { %1707 = vperm.xlu1 %2704, %v1485_v13   ;;  %1702 = vperm.xlu0 %2703, %v1484_v14  }
  0x63   : > { %2643 = vmatmul.mubr.msk.bf16.gmra.mrb[28].mxu0 %vm530_vm0, %v2742_v15  ;;  %2675 = vmatmul.mubr.msk.bf16.gmra.mrb[28].mxu1 %vm530_vm0, %v2743_v16 }
  0x66   : > { %1717 = vperm.xlu1 %2704, %v1487_v17   ;;  %1712 = vperm.xlu0 %2703, %v1486_v18  }
  0x6a   : > { %1727 = vperm.xlu1 %2704, %v1489_v19   ;;  %1722 = vperm.xlu0 %2703, %v1488_v20  }
  0x6e   : > { %1737 = vperm.xlu1 %2704, %v1491_v21   ;;  %1732 = vperm.xlu0 %2703, %v1490_v22  }
  0x72   : > { %1747 = vperm.xlu1 %2704, %v1493_v23   ;;  %1742 = vperm.xlu0 %2703, %v1492_v24  }
  0x76   : > { %1757 = vperm.xlu1 %2704, %v1495_v25   ;;  %1752 = vperm.xlu0 %2703, %v1494_v26  }
  0x7a   : > { %1767 = vperm.xlu1 %2704, %v1497_v27   ;;  %1762 = vperm.xlu0 %2703, %v1496_v28  }
  0x7e   : > { %1777 = vperm.xlu1 %2704, %v1499_v29   ;;  %1772 = vperm.xlu0 %2703, %v1498_v30  }
  0x82   : > { %1787 = vperm.xlu1 %2704, %v1501_v31   ;;  %1782 = vperm.xlu0 %2703, %v1500_v32  }
  0x86   : > { %1797 = vperm.xlu1 %2704, %v1503_v33   ;;  %1792 = vperm.xlu0 %2703, %v1502_v34  }
  0x8a   : > { %1807 = vperm.xlu1 %2704, %v1505_v35   ;;  %1802 = vperm.xlu0 %2703, %v1504_v36  }
  0x8e   : > { %1817 = vperm.xlu1 %2704, %v1507_v37   ;;  %1812 = vperm.xlu0 %2703, %v1506_v38  }
  0x92   : > { %1827 = vperm.xlu1 %2704, %v1509_v39   ;;  %1822 = vperm.xlu0 %2703, %v1508_v40  }
  0x95   : > { %v3086_v41 = vpop.permute.xlu0 %1512  ;;  %v3088_v42 = vpop.permute.xlu1 %1522 }
  0x99   : > { %v3090_v43 = vpop.permute.xlu0 %1517  ;;  %v3092_v44 = vpop.permute.xlu1 %1527 }
  0x9d   : > { %v3094_v45 = vpop.permute.xlu0 %1532  ;;  %v3096_v46 = vpop.permute.xlu1 %1537 }
  0xa1   : > { %v3098_v47 = vpop.permute.xlu0 %1542  ;;  %v3100_v48 = vpop.permute.xlu1 %1547 }
  0xa5   : > { %v3102_v49 = vpop.permute.xlu0 %1552  ;;  %v3104_v50 = vpop.permute.xlu1 %1557 }
  0xa9   : > { %v3106_v51 = vpop.permute.xlu0 %1562  ;;  %v3108_v52 = vpop.permute.xlu1 %1567 }
  0xad   : > { %v3110_v53 = vpop.permute.xlu0 %1572  ;;  %v3112_v54 = vpop.permute.xlu1 %1577 }
  0xb1   : > { %v3114_v55 = vpop.permute.xlu0 %1582  ;;  %v3116_v56 = vpop.permute.xlu1 %1587 }
  0xb5   : > { %v3118_v57 = vpop.permute.xlu0 %1592  ;;  %v3120_v58 = vpop.permute.xlu1 %1597 }
  0xb6   : > { %4072 = vst [vmem:[#allocation2_spill] sm:$0xff] %v3120_v58 }
  0xb9   : > { %v3122_v59 = vpop.permute.xlu0 %1602  ;;  %v3124_v60 = vpop.permute.xlu1 %1607 }
  0xba   : > { %4073 = vst [vmem:[#allocation3_spill] sm:$0xff] %v3124_v60 }
  0xbd   : > { %v3126_v61 = vpop.permute.xlu0 %1612  ;;  %v3128_v62 = vpop.permute.xlu1 %1617 }
  0xbe   : > { %4074 = vst [vmem:[#allocation4_spill] sm:$0xff] %v3126_v61  ;;  %4075 = vst [vmem:[#allocation5_spill] sm:$0xff] %v3128_v62 }
  0xc1   : > { %v3130_v63 = vpop.permute.xlu0 %1622  ;;  %v3132_v0 = vpop.permute.xlu1 %1627 }
  0xc2   : > { %4076 = vst [vmem:[#allocation6_spill] sm:$0xff] %v3130_v63  ;;  %4077 = vst [vmem:[#allocation7_spill] sm:$0xff] %v3132_v0 }
  0xc5   : > { %v3134_v1 = vpop.permute.xlu0 %1632  ;;  %v3136_v2 = vpop.permute.xlu1 %1637 }
  0xc6   : > { %4078 = vst [vmem:[#allocation8_spill] sm:$0xff] %v3134_v1  ;;  %4079 = vst [vmem:[#allocation9_spill] sm:$0xff] %v3136_v2 }
  0xc9   : > { %v3138_v3 = vpop.permute.xlu0 %1642  ;;  %v3140_v4 = vpop.permute.xlu1 %1647 }
  0xca   : > { %4080 = vst [vmem:[#allocation10_spill] sm:$0xff] %v3138_v3  ;;  %4081 = vst [vmem:[#allocation11_spill] sm:$0xff] %v3140_v4 }
  0xcd   : > { %v3142_v5 = vpop.permute.xlu0 %1652  ;;  %v3149_v7 = vpop.permute.xlu1 %1657 }
  0xce   : > { %4082 = vst [vmem:[#allocation12_spill] sm:$0xff] %v3142_v5  ;;  %4083 = vst [vmem:[#allocation13_spill] sm:$0xff] %v3149_v7 }
  0xd1   : > { %v3151_v8 = vpop.permute.xlu0 %1662  ;;  %v3180_v32 = vpop.permute.xlu1 %1667 }
  0xd2   : > { %4084 = vst [vmem:[#allocation14_spill] sm:$0xff] %v3151_v8  ;;  %4085 = vst [vmem:[#allocation15_spill] sm:$0xff] %v3180_v32 }
  0xd5   : > { %v3182_v33 = vpop.permute.xlu0 %1672 }
  0xfe   : > { %v2616_v9 = vpop.f32.mrb[0].mxu0  ;;  %v2648_v11 = vpop.f32.mrb[0].mxu1 }
  0xff   : > { %v929_v12 = vmul.f32 %v2616_v9, %v3147_v6  ;;  %v961_v13 = vmul.f32 %v2648_v11, %v3147_v6  ;;  %v665_v14 = vpop.f32.mrb[1].mxu0  ;;  %v793_v15 = vpop.f32.mrb[1].mxu1 }
 0x100   : > { %v927_v16 = vmul.f32 %v3147_v6, %v665_v14  ;;  %v959_v17 = vmul.f32 %v3147_v6, %v793_v15  ;;  %v2617_v18 = vpop.f32.mrb[2].mxu0  ;;  %v2649_v19 = vpop.f32.mrb[2].mxu1 }
 0x101   : > { %v3163_v20 = vadd.f32 %v3156_v10, %v929_v12  ;;  %v3166_v21 = vadd.f32 %v3156_v10, %v961_v13  ;;  %v930_v22 = vmul.f32 %v2617_v18, %v3147_v6  ;;  %v962_v23 = vmul.f32 %v2649_v19, %v3147_v6  ;;  %v668_v26 = vpop.f32.mrb[3].mxu0  ;;  %v796_v27 = vpop.f32.mrb[3].mxu1 }
 0x102   : > { %v3171_v24 = vadd.f32 %v3156_v10, %v927_v16  ;;  %v3174_v25 = vadd.f32 %v3156_v10, %v959_v17  ;;  %v928_v40 = vmul.f32 %v3147_v6, %v668_v26  ;;  %v960_v9 = vmul.f32 %v3147_v6, %v796_v27 }
 0x103   : > { %v1128_v28 = vmin.f32 %v3163_v20, 0.0  ;;  %v1160_v29 = vmin.f32 %v3166_v21, 0.0  ;;  %v3185_v36 = vadd.f32 %v3156_v10, %v930_v22  ;;  %v3188_v37 = vadd.f32 %v3156_v10, %v962_v23 }
 0x104   : > { %v1126_v30 = vmin.f32 %v3171_v24, 0.0  ;;  %v1158_v31 = vmin.f32 %v3174_v25, 0.0  ;;  %v3195_v17 = vadd.f32 %v3156_v10, %v928_v40  ;;  %v3198_v18 = vadd.f32 %v3156_v10, %v960_v9  ;;  %v3217_v9 = vpop.permute.xlu1 %1677 }
 0x105   : > { %v1194_v34 = vmul.f32 1.442695, %v1128_v28  ;;  %v1258_v35 = vmul.f32 1.442695, %v1160_v29  ;;  %v1129_v13 = vmin.f32 %v3185_v36, 0.0  ;;  %v1161_v16 = vmin.f32 %v3188_v37, 0.0 }
 0x106   : > { %v1190_v38 = vmul.f32 1.442695, %v1126_v30  ;;  %v1254_v39 = vmul.f32 1.442695, %v1158_v31  ;;  %v2620_v11 = vpop.f32.mrb[4].mxu0  ;;  %v2652_v12 = vpop.f32.mrb[4].mxu1 }
 0x107   : > { %2744 = vpow2.f32 %v1194_v34  ;;  %v681_v14 = vpop.f32.mrb[5].mxu0  ;;  %v809_v15 = vpop.f32.mrb[5].mxu1  ;;  %v1196_v23 = vmul.f32 1.442695, %v1129_v13  ;;  %v933_v26 = vmul.f32 %v2620_v11, %v3147_v6  ;;  %v965_v27 = vmul.f32 %v2652_v12, %v3147_v6 }
 0x108   : > { %2746 = vpow2.f32 %v1258_v35  ;;  %v2621_v19 = vpop.f32.mrb[6].mxu0  ;;  %v2653_v22 = vpop.f32.mrb[6].mxu1  ;;  %v1260_v28 = vmul.f32 1.442695, %v1161_v16  ;;  %v1127_v29 = vmin.f32 %v3195_v17, 0.0  ;;  %vm1064_vm2 = vcmp.gt.f32.partialorder %v3163_v20, 0.0 }
 0x109   : > { %2748 = vpow2.f32 %v1190_v38  ;;  %v3203_v30 = vpop.f32.mrb[7].mxu0  ;;  %v3205_v31 = vpop.f32.mrb[7].mxu1  ;;  %v1159_v34 = vmin.f32 %v3198_v18, 0.0  ;;  %v3210_v35 = vadd.f32 %v3156_v10, %v933_v26  ;;  %vm1096_vm3 = vcmp.gt.f32.partialorder %v3166_v21, 0.0 }
 0x10a   : > { %2750 = vpow2.f32 %v1254_v39  ;;  %v1192_v38 = vmul.f32 1.442695, %v1127_v29  ;;  %v3214_v39 = vadd.f32 %v3156_v10, %v965_v27  ;;  %v931_v40 = vmul.f32 %v3147_v6, %v681_v14  ;;  %v1683_v11 = vpop.permute.xlu0 %1682  ;;  %v1688_v61 = vpop.permute.xlu1 %1687 }
 0x10b   : > { %2752 = vpow2.f32 %v1196_v23  ;;  %vm1062_vm4 = vcmp.gt.f32.partialorder %v3171_v24, 0.0  ;;  %v1256_v12 = vmul.f32 1.442695, %v1159_v34  ;;  %v1132_v13 = vmin.f32 %v3210_v35, 0.0 }
 0x10c   : > { %2754 = vpow2.f32 %v1260_v28  ;;  %v963_v16 = vmul.f32 %v3147_v6, %v809_v15  ;;  %vm1094_vm6 = vcmp.gt.f32.partialorder %v3174_v25, 0.0  ;;  %v1164_v23 = vmin.f32 %v3214_v39, 0.0 }
 0x10d   : > { %2756 = vpow2.f32 %v1192_v38  ;;  %v3225_v26 = vadd.f32 %v3156_v10, %v931_v40  ;;  %v1202_v28 = vmul.f32 1.442695, %v1132_v13  ;;  %v934_v15 = vmul.f32 %v2621_v19, %v3147_v6 }
 0x10e   : > { %v3227_v14 = vpop.f32.mrb[8].mxu0  ;;  %v3229_v27 = vpop.f32.mrb[8].mxu1  ;;  %2758 = vpow2.f32 %v1256_v12  ;;  %v3232_v29 = vadd.f32 %v3156_v10, %v963_v16  ;;  %vm1065_vm7 = vcmp.gt.f32.partialorder %v3185_v36, 0.0  ;;  %v1266_v38 = vmul.f32 1.442695, %v1164_v23 }
 0x10f   : > { %v3235_v34 = vpop.f32.mrb[9].mxu0  ;;  %v3237_v7 = vpop.f32.mrb[9].mxu1  ;;  %v1130_v40 = vmin.f32 %v3225_v26, 0.0  ;;  %v966_v32 = vmul.f32 %v2653_v22, %v3147_v6  ;;  %vm1097_vm8 = vcmp.gt.f32.partialorder %v3188_v37, 0.0  ;;  %2760 = vpow2.f32 %v1202_v28 }
 0x110   : > { %v3242_v5 = vpop.f32.mrb[10].mxu0  ;;  %v3244_v12 = vpop.f32.mrb[10].mxu1  ;;  %v1162_v19 = vmin.f32 %v3232_v29, 0.0  ;;  %v3249_v16 = vadd.f32 %v3156_v10, %v934_v15  ;;  %vm1063_vm9 = vcmp.gt.f32.partialorder %v3195_v17, 0.0  ;;  %2762 = vpow2.f32 %v1266_v38 }
 0x111   : > { %v2745_v13 = vpop.eup %2744  ;;  %v1198_v23 = vmul.f32 1.442695, %v1130_v40  ;;  %v3252_v22 = vpop.f32.mrb[11].mxu0  ;;  %vm1095_vm10 = vcmp.gt.f32.partialorder %v3198_v18, 0.0  ;;  %v3262_v38 = vadd.f32 %v3156_v10, %v966_v32  ;;  %vm1068_vm11 = vcmp.gt.f32.partialorder %v3210_v35, 0.0 }
 0x112   : > { %v2747_v8 = vpop.eup %2746  ;;  %v2369_v2 = vadd.f32 -1.0, %v2745_v13  ;;  %v3254_v4 = vpop.f32.mrb[11].mxu1  ;;  %v1262_v28 = vmul.f32 1.442695, %v1162_v19  ;;  %v1133_v62 = vmin.f32 %v3249_v16, 0.0  ;;  %vm1100_vm12 = vcmp.gt.f32.partialorder %v3214_v39, 0.0 }
 0x113   : > { %v2749_v1 = vpop.eup %2748  ;;  %v2401_v3 = vadd.f32 -1.0, %v2747_v8  ;;  %2764 = vpow2.f32 %v1198_v23  ;;  %v3264_v63 = vpop.permute.xlu0 %1692  ;;  %vm1066_vm13 = vcmp.gt.f32.partialorder %v3225_v26, 0.0  ;;  %vm1098_vm14 = vcmp.gt.f32.partialorder %v3232_v29, 0.0 }
 0x114   : > { %v2751_v15 = vpop.eup %2750  ;;  %v1384_v13 = vsel %vm1064_vm2, %v3163_v20, %v2369_v2  ;;  %v2367_v0 = vadd.f32 -1.0, %v2749_v1  ;;  %2766 = vpow2.f32 %v1262_v28  ;;  %vm1069_vm15 = vcmp.gt.f32.partialorder %v3249_v16, 0.0 }
 0x115   : > { %v2753_v40 = vpop.eup %2752  ;;  %v1832_v8 = vmul.f32 %v3088_v42, %v1384_v13  ;;  %v1416_v19 = vsel %vm1096_vm3, %v3166_v21, %v2401_v3  ;;  %v2399_v58 = vadd.f32 -1.0, %v2751_v15  ;;  %v1204_v3 = vmul.f32 1.442695, %v1133_v62 }
 0x116   : > { %v2755_v2 = vpop.eup %2754  ;;  %v1864_v1 = vmul.f32 %v1683_v11, %v1416_v19  ;;  %v1382_v42 = vsel %vm1062_vm4, %v3171_v24, %v2367_v0  ;;  %v2370_v20 = vadd.f32 -1.0, %v2753_v40  ;;  %v3282_v21 = vpop.f32.mrb[12].mxu0  ;;  %vm1101_vm0 = vcmp.gt.f32.partialorder %v3262_v38, 0.0 }
 0x117   : > { %v3284_v32 = vpop.f32.mrb[12].mxu1  ;;  %v2499_v23 = vpack.c.bf16 %v1832_v8, %v1832_v8  ;;  %v1830_v28 = vmul.f32 %v3086_v41, %v1382_v42  ;;  %v1414_v11 = vsel %vm1094_vm6, %v3174_v25, %v2399_v58  ;;  %v2402_v15 = vadd.f32 -1.0, %v2755_v2  ;;  %v3290_v13 = vpop.f32.mrb[13].mxu0 }
 0x118   : > { %v3292_v0 = vpop.f32.mrb[13].mxu1  ;;  %v2757_v24 = vpop.eup %2756  ;;  %v2531_v62 = vpack.c.bf16 %v1864_v1, %v1864_v1  ;;  %v1862_v40 = vmul.f32 %v3182_v33, %v1414_v11  ;;  %v1385_v8 = vsel %vm1065_vm7, %v3185_v36, %v2370_v20  ;;  %2768 = vpow2.f32 %v1204_v3 }
 0x119   : > { %v3299_v41 = vpop.f32.mrb[14].mxu0  ;;  %v3301_v58 = vpop.f32.mrb[14].mxu1  ;;  %2153 = vst.msk [vmem:[%s3276_s26 + $0x8] sm:$0xf] %vm2150_vm5, %v2499_v23  ;;  %v2497_v19 = vpack.c.bf16 %v1830_v28, %v1830_v28  ;;  %v1833_v2 = vmul.f32 %v3092_v44, %v1385_v8  ;;  %v1417_v33 = vsel %vm1097_vm8, %v3188_v37, %v2402_v15  ;;  %v2368_v36 = vadd.f32 -1.0, %v2757_v24 }
 0x11a   : > { %v2759_v25 = vpop.eup %2758  ;;  %v3309_v1 = vpop.f32.mrb[15].mxu0  ;;  %2185 = vst.msk [vmem:[%s3276_s26 + $0x88] sm:$0xf] %vm2150_vm5, %v2531_v62  ;;  %v2529_v20 = vpack.c.bf16 %v1862_v40, %v1862_v40  ;;  %v1865_v3 = vmul.f32 %v1688_v61, %v1417_v33  ;;  %v1165_v23 = vmin.f32 %v3262_v38, 0.0  ;;  %v932_v15 = vmul.f32 %v3147_v6, %v3203_v30 }
 0x11b   : > { %v3311_v42 = vpop.f32.mrb[15].mxu1  ;;  %v2400_v11 = vadd.f32 -1.0, %v2759_v25  ;;  %v2761_v28 = vpop.eup %2760  ;;  %2151 = vst.msk [vmem:[%s3276_s26] sm:$0xf] %vm2150_vm5, %v2497_v19  ;;  %v2500_v44 = vpack.c.bf16 %v1833_v2, %v1833_v2  ;;  %v1383_v37 = vsel %vm1063_vm9, %v3195_v17, %v2368_v36  ;;  %v964_v24 = vmul.f32 %v3147_v6, %v3205_v31 }
 0x11c   : > { %v2763_v61 = vpop.eup %2762  ;;  %2183 = vst.msk [vmem:[%s3276_s26 + $0x80] sm:$0xf] %vm2150_vm5, %v2529_v20  ;;  %v2532_v62 = vpack.c.bf16 %v1865_v3, %v1865_v3  ;;  %v1831_v40 = vmul.f32 %v3090_v43, %v1383_v37  ;;  %v2373_v25 = vadd.f32 -1.0, %v2761_v28  ;;  %v1703_v19 = vpop.permute.xlu0 %1702  ;;  %v1268_v2 = vmul.f32 1.442695, %v1165_v23 }
 0x11d   : > { %v1415_v8 = vsel %vm1095_vm10, %v3198_v18, %v2400_v11  ;;  %2154 = vst.msk [vmem:[%s3276_s26 + $0xc] sm:$0xf] %vm2150_vm5, %v2500_v44  ;;  %v2405_v30 = vadd.f32 -1.0, %v2763_v61  ;;  %v3335_v31 = vadd.f32 %v3156_v10, %v932_v15  ;;  %v2765_v33 = vpop.eup %2764  ;;  %v3343_v36 = vadd.f32 %v3156_v10, %v964_v24 }
 0x11e   : > { %v1863_v17 = vmul.f32 %v3217_v9, %v1415_v8  ;;  %2186 = vst.msk [vmem:[%s3276_s26 + $0x8c] sm:$0xf] %vm2150_vm5, %v2532_v62  ;;  %v2498_v43 = vpack.c.bf16 %v1831_v40, %v1831_v40  ;;  %v1388_v18 = vsel %vm1068_vm11, %v3210_v35, %v2373_v25  ;;  %v937_v9 = vmul.f32 %v3227_v14, %v3147_v6  ;;  %v3347_v20 = vpop.f32.mrb[16].mxu0  ;;  %v3349_v3 = vpop.f32.mrb[16].mxu1 }
 0x11f   : > { %v2767_v11 = vpop.eup %2766  ;;  %v1836_v28 = vmul.f32 %v3098_v47, %v1388_v18  ;;  %v1420_v44 = vsel %vm1100_vm12, %v3214_v39, %v2405_v30  ;;  %v2371_v35 = vadd.f32 -1.0, %v2765_v33  ;;  %v3355_v37 = vpop.f32.mrb[17].mxu0  ;;  %2770 = vpow2.f32 %v1268_v2 }
 0x120   : > { %v2530_v23 = vpack.c.bf16 %v1863_v17, %v1863_v17  ;;  %v3357_v15 = vpop.f32.mrb[17].mxu1  ;;  %2152 = vst.msk [vmem:[%s3276_s26 + $0x4] sm:$0xf] %vm2150_vm5, %v2498_v43  ;;  %v1868_v14 = vmul.f32 %v1703_v19, %v1420_v44  ;;  %v2403_v24 = vadd.f32 -1.0, %v2767_v11  ;;  %v3362_v61 = vpop.f32.mrb[18].mxu0  ;;  %v1131_v40 = vmin.f32 %v3335_v31, 0.0 }
 0x121   : > { %v3364_v47 = vpop.f32.mrb[18].mxu1  ;;  %v2503_v39 = vpack.c.bf16 %v1836_v28, %v1836_v28  ;;  %v1386_v62 = vsel %vm1066_vm13, %v3225_v26, %v2371_v35  ;;  %v3373_v8 = vpop.f32.mrb[19].mxu0  ;;  %v1163_v33 = vmin.f32 %v3343_v36, 0.0  ;;  %v3384_v11 = vadd.f32 %v3156_v10, %v937_v9 }
 0x122   : > { %2184 = vst.msk [vmem:[%s3276_s26 + $0x84] sm:$0xf] %vm2150_vm5, %v2530_v23  ;;  %v3375_v25 = vpop.f32.mrb[19].mxu1  ;;  %v2769_v19 = vpop.eup %2768  ;;  %v2535_v17 = vpack.c.bf16 %v1868_v14, %v1868_v14  ;;  %v1834_v30 = vmul.f32 %v3094_v45, %v1386_v62  ;;  %v1418_v2 = vsel %vm1098_vm14, %v3232_v29, %v2403_v24  ;;  %v1200_v18 = vmul.f32 1.442695, %v1131_v40 }
 0x123   : > { %2157 = vst.msk [vmem:[%s3276_s26 + $0x18] sm:$0xf] %vm2150_vm5, %v2503_v39  ;;  %v1866_v26 = vmul.f32 %v3264_v63, %v1418_v2  ;;  %v2374_v43 = vadd.f32 -1.0, %v2769_v19  ;;  %v1264_v28 = vmul.f32 1.442695, %v1163_v33  ;;  %v969_v45 = vmul.f32 %v3229_v27, %v3147_v6  ;;  %v3392_v44 = vpop.permute.xlu1 %1697 }
 0x124   : > { %2189 = vst.msk [vmem:[%s3276_s26 + $0x98] sm:$0xf] %vm2150_vm5, %v2535_v17  ;;  %v2501_v23 = vpack.c.bf16 %v1834_v30, %v1834_v30  ;;  %v935_v29 = vmul.f32 %v3147_v6, %v3235_v34  ;;  %2772 = vpow2.f32 %v1200_v18  ;;  %v1136_v14 = vmin.f32 %v3384_v11, 0.0 }
 0x125   : > { %v2533_v35 = vpack.c.bf16 %v1866_v26, %v1866_v26  ;;  %v1389_v63 = vsel %vm1069_vm15, %v3249_v16, %v2374_v43  ;;  %2774 = vpow2.f32 %v1264_v28  ;;  %v3402_v27 = vadd.f32 %v3156_v10, %v969_v45 }
 0x126   : > { %2155 = vst.msk [vmem:[%s3276_s26 + $0x10] sm:$0xf] %vm2150_vm5, %v2501_v23  ;;  %v1837_v9 = vmul.f32 %v3100_v48, %v1389_v63  ;;  %v3404_v24 = vpop.f32.mrb[20].mxu0  ;;  %v3406_v34 = vpop.f32.mrb[20].mxu1  ;;  %v3411_v39 = vadd.f32 %v3156_v10, %v935_v29  ;;  %v967_v16 = vmul.f32 %v3147_v6, %v3237_v7  ;;  %v938_v48 = vmul.f32 %v3242_v5, %v3147_v6 }
 0x127   : > { %2187 = vst.msk [vmem:[%s3276_s26 + $0x90] sm:$0xf] %vm2150_vm5, %v2533_v35  ;;  %v970_v62 = vmul.f32 %v3244_v12, %v3147_v6  ;;  %v3419_v40 = vpop.f32.mrb[21].mxu0  ;;  %v3421_v19 = vpop.f32.mrb[21].mxu1  ;;  %v1210_v30 = vmul.f32 1.442695, %v1136_v14  ;;  %v936_v29 = vmul.f32 %v3147_v6, %v3252_v22 }
 0x128   : > { %v2504_v17 = vpack.c.bf16 %v1837_v9, %v1837_v9  ;;  %v1168_v2 = vmin.f32 %v3402_v27, 0.0  ;;  %v3424_v33 = vpop.f32.mrb[22].mxu0  ;;  %v3426_v26 = vpop.f32.mrb[22].mxu1  ;;  %v1134_v7 = vmin.f32 %v3411_v39, 0.0  ;;  %v3430_v43 = vadd.f32 %v3156_v10, %v967_v16 }
 0x129   : > { %v3433_v5 = vadd.f32 %v3156_v10, %v938_v48  ;;  %v3435_v12 = vpop.f32.mrb[23].mxu0  ;;  %v3437_v18 = vpop.f32.mrb[23].mxu1  ;;  %2776 = vpow2.f32 %v1210_v30  ;;  %v3442_v45 = vadd.f32 %v3156_v10, %v970_v62  ;;  %vm1067_vm1 = vcmp.gt.f32.partialorder %v3335_v31, 0.0 }
 0x12a   : > { %4086 = vst [vmem:[#allocation16_spill] sm:$0xff] %v3437_v18  ;;  %v2771_v23 = vpop.eup %2770  ;;  %2158 = vst.msk [vmem:[%s3276_s26 + $0x1c] sm:$0xf] %vm2150_vm5, %v2504_v17  ;;  %v1274_v28 = vmul.f32 1.442695, %v1168_v2  ;;  %v1166_v9 = vmin.f32 %v3430_v43, 0.0  ;;  %v1708_v16 = vpop.permute.xlu1 %1707 }
 0x12b   : > { %v2406_v35 = vadd.f32 -1.0, %v2771_v23  ;;  %v1206_v63 = vmul.f32 1.442695, %v1134_v7  ;;  %vm1099_vm2 = vcmp.gt.f32.partialorder %v3343_v36, 0.0  ;;  %v1137_v14 = vmin.f32 %v3433_v5, 0.0  ;;  %v3451_v48 = vpop.permute.xlu0 %1712 }
 0x12c   : > { %2778 = vpow2.f32 %v1274_v28  ;;  %v1270_v22 = vmul.f32 1.442695, %v1166_v9  ;;  %v1169_v17 = vmin.f32 %v3442_v45, 0.0  ;;  %vm1072_vm3 = vcmp.gt.f32.partialorder %v3384_v11, 0.0 }
 0x12d   : > { %v1421_v62 = vsel %vm1101_vm0, %v3262_v38, %v2406_v35  ;;  %2780 = vpow2.f32 %v1206_v63  ;;  %v1212_v2 = vmul.f32 1.442695, %v1137_v14  ;;  %v3457_v7 = vadd.f32 %v3156_v10, %v936_v29 }
 0x12e   : > { %v1869_v30 = vmul.f32 %v1708_v16, %v1421_v62  ;;  %v968_v23 = vmul.f32 %v3147_v6, %v3254_v4  ;;  %v3461_v28 = vpop.f32.mrb[24].mxu0  ;;  %v3463_v18 = vpop.f32.mrb[24].mxu1  ;;  %2782 = vpow2.f32 %v1270_v22  ;;  %v1276_v38 = vmul.f32 1.442695, %v1169_v17 }
 0x12f   : > { %4087 = vst [vmem:[#allocation17_spill] sm:$0xff] %v3463_v18  ;;  %v2773_v60 = vpop.eup %2772  ;;  %v941_v35 = vmul.f32 %v3282_v21, %v3147_v6  ;;  %v973_v63 = vmul.f32 %v3284_v32, %v3147_v6  ;;  %v3469_v9 = vpop.f32.mrb[25].mxu0  ;;  %vm1104_vm4 = vcmp.gt.f32.partialorder %v3402_v27, 0.0  ;;  %2784 = vpow2.f32 %v1212_v2 }
 0x130   : > { %4088 = vst [vmem:[#allocation18_spill] sm:$0xff] %v3469_v9  ;;  %v3471_v29 = vpop.f32.mrb[25].mxu1  ;;  %v2775_v14 = vpop.eup %2774  ;;  %v2536_v4 = vpack.c.bf16 %v1869_v30, %v1869_v30  ;;  %v2372_v16 = vadd.f32 -1.0, %v2773_v60  ;;  %2786 = vpow2.f32 %v1276_v38  ;;  %v1135_v21 = vmin.f32 %v3457_v7, 0.0 }
 0x131   : > { %4089 = vst [vmem:[#allocation19_spill] sm:$0xff] %v3471_v29  ;;  %v3474_v62 = vpop.f32.mrb[26].mxu0  ;;  %v3476_v22 = vpop.f32.mrb[26].mxu1  ;;  %v2404_v17 = vadd.f32 -1.0, %v2775_v14  ;;  %v3480_v32 = vadd.f32 %v3156_v10, %v968_v23  ;;  %vm1070_vm6 = vcmp.gt.f32.partialorder %v3411_v39, 0.0  ;;  %v3493_v30 = vadd.f32 %v3156_v10, %v941_v35 }
 0x132   : > { %4090 = vst [vmem:[#allocation20_spill] sm:$0xff] %v3474_v62  ;;  %4091 = vst [vmem:[#allocation21_spill] sm:$0xff] %v3476_v22  ;;  %v3482_v9 = vpop.f32.mrb[27].mxu0  ;;  %v3484_v29 = vpop.f32.mrb[27].mxu1  ;;  %v1387_v60 = vsel %vm1067_vm1, %v3335_v31, %v2372_v16  ;;  %v3496_v2 = vadd.f32 %v3156_v10, %v973_v63  ;;  %v1208_v14 = vmul.f32 1.442695, %v1135_v21 }
 0x133   : > { %4092 = vst [vmem:[#allocation22_spill] sm:$0xff] %v3482_v9  ;;  %4093 = vst [vmem:[#allocation23_spill] sm:$0xff] %v3484_v29  ;;  %v1835_v23 = vmul.f32 %v3096_v46, %v1387_v60  ;;  %v1419_v38 = vsel %vm1099_vm2, %v3343_v36, %v2404_v17  ;;  %v2777_v29 = vpop.eup %2776  ;;  %vm1102_vm7 = vcmp.gt.f32.partialorder %v3430_v43, 0.0  ;;  %v1167_v35 = vmin.f32 %v3480_v32, 0.0  ;;  %v3508_v16 = vpop.permute.xlu1 %1717 }
 0x134   : > { %2190 = vst.msk [vmem:[%s3276_s26 + $0x9c] sm:$0xf] %vm2150_vm5, %v2536_v4  ;;  %v939_v4 = vmul.f32 %v3147_v6, %v3290_v13  ;;  %v1867_v31 = vmul.f32 %v3392_v44, %v1419_v38  ;;  %v1140_v63 = vmin.f32 %v3493_v30, 0.0  ;;  %v2377_v60 = vadd.f32 -1.0, %v2777_v29  ;;  %v1723_v13 = vpop.permute.xlu0 %1722 }
 0x135   : > { %v2502_v46 = vpack.c.bf16 %v1835_v23, %v1835_v23  ;;  %vm1073_vm8 = vcmp.gt.f32.partialorder %v3433_v5, 0.0  ;;  %2788 = vpow2.f32 %v1208_v14  ;;  %v1272_v21 = vmul.f32 1.442695, %v1167_v35 }
 0x136   : > { %v2779_v36 = vpop.eup %2778  ;;  %v2534_v17 = vpack.c.bf16 %v1867_v31, %v1867_v31  ;;  %v1218_v44 = vmul.f32 1.442695, %v1140_v63  ;;  %v1172_v38 = vmin.f32 %v3496_v2, 0.0  ;;  %v3512_v9 = vpop.f32.mrb[28].mxu0  ;;  %v1392_v29 = vsel %vm1072_vm3, %v3384_v11, %v2377_v60 }
 0x137   : > { %4094 = vst [vmem:[#allocation24_spill] sm:$0xff] %v3512_v9  ;;  %v2781_v22 = vpop.eup %2780  ;;  %2156 = vst.msk [vmem:[%s3276_s26 + $0x14] sm:$0xf] %vm2150_vm5, %v2502_v46  ;;  %v2409_v23 = vadd.f32 -1.0, %v2779_v36  ;;  %v3520_v14 = vadd.f32 %v3156_v10, %v939_v4  ;;  %v971_v31 = vmul.f32 %v3147_v6, %v3292_v0  ;;  %v3524_v35 = vpop.f32.mrb[28].mxu1  ;;  %v1840_v9 = vmul.f32 %v3106_v51, %v1392_v29 }
 0x138   : > { %v3526_v63 = vpop.f32.mrb[29].mxu0  ;;  %2188 = vst.msk [vmem:[%s3276_s26 + $0x94] sm:$0xf] %vm2150_vm5, %v2534_v17  ;;  %v2375_v46 = vadd.f32 -1.0, %v2781_v22  ;;  %2790 = vpow2.f32 %v1272_v21  ;;  %v1282_v62 = vmul.f32 1.442695, %v1172_v38  ;;  %v2783_v4 = vpop.eup %2782 }
 0x139   : > { %v3531_v18 = vpop.f32.mrb[29].mxu1  ;;  %v3533_v11 = vpop.f32.mrb[30].mxu0  ;;  %v1424_v0 = vsel %vm1104_vm4, %v3402_v27, %v2409_v23  ;;  %vm1105_vm9 = vcmp.gt.f32.partialorder %v3442_v45, 0.0  ;;  %2792 = vpow2.f32 %v1218_v44  ;;  %v1138_v60 = vmin.f32 %v3520_v14, 0.0 }
 0x13a   : > { %4095 = vst [vmem:[#allocation25_spill] sm:$0xff] %v3531_v18  ;;  %4096 = vst [vmem:[#allocation26_spill] sm:$0xff] %v3533_v11  ;;  %v3540_v36 = vpop.f32.mrb[30].mxu1  ;;  %v3542_v51 = vpop.f32.mrb[31].mxu0  ;;  %v2507_v17 = vpack.c.bf16 %v1840_v9, %v1840_v9  ;;  %v1872_v21 = vmul.f32 %v1723_v13, %v1424_v0  ;;  %v1390_v38 = vsel %vm1070_vm6, %v3411_v39, %v2375_v46  ;;  %v2407_v29 = vadd.f32 -1.0, %v2783_v4 }
 0x13b   : > { %4097 = vst [vmem:[#allocation27_spill] sm:$0xff] %v3542_v51  ;;  %v2785_v22 = vpop.eup %2784  ;;  %v3547_v11 = vpop.f32.mrb[31].mxu1  ;;  %v1838_v44 = vmul.f32 %v3102_v49, %v1390_v38  ;;  %2794 = vpow2.f32 %v1282_v62  ;;  %v1214_v18 = vmul.f32 1.442695, %v1138_v60  ;;  %v3556_v39 = vadd.f32 %v3156_v10, %v971_v31 }
 0x13c   : > { %v2787_v27 = vpop.eup %2786  ;;  %v2378_v23 = vadd.f32 -1.0, %v2785_v22  ;;  %2161 = vst.msk [vmem:[%s3276_s26 + $0x28] sm:$0xf] %vm2150_vm5, %v2507_v17  ;;  %v2539_v51 = vpack.c.bf16 %v1872_v21, %v1872_v21  ;;  %v1422_v9 = vsel %vm1102_vm7, %v3430_v43, %v2407_v29  ;;  %v1728_v62 = vpop.permute.xlu1 %1727  ;;  %vm1071_vm10 = vcmp.gt.f32.partialorder %v3457_v7, 0.0 }
 0x13d   : > { %v2410_v13 = vadd.f32 -1.0, %v2787_v27  ;;  %v2505_v46 = vpack.c.bf16 %v1838_v44, %v1838_v44  ;;  %v1870_v4 = vmul.f32 %v3451_v48, %v1422_v9  ;;  %2796 = vpow2.f32 %v1214_v18 }
 0x13e   : > { %v1393_v49 = vsel %vm1073_vm8, %v3433_v5, %v2378_v23  ;;  %2193 = vst.msk [vmem:[%s3276_s26 + $0xa8] sm:$0xf] %vm2150_vm5, %v2539_v51  ;;  %v1170_v31 = vmin.f32 %v3556_v39, 0.0  ;;  %v942_v60 = vmul.f32 %v3299_v41, %v3147_v6  ;;  %v940_v17 = vmul.f32 %v3147_v6, %v3309_v1 }
 0x13f   : > { %v1841_v0 = vmul.f32 %v3108_v52, %v1393_v49  ;;  %v1425_v43 = vsel %vm1105_vm9, %v3442_v45, %v2410_v13  ;;  %v2789_v48 = vpop.eup %2788  ;;  %2159 = vst.msk [vmem:[%s3276_s26 + $0x20] sm:$0xf] %vm2150_vm5, %v2505_v46  ;;  %v2537_v5 = vpack.c.bf16 %v1870_v4, %v1870_v4  ;;  %v974_v52 = vmul.f32 %v3301_v58, %v3147_v6  ;;  %v3587_v58 = vpop.permute.xlu0 %1732 }
 0x140   : > { %v1873_v18 = vmul.f32 %v1728_v62, %v1425_v43  ;;  %v2376_v22 = vadd.f32 -1.0, %v2789_v48  ;;  %v1278_v45 = vmul.f32 1.442695, %v1170_v31  ;;  %vm1103_vm11 = vcmp.gt.f32.partialorder %v3480_v32, 0.0 }
 0x141   : > { %v2508_v51 = vpack.c.bf16 %v1841_v0, %v1841_v0  ;;  %2191 = vst.msk [vmem:[%s3276_s26 + $0xa0] sm:$0xf] %vm2150_vm5, %v2537_v5  ;;  %v3582_v38 = vadd.f32 %v3156_v10, %v942_v60  ;;  %v3585_v41 = vadd.f32 %v3156_v10, %v974_v52  ;;  %vm1076_vm12 = vcmp.gt.f32.partialorder %v3493_v30, 0.0 }
 0x142   : > { %v2540_v21 = vpack.c.bf16 %v1873_v18, %v1873_v18  ;;  %v2791_v29 = vpop.eup %2790  ;;  %v1391_v1 = vsel %vm1071_vm10, %v3457_v7, %v2376_v22  ;;  %2798 = vpow2.f32 %v1278_v45  ;;  %v3596_v27 = vadd.f32 %v3156_v10, %v940_v17 }
 0x143   : > { %2162 = vst.msk [vmem:[%s3276_s26 + $0x2c] sm:$0xf] %vm2150_vm5, %v2508_v51  ;;  %v2793_v44 = vpop.eup %2792  ;;  %v1839_v23 = vmul.f32 %v3104_v50, %v1391_v1  ;;  %v2408_v9 = vadd.f32 -1.0, %v2791_v29  ;;  %v1141_v13 = vmin.f32 %v3582_v38, 0.0  ;;  %v972_v46 = vmul.f32 %v3147_v6, %v3311_v42  ;;  %v1743_v51 = vpop.permute.xlu0 %1742 }
 0x144   : > { %2194 = vst.msk [vmem:[%s3276_s26 + $0xac] sm:$0xf] %vm2150_vm5, %v2540_v21  ;;  %v2381_v4 = vadd.f32 -1.0, %v2793_v44  ;;  %vm1108_vm13 = vcmp.gt.f32.partialorder %v3496_v2, 0.0  ;;  %v1173_v7 = vmin.f32 %v3585_v41, 0.0  ;;  %v945_v49 = vmul.f32 %v3347_v20, %v3147_v6 }
 0x145   : > { %v2795_v62 = vpop.eup %2794  ;;  %v2506_v0 = vpack.c.bf16 %v1839_v23, %v1839_v23  ;;  %v1423_v50 = vsel %vm1103_vm11, %v3480_v32, %v2408_v9  ;;  %v1220_v43 = vmul.f32 1.442695, %v1141_v13  ;;  %v1139_v31 = vmin.f32 %v3596_v27, 0.0 }
 0x146   : > { %v1871_v48 = vmul.f32 %v3508_v16, %v1423_v50  ;;  %v1396_v42 = vsel %vm1076_vm12, %v3493_v30, %v2381_v4  ;;  %v2413_v5 = vadd.f32 -1.0, %v2795_v62  ;;  %v1284_v18 = vmul.f32 1.442695, %v1173_v7  ;;  %v3657_v62 = vpop.permute.xlu1 %1737 }
 0x147   : > { %v2797_v60 = vpop.eup %2796  ;;  %2160 = vst.msk [vmem:[%s3276_s26 + $0x24] sm:$0xf] %vm2150_vm5, %v2506_v0  ;;  %v1844_v20 = vmul.f32 %v3114_v55, %v1396_v42  ;;  %2800 = vpow2.f32 %v1220_v43  ;;  %v1216_v52 = vmul.f32 1.442695, %v1139_v31  ;;  %v3620_v32 = vadd.f32 %v3156_v10, %v972_v46 }
 0x148   : > { %v2538_v16 = vpack.c.bf16 %v1871_v48, %v1871_v48  ;;  %v1428_v30 = vsel %vm1108_vm13, %v3496_v2, %v2413_v5  ;;  %v2379_v22 = vadd.f32 -1.0, %v2797_v60  ;;  %2802 = vpow2.f32 %v1284_v18 }
 0x149   : > { %v2511_v45 = vpack.c.bf16 %v1844_v20, %v1844_v20  ;;  %v1876_v17 = vmul.f32 %v1743_v51, %v1428_v30  ;;  %vm1074_vm14 = vcmp.gt.f32.partialorder %v3520_v14, 0.0  ;;  %2804 = vpow2.f32 %v1216_v52 }
 0x14a   : > { %2192 = vst.msk [vmem:[%s3276_s26 + $0xa4] sm:$0xf] %vm2150_vm5, %v2538_v16  ;;  %v1394_v55 = vsel %vm1074_vm14, %v3520_v14, %v2379_v22  ;;  %v1171_v21 = vmin.f32 %v3620_v32, 0.0  ;;  %v3631_v29 = vadd.f32 %v3156_v10, %v945_v49  ;;  %v977_v2 = vmul.f32 %v3349_v3, %v3147_v6 }
 0x14b   : > { %2165 = vst.msk [vmem:[%s3276_s26 + $0x38] sm:$0xf] %vm2150_vm5, %v2511_v45  ;;  %v2543_v1 = vpack.c.bf16 %v1876_v17, %v1876_v17  ;;  %v1842_v44 = vmul.f32 %v3110_v53, %v1394_v55  ;;  %v943_v23 = vmul.f32 %v3147_v6, %v3355_v37  ;;  %v975_v9 = vmul.f32 %v3147_v6, %v3357_v15  ;;  %v1748_v17 = vpop.permute.xlu1 %1747 }
 0x14c   : > { %v2799_v14 = vpop.eup %2798  ;;  %vm1106_vm15 = vcmp.gt.f32.partialorder %v3556_v39, 0.0  ;;  %v1280_v13 = vmul.f32 1.442695, %v1171_v21  ;;  %v1144_v46 = vmin.f32 %v3631_v29, 0.0  ;;  %v3645_v3 = vadd.f32 %v3156_v10, %v977_v2 }
 0x14d   : > { %2197 = vst.msk [vmem:[%s3276_s26 + $0xb8] sm:$0xf] %vm2150_vm5, %v2543_v1  ;;  %v2509_v4 = vpack.c.bf16 %v1842_v44, %v1842_v44  ;;  %v2411_v53 = vadd.f32 -1.0, %v2799_v14  ;;  %v3650_v7 = vadd.f32 %v3156_v10, %v943_v23  ;;  %v3653_v37 = vadd.f32 %v3156_v10, %v975_v9 }
 0x14e   : > { %vm1077_vm0 = vcmp.gt.f32.partialorder %v3582_v38, 0.0  ;;  %2806 = vpow2.f32 %v1280_v13  ;;  %v1226_v15 = vmul.f32 1.442695, %v1144_v46  ;;  %v1176_v49 = vmin.f32 %v3645_v3, 0.0 }
 0x14f   : > { %2163 = vst.msk [vmem:[%s3276_s26 + $0x30] sm:$0xf] %vm2150_vm5, %v2509_v4  ;;  %v1426_v0 = vsel %vm1106_vm15, %v3556_v39, %v2411_v53  ;;  %vm1109_vm1 = vcmp.gt.f32.partialorder %v3585_v41, 0.0  ;;  %vm1075_vm2 = vcmp.gt.f32.partialorder %v3596_v27, 0.0  ;;  %v1142_v50 = vmin.f32 %v3650_v7, 0.0  ;;  %v1753_v4 = vpop.permute.xlu0 %1752 }
 0x150   : > { %v1874_v43 = vmul.f32 %v3587_v58, %v1426_v0  ;;  %2808 = vpow2.f32 %v1226_v15  ;;  %v1290_v31 = vmul.f32 1.442695, %v1176_v49  ;;  %v1174_v48 = vmin.f32 %v3653_v37, 0.0 }
 0x151   : > { %v2801_v42 = vpop.eup %2800  ;;  %v1222_v5 = vmul.f32 1.442695, %v1142_v50  ;;  %v946_v18 = vmul.f32 %v3362_v61, %v3147_v6  ;;  %v978_v39 = vmul.f32 %v3364_v47, %v3147_v6  ;;  %v944_v60 = vmul.f32 %v3147_v6, %v3373_v8 }
 0x152   : > { %v2803_v20 = vpop.eup %2802  ;;  %v2541_v52 = vpack.c.bf16 %v1874_v43, %v1874_v43  ;;  %v2382_v51 = vadd.f32 -1.0, %v2801_v42  ;;  %2810 = vpow2.f32 %v1290_v31  ;;  %v1286_v58 = vmul.f32 1.442695, %v1174_v48 }
 0x153   : > { %v2805_v16 = vpop.eup %2804  ;;  %v2414_v30 = vadd.f32 -1.0, %v2803_v20  ;;  %2812 = vpow2.f32 %v1222_v5  ;;  %v3674_v22 = vadd.f32 %v3156_v10, %v946_v18  ;;  %v3677_v45 = vadd.f32 %v3156_v10, %v978_v39 }
 0x154   : > { %2195 = vst.msk [vmem:[%s3276_s26 + $0xb0] sm:$0xf] %vm2150_vm5, %v2541_v52  ;;  %v1397_v61 = vsel %vm1077_vm0, %v3582_v38, %v2382_v51  ;;  %v2380_v47 = vadd.f32 -1.0, %v2805_v16  ;;  %2814 = vpow2.f32 %v1286_v58  ;;  %v3685_v8 = vadd.f32 %v3156_v10, %v944_v60  ;;  %v1763_v58 = vpop.permute.xlu0 %1762 }
 0x155   : > { %v1845_v55 = vmul.f32 %v3116_v56, %v1397_v61  ;;  %v1429_v21 = vsel %vm1109_vm1, %v3585_v41, %v2414_v30  ;;  %vm1107_vm3 = vcmp.gt.f32.partialorder %v3620_v32, 0.0  ;;  %v1145_v2 = vmin.f32 %v3674_v22, 0.0  ;;  %v3744_v61 = vld [vmem:[%s4069_s3] ss:$0 sm:$0xff] }
 0x156   : > { %v1877_v1 = vmul.f32 %v1748_v17, %v1429_v21  ;;  %v1395_v38 = vsel %vm1075_vm2, %v3596_v27, %v2380_v47  ;;  %vm1080_vm4 = vcmp.gt.f32.partialorder %v3631_v29, 0.0  ;;  %v1177_v44 = vmin.f32 %v3677_v45, 0.0 }
 0x157   : > { %v2512_v23 = vpack.c.bf16 %v1845_v55, %v1845_v55  ;;  %v1843_v56 = vmul.f32 %v3112_v54, %v1395_v38  ;;  %vm1112_vm6 = vcmp.gt.f32.partialorder %v3645_v3, 0.0  ;;  %v1228_v41 = vmul.f32 1.442695, %v1145_v2 }
 0x158   : > { %v2807_v9 = vpop.eup %2806  ;;  %v2544_v14 = vpack.c.bf16 %v1877_v1, %v1877_v1  ;;  %v1292_v13 = vmul.f32 1.442695, %v1177_v44  ;;  %v1143_v46 = vmin.f32 %v3685_v8, 0.0  ;;  %v976_v27 = vmul.f32 %v3147_v6, %v3375_v25 }
 0x159   : > { %2166 = vst.msk [vmem:[%s3276_s26 + $0x3c] sm:$0xf] %vm2150_vm5, %v2512_v23  ;;  %v2510_v53 = vpack.c.bf16 %v1843_v56, %v1843_v56  ;;  %v2412_v15 = vadd.f32 -1.0, %v2807_v9  ;;  %2816 = vpow2.f32 %v1228_v41  ;;  %v949_v54 = vmul.f32 %v3404_v24, %v3147_v6  ;;  %v3724_v6 = vld [vmem:[%s4068_s2] ss:$0 sm:$0xff] }
 0x15a   : > { %v2809_v49 = vpop.eup %2808  ;;  %2198 = vst.msk [vmem:[%s3276_s26 + $0xbc] sm:$0xf] %vm2150_vm5, %v2544_v14  ;;  %vm1078_vm7 = vcmp.gt.f32.partialorder %v3650_v7, 0.0  ;;  %2818 = vpow2.f32 %v1292_v13  ;;  %v1224_v0 = vmul.f32 1.442695, %v1143_v46  ;;  %v3711_v50 = vadd.f32 %v3156_v10, %v976_v27 }
 0x15b   : > { %2164 = vst.msk [vmem:[%s3276_s26 + $0x34] sm:$0xf] %vm2150_vm5, %v2510_v53  ;;  %v1427_v25 = vsel %vm1107_vm3, %v3620_v32, %v2412_v15  ;;  %v2385_v43 = vadd.f32 -1.0, %v2809_v49  ;;  %v3719_v31 = vadd.f32 %v3156_v10, %v949_v54  ;;  %v981_v24 = vmul.f32 %v3724_v6, %v3406_v34  ;;  %v4098_v49 = vld [vmem:[#allocation3_spill] sm:$0xff] }
 0x15c   : > { %v2811_v48 = vpop.eup %2810  ;;  %v1875_v42 = vmul.f32 %v3657_v62, %v1427_v25  ;;  %vm1110_vm8 = vcmp.gt.f32.partialorder %v3653_v37, 0.0  ;;  %2820 = vpow2.f32 %v1224_v0  ;;  %v1175_v32 = vmin.f32 %v3711_v50, 0.0 }
 0x15d   : > { %v2813_v5 = vpop.eup %2812  ;;  %v1400_v10 = vsel %vm1080_vm4, %v3631_v29, %v2385_v43  ;;  %v2417_v18 = vadd.f32 -1.0, %v2811_v48  ;;  %v1148_v39 = vmin.f32 %v3719_v31, 0.0  ;;  %v947_v34 = vmul.f32 %v3724_v6, %v3419_v40 }
 0x15e   : > { %v2815_v60 = vpop.eup %2814  ;;  %v2542_v20 = vpack.c.bf16 %v1875_v42, %v1875_v42  ;;  %v1848_v62 = vmul.f32 %v3122_v59, %v1400_v10  ;;  %v2383_v52 = vadd.f32 -1.0, %v2813_v5  ;;  %v1288_v51 = vmul.f32 1.442695, %v1175_v32 }
 0x15f   : > { %v1432_v16 = vsel %vm1112_vm6, %v3645_v3, %v2417_v18  ;;  %v2415_v30 = vadd.f32 -1.0, %v2815_v60  ;;  %v1234_v29 = vmul.f32 1.442695, %v1148_v39  ;;  %v3747_v40 = vadd.f32 %v3744_v61, %v981_v24  ;;  %v3754_v3 = vpop.permute.xlu1 %1757 }
 0x160   : > { %2196 = vst.msk [vmem:[%s3276_s26 + $0xb4] sm:$0xf] %vm2150_vm5, %v2542_v20  ;;  %v2515_v59 = vpack.c.bf16 %v1848_v62, %v1848_v62  ;;  %v1880_v47 = vmul.f32 %v1763_v58, %v1432_v16  ;;  %v1398_v17 = vsel %vm1078_vm7, %v3650_v7, %v2383_v52  ;;  %2822 = vpow2.f32 %v1288_v51  ;;  %v4100_v58 = vld [vmem:[#allocation16_spill] sm:$0xff] }
 0x161   : > { %v1846_v55 = vmul.f32 %v3118_v57, %v1398_v17  ;;  %v1430_v21 = vsel %vm1110_vm8, %v3653_v37, %v2415_v30  ;;  %vm1081_vm9 = vcmp.gt.f32.partialorder %v3674_v22, 0.0  ;;  %2824 = vpow2.f32 %v1234_v29  ;;  %v3814_v30 = vpop.permute.xlu0 %1772 }
 0x162   : > { %2169 = vst.msk [vmem:[%s3276_s26 + $0x48] sm:$0xf] %vm2150_vm5, %v2515_v59  ;;  %v2547_v2 = vpack.c.bf16 %v1880_v47, %v1880_v47  ;;  %v1878_v1 = vmul.f32 %v1753_v4, %v1430_v21  ;;  %v1180_v7 = vmin.f32 %v3747_v40, 0.0  ;;  %v3765_v38 = vadd.f32 %v3744_v61, %v947_v34 }
 0x163   : > { %v2817_v44 = vpop.eup %2816  ;;  %v2513_v23 = vpack.c.bf16 %v1846_v55, %v1846_v55  ;;  %v979_v57 = vmul.f32 %v3724_v6, %v3421_v19  ;;  %v950_v37 = vmul.f32 %v3724_v6, %v3424_v33  ;;  %v982_v56 = vmul.f32 %v3724_v6, %v3426_v26  ;;  %v1768_v54 = vpop.permute.xlu1 %1767 }
 0x164   : > { %v2819_v41 = vpop.eup %2818  ;;  %2201 = vst.msk [vmem:[%s3276_s26 + $0xc8] sm:$0xf] %vm2150_vm5, %v2547_v2  ;;  %v2545_v9 = vpack.c.bf16 %v1878_v1, %v1878_v1  ;;  %v2386_v14 = vadd.f32 -1.0, %v2817_v44  ;;  %vm1113_vm10 = vcmp.gt.f32.partialorder %v3677_v45, 0.0  ;;  %v1298_v13 = vmul.f32 1.442695, %v1180_v7 }
 0x165   : > { %2167 = vst.msk [vmem:[%s3276_s26 + $0x40] sm:$0xf] %vm2150_vm5, %v2513_v23  ;;  %v2418_v46 = vadd.f32 -1.0, %v2819_v41  ;;  %v1146_v27 = vmin.f32 %v3765_v38, 0.0  ;;  %v3780_v19 = vadd.f32 %v3744_v61, %v979_v57  ;;  %v3783_v33 = vadd.f32 %v3744_v61, %v950_v37  ;;  %v4101_v2 = vld [vmem:[#allocation6_spill] sm:$0xff]  ;;  %v4102_v7 = vld [vmem:[#allocation17_spill] sm:$0xff] }
 0x166   : > { %v2821_v26 = vpop.eup %2820  ;;  %2199 = vst.msk [vmem:[%s3276_s26 + $0xc0] sm:$0xf] %vm2150_vm5, %v2545_v9  ;;  %v1401_v4 = vsel %vm1081_vm9, %v3674_v22, %v2386_v14  ;;  %2826 = vpow2.f32 %v1298_v13  ;;  %v3791_v53 = vadd.f32 %v3744_v61, %v982_v56  ;;  %v948_v15 = vmul.f32 %v3724_v6, %v3435_v12  ;;  %v4103_v14 = vld [vmem:[#allocation18_spill] sm:$0xff] }
 0x167   : > { %v1849_v0 = vmul.f32 %v4098_v49, %v1401_v4  ;;  %v1433_v25 = vsel %vm1113_vm10, %v3677_v45, %v2418_v46  ;;  %v2384_v43 = vadd.f32 -1.0, %v2821_v26  ;;  %v1230_v24 = vmul.f32 1.442695, %v1146_v27  ;;  %v4099_v45 = vld [vmem:[#allocation2_spill] sm:$0xff]  ;;  %v4104_v46 = vld [vmem:[#allocation19_spill] sm:$0xff]  ;;  %v1783_v4 = vpop.permute.xlu0 %1782 }
 0x168   : > { %v1881_v48 = vmul.f32 %v1768_v54, %v1433_v25  ;;  %vm1079_vm11 = vcmp.gt.f32.partialorder %v3685_v8, 0.0  ;;  %vm1111_vm12 = vcmp.gt.f32.partialorder %v3711_v50, 0.0  ;;  %v1178_v22 = vmin.f32 %v3780_v19, 0.0 }
 0x169   : > { %v2516_v42 = vpack.c.bf16 %v1849_v0, %v1849_v0  ;;  %v1399_v32 = vsel %vm1079_vm11, %v3685_v8, %v2384_v43  ;;  %2828 = vpow2.f32 %v1230_v24  ;;  %v1149_v12 = vmin.f32 %v3783_v33, 0.0 }
 0x16a   : > { %v2823_v5 = vpop.eup %2822  ;;  %v2548_v10 = vpack.c.bf16 %v1881_v48, %v1881_v48  ;;  %v1847_v18 = vmul.f32 %v4099_v45, %v1399_v32  ;;  %vm1084_vm13 = vcmp.gt.f32.partialorder %v3719_v31, 0.0  ;;  %v1294_v39 = vmul.f32 1.442695, %v1178_v22  ;;  %v3866_v32 = vpop.permute.xlu1 %1777 }
 0x16b   : > { %v2825_v34 = vpop.eup %2824  ;;  %2170 = vst.msk [vmem:[%s3276_s26 + $0x4c] sm:$0xf] %vm2150_vm5, %v2516_v42  ;;  %v2416_v60 = vadd.f32 -1.0, %v2823_v5  ;;  %v1236_v20 = vmul.f32 1.442695, %v1149_v12  ;;  %v1181_v62 = vmin.f32 %v3791_v53, 0.0  ;;  %v3808_v8 = vadd.f32 %v3744_v61, %v948_v15 }
 0x16c   : > { %2202 = vst.msk [vmem:[%s3276_s26 + $0xcc] sm:$0xf] %vm2150_vm5, %v2548_v10  ;;  %v2514_v52 = vpack.c.bf16 %v1847_v18, %v1847_v18  ;;  %v2389_v51 = vadd.f32 -1.0, %v2825_v34  ;;  %2830 = vpow2.f32 %v1294_v39  ;;  %v980_v16 = vmul.f32 %v3724_v6, %v4100_v58  ;;  %v4106_v18 = vld [vmem:[#allocation4_spill] sm:$0xff] }
 0x16d   : > { %v1431_v29 = vsel %vm1111_vm12, %v3711_v50, %v2416_v60  ;;  %vm1116_vm14 = vcmp.gt.f32.partialorder %v3747_v40, 0.0  ;;  %2832 = vpow2.f32 %v1236_v20  ;;  %v1300_v59 = vmul.f32 1.442695, %v1181_v62  ;;  %v4107_v62 = vld [vmem:[#allocation21_spill] sm:$0xff] }
 0x16e   : > { %2168 = vst.msk [vmem:[%s3276_s26 + $0x44] sm:$0xf] %vm2150_vm5, %v2514_v52  ;;  %v1879_v47 = vmul.f32 %v3754_v3, %v1431_v29  ;;  %v1404_v17 = vsel %vm1084_vm13, %v3719_v31, %v2389_v51  ;;  %v1147_v55 = vmin.f32 %v3808_v8, 0.0  ;;  %v3828_v21 = vadd.f32 %v3744_v61, %v980_v16 }
 0x16f   : > { %v1852_v50 = vmul.f32 %v4101_v2, %v1404_v17  ;;  %2834 = vpow2.f32 %v1300_v59  ;;  %v953_v1 = vmul.f32 %v3724_v6, %v3461_v28  ;;  %v985_v44 = vmul.f32 %v3724_v6, %v4102_v7  ;;  %v4108_v2 = vld [vmem:[#allocation7_spill] sm:$0xff] }
 0x170   : > { %v2827_v3 = vpop.eup %2826  ;;  %v2546_v23 = vpack.c.bf16 %v1879_v47, %v1879_v47  ;;  %vm1082_vm15 = vcmp.gt.f32.partialorder %v3765_v38, 0.0  ;;  %v1232_v31 = vmul.f32 1.442695, %v1147_v55  ;;  %v1179_v57 = vmin.f32 %v3828_v21, 0.0 }
 0x171   : > { %v2519_v37 = vpack.c.bf16 %v1852_v50, %v1852_v50  ;;  %v2421_v56 = vadd.f32 -1.0, %v2827_v3  ;;  %v3838_v41 = vadd.f32 %v3744_v61, %v953_v1  ;;  %v3841_v9 = vadd.f32 %v3744_v61, %v985_v44  ;;  %v1788_v44 = vpop.permute.xlu1 %1787 }
 0x172   : > { %2200 = vst.msk [vmem:[%s3276_s26 + $0xc4] sm:$0xf] %vm2150_vm5, %v2546_v23  ;;  %2836 = vpow2.f32 %v1232_v31  ;;  %v1296_v28 = vmul.f32 1.442695, %v1179_v57  ;;  %v951_v13 = vmul.f32 %v3724_v6, %v4103_v14  ;;  %v983_v27 = vmul.f32 %v3724_v6, %v4104_v46  ;;  %v4109_v14 = vld [vmem:[#allocation22_spill] sm:$0xff] }
 0x173   : > { %v2829_v26 = vpop.eup %2828  ;;  %2173 = vst.msk [vmem:[%s3276_s26 + $0x58] sm:$0xf] %vm2150_vm5, %v2519_v37  ;;  %v1436_v15 = vsel %vm1116_vm14, %v3747_v40, %v2421_v56  ;;  %vm1114_vm0 = vcmp.gt.f32.partialorder %v3780_v19, 0.0  ;;  %vm1085_vm1 = vcmp.gt.f32.partialorder %v3783_v33, 0.0  ;;  %v1152_v54 = vmin.f32 %v3838_v41, 0.0  ;;  %v4105_v40 = vld [vmem:[#allocation20_spill] sm:$0xff] }
 0x174   : > { %v1884_v49 = vmul.f32 %v1783_v4, %v1436_v15  ;;  %v2387_v0 = vadd.f32 -1.0, %v2829_v26  ;;  %2838 = vpow2.f32 %v1296_v28  ;;  %v1184_v25 = vmin.f32 %v3841_v9, 0.0  ;;  %v4110_v4 = vld [vmem:[#allocation23_spill] sm:$0xff] }
 0x175   : > { %v1242_v43 = vmul.f32 1.442695, %v1152_v54  ;;  %v3859_v24 = vadd.f32 %v3744_v61, %v951_v13  ;;  %v3862_v48 = vadd.f32 %v3744_v61, %v983_v27  ;;  %v954_v22 = vmul.f32 %v3724_v6, %v4105_v40  ;;  %v1793_v13 = vpop.permute.xlu0 %1792  ;;  %v4111_v54 = vld [vmem:[#allocation5_spill] sm:$0xff] }
 0x176   : > { %v2831_v42 = vpop.eup %2830  ;;  %v2551_v12 = vpack.c.bf16 %v1884_v49, %v1884_v49  ;;  %v1402_v5 = vsel %vm1082_vm15, %v3765_v38, %v2387_v0  ;;  %vm1117_vm2 = vcmp.gt.f32.partialorder %v3791_v53, 0.0  ;;  %v1306_v10 = vmul.f32 1.442695, %v1184_v25 }
 0x177   : > { %v2833_v45 = vpop.eup %2832  ;;  %v1850_v39 = vmul.f32 %v4106_v18, %v1402_v5  ;;  %v2419_v34 = vadd.f32 -1.0, %v2831_v42  ;;  %vm1083_vm3 = vcmp.gt.f32.partialorder %v3808_v8, 0.0  ;;  %2840 = vpow2.f32 %v1242_v43 }
 0x178   : > { %2205 = vst.msk [vmem:[%s3276_s26 + $0xd8] sm:$0xf] %vm2150_vm5, %v2551_v12  ;;  %v2390_v60 = vadd.f32 -1.0, %v2833_v45  ;;  %2842 = vpow2.f32 %v1306_v10  ;;  %v1150_v20 = vmin.f32 %v3859_v24, 0.0  ;;  %v986_v38 = vmul.f32 %v3724_v6, %v4107_v62  ;;  %v4113_v62 = vld [vmem:[#allocation10_spill] sm:$0xff] }
 0x179   : > { %v2835_v52 = vpop.eup %2834  ;;  %v2517_v51 = vpack.c.bf16 %v1850_v39, %v1850_v39  ;;  %v1434_v58 = vsel %vm1114_vm0, %v3780_v19, %v2419_v34  ;;  %v1182_v16 = vmin.f32 %v3862_v48, 0.0  ;;  %v3884_v29 = vadd.f32 %v3744_v61, %v954_v22  ;;  %v4112_v22 = vld [vmem:[#allocation24_spill] sm:$0xff] }
 0x17a   : > { %v1882_v59 = vmul.f32 %v3814_v30, %v1434_v58  ;;  %v1405_v47 = vsel %vm1085_vm1, %v3783_v33, %v2390_v60  ;;  %v2422_v17 = vadd.f32 -1.0, %v2835_v52  ;;  %v1238_v55 = vmul.f32 1.442695, %v1150_v20  ;;  %v1803_v20 = vpop.permute.xlu0 %1802 }
 0x17b   : > { %2171 = vst.msk [vmem:[%s3276_s26 + $0x50] sm:$0xf] %vm2150_vm5, %v2517_v51  ;;  %v1853_v50 = vmul.f32 %v4108_v2, %v1405_v47  ;;  %vm1115_vm4 = vcmp.gt.f32.partialorder %v3828_v21, 0.0  ;;  %v1302_v19 = vmul.f32 1.442695, %v1182_v16  ;;  %v1153_v1 = vmin.f32 %v3884_v29, 0.0 }
 0x17c   : > { %v2837_v7 = vpop.eup %2836  ;;  %v2549_v30 = vpack.c.bf16 %v1882_v59, %v1882_v59  ;;  %v1437_v33 = vsel %vm1117_vm2, %v3791_v53, %v2422_v17  ;;  %2844 = vpow2.f32 %v1238_v55  ;;  %v3899_v3 = vadd.f32 %v3744_v61, %v986_v38 }
 0x17d   : > { %v2520_v23 = vpack.c.bf16 %v1853_v50, %v1853_v50  ;;  %v1885_v31 = vmul.f32 %v1788_v44, %v1437_v33  ;;  %v2388_v57 = vadd.f32 -1.0, %v2837_v7  ;;  %2846 = vpow2.f32 %v1302_v19  ;;  %v4114_v33 = vld [vmem:[#allocation25_spill] sm:$0xff] }
 0x17e   : > { %v2839_v37 = vpop.eup %2838  ;;  %2203 = vst.msk [vmem:[%s3276_s26 + $0xd0] sm:$0xf] %vm2150_vm5, %v2549_v30  ;;  %vm1088_vm6 = vcmp.gt.f32.partialorder %v3838_v41, 0.0  ;;  %v1244_v56 = vmul.f32 1.442695, %v1153_v1  ;;  %v1185_v28 = vmin.f32 %v3899_v3, 0.0  ;;  %v952_v53 = vmul.f32 %v3724_v6, %v4109_v14  ;;  %v3953_v1 = vpop.permute.xlu1 %1797 }
 0x17f   : > { %2174 = vst.msk [vmem:[%s3276_s26 + $0x5c] sm:$0xf] %vm2150_vm5, %v2520_v23  ;;  %v2552_v46 = vpack.c.bf16 %v1885_v31, %v1885_v31  ;;  %v1403_v27 = vsel %vm1083_vm3, %v3808_v8, %v2388_v57  ;;  %v2420_v26 = vadd.f32 -1.0, %v2839_v37  ;;  %v984_v15 = vmul.f32 %v3724_v6, %v4110_v4  ;;  %v4115_v57 = vld [vmem:[#allocation8_spill] sm:$0xff] }
 0x180   : > { %v1851_v49 = vmul.f32 %v4111_v54, %v1403_v27  ;;  %2848 = vpow2.f32 %v1244_v56  ;;  %v1308_v0 = vmul.f32 1.442695, %v1185_v28  ;;  %v3916_v25 = vadd.f32 %v3744_v61, %v952_v53 }
 0x181   : > { %v2841_v43 = vpop.eup %2840  ;;  %2206 = vst.msk [vmem:[%s3276_s26 + $0xdc] sm:$0xf] %vm2150_vm5, %v2552_v46  ;;  %v1435_v40 = vsel %vm1115_vm4, %v3828_v21, %v2420_v26  ;;  %v3924_v8 = vadd.f32 %v3744_v61, %v984_v15  ;;  %v957_v42 = vmul.f32 %v3724_v6, %v4112_v22  ;;  %v989_v12 = vmul.f32 %v3724_v6, %v3524_v35 }
 0x182   : > { %v2843_v5 = vpop.eup %2842  ;;  %v2518_v10 = vpack.c.bf16 %v1851_v49, %v1851_v49  ;;  %v1883_v45 = vmul.f32 %v3866_v32, %v1435_v40  ;;  %v2393_v18 = vadd.f32 -1.0, %v2841_v43  ;;  %2850 = vpow2.f32 %v1308_v0  ;;  %v4117_v0 = vld [vmem:[#allocation11_spill] sm:$0xff]  ;;  %v1808_v22 = vpop.permute.xlu1 %1807 }
 0x183   : > { %vm1120_vm7 = vcmp.gt.f32.partialorder %v3841_v9, 0.0  ;;  %v2425_v39 = vadd.f32 -1.0, %v2843_v5  ;;  %vm1086_vm8 = vcmp.gt.f32.partialorder %v3859_v24, 0.0  ;;  %v1151_v21 = vmin.f32 %v3916_v25, 0.0 }
 0x184   : > { %2172 = vst.msk [vmem:[%s3276_s26 + $0x54] sm:$0xf] %vm2150_vm5, %v2518_v10  ;;  %v2550_v34 = vpack.c.bf16 %v1883_v45, %v1883_v45  ;;  %v1408_v35 = vsel %vm1088_vm6, %v3838_v41, %v2393_v18  ;;  %v1183_v60 = vmin.f32 %v3924_v8, 0.0  ;;  %v3941_v32 = vadd.f32 %v3744_v61, %v957_v42 }
 0x185   : > { %v1856_v38 = vmul.f32 %v4113_v62, %v1408_v35  ;;  %v1440_v52 = vsel %vm1120_vm7, %v3841_v9, %v2425_v39  ;;  %v1240_v51 = vmul.f32 1.442695, %v1151_v21  ;;  %v3946_v58 = vadd.f32 %v3744_v61, %v989_v12 }
 0x186   : > { %v2845_v16 = vpop.eup %2844  ;;  %2204 = vst.msk [vmem:[%s3276_s26 + $0xd4] sm:$0xf] %vm2150_vm5, %v2550_v34  ;;  %v1888_v59 = vmul.f32 %v1803_v20, %v1440_v52  ;;  %vm1118_vm9 = vcmp.gt.f32.partialorder %v3862_v48, 0.0  ;;  %v1304_v41 = vmul.f32 1.442695, %v1183_v60  ;;  %v1156_v47 = vmin.f32 %v3941_v32, 0.0 }
 0x187   : > { %v2847_v17 = vpop.eup %2846  ;;  %v2523_v55 = vpack.c.bf16 %v1856_v38, %v1856_v38  ;;  %v2391_v2 = vadd.f32 -1.0, %v2845_v16  ;;  %vm1089_vm10 = vcmp.gt.f32.partialorder %v3884_v29, 0.0  ;;  %2852 = vpow2.f32 %v1240_v51  ;;  %v4118_v34 = vld [vmem:[#allocation27_spill] sm:$0xff] }
 0x188   : > { %v2555_v9 = vpack.c.bf16 %v1888_v59, %v1888_v59  ;;  %v2423_v50 = vadd.f32 -1.0, %v2847_v17  ;;  %2854 = vpow2.f32 %v1304_v41  ;;  %v1250_v19 = vmul.f32 1.442695, %v1156_v47  ;;  %v1813_v59 = vpop.permute.xlu0 %1812  ;;  %v4119_v41 = vld [vmem:[#allocation9_spill] sm:$0xff] }
 0x189   : > { %2177 = vst.msk [vmem:[%s3276_s26 + $0x68] sm:$0xf] %vm2150_vm5, %v2523_v55  ;;  %v1406_v7 = vsel %vm1086_vm8, %v3859_v24, %v2391_v2  ;;  %v1188_v44 = vmin.f32 %v3946_v58, 0.0  ;;  %v955_v30 = vmul.f32 %v3724_v6, %v3526_v63  ;;  %v987_v23 = vmul.f32 %v3724_v6, %v4114_v33  ;;  %v4116_v24 = vld [vmem:[#allocation26_spill] sm:$0xff] }
 0x18a   : > { %v2849_v31 = vpop.eup %2848  ;;  %2209 = vst.msk [vmem:[%s3276_s26 + $0xe8] sm:$0xf] %vm2150_vm5, %v2555_v9  ;;  %v1854_v37 = vmul.f32 %v4115_v57, %v1406_v7  ;;  %v1438_v56 = vsel %vm1118_vm9, %v3862_v48, %v2423_v50  ;;  %2856 = vpow2.f32 %v1250_v19  ;;  %v958_v28 = vmul.f32 %v3724_v6, %v4116_v24 }
 0x18b   : > { %v1886_v14 = vmul.f32 %v1793_v13, %v1438_v56  ;;  %v2394_v53 = vadd.f32 -1.0, %v2849_v31  ;;  %v1314_v63 = vmul.f32 1.442695, %v1188_v44  ;;  %v3974_v46 = vadd.f32 %v3744_v61, %v955_v30  ;;  %v4120_v30 = vld [vmem:[#allocation14_spill] sm:$0xff] }
 0x18c   : > { %v2851_v27 = vpop.eup %2850  ;;  %v2521_v26 = vpack.c.bf16 %v1854_v37, %v1854_v37  ;;  %v3977_v4 = vadd.f32 %v3744_v61, %v987_v23  ;;  %v3980_v15 = vadd.f32 %v3744_v61, %v958_v28  ;;  %v990_v48 = vmul.f32 %v3724_v6, %v3540_v36  ;;  %v1823_v31 = vpop.permute.xlu0 %1822 }
 0x18d   : > { %v2553_v54 = vpack.c.bf16 %v1886_v14, %v1886_v14  ;;  %v1409_v13 = vsel %vm1089_vm10, %v3884_v29, %v2394_v53  ;;  %v2426_v49 = vadd.f32 -1.0, %v2851_v27  ;;  %2858 = vpow2.f32 %v1314_v63  ;;  %v1818_v63 = vpop.permute.xlu1 %1817 }
 0x18e   : > { %2175 = vst.msk [vmem:[%s3276_s26 + $0x60] sm:$0xf] %vm2150_vm5, %v2521_v26  ;;  %v1857_v43 = vmul.f32 %v4117_v0, %v1409_v13  ;;  %vm1121_vm11 = vcmp.gt.f32.partialorder %v3899_v3, 0.0  ;;  %v1154_v40 = vmin.f32 %v3974_v46, 0.0  ;;  %v1186_v42 = vmin.f32 %v3977_v4, 0.0 }
 0x18f   : > { %2207 = vst.msk [vmem:[%s3276_s26 + $0xe0] sm:$0xf] %vm2150_vm5, %v2553_v54  ;;  %v1441_v36 = vsel %vm1121_vm11, %v3899_v3, %v2426_v49  ;;  %v1157_v29 = vmin.f32 %v3980_v15, 0.0  ;;  %v3998_v45 = vadd.f32 %v3744_v61, %v990_v48  ;;  %v956_v35 = vmul.f32 %v3724_v6, %v4118_v34  ;;  %v4121_v48 = vld [vmem:[#allocation12_spill] sm:$0xff] }
 0x190   : > { %v2524_v12 = vpack.c.bf16 %v1857_v43, %v1857_v43  ;;  %v1889_v5 = vmul.f32 %v1808_v22, %v1441_v36  ;;  %v1246_v10 = vmul.f32 1.442695, %v1154_v40  ;;  %v1310_v39 = vmul.f32 1.442695, %v1186_v42  ;;  %v4122_v22 = vld [vmem:[#allocation15_spill] sm:$0xff] }
 0x191   : > { %v2853_v18 = vpop.eup %2852  ;;  %v1252_v21 = vmul.f32 1.442695, %v1157_v29  ;;  %v988_v3 = vmul.f32 %v3724_v6, %v3547_v11  ;;  %vm1087_vm12 = vcmp.gt.f32.partialorder %v3916_v25, 0.0  ;;  %v1189_v52 = vmin.f32 %v3998_v45, 0.0 }
 0x192   : > { %v2855_v60 = vpop.eup %2854  ;;  %2178 = vst.msk [vmem:[%s3276_s26 + $0x6c] sm:$0xf] %vm2150_vm5, %v2524_v12  ;;  %v2556_v20 = vpack.c.bf16 %v1889_v5, %v1889_v5  ;;  %v2392_v62 = vadd.f32 -1.0, %v2853_v18  ;;  %2860 = vpow2.f32 %v1246_v10  ;;  %v4009_v51 = vadd.f32 %v3744_v61, %v956_v35  ;;  %v1828_v12 = vpop.permute.xlu1 %1827  ;;  %v4123_v35 = vld [vmem:[#allocation13_spill] sm:$0xff] }
 0x193   : > { %v2424_v38 = vadd.f32 -1.0, %v2855_v60  ;;  %2862 = vpow2.f32 %v1310_v39  ;;  %vm1119_vm13 = vcmp.gt.f32.partialorder %v3924_v8, 0.0  ;;  %v4016_v6 = vadd.f32 %v3744_v61, %v988_v3 }
 0x194   : > { %v2857_v16 = vpop.eup %2856  ;;  %2210 = vst.msk [vmem:[%s3276_s26 + $0xec] sm:$0xf] %vm2150_vm5, %v2556_v20  ;;  %v1407_v11 = vsel %vm1087_vm12, %v3916_v25, %v2392_v62  ;;  %2864 = vpow2.f32 %v1252_v21  ;;  %v1316_v2 = vmul.f32 1.442695, %v1189_v52  ;;  %vm1092_vm14 = vcmp.gt.f32.partialorder %v3941_v32, 0.0 }
 0x195   : > { %v1855_v47 = vmul.f32 %v4119_v41, %v1407_v11  ;;  %v1439_v17 = vsel %vm1119_vm13, %v3924_v8, %v2424_v38  ;;  %v2397_v55 = vadd.f32 -1.0, %v2857_v16  ;;  %v1155_v25 = vmin.f32 %v4009_v51, 0.0 }
 0x196   : > { %v1887_v9 = vmul.f32 %v3953_v1, %v1439_v17  ;;  %2866 = vpow2.f32 %v1316_v2  ;;  %v1187_v61 = vmin.f32 %v4016_v6, 0.0  ;;  %vm1124_vm15 = vcmp.gt.f32.partialorder %v3946_v58, 0.0 }
 0x197   : > { %v2859_v50 = vpop.eup %2858  ;;  %v2522_v19 = vpack.c.bf16 %v1855_v47, %v1855_v47  ;;  %v1412_v7 = vsel %vm1092_vm14, %v3941_v32, %v2397_v55  ;;  %v1248_v23 = vmul.f32 1.442695, %v1155_v25  ;;  %vm1090_vm0 = vcmp.gt.f32.partialorder %v3974_v46, 0.0 }
 0x198   : > { %v2554_v44 = vpack.c.bf16 %v1887_v9, %v1887_v9  ;;  %v1860_v8 = vmul.f32 %v4120_v30, %v1412_v7  ;;  %v2429_v33 = vadd.f32 -1.0, %v2859_v50  ;;  %v1312_v1 = vmul.f32 1.442695, %v1187_v61 }
 0x199   : > { %2176 = vst.msk [vmem:[%s3276_s26 + $0x64] sm:$0xf] %vm2150_vm5, %v2522_v19  ;;  %2868 = vpow2.f32 %v1248_v23  ;;  %vm1122_vm1 = vcmp.gt.f32.partialorder %v3977_v4, 0.0  ;;  %vm1093_vm2 = vcmp.gt.f32.partialorder %v3980_v15, 0.0  ;;  %vm1125_vm3 = vcmp.gt.f32.partialorder %v3998_v45, 0.0 }
 0x19a   : > { %2208 = vst.msk [vmem:[%s3276_s26 + $0xe4] sm:$0xf] %vm2150_vm5, %v2554_v44  ;;  %v2527_v57 = vpack.c.bf16 %v1860_v8, %v1860_v8  ;;  %v1444_v32 = vsel %vm1124_vm15, %v3946_v58, %v2429_v33  ;;  %2870 = vpow2.f32 %v1312_v1  ;;  %vm1091_vm4 = vcmp.gt.f32.partialorder %v4009_v51, 0.0 }
 0x19b   : > { %v1892_v37 = vmul.f32 %v1823_v31, %v1444_v32  ;;  %vm1123_vm6 = vcmp.gt.f32.partialorder %v4016_v6, 0.0 }
 0x19c   : > { %v2861_v56 = vpop.eup %2860  ;;  %2181 = vst.msk [vmem:[%s3276_s26 + $0x78] sm:$0xf] %vm2150_vm5, %v2527_v57 }
 0x19d   : > { %v2863_v24 = vpop.eup %2862  ;;  %v2559_v28 = vpack.c.bf16 %v1892_v37, %v1892_v37  ;;  %v2395_v14 = vadd.f32 -1.0, %v2861_v56 }
 0x19e   : > { %v2865_v53 = vpop.eup %2864  ;;  %v2427_v27 = vadd.f32 -1.0, %v2863_v24 }
 0x19f   : > { %2213 = vst.msk [vmem:[%s3276_s26 + $0xf8] sm:$0xf] %vm2150_vm5, %v2559_v28  ;;  %v1410_v26 = vsel %vm1090_vm0, %v3974_v46, %v2395_v14  ;;  %v2398_v58 = vadd.f32 -1.0, %v2865_v53 }
 0x1a0   : > { %v1858_v54 = vmul.f32 %v4121_v48, %v1410_v26  ;;  %v1442_v13 = vsel %vm1122_vm1, %v3977_v4, %v2427_v27  ;;  %v2867_v49 = vpop.eup %2866 }
 0x1a1   : > { %v1890_v0 = vmul.f32 %v1813_v59, %v1442_v13  ;;  %v1413_v43 = vsel %vm1093_vm2, %v3980_v15, %v2398_v58  ;;  %v2430_v46 = vadd.f32 -1.0, %v2867_v49 }
 0x1a2   : > { %v2525_v40 = vpack.c.bf16 %v1858_v54, %v1858_v54  ;;  %v1861_v36 = vmul.f32 %v4122_v22, %v1413_v43 }
 0x1a3   : > { %v2557_v42 = vpack.c.bf16 %v1890_v0, %v1890_v0  ;;  %v2869_v29 = vpop.eup %2868  ;;  %v1445_v5 = vsel %vm1125_vm3, %v3998_v45, %v2430_v46 }
 0x1a4   : > { %2179 = vst.msk [vmem:[%s3276_s26 + $0x70] sm:$0xf] %vm2150_vm5, %v2525_v40  ;;  %v2528_v4 = vpack.c.bf16 %v1861_v36, %v1861_v36  ;;  %v2871_v10 = vpop.eup %2870  ;;  %v1893_v15 = vmul.f32 %v1828_v12, %v1445_v5  ;;  %v2396_v18 = vadd.f32 -1.0, %v2869_v29 }
 0x1a5   : > { %2211 = vst.msk [vmem:[%s3276_s26 + $0xf0] sm:$0xf] %vm2150_vm5, %v2557_v42  ;;  %v2428_v39 = vadd.f32 -1.0, %v2871_v10 }
 0x1a6   : > { %2182 = vst.msk [vmem:[%s3276_s26 + $0x7c] sm:$0xf] %vm2150_vm5, %v2528_v4  ;;  %v2560_v21 = vpack.c.bf16 %v1893_v15, %v1893_v15  ;;  %v1411_v34 = vsel %vm1091_vm4, %v4009_v51, %v2396_v18 }
 0x1a7   : > { %v1859_v3 = vmul.f32 %v4123_v35, %v1411_v34  ;;  %v1443_v45 = vsel %vm1123_vm6, %v4016_v6, %v2428_v39 }
 0x1a8   : > { %2214 = vst.msk [vmem:[%s3276_s26 + $0xfc] sm:$0xf] %vm2150_vm5, %v2560_v21  ;;  %v1891_v60 = vmul.f32 %v1818_v63, %v1443_v45 }
 0x1a9   : > { %v2526_v20 = vpack.c.bf16 %v1859_v3, %v1859_v3 }
 0x1aa   : > { %v2558_v62 = vpack.c.bf16 %v1891_v60, %v1891_v60 }
 0x1ab   : > { %2180 = vst.msk [vmem:[%s3276_s26 + $0x74] sm:$0xf] %vm2150_vm5, %v2526_v20 }
 0x1ac   : > { %2212 = vst.msk [vmem:[%s3276_s26 + $0xf4] sm:$0xf] %vm2150_vm5, %v2558_v62 }
 0x1ad PF: > { %s15_s18 = sadd.s32 1, %s2880_s18  }
 0x1ae   : > { %p12_p4 = scmp.ge.s32.totalorder %s15_s18, 4  }
 0x1b0   :  { %14 = sbr.rel (!%p12_p4) target bundleno = 1 (0x1), region = 73 }

// kernel: vae_forward.15
= control target key start
LH: loop header
LB: loop body
LE: loop exit
PB: predicated region body
PF: predicated region fallthrough
CT: control target
= control target key end

     0   :  { %v781_v1 = vmov 0   ;;  %vm132_vm0 = vcmask 883712   ;;  %vm157_vm1 = vcmask 1045504   ;;  %vm576_vm4 = vcmask 60416   ;;  %s1137_s1 = inlined_call_operand.vmem [shape: bf16[108,8], index: 1, kind: input, shape index: {}]   ;;  %s1138_s0 = inlined_call_operand.vmem [shape: bf16[128,108], index: 0, kind: input, shape index: {}]   ;;  %s1139_s4 = inlined_call_operand.vmem [shape: f32[128,1], index: 4, kind: input, shape index: {}]   ;;  %s1140_s2 = inlined_call_operand.vmem [shape: f32[1,8], index: 2, kind: input, shape index: {}]   ;;  %s1141_s3 = inlined_call_operand.vmem [shape: f32[1,8], index: 3, kind: input, shape index: {}]   ;;  %s1142_s5 = inlined_call_operand.vmem [shape: bf16[128,8], index: 5, kind: output, shape index: {}]  }
   0x1   :  { %v734_v0 = vld [vmem:[%s1137_s1] sm:$0xff]   ;;  %733 = vset.pattern.permute.xlu1 %v781_v1  ;;  %732 = vset.pattern.permute.xlu0 %v781_v1  ;;  %v735_v2 = vld [vmem:[%s1137_s1 + $0x8] sm:$0xff]   ;;  %v736_v3 = vld [vmem:[%s1137_s1 + $0x10] sm:$0xff]  }
   0x2   :  { %685 = vmatprep.subr.bf16.mxu0 %v734_v0  ;;  %715 = vmatprep.subr.bf16.mxu1 %v734_v0  ;;  %v737_v4 = vld [vmem:[%s1137_s1 + $0x18] sm:$0xff]   ;;  %v741_v5 = vld [vmem:[%s1138_s0] sm:$0xff]   ;;  %v402_v8 = vld [vmem:[%s1139_s4 + $0x10] sm:$0xff] }
   0x3   :  { %686 = vmatpush3.bf16.msra.mxu0 %v734_v0  ;;  %722 = vmatpush3.bf16.msra.mxu1 %v734_v0  ;;  %v742_v6 = vld [vmem:[%s1138_s0 + $0x20] sm:$0xff]   ;;  %v739_v10 = vld [vmem:[%s1137_s1 + $0x28] sm:$0xff]   ;;  %v403_v11 = vld [vmem:[%s1139_s4 + $0x18] sm:$0xff] }
   0x4   :  { %687 = vmatprep.subr.bf16.mxu0 %v735_v2  ;;  %716 = vmatprep.subr.bf16.mxu1 %v735_v2  ;;  %v738_v7 = vld [vmem:[%s1137_s1 + $0x20] sm:$0xff]   ;;  %v401_v12 = vld [vmem:[%s1139_s4 + $0x8] sm:$0xff]  ;;  %v740_v13 = vld [vmem:[%s1137_s1 + $0x30] sm:$0x3f]  }
   0x5   :  { %699 = vmatprep.mubr.msk.bf16.mxu0 %vm132_vm0, %v741_v5  ;;  %707 = vmatprep.mubr.msk.bf16.mxu1 %vm132_vm0, %v742_v6  ;;  %v400_v9 = vld [vmem:[%s1139_s4] sm:$0xff]  ;;  %v405_v14 = vld [vmem:[%s1139_s4 + $0x28] sm:$0xff]  ;;  %v159_v16 = vsel %vm157_vm1, %v740_v13, 0  ;;  %v407_v19 = vld [vmem:[%s1139_s4 + $0x38] sm:$0xff] }
   0x6   :  { %428 = vperm.xlu1 %733, %v402_v8   ;;  %418 = vperm.xlu0 %732, %v400_v9   ;;  %v404_v15 = vld [vmem:[%s1139_s4 + $0x20] sm:$0xff]  ;;  %v743_v17 = vld [vmem:[%s1138_s0 + $0x8] sm:$0xff]   ;;  %v406_v20 = vld [vmem:[%s1139_s4 + $0x30] sm:$0xff] }
   0x7   :  { %688 = vmatpush3.bf16.msra.mxu0 %v735_v2  ;;  %723 = vmatpush3.bf16.msra.mxu1 %v735_v2  ;;  %v744_v18 = vld [vmem:[%s1138_s0 + $0x28] sm:$0xff]   ;;  %v745_v21 = vld [vmem:[%s1138_s0 + $0x10] sm:$0xff]   ;;  %v408_v24 = vld [vmem:[%s1139_s4 + $0x40] sm:$0xff] }
   0x8   :  { %689 = vmatprep.subr.bf16.mxu0 %v736_v3  ;;  %717 = vmatprep.subr.bf16.mxu1 %v736_v3  ;;  %v746_v22 = vld [vmem:[%s1138_s0 + $0x30] sm:$0xff]   ;;  %v409_v23 = vld [vmem:[%s1139_s4 + $0x48] sm:$0xff]  ;;  %v747_v25 = vld [vmem:[%s1138_s0 + $0x18] sm:$0xff]  }
   0x9   :  { %v748_v26 = vld [vmem:[%s1138_s0 + $0x38] sm:$0xff]   ;;  %v410_v28 = vld [vmem:[%s1139_s4 + $0x50] sm:$0xff]  ;;  %v413_v29 = vld [vmem:[%s1139_s4 + $0x68] sm:$0xff] }
   0xa   :  { %433 = vperm.xlu1 %733, %v403_v11   ;;  %423 = vperm.xlu0 %732, %v401_v12   ;;  %v411_v27 = vld [vmem:[%s1139_s4 + $0x58] sm:$0xff]  ;;  %v412_v30 = vld [vmem:[%s1139_s4 + $0x60] sm:$0xff]  ;;  %v414_v32 = vld [vmem:[%s1139_s4 + $0x70] sm:$0xff] }
   0xb   :  { %690 = vmatpush3.bf16.msra.mxu0 %v736_v3  ;;  %724 = vmatpush3.bf16.msra.mxu1 %v736_v3  ;;  %v415_v31 = vld [vmem:[%s1139_s4 + $0x78] sm:$0xff]  ;;  %v922_v36 = vld [vmem:[%s1140_s2] ss:$0 sm:$0xff] }
   0xc   :  { %691 = vmatprep.subr.bf16.mxu0 %v737_v4  ;;  %718 = vmatprep.subr.bf16.mxu1 %v737_v4  ;;  %v931_v40 = vld [vmem:[%s1141_s3] ss:$0 sm:$0xff] }
   0xe   :  { %443 = vperm.xlu1 %733, %v405_v14   ;;  %438 = vperm.xlu0 %732, %v404_v15  }
   0xf   :  { %692 = vmatpush3.bf16.msra.mxu0 %v737_v4  ;;  %725 = vmatpush3.bf16.msra.mxu1 %v737_v4 }
  0x10   :  { %693 = vmatprep.subr.bf16.mxu0 %v738_v7  ;;  %719 = vmatprep.subr.bf16.mxu1 %v738_v7 }
  0x12   :  { %453 = vperm.xlu1 %733, %v407_v19   ;;  %448 = vperm.xlu0 %732, %v406_v20  }
  0x13   :  { %694 = vmatpush3.bf16.msra.mxu0 %v738_v7  ;;  %726 = vmatpush3.bf16.msra.mxu1 %v738_v7 }
  0x14   :  { %695 = vmatprep.subr.bf16.mxu0 %v739_v10  ;;  %720 = vmatprep.subr.bf16.mxu1 %v739_v10 }
  0x16   :  { %463 = vperm.xlu1 %733, %v409_v23   ;;  %458 = vperm.xlu0 %732, %v408_v24  }
  0x17   :  { %696 = vmatpush3.bf16.msra.mxu0 %v739_v10  ;;  %727 = vmatpush3.bf16.msra.mxu1 %v739_v10 }
  0x18   :  { %729 = vmatprep.subr.msk.bf16.mxu0 %vm157_vm1, %v740_v13  ;;  %730 = vmatprep.subr.msk.bf16.mxu1 %vm157_vm1, %v740_v13 }
  0x1a   :  { %473 = vperm.xlu1 %733, %v411_v27   ;;  %468 = vperm.xlu0 %732, %v410_v28  }
  0x1b   :  { %698 = vmatpush3.bf16.msra.mxu0 %v159_v16  ;;  %728 = vmatpush3.bf16.msra.mxu1 %v159_v16 }
  0x1e   :  { %700 = vmatmul.mubr.msk.bf16.vlgmr.msra.gmra.mrb[0].mxu0 %vm132_vm0, %v743_v17  ;;  %708 = vmatmul.mubr.msk.bf16.vlgmr.msra.gmra.mrb[0].mxu1 %vm132_vm0, %v744_v18 }
  0x1f   :  { %703 = vmatprep.mubr.msk.bf16.mxu0 %vm132_vm0, %v745_v21  ;;  %711 = vmatprep.mubr.msk.bf16.mxu1 %vm132_vm0, %v746_v22 }
  0x20   :  { %483 = vperm.xlu1 %733, %v413_v29   ;;  %478 = vperm.xlu0 %732, %v412_v30  }
  0x24   :  { %493 = vperm.xlu1 %733, %v415_v31   ;;  %488 = vperm.xlu0 %732, %v414_v32  }
  0x26   :  { %704 = vmatmul.mubr.msk.bf16.gmra.mrb[4].mxu0 %vm132_vm0, %v747_v25  ;;  %712 = vmatmul.mubr.msk.bf16.gmra.mrb[4].mxu1 %vm132_vm0, %v748_v26 }
  0x85   :  { %v913_v33 = vpop.permute.xlu0 %418  ;;  %v915_v34 = vpop.permute.xlu1 %428 }
  0x89   :  { %v917_v35 = vpop.permute.xlu0 %423  ;;  %v924_v37 = vpop.permute.xlu1 %433 }
  0x8d   :  { %v926_v38 = vpop.permute.xlu0 %438  ;;  %v957_v0 = vpop.permute.xlu1 %443 }
  0x91   :  { %v959_v1 = vpop.permute.xlu0 %448  ;;  %v989_v32 = vpop.permute.xlu1 %453 }
  0xf1   :  { %v701_v39 = vpop.f32.mrb[0].mxu0  ;;  %v709_v41 = vpop.f32.mrb[0].mxu1 }
  0xf2   :  { %v267_v42 = vmul.f32 %v701_v39, %v922_v36  ;;  %v275_v43 = vmul.f32 %v709_v41, %v922_v36  ;;  %v195_v44 = vpop.f32.mrb[1].mxu0  ;;  %v227_v45 = vpop.f32.mrb[1].mxu1 }
  0xf3   :  { %v265_v46 = vmul.f32 %v922_v36, %v195_v44  ;;  %v273_v47 = vmul.f32 %v922_v36, %v227_v45  ;;  %v702_v48 = vpop.f32.mrb[2].mxu0  ;;  %v710_v49 = vpop.f32.mrb[2].mxu1 }
  0xf4   :  { %v938_v50 = vadd.f32 %v931_v40, %v267_v42  ;;  %v941_v51 = vadd.f32 %v931_v40, %v275_v43  ;;  %v268_v52 = vmul.f32 %v702_v48, %v922_v36  ;;  %v276_v53 = vmul.f32 %v710_v49, %v922_v36  ;;  %v198_v54 = vpop.f32.mrb[3].mxu0  ;;  %v230_v55 = vpop.f32.mrb[3].mxu1 }
  0xf5   :  { %v946_v56 = vadd.f32 %v931_v40, %v265_v46  ;;  %v949_v57 = vadd.f32 %v931_v40, %v273_v47  ;;  %v266_v58 = vmul.f32 %v922_v36, %v198_v54  ;;  %v274_v59 = vmul.f32 %v922_v36, %v230_v55  ;;  %v459_v43 = vpop.permute.xlu0 %458 }
  0xf6   :  { %v322_v60 = vmin.f32 %v938_v50, 0.0  ;;  %v330_v61 = vmin.f32 %v941_v51, 0.0  ;;  %v962_v4 = vadd.f32 %v931_v40, %v268_v52  ;;  %v965_v5 = vadd.f32 %v931_v40, %v276_v53 }
  0xf7   :  { %v320_v62 = vmin.f32 %v946_v56, 0.0  ;;  %v328_v63 = vmin.f32 %v949_v57, 0.0  ;;  %v968_v8 = vadd.f32 %v931_v40, %v266_v58  ;;  %v971_v9 = vadd.f32 %v931_v40, %v274_v59 }
  0xf8   :  { %v340_v2 = vmul.f32 1.442695, %v322_v60  ;;  %v356_v3 = vmul.f32 1.442695, %v330_v61  ;;  %v323_v12 = vmin.f32 %v962_v4, 0.0  ;;  %v331_v15 = vmin.f32 %v965_v5, 0.0 }
  0xf9   :  { %v336_v6 = vmul.f32 1.442695, %v320_v62  ;;  %v352_v7 = vmul.f32 1.442695, %v328_v63  ;;  %v705_v10 = vpop.f32.mrb[4].mxu0  ;;  %v713_v11 = vpop.f32.mrb[4].mxu1 }
  0xfa   :  { %749 = vpow2.f32 %v340_v2  ;;  %v211_v13 = vpop.f32.mrb[5].mxu0  ;;  %v243_v14 = vpop.f32.mrb[5].mxu1  ;;  %v321_v16 = vmin.f32 %v968_v8, 0.0  ;;  %v342_v19 = vmul.f32 1.442695, %v323_v12  ;;  %v329_v20 = vmin.f32 %v971_v9, 0.0 }
  0xfb   :  { %751 = vpow2.f32 %v356_v3  ;;  %v706_v17 = vpop.f32.mrb[6].mxu0  ;;  %v714_v18 = vpop.f32.mrb[6].mxu1  ;;  %v358_v23 = vmul.f32 1.442695, %v331_v15  ;;  %v271_v25 = vmul.f32 %v705_v10, %v922_v36  ;;  %vm306_vm2 = vcmp.gt.f32.partialorder %v938_v50, 0.0 }
  0xfc   :  { %753 = vpow2.f32 %v336_v6  ;;  %v214_v21 = vpop.f32.mrb[7].mxu0  ;;  %v977_v22 = vpop.f32.mrb[7].mxu1  ;;  %v338_v24 = vmul.f32 1.442695, %v321_v16  ;;  %v354_v26 = vmul.f32 1.442695, %v329_v20  ;;  %v279_v27 = vmul.f32 %v713_v11, %v922_v36 }
  0xfd   :  { %755 = vpow2.f32 %v352_v7  ;;  %v269_v28 = vmul.f32 %v922_v36, %v211_v13  ;;  %vm314_vm3 = vcmp.gt.f32.partialorder %v941_v51, 0.0  ;;  %v985_v29 = vadd.f32 %v931_v40, %v271_v25  ;;  %v464_v63 = vpop.permute.xlu1 %463  ;;  %v469_v10 = vpop.permute.xlu0 %468 }
  0xfe   :  { %757 = vpow2.f32 %v342_v19  ;;  %v277_v30 = vmul.f32 %v922_v36, %v243_v14  ;;  %v272_v31 = vmul.f32 %v706_v17, %v922_v36  ;;  %v992_v39 = vadd.f32 %v931_v40, %v279_v27 }
  0xff   :  { %759 = vpow2.f32 %v358_v23  ;;  %v995_v41 = vadd.f32 %v931_v40, %v269_v28  ;;  %v280_v42 = vmul.f32 %v714_v18, %v922_v36  ;;  %vm304_vm5 = vcmp.gt.f32.partialorder %v946_v56, 0.0 }
 0x100   :  { %761 = vpow2.f32 %v338_v24  ;;  %v326_v44 = vmin.f32 %v985_v29, 0.0  ;;  %v1001_v45 = vadd.f32 %v931_v40, %v277_v30  ;;  %vm312_vm6 = vcmp.gt.f32.partialorder %v949_v57, 0.0 }
 0x101   :  { %763 = vpow2.f32 %v354_v26  ;;  %vm307_vm7 = vcmp.gt.f32.partialorder %v962_v4, 0.0  ;;  %v334_v46 = vmin.f32 %v992_v39, 0.0  ;;  %v324_v47 = vmin.f32 %v995_v41, 0.0 }
 0x102   :  { %vm315_vm8 = vcmp.gt.f32.partialorder %v965_v5, 0.0  ;;  %v348_v48 = vmul.f32 1.442695, %v326_v44  ;;  %v332_v49 = vmin.f32 %v1001_v45, 0.0  ;;  %v1010_v52 = vadd.f32 %v931_v40, %v272_v31 }
 0x103   :  { %vm305_vm9 = vcmp.gt.f32.partialorder %v968_v8, 0.0  ;;  %v364_v54 = vmul.f32 1.442695, %v334_v46  ;;  %v344_v55 = vmul.f32 1.442695, %v324_v47  ;;  %v1014_v58 = vadd.f32 %v931_v40, %v280_v42 }
 0x104   :  { %v750_v53 = vpop.eup %749  ;;  %vm313_vm10 = vcmp.gt.f32.partialorder %v971_v9, 0.0  ;;  %765 = vpow2.f32 %v348_v48  ;;  %v360_v61 = vmul.f32 1.442695, %v332_v49  ;;  %v327_v3 = vmin.f32 %v1010_v52, 0.0 }
 0x105   :  { %v752_v59 = vpop.eup %751  ;;  %v624_v60 = vadd.f32 -1.0, %v750_v53  ;;  %767 = vpow2.f32 %v364_v54  ;;  %v270_v6 = vmul.f32 %v922_v36, %v214_v21  ;;  %v335_v13 = vmin.f32 %v1014_v58, 0.0 }
 0x106   :  { %v754_v62 = vpop.eup %753  ;;  %v632_v2 = vadd.f32 -1.0, %v752_v59  ;;  %769 = vpow2.f32 %v344_v55  ;;  %v350_v21 = vmul.f32 1.442695, %v327_v3  ;;  %v278_v59 = vmul.f32 %v922_v36, %v977_v22 }
 0x107   :  { %v756_v7 = vpop.eup %755  ;;  %v386_v11 = vsel %vm306_vm2, %v938_v50, %v624_v60  ;;  %v622_v12 = vadd.f32 -1.0, %v754_v62  ;;  %771 = vpow2.f32 %v360_v61  ;;  %v366_v49 = vmul.f32 1.442695, %v335_v13 }
 0x108   :  { %v758_v14 = vpop.eup %757  ;;  %v498_v15 = vmul.f32 %v915_v34, %v386_v11  ;;  %v394_v16 = vsel %vm314_vm3, %v941_v51, %v632_v2  ;;  %v630_v17 = vadd.f32 -1.0, %v756_v7  ;;  %773 = vpow2.f32 %v350_v21 }
 0x109   :  { %v760_v18 = vpop.eup %759  ;;  %v506_v19 = vmul.f32 %v469_v10, %v394_v16  ;;  %v384_v20 = vsel %vm304_vm5, %v946_v56, %v622_v12  ;;  %v625_v50 = vadd.f32 -1.0, %v758_v14  ;;  %v474_v56 = vpop.permute.xlu1 %473  ;;  %v1065_v55 = vadd.f32 %v931_v40, %v270_v6 }
 0x10a   :  { %v762_v23 = vpop.eup %761  ;;  %v656_v24 = vpack.c.bf16 %v498_v15, %v498_v15  ;;  %v496_v25 = vmul.f32 %v913_v33, %v384_v20  ;;  %v392_v34 = vsel %vm312_vm6, %v949_v57, %v630_v17  ;;  %v633_v26 = vadd.f32 -1.0, %v760_v18 }
 0x10b   :  { %v764_v51 = vpop.eup %763  ;;  %v664_v27 = vpack.c.bf16 %v506_v19, %v506_v19  ;;  %v504_v28 = vmul.f32 %v459_v43, %v392_v34  ;;  %v387_v30 = vsel %vm307_vm7, %v962_v4, %v625_v50  ;;  %v623_v31 = vadd.f32 -1.0, %v762_v23  ;;  %v479_v4 = vpop.permute.xlu0 %478 }
 0x10c   :  { %579 = vst.msk [vmem:[%s1142_s5 + $0x8] sm:$0xf] %vm576_vm4, %v656_v24  ;;  %v654_v33 = vpack.c.bf16 %v496_v25, %v496_v25  ;;  %v499_v42 = vmul.f32 %v924_v37, %v387_v30  ;;  %v395_v57 = vsel %vm315_vm8, %v965_v5, %v633_v26  ;;  %v631_v44 = vadd.f32 -1.0, %v764_v51 }
 0x10d   :  { %587 = vst.msk [vmem:[%s1142_s5 + $0x28] sm:$0xf] %vm576_vm4, %v664_v27  ;;  %v662_v43 = vpack.c.bf16 %v504_v28, %v504_v28  ;;  %v507_v46 = vmul.f32 %v474_v56, %v395_v57  ;;  %v385_v47 = vsel %vm305_vm9, %v968_v8, %v623_v31  ;;  %vm310_vm11 = vcmp.gt.f32.partialorder %v985_v29, 0.0  ;;  %v484_v50 = vpop.permute.xlu1 %483 }
 0x10e   :  { %577 = vst.msk [vmem:[%s1142_s5] sm:$0xf] %vm576_vm4, %v654_v33  ;;  %v657_v37 = vpack.c.bf16 %v499_v42, %v499_v42  ;;  %v497_v5 = vmul.f32 %v917_v35, %v385_v47  ;;  %v393_v48 = vsel %vm313_vm10, %v971_v9, %v631_v44  ;;  %v766_v53 = vpop.eup %765  ;;  %775 = vpow2.f32 %v366_v49 }
 0x10f   :  { %585 = vst.msk [vmem:[%s1142_s5 + $0x20] sm:$0xf] %vm576_vm4, %v662_v43  ;;  %v665_v8 = vpack.c.bf16 %v507_v46, %v507_v46  ;;  %v505_v54 = vmul.f32 %v464_v63, %v393_v48  ;;  %v768_v35 = vpop.eup %767  ;;  %v628_v60 = vadd.f32 -1.0, %v766_v53  ;;  %vm318_vm12 = vcmp.gt.f32.partialorder %v992_v39, 0.0  ;;  %v489_v7 = vpop.permute.xlu0 %488 }
 0x110   :  { %580 = vst.msk [vmem:[%s1142_s5 + $0xc] sm:$0xf] %vm576_vm4, %v657_v37  ;;  %v655_v9 = vpack.c.bf16 %v497_v5, %v497_v5  ;;  %v770_v61 = vpop.eup %769  ;;  %v636_v36 = vadd.f32 -1.0, %v768_v35  ;;  %v325_v22 = vmin.f32 %v1065_v55, 0.0  ;;  %vm308_vm13 = vcmp.gt.f32.partialorder %v995_v41, 0.0 }
 0x111   :  { %588 = vst.msk [vmem:[%s1142_s5 + $0x2c] sm:$0xf] %vm576_vm4, %v665_v8  ;;  %v663_v62 = vpack.c.bf16 %v505_v54, %v505_v54  ;;  %v772_v63 = vpop.eup %771  ;;  %v390_v2 = vsel %vm310_vm11, %v985_v29, %v628_v60  ;;  %v626_v3 = vadd.f32 -1.0, %v770_v61  ;;  %v301_v6 = vadd.f32 %v931_v40, %v278_v59  ;;  %v494_v25 = vpop.permute.xlu1 %493 }
 0x112   :  { %578 = vst.msk [vmem:[%s1142_s5 + $0x4] sm:$0xf] %vm576_vm4, %v655_v9  ;;  %v502_v10 = vmul.f32 %v959_v1, %v390_v2  ;;  %v398_v11 = vsel %vm318_vm12, %v992_v39, %v636_v36  ;;  %v634_v12 = vadd.f32 -1.0, %v772_v63  ;;  %v346_v13 = vmul.f32 1.442695, %v325_v22  ;;  %v774_v1 = vpop.eup %773 }
 0x113   :  { %586 = vst.msk [vmem:[%s1142_s5 + $0x24] sm:$0xf] %vm576_vm4, %v663_v62  ;;  %v510_v14 = vmul.f32 %v489_v7, %v398_v11  ;;  %v388_v29 = vsel %vm308_vm13, %v995_v41, %v626_v3  ;;  %vm316_vm14 = vcmp.gt.f32.partialorder %v1001_v45, 0.0  ;;  %v333_v15 = vmin.f32 %v301_v6, 0.0 }
 0x114   :  { %v660_v16 = vpack.c.bf16 %v502_v10, %v502_v10  ;;  %v500_v40 = vmul.f32 %v926_v38, %v388_v29  ;;  %v396_v17 = vsel %vm316_vm14, %v1001_v45, %v634_v12  ;;  %777 = vpow2.f32 %v346_v13 }
 0x115   :  { %v668_v18 = vpack.c.bf16 %v510_v14, %v510_v14  ;;  %v508_v19 = vmul.f32 %v479_v4, %v396_v17  ;;  %v362_v20 = vmul.f32 1.442695, %v333_v15  ;;  %v629_v41 = vadd.f32 -1.0, %v774_v1 }
 0x116   :  { %583 = vst.msk [vmem:[%s1142_s5 + $0x18] sm:$0xf] %vm576_vm4, %v660_v16  ;;  %v658_v39 = vpack.c.bf16 %v500_v40, %v500_v40  ;;  %vm311_vm15 = vcmp.gt.f32.partialorder %v1010_v52, 0.0  ;;  %vm319_vm0 = vcmp.gt.f32.partialorder %v1014_v58, 0.0  ;;  %vm309_vm1 = vcmp.gt.f32.partialorder %v1065_v55, 0.0 }
 0x117   :  { %591 = vst.msk [vmem:[%s1142_s5 + $0x38] sm:$0xf] %vm576_vm4, %v668_v18  ;;  %v666_v38 = vpack.c.bf16 %v508_v19, %v508_v19  ;;  %779 = vpow2.f32 %v362_v20  ;;  %v391_v21 = vsel %vm311_vm15, %v1010_v52, %v629_v41  ;;  %vm317_vm2 = vcmp.gt.f32.partialorder %v301_v6, 0.0 }
 0x118   :  { %581 = vst.msk [vmem:[%s1142_s5 + $0x10] sm:$0xf] %vm576_vm4, %v658_v39  ;;  %v776_v45 = vpop.eup %775  ;;  %v503_v23 = vmul.f32 %v989_v32, %v391_v21 }
 0x119   :  { %589 = vst.msk [vmem:[%s1142_s5 + $0x30] sm:$0xf] %vm576_vm4, %v666_v38  ;;  %v637_v24 = vadd.f32 -1.0, %v776_v45 }
 0x11a   :  { %v661_v34 = vpack.c.bf16 %v503_v23, %v503_v23 }
 0x11b   :  { %v399_v26 = vsel %vm319_vm0, %v1014_v58, %v637_v24 }
 0x11c   :  { %v511_v51 = vmul.f32 %v494_v25, %v399_v26  ;;  %584 = vst.msk [vmem:[%s1142_s5 + $0x1c] sm:$0xf] %vm576_vm4, %v661_v34 }
 0x11e   :  { %v778_v27 = vpop.eup %777  ;;  %v669_v28 = vpack.c.bf16 %v511_v51, %v511_v51 }
 0x11f   :  { %v627_v30 = vadd.f32 -1.0, %v778_v27 }
 0x120   :  { %592 = vst.msk [vmem:[%s1142_s5 + $0x3c] sm:$0xf] %vm576_vm4, %v669_v28 }
 0x121   :  { %v780_v52 = vpop.eup %779  ;;  %v389_v32 = vsel %vm309_vm1, %v1065_v55, %v627_v30 }
 0x122   :  { %v501_v58 = vmul.f32 %v957_v0, %v389_v32  ;;  %v635_v31 = vadd.f32 -1.0, %v780_v52 }
 0x124   :  { %v659_v56 = vpack.c.bf16 %v501_v58, %v501_v58  ;;  %v397_v33 = vsel %vm317_vm2, %v301_v6, %v635_v31 }
 0x125   :  { %v509_v42 = vmul.f32 %v484_v50, %v397_v33 }
 0x126   :  { %582 = vst.msk [vmem:[%s1142_s5 + $0x14] sm:$0xf] %vm576_vm4, %v659_v56 }
 0x127   :  { %v667_v57 = vpack.c.bf16 %v509_v42, %v509_v42 }
 0x129   :  { %590 = vst.msk [vmem:[%s1142_s5 + $0x34] sm:$0xf] %vm576_vm4, %v667_v57 }

// kernel: vae_forward.16
= control target key start
LH: loop header
LB: loop body
LE: loop exit
PB: predicated region body
PF: predicated region fallthrough
CT: control target
= control target key end

     0   :  { %v871_v0 = vmov 0   ;;  %vm217_vm0 = vcmask 719872   ;;  %vm242_vm1 = vcmask 1043456   ;;  %vm661_vm2 = vcmask 60416   ;;  %s1297_s1 = inlined_call_operand.vmem [shape: bf16[216,8], index: 1, kind: input, shape index: {}]   ;;  %s1298_s0 = inlined_call_operand.vmem [shape: bf16[128,216], index: 0, kind: input, shape index: {}]   ;;  %s1299_s4 = inlined_call_operand.vmem [shape: f32[128,1], index: 4, kind: input, shape index: {}]   ;;  %s1300_s2 = inlined_call_operand.vmem [shape: f32[1,8], index: 2, kind: input, shape index: {}]   ;;  %s1301_s3 = inlined_call_operand.vmem [shape: f32[1,8], index: 3, kind: input, shape index: {}]   ;;  %s1302_s5 = inlined_call_operand.vmem [shape: bf16[128,8], index: 5, kind: output, shape index: {}]  }
   0x1   :  { %246 = vmatprep.subr.bf16.mxu0 %v871_v0  ;;  %770 = vmatprep.subr.bf16.mxu1 %v871_v0  ;;  %v801_v1 = vld [vmem:[%s1297_s1] sm:$0xff]   ;;  %v802_v2 = vld [vmem:[%s1297_s1 + $0x8] sm:$0xff]   ;;  %v803_v3 = vld [vmem:[%s1297_s1 + $0x10] sm:$0xff]  }
   0x2   :  { %800 = vset.pattern.permute.xlu1 %v871_v0  ;;  %799 = vset.pattern.permute.xlu0 %v871_v0  ;;  %v804_v4 = vld [vmem:[%s1297_s1 + $0x18] sm:$0xff]   ;;  %v805_v5 = vld [vmem:[%s1297_s1 + $0x20] sm:$0xff]   ;;  %v806_v8 = vld [vmem:[%s1297_s1 + $0x28] sm:$0xff]  }
   0x3   :  { %247 = vmatpush1.bf16.msra.mxu0 %v801_v1  ;;  %784 = vmatpush1.bf16.msra.mxu1 %v801_v1  ;;  %v817_v6 = vld [vmem:[%s1298_s0 + $0x4] ss:$8 sps:$4 sm:$0xff]   ;;  %v807_v9 = vld [vmem:[%s1297_s1 + $0x30] sm:$0xff]   ;;  %v808_v12 = vld [vmem:[%s1297_s1 + $0x38] sm:$0xff]  }
   0x4   :  { %248 = vmatprep.subr.bf16.mxu0 %v871_v0  ;;  %771 = vmatprep.subr.bf16.mxu1 %v871_v0  ;;  %v820_v7 = vld [vmem:[%s1298_s0 + $0x44] ss:$8 sps:$4 sm:$0xff]   ;;  %v487_v10 = vld [vmem:[%s1299_s4 + $0x10] sm:$0xff]  ;;  %v488_v13 = vld [vmem:[%s1299_s4 + $0x18] sm:$0xff] }
   0x5   :  { %712 = vmatprep.mubr.msk.bf16.mxu0 %vm217_vm0, %v817_v6  ;;  %716 = vmatprep.mubr.msk.bf16.mxu1 %vm217_vm0, %v820_v7  ;;  %v485_v11 = vld [vmem:[%s1299_s4] sm:$0xff]  ;;  %v486_v14 = vld [vmem:[%s1299_s4 + $0x8] sm:$0xff]  ;;  %v492_v19 = vld [vmem:[%s1299_s4 + $0x38] sm:$0xff] }
   0x6   :  { %513 = vperm.xlu1 %800, %v487_v10   ;;  %503 = vperm.xlu0 %799, %v485_v11   ;;  %v809_v15 = vld [vmem:[%s1297_s1 + $0x40] sm:$0xff]   ;;  %v490_v16 = vld [vmem:[%s1299_s4 + $0x28] sm:$0xff]  ;;  %v491_v20 = vld [vmem:[%s1299_s4 + $0x30] sm:$0xff] }
   0x7   :  { %249 = vmatpush1.bf16.msra.mxu0 %v802_v2  ;;  %785 = vmatpush1.bf16.msra.mxu1 %v802_v2  ;;  %v489_v17 = vld [vmem:[%s1299_s4 + $0x20] sm:$0xff]  ;;  %v810_v18 = vld [vmem:[%s1297_s1 + $0x48] sm:$0xff]   ;;  %v811_v21 = vld [vmem:[%s1297_s1 + $0x50] sm:$0xff]  }
   0x8   :  { %250 = vmatprep.subr.bf16.mxu0 %v871_v0  ;;  %772 = vmatprep.subr.bf16.mxu1 %v871_v0  ;;  %v494_v22 = vld [vmem:[%s1299_s4 + $0x48] sm:$0xff]  ;;  %v493_v23 = vld [vmem:[%s1299_s4 + $0x40] sm:$0xff]  ;;  %v812_v24 = vld [vmem:[%s1297_s1 + $0x58] sm:$0xff]  }
   0x9   :  { %v496_v25 = vld [vmem:[%s1299_s4 + $0x58] sm:$0xff]  ;;  %v495_v26 = vld [vmem:[%s1299_s4 + $0x50] sm:$0xff]  ;;  %v813_v27 = vld [vmem:[%s1297_s1 + $0x60] sm:$0xff]  }
   0xa   :  { %518 = vperm.xlu1 %800, %v488_v13   ;;  %508 = vperm.xlu0 %799, %v486_v14   ;;  %v498_v28 = vld [vmem:[%s1299_s4 + $0x68] sm:$0xff]  ;;  %v497_v29 = vld [vmem:[%s1299_s4 + $0x60] sm:$0xff]  ;;  %v500_v31 = vld [vmem:[%s1299_s4 + $0x78] sm:$0xff] }
   0xb   :  { %251 = vmatpush1.bf16.msra.mxu0 %v803_v3  ;;  %786 = vmatpush1.bf16.msra.mxu1 %v803_v3  ;;  %v814_v30 = vld [vmem:[%s1297_s1 + $0x68] ss:$0 sps:$4 sm:$0xff]   ;;  %v499_v32 = vld [vmem:[%s1299_s4 + $0x70] sm:$0xff]  ;;  %v827_v40 = vld [vmem:[%s1298_s0 + $0x24] ss:$8 sps:$4 sm:$0xff]  }
   0xc   :  { %252 = vmatprep.subr.bf16.mxu0 %v871_v0  ;;  %773 = vmatprep.subr.bf16.mxu1 %v871_v0  ;;  %v244_v33 = vsel %vm242_vm1, %v814_v30, 0  ;;  %v815_v34 = vld [vmem:[%s1298_s0] ss:$8 sps:$4 sm:$0xff]   ;;  %v821_v36 = vld [vmem:[%s1298_s0 + $0x14] ss:$8 sps:$4 sm:$0xff]  }
   0xd   :  { %v818_v35 = vld [vmem:[%s1298_s0 + $0x40] ss:$8 sps:$4 sm:$0xff]   ;;  %v823_v37 = vld [vmem:[%s1298_s0 + $0x54] ss:$8 sps:$4 sm:$0xff]   ;;  %v825_v38 = vld [vmem:[%s1298_s0 + $0x10] ss:$8 sps:$4 sm:$0xff]  }
   0xe   :  { %528 = vperm.xlu1 %800, %v490_v16   ;;  %523 = vperm.xlu0 %799, %v489_v17   ;;  %v826_v39 = vld [vmem:[%s1298_s0 + $0x50] ss:$8 sps:$4 sm:$0xff]   ;;  %v829_v41 = vld [vmem:[%s1298_s0 + $0x64] ss:$8 sps:$4 sm:$0xff]   ;;  %v831_v42 = vld [vmem:[%s1298_s0 + $0x20] ss:$8 sps:$4 sm:$0xff]  }
   0xf   :  { %253 = vmatpush1.bf16.msra.mxu0 %v804_v4  ;;  %787 = vmatpush1.bf16.msra.mxu1 %v804_v4  ;;  %v832_v43 = vld [vmem:[%s1298_s0 + $0x60] ss:$8 sps:$4 sm:$0xff]   ;;  %v833_v44 = vld [vmem:[%s1298_s0 + $0x34] ss:$8 sps:$4 sm:$0xff]   ;;  %v837_v46 = vld [vmem:[%s1298_s0 + $0x30] ss:$8 sps:$4 sm:$0xff]  }
  0x10   :  { %254 = vmatprep.subr.bf16.mxu0 %v871_v0  ;;  %774 = vmatprep.subr.bf16.mxu1 %v871_v0  ;;  %v835_v45 = vld [vmem:[%s1298_s0 + $0x74] ss:$8 sps:$4 sm:$0xff]   ;;  %v838_v47 = vld [vmem:[%s1298_s0 + $0x70] ss:$8 sps:$4 sm:$0xff]   ;;  %v1085_v50 = vld [vmem:[%s1300_s2] ss:$0 sm:$0xff] }
  0x11   :  { %v1094_v54 = vld [vmem:[%s1301_s3] ss:$0 sm:$0xff] }
  0x12   :  { %538 = vperm.xlu1 %800, %v492_v19   ;;  %533 = vperm.xlu0 %799, %v491_v20  }
  0x13   :  { %255 = vmatpush1.bf16.msra.mxu0 %v805_v5  ;;  %788 = vmatpush1.bf16.msra.mxu1 %v805_v5 }
  0x14   :  { %256 = vmatprep.subr.bf16.mxu0 %v871_v0  ;;  %775 = vmatprep.subr.bf16.mxu1 %v871_v0 }
  0x16   :  { %548 = vperm.xlu1 %800, %v494_v22   ;;  %543 = vperm.xlu0 %799, %v493_v23  }
  0x17   :  { %257 = vmatpush1.bf16.msra.mxu0 %v806_v8  ;;  %789 = vmatpush1.bf16.msra.mxu1 %v806_v8 }
  0x18   :  { %258 = vmatprep.subr.bf16.mxu0 %v871_v0  ;;  %776 = vmatprep.subr.bf16.mxu1 %v871_v0 }
  0x1a   :  { %558 = vperm.xlu1 %800, %v496_v25   ;;  %553 = vperm.xlu0 %799, %v495_v26  }
  0x1b   :  { %259 = vmatpush1.bf16.msra.mxu0 %v807_v9  ;;  %790 = vmatpush1.bf16.msra.mxu1 %v807_v9 }
  0x1c   :  { %260 = vmatprep.subr.bf16.mxu0 %v871_v0  ;;  %777 = vmatprep.subr.bf16.mxu1 %v871_v0 }
  0x1e   :  { %568 = vperm.xlu1 %800, %v498_v28   ;;  %563 = vperm.xlu0 %799, %v497_v29  }
  0x1f   :  { %261 = vmatpush1.bf16.msra.mxu0 %v808_v12  ;;  %791 = vmatpush1.bf16.msra.mxu1 %v808_v12 }
  0x20   :  { %262 = vmatprep.subr.bf16.mxu0 %v871_v0  ;;  %778 = vmatprep.subr.bf16.mxu1 %v871_v0 }
  0x22   :  { %578 = vperm.xlu1 %800, %v500_v31   ;;  %573 = vperm.xlu0 %799, %v499_v32  }
  0x23   :  { %263 = vmatpush1.bf16.msra.mxu0 %v809_v15  ;;  %792 = vmatpush1.bf16.msra.mxu1 %v809_v15 }
  0x24   :  { %264 = vmatprep.subr.bf16.mxu0 %v871_v0  ;;  %779 = vmatprep.subr.bf16.mxu1 %v871_v0 }
  0x27   :  { %265 = vmatpush1.bf16.msra.mxu0 %v810_v18  ;;  %793 = vmatpush1.bf16.msra.mxu1 %v810_v18 }
  0x28   :  { %266 = vmatprep.subr.bf16.mxu0 %v871_v0  ;;  %780 = vmatprep.subr.bf16.mxu1 %v871_v0 }
  0x2b   :  { %267 = vmatpush1.bf16.msra.mxu0 %v811_v21  ;;  %794 = vmatpush1.bf16.msra.mxu1 %v811_v21 }
  0x2c   :  { %268 = vmatprep.subr.bf16.mxu0 %v871_v0  ;;  %781 = vmatprep.subr.bf16.mxu1 %v871_v0 }
  0x2f   :  { %269 = vmatpush1.bf16.msra.mxu0 %v812_v24  ;;  %795 = vmatpush1.bf16.msra.mxu1 %v812_v24 }
  0x30   :  { %270 = vmatprep.subr.bf16.mxu0 %v871_v0  ;;  %782 = vmatprep.subr.bf16.mxu1 %v871_v0 }
  0x33   :  { %271 = vmatpush1.bf16.msra.mxu0 %v813_v27  ;;  %796 = vmatpush1.bf16.msra.mxu1 %v813_v27 }
  0x34   :  { %272 = vmatprep.subr.bf16.mxu0 %v871_v0  ;;  %783 = vmatprep.subr.bf16.mxu1 %v871_v0 }
  0x37   :  { %273 = vmatpush1.bf16.msra.mxu0 %v244_v33  ;;  %797 = vmatpush1.bf16.msra.mxu1 %v244_v33 }
  0x3a   :  { %279 = vmatmul.mubr.bf16.vlgmr.msra.gmra.mrb[0].mxu0 %v815_v34  ;;  %311 = vmatmul.mubr.bf16.vlgmr.msra.gmra.mrb[0].mxu1 %v818_v35 }
  0x3b   :  { %713 = vmatprep.mubr.msk.bf16.mxu0 %vm217_vm0, %v821_v36  ;;  %717 = vmatprep.mubr.msk.bf16.mxu1 %vm217_vm0, %v823_v37 }
  0x42   :  { %287 = vmatmul.mubr.bf16.gmra.mrb[4].mxu0 %v825_v38  ;;  %319 = vmatmul.mubr.bf16.gmra.mrb[4].mxu1 %v826_v39 }
  0x43   :  { %714 = vmatprep.mubr.msk.bf16.mxu0 %vm217_vm0, %v827_v40  ;;  %718 = vmatprep.mubr.msk.bf16.mxu1 %vm217_vm0, %v829_v41 }
  0x4a   :  { %295 = vmatmul.mubr.bf16.gmra.mrb[8].mxu0 %v831_v42  ;;  %327 = vmatmul.mubr.bf16.gmra.mrb[8].mxu1 %v832_v43 }
  0x4b   :  { %715 = vmatprep.mubr.msk.bf16.mxu0 %vm217_vm0, %v833_v44  ;;  %719 = vmatprep.mubr.msk.bf16.mxu1 %vm217_vm0, %v835_v45 }
  0x52   :  { %303 = vmatmul.mubr.bf16.gmra.mrb[12].mxu0 %v837_v46  ;;  %335 = vmatmul.mubr.bf16.gmra.mrb[12].mxu1 %v838_v47 }
  0x85   :  { %v1078_v48 = vpop.permute.xlu1 %513  ;;  %v1080_v49 = vpop.permute.xlu0 %503 }
  0x89   :  { %v1087_v51 = vpop.permute.xlu1 %518  ;;  %v1089_v52 = vpop.permute.xlu0 %508 }
  0x8d   :  { %v1114_v8 = vpop.permute.xlu1 %528  ;;  %v1116_v9 = vpop.permute.xlu0 %523 }
  0x91   :  { %v1138_v34 = vpop.permute.xlu1 %538  ;;  %v1140_v35 = vpop.permute.xlu0 %533 }
 0x10d   :  { %v280_v53 = vpop.f32.mrb[0].mxu0  ;;  %v312_v55 = vpop.f32.mrb[0].mxu1 }
 0x10e   :  { %v350_v56 = vmul.f32 %v1085_v50, %v280_v53  ;;  %v358_v57 = vmul.f32 %v1085_v50, %v312_v55  ;;  %v282_v58 = vpop.f32.mrb[1].mxu0  ;;  %v314_v59 = vpop.f32.mrb[1].mxu1 }
 0x10f   :  { %v283_v60 = vpop.f32.mrb[2].mxu0  ;;  %v315_v61 = vpop.f32.mrb[2].mxu1 }
 0x110   :  { %v1099_v62 = vadd.f32 %v1094_v54, %v350_v56  ;;  %v1102_v63 = vadd.f32 %v1094_v54, %v358_v57  ;;  %v351_v0 = vmul.f32 %v1085_v50, %v283_v60  ;;  %v359_v1 = vmul.f32 %v1085_v50, %v315_v61  ;;  %v285_v2 = vpop.f32.mrb[3].mxu0  ;;  %v317_v3 = vpop.f32.mrb[3].mxu1 }
 0x112   :  { %v405_v4 = vmin.f32 %v1099_v62, 0.0  ;;  %v413_v5 = vmin.f32 %v1102_v63, 0.0  ;;  %v1109_v6 = vadd.f32 %v1094_v54, %v351_v0  ;;  %v1112_v7 = vadd.f32 %v1094_v54, %v359_v1 }
 0x113   :  { %vm389_vm3 = vcmp.gt.f32.partialorder %v1099_v62, 0.0  ;;  %vm397_vm4 = vcmp.gt.f32.partialorder %v1102_v63, 0.0 }
 0x114   :  { %v421_v10 = vmul.f32 1.442695, %v405_v4  ;;  %v437_v11 = vmul.f32 1.442695, %v413_v5  ;;  %v406_v12 = vmin.f32 %v1109_v6, 0.0  ;;  %v414_v13 = vmin.f32 %v1112_v7, 0.0 }
 0x115   :  { %v288_v14 = vpop.f32.mrb[4].mxu0  ;;  %v320_v15 = vpop.f32.mrb[4].mxu1  ;;  %vm390_vm5 = vcmp.gt.f32.partialorder %v1109_v6, 0.0  ;;  %vm398_vm6 = vcmp.gt.f32.partialorder %v1112_v7, 0.0 }
 0x116   :  { %839 = vpow2.f32 %v421_v10  ;;  %v423_v16 = vmul.f32 1.442695, %v406_v12  ;;  %v352_v17 = vmul.f32 %v1085_v50, %v288_v14  ;;  %v360_v18 = vmul.f32 %v1085_v50, %v320_v15  ;;  %v290_v19 = vpop.f32.mrb[5].mxu0  ;;  %v322_v20 = vpop.f32.mrb[5].mxu1 }
 0x117   :  { %841 = vpow2.f32 %v437_v11  ;;  %v439_v21 = vmul.f32 1.442695, %v414_v13  ;;  %v291_v22 = vpop.f32.mrb[6].mxu0  ;;  %v323_v23 = vpop.f32.mrb[6].mxu1 }
 0x118   :  { %843 = vpow2.f32 %v423_v16  ;;  %v1123_v24 = vadd.f32 %v1094_v54, %v352_v17  ;;  %v1126_v25 = vadd.f32 %v1094_v54, %v360_v18  ;;  %v353_v26 = vmul.f32 %v1085_v50, %v291_v22  ;;  %v293_v27 = vpop.f32.mrb[7].mxu0  ;;  %v325_v28 = vpop.f32.mrb[7].mxu1 }
 0x119   :  { %845 = vpow2.f32 %v439_v21  ;;  %v361_v29 = vmul.f32 %v1085_v50, %v323_v23  ;;  %v549_v16 = vpop.permute.xlu1 %548  ;;  %v544_v18 = vpop.permute.xlu0 %543 }
 0x11a   :  { %v407_v30 = vmin.f32 %v1123_v24, 0.0  ;;  %v415_v31 = vmin.f32 %v1126_v25, 0.0  ;;  %v1133_v32 = vadd.f32 %v1094_v54, %v353_v26  ;;  %vm391_vm7 = vcmp.gt.f32.partialorder %v1123_v24, 0.0 }
 0x11b   :  { %v1136_v33 = vadd.f32 %v1094_v54, %v361_v29  ;;  %vm399_vm8 = vcmp.gt.f32.partialorder %v1126_v25, 0.0 }
 0x11c   :  { %v425_v36 = vmul.f32 1.442695, %v407_v30  ;;  %v441_v37 = vmul.f32 1.442695, %v415_v31  ;;  %v408_v38 = vmin.f32 %v1133_v32, 0.0  ;;  %vm392_vm9 = vcmp.gt.f32.partialorder %v1133_v32, 0.0 }
 0x11d   :  { %v416_v39 = vmin.f32 %v1136_v33, 0.0  ;;  %v296_v40 = vpop.f32.mrb[8].mxu0  ;;  %v328_v41 = vpop.f32.mrb[8].mxu1  ;;  %vm400_vm10 = vcmp.gt.f32.partialorder %v1136_v33, 0.0 }
 0x11e   :  { %847 = vpow2.f32 %v425_v36  ;;  %v427_v42 = vmul.f32 1.442695, %v408_v38  ;;  %v354_v43 = vmul.f32 %v1085_v50, %v296_v40  ;;  %v362_v44 = vmul.f32 %v1085_v50, %v328_v41  ;;  %v298_v45 = vpop.f32.mrb[9].mxu0  ;;  %v330_v46 = vpop.f32.mrb[9].mxu1 }
 0x11f   :  { %849 = vpow2.f32 %v441_v37  ;;  %v443_v47 = vmul.f32 1.442695, %v416_v39  ;;  %v299_v53 = vpop.f32.mrb[10].mxu0  ;;  %v331_v55 = vpop.f32.mrb[10].mxu1 }
 0x120   :  { %v840_v56 = vpop.eup %839  ;;  %851 = vpow2.f32 %v427_v42  ;;  %v1149_v57 = vadd.f32 %v1094_v54, %v354_v43  ;;  %v1152_v58 = vadd.f32 %v1094_v54, %v362_v44  ;;  %v355_v59 = vmul.f32 %v1085_v50, %v299_v53  ;;  %v301_v60 = vpop.f32.mrb[11].mxu0 }
 0x121   :  { %v333_v61 = vpop.f32.mrb[11].mxu1  ;;  %v842_v0 = vpop.eup %841  ;;  %v722_v1 = vadd.f32 -1.0, %v840_v56  ;;  %853 = vpow2.f32 %v443_v47  ;;  %v363_v5 = vmul.f32 %v1085_v50, %v331_v55 }
 0x122   :  { %v844_v2 = vpop.eup %843  ;;  %v730_v3 = vadd.f32 -1.0, %v842_v0  ;;  %v409_v4 = vmin.f32 %v1149_v57, 0.0  ;;  %v417_v13 = vmin.f32 %v1152_v58, 0.0  ;;  %v1165_v14 = vadd.f32 %v1094_v54, %v355_v59 }
 0x123   :  { %v846_v10 = vpop.eup %845  ;;  %v469_v11 = vsel %vm389_vm3, %v1099_v62, %v722_v1  ;;  %v723_v12 = vadd.f32 -1.0, %v844_v2  ;;  %v1185_v39 = vadd.f32 %v1094_v54, %v363_v5  ;;  %vm393_vm11 = vcmp.gt.f32.partialorder %v1149_v57, 0.0 }
 0x124   :  { %v581_v15 = vmul.f32 %v1080_v49, %v469_v11  ;;  %v731_v17 = vadd.f32 -1.0, %v846_v10  ;;  %v477_v19 = vsel %vm397_vm4, %v1102_v63, %v730_v3  ;;  %v429_v20 = vmul.f32 1.442695, %v409_v4  ;;  %v554_v4 = vpop.permute.xlu0 %553 }
 0x125   :  { %v470_v62 = vsel %vm390_vm5, %v1109_v6, %v723_v12  ;;  %v589_v21 = vmul.f32 %v544_v18, %v477_v19  ;;  %v445_v22 = vmul.f32 1.442695, %v417_v13  ;;  %v304_v23 = vpop.f32.mrb[12].mxu0  ;;  %v336_v26 = vpop.f32.mrb[12].mxu1  ;;  %v410_v6 = vmin.f32 %v1165_v14, 0.0 }
 0x126   :  { %v754_v27 = vpack.c.bf16 %v581_v15, %v581_v15  ;;  %v582_v49 = vmul.f32 %v1089_v52, %v470_v62  ;;  %v478_v28 = vsel %vm398_vm6, %v1112_v7, %v731_v17  ;;  %855 = vpow2.f32 %v429_v20  ;;  %v306_v63 = vpop.f32.mrb[13].mxu0  ;;  %v338_v29 = vpop.f32.mrb[13].mxu1 }
 0x127   :  { %v590_v30 = vmul.f32 %v549_v16, %v478_v28  ;;  %v762_v31 = vpack.c.bf16 %v589_v21, %v589_v21  ;;  %857 = vpow2.f32 %v445_v22  ;;  %v307_v36 = vpop.f32.mrb[14].mxu0  ;;  %v339_v37 = vpop.f32.mrb[14].mxu1  ;;  %v356_v7 = vmul.f32 %v1085_v50, %v304_v23 }
 0x128   :  { %v848_v38 = vpop.eup %847  ;;  %662 = vst.msk [vmem:[%s1302_s5] sm:$0xf] %vm661_vm2, %v754_v27  ;;  %v755_v52 = vpack.c.bf16 %v582_v49, %v582_v49  ;;  %v364_v40 = vmul.f32 %v1085_v50, %v336_v26  ;;  %v309_v41 = vpop.f32.mrb[15].mxu0  ;;  %v431_v46 = vmul.f32 1.442695, %v410_v6  ;;  %v418_v55 = vmin.f32 %v1185_v39, 0.0 }
 0x129   :  { %v341_v42 = vpop.f32.mrb[15].mxu1  ;;  %v850_v43 = vpop.eup %849  ;;  %v763_v44 = vpack.c.bf16 %v590_v30, %v590_v30  ;;  %670 = vst.msk [vmem:[%s1302_s5 + $0x20] sm:$0xf] %vm661_vm2, %v762_v31  ;;  %v724_v45 = vadd.f32 -1.0, %v848_v38  ;;  %v1200_v56 = vadd.f32 %v1094_v54, %v356_v7  ;;  %v357_v59 = vmul.f32 %v1085_v50, %v307_v36 }
 0x12a   :  { %v852_v47 = vpop.eup %851  ;;  %663 = vst.msk [vmem:[%s1302_s5 + $0x4] sm:$0xf] %vm661_vm2, %v755_v52  ;;  %v732_v53 = vadd.f32 -1.0, %v850_v43  ;;  %859 = vpow2.f32 %v431_v46  ;;  %v1211_v1 = vadd.f32 %v1094_v54, %v364_v40  ;;  %v447_v10 = vmul.f32 1.442695, %v418_v55  ;;  %v564_v28 = vpop.permute.xlu0 %563 }
 0x12b   :  { %v854_v60 = vpop.eup %853  ;;  %671 = vst.msk [vmem:[%s1302_s5 + $0x24] sm:$0xf] %vm661_vm2, %v763_v44  ;;  %v471_v61 = vsel %vm391_vm7, %v1123_v24, %v724_v45  ;;  %v725_v0 = vadd.f32 -1.0, %v852_v47  ;;  %v411_v12 = vmin.f32 %v1200_v56, 0.0  ;;  %v1230_v62 = vadd.f32 %v1094_v54, %v357_v59 }
 0x12c   :  { %v583_v2 = vmul.f32 %v1078_v48, %v471_v61  ;;  %v733_v3 = vadd.f32 -1.0, %v854_v60  ;;  %v479_v5 = vsel %vm399_vm8, %v1126_v25, %v732_v53  ;;  %v559_v48 = vpop.permute.xlu1 %558  ;;  %861 = vpow2.f32 %v447_v10 }
 0x12d   :  { %v472_v11 = vsel %vm392_vm9, %v1133_v32, %v725_v0  ;;  %v591_v24 = vmul.f32 %v554_v4, %v479_v5  ;;  %v433_v25 = vmul.f32 1.442695, %v411_v12  ;;  %v419_v20 = vmin.f32 %v1211_v1, 0.0 }
 0x12e   :  { %v756_v13 = vpack.c.bf16 %v583_v2, %v583_v2  ;;  %v584_v15 = vmul.f32 %v1087_v51, %v472_v11  ;;  %v480_v16 = vsel %vm400_vm10, %v1136_v33, %v733_v3  ;;  %v365_v51 = vmul.f32 %v1085_v50, %v339_v37 }
 0x12f   :  { %v592_v17 = vmul.f32 %v559_v48, %v480_v16  ;;  %v764_v18 = vpack.c.bf16 %v591_v24, %v591_v24  ;;  %863 = vpow2.f32 %v433_v25  ;;  %v449_v26 = vmul.f32 1.442695, %v419_v20 }
 0x130   :  { %v856_v19 = vpop.eup %855  ;;  %664 = vst.msk [vmem:[%s1302_s5 + $0x8] sm:$0xf] %vm661_vm2, %v756_v13  ;;  %v757_v32 = vpack.c.bf16 %v584_v15, %v584_v15  ;;  %v412_v50 = vmin.f32 %v1230_v62, 0.0  ;;  %vm401_vm12 = vcmp.gt.f32.partialorder %v1152_v58, 0.0  ;;  %v388_v49 = vadd.f32 %v1094_v54, %v365_v51  ;;  %v569_v41 = vpop.permute.xlu1 %568 }
 0x131   :  { %v858_v21 = vpop.eup %857  ;;  %v765_v33 = vpack.c.bf16 %v592_v17, %v592_v17  ;;  %672 = vst.msk [vmem:[%s1302_s5 + $0x28] sm:$0xf] %vm661_vm2, %v764_v18  ;;  %v726_v22 = vadd.f32 -1.0, %v856_v19  ;;  %865 = vpow2.f32 %v449_v26  ;;  %vm394_vm13 = vcmp.gt.f32.partialorder %v1165_v14, 0.0 }
 0x132   :  { %665 = vst.msk [vmem:[%s1302_s5 + $0xc] sm:$0xf] %vm661_vm2, %v757_v32  ;;  %v734_v23 = vadd.f32 -1.0, %v858_v21  ;;  %v435_v30 = vmul.f32 1.442695, %v412_v50  ;;  %v420_v36 = vmin.f32 %v388_v49, 0.0 }
 0x133   :  { %673 = vst.msk [vmem:[%s1302_s5 + $0x2c] sm:$0xf] %vm661_vm2, %v765_v33  ;;  %v473_v27 = vsel %vm393_vm11, %v1149_v57, %v726_v22  ;;  %vm402_vm14 = vcmp.gt.f32.partialorder %v1185_v39, 0.0  ;;  %vm395_vm15 = vcmp.gt.f32.partialorder %v1200_v56, 0.0  ;;  %vm403_vm0 = vcmp.gt.f32.partialorder %v1211_v1, 0.0 }
 0x134   :  { %v585_v63 = vmul.f32 %v1116_v9, %v473_v27  ;;  %v481_v29 = vsel %vm401_vm12, %v1152_v58, %v734_v23  ;;  %v860_v31 = vpop.eup %859  ;;  %867 = vpow2.f32 %v435_v30  ;;  %v451_v57 = vmul.f32 1.442695, %v420_v36  ;;  %v579_v5 = vpop.permute.xlu1 %578 }
 0x135   :  { %v593_v6 = vmul.f32 %v564_v28, %v481_v29  ;;  %v727_v38 = vadd.f32 -1.0, %v860_v31  ;;  %vm396_vm1 = vcmp.gt.f32.partialorder %v1230_v62, 0.0  ;;  %vm404_vm3 = vcmp.gt.f32.partialorder %v388_v49, 0.0 }
 0x136   :  { %v758_v37 = vpack.c.bf16 %v585_v63, %v585_v63  ;;  %v862_v7 = vpop.eup %861  ;;  %869 = vpow2.f32 %v451_v57 }
 0x137   :  { %v766_v52 = vpack.c.bf16 %v593_v6, %v593_v6  ;;  %v474_v54 = vsel %vm394_vm13, %v1165_v14, %v727_v38  ;;  %v735_v58 = vadd.f32 -1.0, %v862_v7 }
 0x138   :  { %666 = vst.msk [vmem:[%s1302_s5 + $0x10] sm:$0xf] %vm661_vm2, %v758_v37  ;;  %v586_v9 = vmul.f32 %v1114_v8, %v474_v54 }
 0x139   :  { %674 = vst.msk [vmem:[%s1302_s5 + $0x30] sm:$0xf] %vm661_vm2, %v766_v52  ;;  %v864_v40 = vpop.eup %863  ;;  %v482_v43 = vsel %vm402_vm14, %v1185_v39, %v735_v58  ;;  %v574_v39 = vpop.permute.xlu0 %573 }
 0x13a   :  { %v759_v42 = vpack.c.bf16 %v586_v9, %v586_v9  ;;  %v594_v44 = vmul.f32 %v569_v41, %v482_v43  ;;  %v728_v45 = vadd.f32 -1.0, %v864_v40 }
 0x13b   :  { %v866_v14 = vpop.eup %865 }
 0x13c   :  { %667 = vst.msk [vmem:[%s1302_s5 + $0x14] sm:$0xf] %vm661_vm2, %v759_v42  ;;  %v767_v8 = vpack.c.bf16 %v594_v44, %v594_v44  ;;  %v475_v46 = vsel %vm395_vm15, %v1200_v56, %v728_v45  ;;  %v736_v53 = vadd.f32 -1.0, %v866_v14 }
 0x13d   :  { %v587_v47 = vmul.f32 %v1140_v35, %v475_v46 }
 0x13e   :  { %v868_v55 = vpop.eup %867  ;;  %675 = vst.msk [vmem:[%s1302_s5 + $0x34] sm:$0xf] %vm661_vm2, %v767_v8  ;;  %v483_v60 = vsel %vm403_vm0, %v1211_v1, %v736_v53 }
 0x13f   :  { %v760_v59 = vpack.c.bf16 %v587_v47, %v587_v47  ;;  %v729_v61 = vadd.f32 -1.0, %v868_v55  ;;  %v595_v0 = vmul.f32 %v574_v39, %v483_v60 }
 0x140   :  { %v870_v56 = vpop.eup %869 }
 0x141   :  { %668 = vst.msk [vmem:[%s1302_s5 + $0x18] sm:$0xf] %vm661_vm2, %v760_v59  ;;  %v476_v35 = vsel %vm396_vm1, %v1230_v62, %v729_v61  ;;  %v768_v2 = vpack.c.bf16 %v595_v0, %v595_v0  ;;  %v737_v4 = vadd.f32 -1.0, %v870_v56 }
 0x142   :  { %v588_v3 = vmul.f32 %v1138_v34, %v476_v35 }
 0x143   :  { %676 = vst.msk [vmem:[%s1302_s5 + $0x38] sm:$0xf] %vm661_vm2, %v768_v2  ;;  %v484_v10 = vsel %vm404_vm3, %v388_v49, %v737_v4 }
 0x144   :  { %v761_v1 = vpack.c.bf16 %v588_v3, %v588_v3  ;;  %v596_v11 = vmul.f32 %v579_v5, %v484_v10 }
 0x146   :  { %669 = vst.msk [vmem:[%s1302_s5 + $0x1c] sm:$0xf] %vm661_vm2, %v761_v1  ;;  %v769_v24 = vpack.c.bf16 %v596_v11, %v596_v11 }
 0x148   :  { %677 = vst.msk [vmem:[%s1302_s5 + $0x3c] sm:$0xf] %vm661_vm2, %v769_v24 }

// kernel: vae_forward.17
= control target key start
LH: loop header
LB: loop body
LE: loop exit
PB: predicated region body
PF: predicated region fallthrough
CT: control target
= control target key end

     0   :  { %v296_v0 = vmov 0   ;;  %vm140_vm0 = vcmask 719872   ;;  %vm144_vm1 = vcmask 1043456   ;;  %vm241_vm4 = vcmask 125952   ;;  %s393_s1 = inlined_call_operand.vmem [shape: bf16[216,16], index: 1, kind: input, shape index: {}]   ;;  %s394_s0 = inlined_call_operand.vmem [shape: bf16[16,216], index: 0, kind: input, shape index: {}]   ;;  %s395_s4 = inlined_call_operand.vmem [shape: f32[16,1], index: 4, kind: input, shape index: {}]   ;;  %s396_s2 = inlined_call_operand.vmem [shape: f32[1,16], index: 2, kind: input, shape index: {}]   ;;  %s397_s3 = inlined_call_operand.vmem [shape: f32[1,16], index: 3, kind: input, shape index: {}]   ;;  %s398_s5 = inlined_call_operand.vmem [shape: bf16[16,16], index: 5, kind: output, shape index: {}]  }
   0x1   :  { %148 = vmatprep.subr.bf16.mxu0 %v296_v0  ;;  %v275_v1 = vld [vmem:[%s393_s1] sm:$0xff]   ;;  %274 = vset.pattern.permute.xlu0 %v296_v0  ;;  %v276_v2 = vld [vmem:[%s393_s1 + $0x8] sm:$0xff]   ;;  %v277_v3 = vld [vmem:[%s393_s1 + $0x10] sm:$0xff]  }
   0x2   :  { %149 = vmatpush1.bf16.msra.mxu0 %v275_v1  ;;  %v278_v4 = vld [vmem:[%s393_s1 + $0x18] sm:$0xff]   ;;  %v279_v5 = vld [vmem:[%s393_s1 + $0x20] sm:$0xff]   ;;  %v220_v8 = vld [vmem:[%s395_s4 + $0x8] sm:$0xff] }
   0x3   :  { %150 = vmatprep.subr.bf16.mxu0 %v296_v0  ;;  %v291_v6 = vld [vmem:[%s394_s0 + $0x4] ss:$8 sps:$4 sm:$0xff]   ;;  %v281_v10 = vld [vmem:[%s393_s1 + $0x30] sm:$0xff]   ;;  %v282_v11 = vld [vmem:[%s393_s1 + $0x38] sm:$0xff]  }
   0x4   :  { %v219_v7 = vld [vmem:[%s395_s4] sm:$0xff]  ;;  %264 = vmatprep.mubr.msk.bf16.mxu0 %vm140_vm0, %v291_v6  ;;  %v280_v9 = vld [vmem:[%s393_s1 + $0x28] sm:$0xff]   ;;  %v285_v14 = vld [vmem:[%s393_s1 + $0x50] sm:$0xff]  }
   0x5   :  { %223 = vperm.xlu0 %274, %v219_v7   ;;  %v283_v12 = vld [vmem:[%s393_s1 + $0x40] sm:$0xff]   ;;  %v284_v13 = vld [vmem:[%s393_s1 + $0x48] sm:$0xff]   ;;  %v286_v15 = vld [vmem:[%s393_s1 + $0x58] sm:$0xff]  }
   0x6   :  { %151 = vmatpush1.bf16.msra.mxu0 %v276_v2  ;;  %v287_v16 = vld [vmem:[%s393_s1 + $0x60] sm:$0xff]   ;;  %v288_v17 = vld [vmem:[%s393_s1 + $0x68] ss:$0 sps:$4 sm:$0xff]  }
   0x7   :  { %152 = vmatprep.subr.bf16.mxu0 %v296_v0  ;;  %v146_v18 = vsel %vm144_vm1, %v288_v17, 0  ;;  %v289_v19 = vld [vmem:[%s394_s0] ss:$8 sps:$4 sm:$0xff]  }
   0x8   :  { %v265_v20 = vld [vmem:[%s396_s2] ss:$0 sm:$0xff] }
   0x9   :  { %228 = vperm.xlu0 %274, %v220_v8   ;;  %v266_v22 = vld [vmem:[%s397_s3] ss:$0 sm:$0xff] }
   0xa   :  { %153 = vmatpush1.bf16.msra.mxu0 %v277_v3 }
   0xb   :  { %154 = vmatprep.subr.bf16.mxu0 %v296_v0 }
   0xe   :  { %155 = vmatpush1.bf16.msra.mxu0 %v278_v4 }
   0xf   :  { %156 = vmatprep.subr.bf16.mxu0 %v296_v0 }
  0x12   :  { %157 = vmatpush1.bf16.msra.mxu0 %v279_v5 }
  0x13   :  { %158 = vmatprep.subr.bf16.mxu0 %v296_v0 }
  0x16   :  { %159 = vmatpush1.bf16.msra.mxu0 %v280_v9 }
  0x17   :  { %160 = vmatprep.subr.bf16.mxu0 %v296_v0 }
  0x1a   :  { %161 = vmatpush1.bf16.msra.mxu0 %v281_v10 }
  0x1b   :  { %162 = vmatprep.subr.bf16.mxu0 %v296_v0 }
  0x1e   :  { %163 = vmatpush1.bf16.msra.mxu0 %v282_v11 }
  0x1f   :  { %164 = vmatprep.subr.bf16.mxu0 %v296_v0 }
  0x22   :  { %165 = vmatpush1.bf16.msra.mxu0 %v283_v12 }
  0x23   :  { %166 = vmatprep.subr.bf16.mxu0 %v296_v0 }
  0x26   :  { %167 = vmatpush1.bf16.msra.mxu0 %v284_v13 }
  0x27   :  { %168 = vmatprep.subr.bf16.mxu0 %v296_v0 }
  0x2a   :  { %169 = vmatpush1.bf16.msra.mxu0 %v285_v14 }
  0x2b   :  { %170 = vmatprep.subr.bf16.mxu0 %v296_v0 }
  0x2e   :  { %171 = vmatpush1.bf16.msra.mxu0 %v286_v15 }
  0x2f   :  { %172 = vmatprep.subr.bf16.mxu0 %v296_v0 }
  0x32   :  { %173 = vmatpush1.bf16.msra.mxu0 %v287_v16 }
  0x33   :  { %174 = vmatprep.subr.bf16.mxu0 %v296_v0 }
  0x36   :  { %175 = vmatpush1.bf16.msra.mxu0 %v146_v18 }
  0x39   :  { %181 = vmatmul.mubr.bf16.vlgmr.msra.gmra.mrb[0].mxu0 %v289_v19 }
  0x84   :  { %v224_v34 = vpop.permute.xlu0 %223 }
  0x88   :  { %v229_v41 = vpop.permute.xlu0 %228 }
 0x10c   :  { %v182_v21 = vpop.f32.mrb[0].mxu0 }
 0x10d   :  { %v196_v23 = vmul.f32 %v265_v20, %v182_v21  ;;  %v184_v24 = vpop.f32.mrb[1].mxu0 }
 0x10e   :  { %v185_v25 = vpop.f32.mrb[2].mxu0 }
 0x10f   :  { %v205_v26 = vadd.f32 %v266_v22, %v196_v23  ;;  %v197_v27 = vmul.f32 %v265_v20, %v185_v25  ;;  %v187_v28 = vpop.f32.mrb[3].mxu0 }
 0x111   :  { %v209_v29 = vmin.f32 %v205_v26, 0.0  ;;  %v206_v30 = vadd.f32 %v266_v22, %v197_v27  ;;  %vm207_vm2 = vcmp.gt.f32.partialorder %v205_v26, 0.0 }
 0x113   :  { %v211_v31 = vmul.f32 1.442695, %v209_v29  ;;  %v210_v32 = vmin.f32 %v206_v30, 0.0  ;;  %vm208_vm3 = vcmp.gt.f32.partialorder %v206_v30, 0.0 }
 0x115   :  { %292 = vpow2.f32 %v211_v31  ;;  %v213_v33 = vmul.f32 1.442695, %v210_v32 }
 0x117   :  { %294 = vpow2.f32 %v213_v33 }
 0x11f   :  { %v293_v35 = vpop.eup %292 }
 0x120   :  { %v267_v36 = vadd.f32 -1.0, %v293_v35 }
 0x121   :  { %v295_v37 = vpop.eup %294 }
 0x122   :  { %v217_v38 = vsel %vm207_vm2, %v205_v26, %v267_v36  ;;  %v268_v39 = vadd.f32 -1.0, %v295_v37 }
 0x123   :  { %v231_v40 = vmul.f32 %v224_v34, %v217_v38 }
 0x124   :  { %v218_v42 = vsel %vm208_vm3, %v206_v30, %v268_v39 }
 0x125   :  { %v271_v43 = vpack.c.bf16 %v231_v40, %v231_v40  ;;  %v232_v44 = vmul.f32 %v229_v41, %v218_v42 }
 0x127   :  { %242 = vst.msk [vmem:[%s398_s5] sm:$0xf] %vm241_vm4, %v271_v43  ;;  %v272_v45 = vpack.c.bf16 %v232_v44, %v232_v44 }
 0x129   :  { %243 = vst.msk [vmem:[%s398_s5 + $0x4] sm:$0xf] %vm241_vm4, %v272_v45 }

// kernel: tile.33
= control target key start
LH: loop header
LB: loop body
LE: loop exit
PB: predicated region body
PF: predicated region fallthrough
CT: control target
= control target key end

     0   :  { %s22_s0 = inlined_call_operand.vmem [shape: f32[16], index: 0, kind: input, shape index: {}]   ;;  %s23_s1 = inlined_call_operand.vmem [shape: f32[8,16], index: 1, kind: output, shape index: {}]  }
   0x1   :  { %v4_v0 = vld [vmem:[%s22_s0] ss:$0 sm:$0xff] }
   0x2   :  { %5 = vst [vmem:[%s23_s1] sm:$0xff] %v4_v0 }

// kernel: tile.38
= control target key start
LH: loop header
LB: loop body
LE: loop exit
PB: predicated region body
PF: predicated region fallthrough
CT: control target
= control target key end

     0   :  { %s67_s10 = smov 112   ;;  %s68_s11 = smov 80   ;;  %vm3_vm0 = vcmask 130048   ;;  %vm9_vm1 = vcmask 1048448   ;;  %vm15_vm2 = vcmask 917248   ;;  %vm21_vm3 = vcmask 786048   ;;  %s111_s0 = inlined_call_operand.vmem [shape: f32[8,16], index: 0, kind: input, shape index: {}]   ;;  %s112_s1 = inlined_call_operand.vmem [shape: f32[1,128], index: 1, kind: output, shape index: {}]  }
   0x1   :  { %v53_v0 = vld [vmem:[%s111_s0 + $0x7] sm:$0x1]   ;;  %v55_v1 = vld [vmem:[%s111_s0 + $0x5] sm:$0x1]   ;;  %v54_v2 = vld [vmem:[%s111_s0 + $0x6] sm:$0x1]  }
   0x2   :  { %7 = vrot.lane.b32.xlu0 %v53_v0, %s67_s10  ;;  %19 = vrot.lane.b32.xlu1 %v55_v1, %s68_s11  ;;  %v56_v3 = vld [vmem:[%s111_s0 + $0x4] sm:$0x1]   ;;  %v2_v4 = vld [vmem:[%s111_s0] sm:$0x1]   ;;  %s69_s18 = smov 96   ;;  %s70_s19 = smov 64  }
   0x3   :  { %4 = vst.msk [vmem:[#allocation0] sm:$0x1] %vm3_vm0, %v2_v4   ;;  %v57_v5 = vld [vmem:[%s111_s0 + $0x3] sm:$0x1]   ;;  %v58_v6 = vld [vmem:[%s111_s0 + $0x2] sm:$0x1]  }
   0x4   :  { %s71_s24 = smov 48   ;;  %s72_s25 = smov 32   ;;  %v59_v7 = vld [vmem:[%s111_s0 + $0x1] sm:$0x1]   ;;  %vm27_vm4 = vcmask 654848   ;;  %vm33_vm5 = vcmask 523648  }
   0x5   :  { %s73_s0 = smov 16   ;;  %vm39_vm6 = vcmask 392448   ;;  %vm45_vm7 = vcmask 261248  }
   0x6   :  { %13 = vrot.lane.b32.xlu0 %v54_v2, %s69_s18  ;;  %25 = vrot.lane.b32.xlu1 %v56_v3, %s70_s19 }
   0xa   :  { %31 = vrot.lane.b32.xlu0 %v57_v5, %s71_s24  ;;  %37 = vrot.lane.b32.xlu1 %v58_v6, %s72_s25 }
   0xe   :  { %43 = vrot.lane.b32.xlu0 %v59_v7, %s73_s0 }
  0x74   :  { %v8_v8 = vpop.permute.xlu0 %7   ;;  %v20_v9 = vpop.permute.xlu1 %19  }
  0x75   :  { %10 = vst.msk [vmem:[#allocation0] sm:$0x1] %vm9_vm1, %v8_v8  }
  0x78   :  { %v14_v10 = vpop.permute.xlu0 %13   ;;  %v26_v11 = vpop.permute.xlu1 %25  }
  0x79   :  { %16 = vst.msk [vmem:[#allocation0] sm:$0x1] %vm15_vm2, %v14_v10  }
  0x7a   :  { %22 = vst.msk [vmem:[#allocation0] sm:$0x1] %vm21_vm3, %v20_v9  }
  0x7b   :  { %28 = vst.msk [vmem:[#allocation0] sm:$0x1] %vm27_vm4, %v26_v11  }
  0x7c   :  { %v32_v12 = vpop.permute.xlu0 %31   ;;  %v38_v13 = vpop.permute.xlu1 %37  }
  0x7d   :  { %34 = vst.msk [vmem:[#allocation0] sm:$0x1] %vm33_vm5, %v32_v12  }
  0x7e   :  { %40 = vst.msk [vmem:[#allocation0] sm:$0x1] %vm39_vm6, %v38_v13  }
  0x80   :  { %v44_v14 = vpop.permute.xlu0 %43  }
  0x81   :  { %46 = vst.msk [vmem:[#allocation0] sm:$0x1] %vm45_vm7, %v44_v14  }
  0x88   :  { %v50_v15 = vld [vmem:[#allocation0] sm:$0x1] }
  0x89   :  { %52 = vst [vmem:[%s112_s1] sm:$0x1] %v50_v15 }

// kernel: vae_forward.18
= control target key start
LH: loop header
LB: loop body
LE: loop exit
PB: predicated region body
PF: predicated region fallthrough
CT: control target
= control target key end

     0   :  { %v506_v0 = vmov 0   ;;  %vm260_vm0 = vcmask 392192   ;;  %vm398_vm3 = vcmask 125952   ;;  %s660_s1 = inlined_call_operand.vmem [shape: bf16[432,16], index: 1, kind: input, shape index: {}]   ;;  %s661_s0 = inlined_call_operand.vmem [shape: bf16[16,432], index: 0, kind: input, shape index: {}]   ;;  %s662_s4 = inlined_call_operand.vmem [shape: f32[16,1], index: 4, kind: input, shape index: {}]   ;;  %s663_s2 = inlined_call_operand.vmem [shape: f32[1,16], index: 2, kind: input, shape index: {}]   ;;  %s664_s3 = inlined_call_operand.vmem [shape: f32[1,16], index: 3, kind: input, shape index: {}]   ;;  %s665_s5 = inlined_call_operand.vmem [shape: bf16[16,16], index: 5, kind: output, shape index: {}]  }
   0x1   :  { %305 = vmatprep.subr.bf16.mxu1 %v506_v0  ;;  %v469_v1 = vld [vmem:[%s660_s1 + $0x80] sm:$0xff]   ;;  %468 = vset.pattern.permute.xlu0 %v506_v0  ;;  %v470_v2 = vld [vmem:[%s660_s1 + $0x88] sm:$0xff]   ;;  %v473_v5 = vld [vmem:[%s660_s1 + $0x90] sm:$0xff]  }
   0x2   :  { %306 = vmatpush1.bf16.msra.mxu1 %v469_v1  ;;  %v471_v3 = vld [vmem:[%s660_s1 + $0x40] sm:$0xff]   ;;  %v474_v6 = vld [vmem:[%s660_s1 + $0x48] sm:$0xff]   ;;  %v477_v8 = vld [vmem:[%s660_s1 + $0x50] sm:$0xff]  }
   0x3   :  { %307 = vmatprep.subr.bf16.mxu1 %v506_v0  ;;  %v472_v4 = vld [vmem:[%s660_s1] sm:$0xff]   ;;  %445 = vmatprep.subr.bf16.mxu0 %v471_v3  ;;  %v475_v7 = vld [vmem:[%s660_s1 + $0x8] sm:$0xff]   ;;  %v478_v9 = vld [vmem:[%s660_s1 + $0x10] sm:$0xff]  }
   0x4   :  { %446 = vmatpush3.bf16.msra.mxu0 %v472_v4  ;;  %v476_v10 = vld [vmem:[%s660_s1 + $0x98] sm:$0xff]   ;;  %v479_v12 = vld [vmem:[%s660_s1 + $0xa0] sm:$0xff]   ;;  %v482_v15 = vld [vmem:[%s660_s1 + $0xa8] sm:$0xff]  }
   0x5   :  { %447 = vmatprep.subr.bf16.mxu0 %v474_v6  ;;  %v480_v11 = vld [vmem:[%s660_s1 + $0x58] sm:$0xff]   ;;  %v483_v14 = vld [vmem:[%s660_s1 + $0x60] sm:$0xff]   ;;  %v486_v17 = vld [vmem:[%s660_s1 + $0x68] sm:$0xff]  }
   0x6   :  { %308 = vmatpush1.bf16.msra.mxu1 %v470_v2  ;;  %v481_v13 = vld [vmem:[%s660_s1 + $0x18] sm:$0xff]   ;;  %v484_v16 = vld [vmem:[%s660_s1 + $0x20] sm:$0xff]   ;;  %v485_v18 = vld [vmem:[%s660_s1 + $0xb0] sm:$0xff]  }
   0x7   :  { %309 = vmatprep.subr.bf16.mxu1 %v506_v0  ;;  %v487_v19 = vld [vmem:[%s660_s1 + $0x28] sm:$0xff]   ;;  %v489_v20 = vld [vmem:[%s660_s1 + $0x70] sm:$0xff]   ;;  %v488_v21 = vld [vmem:[%s660_s1 + $0xb8] sm:$0xff]  }
   0x8   :  { %448 = vmatpush3.bf16.msra.mxu0 %v475_v7  ;;  %v490_v22 = vld [vmem:[%s660_s1 + $0x30] sm:$0xff]   ;;  %v492_v23 = vld [vmem:[%s660_s1 + $0x78] sm:$0xff]   ;;  %v376_v27 = vld [vmem:[%s662_s4] sm:$0xff] }
   0x9   :  { %449 = vmatprep.subr.bf16.mxu0 %v477_v8  ;;  %v496_v24 = vld [vmem:[%s661_s0 + $0x4] ss:$16 sps:$4 sm:$0xff]   ;;  %v493_v25 = vld [vmem:[%s660_s1 + $0x38] sm:$0xff]   ;;  %v494_v29 = vld [vmem:[%s661_s0] ss:$16 sps:$4 sm:$0xff]   ;;  %380 = vperm.xlu0 %468, %v376_v27  }
   0xa   :  { %310 = vmatpush1.bf16.msra.mxu1 %v473_v5  ;;  %296 = vmatprep.mubr.bf16.mxu0 %v496_v24  ;;  %v501_v26 = vld [vmem:[%s661_s0 + $0xc] ss:$16 sps:$4 sm:$0xff]   ;;  %v491_v28 = vld [vmem:[%s660_s1 + $0xc0] sm:$0xff]   ;;  %v498_v32 = vld [vmem:[%s660_s1 + $0xd0] sm:$0xff]  }
   0xb   :  { %311 = vmatprep.subr.bf16.mxu1 %v506_v0  ;;  %436 = vmatprep.mubr.msk.bf16.mxu1 %vm260_vm0, %v501_v26  ;;  %v377_v30 = vld [vmem:[%s662_s4 + $0x8] sm:$0xff]  ;;  %v437_v41 = vld [vmem:[%s663_s2] ss:$0 sm:$0xff] }
   0xc   :  { %450 = vmatpush3.bf16.msra.mxu0 %v478_v9  ;;  %v497_v31 = vld [vmem:[%s660_s1 + $0xc8] sm:$0xff]   ;;  %v438_v44 = vld [vmem:[%s664_s3] ss:$0 sm:$0xff] }
   0xd   :  { %451 = vmatprep.subr.bf16.mxu0 %v480_v11  ;;  %385 = vperm.xlu0 %468, %v377_v30   ;;  %v499_v33 = vld [vmem:[%s661_s0 + $0x8] ss:$16 sps:$4 sm:$0xff]  }
   0xe   :  { %312 = vmatpush1.bf16.msra.mxu1 %v476_v10 }
   0xf   :  { %313 = vmatprep.subr.bf16.mxu1 %v506_v0 }
  0x10   :  { %452 = vmatpush3.bf16.msra.mxu0 %v481_v13 }
  0x11   :  { %453 = vmatprep.subr.bf16.mxu0 %v483_v14 }
  0x12   :  { %314 = vmatpush1.bf16.msra.mxu1 %v479_v12 }
  0x13   :  { %315 = vmatprep.subr.bf16.mxu1 %v506_v0 }
  0x14   :  { %454 = vmatpush3.bf16.msra.mxu0 %v484_v16 }
  0x15   :  { %455 = vmatprep.subr.bf16.mxu0 %v486_v17 }
  0x16   :  { %316 = vmatpush1.bf16.msra.mxu1 %v482_v15 }
  0x17   :  { %317 = vmatprep.subr.bf16.mxu1 %v506_v0 }
  0x18   :  { %456 = vmatpush3.bf16.msra.mxu0 %v487_v19 }
  0x19   :  { %457 = vmatprep.subr.bf16.mxu0 %v489_v20 }
  0x1a   :  { %318 = vmatpush1.bf16.msra.mxu1 %v485_v18 }
  0x1b   :  { %319 = vmatprep.subr.bf16.mxu1 %v506_v0 }
  0x1c   :  { %458 = vmatpush3.bf16.msra.mxu0 %v490_v22 }
  0x1d   :  { %459 = vmatprep.subr.bf16.mxu0 %v492_v23 }
  0x1e   :  { %320 = vmatpush1.bf16.msra.mxu1 %v488_v21 }
  0x1f   :  { %321 = vmatprep.subr.bf16.mxu1 %v506_v0 }
  0x20   :  { %460 = vmatpush3.bf16.msra.mxu0 %v493_v25 }
  0x22   :  { %322 = vmatpush1.bf16.msra.mxu1 %v491_v28 }
  0x23   :  { %323 = vmatprep.subr.bf16.mxu1 %v506_v0  ;;  %297 = vmatmul.mubr.bf16.vlgmr.msra.gmra.mrb[0].mxu0 %v494_v29 }
  0x26   :  { %324 = vmatpush1.bf16.msra.mxu1 %v497_v31 }
  0x27   :  { %325 = vmatprep.subr.bf16.mxu1 %v506_v0 }
  0x2a   :  { %326 = vmatpush1.bf16.msra.mxu1 %v498_v32 }
  0x2d   :  { %338 = vmatmul.mubr.bf16.vlgmr.msra.gmra.mrb[0].mxu1 %v499_v33 }
  0x88   :  { %v381_v56 = vpop.permute.xlu0 %380 }
  0x8c   :  { %v386_v63 = vpop.permute.xlu0 %385 }
  0xf6   :  { %v461_v34 = vpop.f32.mrb[0].mxu0 }
  0xf7   :  { %v462_v35 = vpop.f32.mrb[1].mxu0 }
  0xf8   :  { %v463_v36 = vadd.f32 %v462_v35, %v461_v34  ;;  %v464_v37 = vpop.f32.mrb[2].mxu0 }
  0xf9   :  { %v465_v38 = vpop.f32.mrb[3].mxu0 }
  0xfa   :  { %v466_v39 = vadd.f32 %v465_v38, %v464_v37 }
 0x100   :  { %v339_v40 = vpop.f32.mrb[0].mxu1 }
 0x101   :  { %v340_v42 = vadd.f32 %v463_v36, %v339_v40  ;;  %v341_v43 = vpop.f32.mrb[1].mxu1 }
 0x102   :  { %v342_v45 = vpop.f32.mrb[2].mxu1 }
 0x103   :  { %v353_v46 = vmul.f32 %v437_v41, %v340_v42  ;;  %v343_v47 = vadd.f32 %v466_v39, %v342_v45  ;;  %v344_v48 = vpop.f32.mrb[3].mxu1 }
 0x105   :  { %v362_v49 = vadd.f32 %v438_v44, %v353_v46  ;;  %v354_v50 = vmul.f32 %v437_v41, %v343_v47 }
 0x107   :  { %v366_v51 = vmin.f32 %v362_v49, 0.0  ;;  %v363_v52 = vadd.f32 %v438_v44, %v354_v50  ;;  %vm364_vm1 = vcmp.gt.f32.partialorder %v362_v49, 0.0 }
 0x109   :  { %v367_v53 = vmin.f32 %v363_v52, 0.0  ;;  %v368_v54 = vmul.f32 1.442695, %v366_v51  ;;  %vm365_vm2 = vcmp.gt.f32.partialorder %v363_v52, 0.0 }
 0x10b   :  { %502 = vpow2.f32 %v368_v54  ;;  %v370_v55 = vmul.f32 1.442695, %v367_v53 }
 0x10d   :  { %504 = vpow2.f32 %v370_v55 }
 0x115   :  { %v503_v57 = vpop.eup %502 }
 0x116   :  { %v439_v58 = vadd.f32 -1.0, %v503_v57 }
 0x117   :  { %v505_v59 = vpop.eup %504 }
 0x118   :  { %v374_v60 = vsel %vm364_vm1, %v362_v49, %v439_v58  ;;  %v440_v61 = vadd.f32 -1.0, %v505_v59 }
 0x119   :  { %v388_v62 = vmul.f32 %v381_v56, %v374_v60 }
 0x11a   :  { %v375_v0 = vsel %vm365_vm2, %v363_v52, %v440_v61 }
 0x11b   :  { %v443_v1 = vpack.c.bf16 %v388_v62, %v388_v62  ;;  %v389_v2 = vmul.f32 %v386_v63, %v375_v0 }
 0x11d   :  { %399 = vst.msk [vmem:[%s665_s5] sm:$0xf] %vm398_vm3, %v443_v1  ;;  %v444_v3 = vpack.c.bf16 %v389_v2, %v389_v2 }
 0x11f   :  { %400 = vst.msk [vmem:[%s665_s5 + $0x4] sm:$0xf] %vm398_vm3, %v444_v3 }

// kernel: vae_forward.19
= control target key start
LH: loop header
LB: loop body
LE: loop exit
PB: predicated region body
PF: predicated region fallthrough
CT: control target
= control target key end

     0   :  { %vm50_vm0 = vcmask 7168   ;;  %v201_v0 = vmov 0   ;;  %v202_v21 = vmov 0.0|0.0   ;;  %vm203_vm1 = vmmov 0   ;;  %s254_s1 = inlined_call_operand.vmem [shape: f32[2,8,1], index: 1, kind: input, shape index: {}]   ;;  %s255_s2 = inlined_call_operand.vmem [shape: f32[16,32], index: 2, kind: input, shape index: {}]   ;;  %s256_s0 = inlined_call_operand.vmem [shape: bf16[2,8,16], index: 0, kind: input, shape index: {}]   ;;  %s257_s3 = inlined_call_operand.vmem [shape: f32[1,32], index: 3, kind: input, shape index: {}]   ;;  %s258_s4 = inlined_call_operand.vmem [shape: f32[2,32], index: 4, kind: output, shape index: {}]  }
   0x1   :  { %195 = vset.pattern.permute.xlu0 %v201_v0  ;;  %v17_v1 = vld [vmem:[%s254_s1] sm:$0xff]  ;;  %v18_v2 = vld [vmem:[%s254_s1 + $0x8] sm:$0xff]  ;;  %196 = vset.pattern.permute.xlu1 %v201_v0  ;;  %v204_v25 = vmov 0.0   ;;  %vm35_vm2 = vcmask 130048   ;;  %vm92_vm3 = vcmask 1041409   ;;  %vm166_vm4 = vcmask 254976  }
   0x2   :  { %25 = vperm.xlu0 %195, %v17_v1   ;;  %v51_v3 = vsel %vm50_vm0, %v17_v1, 0.0  ;;  %v58_v4 = vsel %vm50_vm0, %v18_v2, 0.0  ;;  %188 = vmatprep.subr.bf16.mxu0 %v202_v21  ;;  %v81_v22 = vld [vmem:[%s255_s2] sm:$0xff]  ;;  %v82_v23 = vld [vmem:[%s255_s2 + $0x8] sm:$0xff] }
   0x3   :  { %v52_v5 = vrot.slane %v51_v3, 4  ;;  %v59_v6 = vrot.slane %v58_v4, 4  ;;  %v189_v24 = vpack.c.bf16 %v82_v23, %v81_v22  ;;  %185 = vmatprep.mubr.msk.f32.mxu0 %vm203_vm1, %v204_v25  ;;  %v175_v26 = vld [vmem:[%s256_s0] sm:$0xff]  }
   0x4   :  { %v176_v27 = vunpack.c.l.bf16 %v175_v26  ;;  %v177_v29 = vunpack.c.h.bf16 %v175_v26  ;;  %v172_v52 = vld [vmem:[%s257_s3] ss:$0 sm:$0xff] }
   0x5   :  { %v53_v7 = vadd.f32 %v52_v5, %v51_v3  ;;  %v60_v8 = vadd.f32 %v59_v6, %v58_v4  ;;  %190 = vmatpush3.bf16.msra.mxu0 %v189_v24 }
   0x6   :  { %30 = vperm.xlu0 %195, %v18_v2  }
   0x7   :  { %v54_v9 = vrot.slane %v53_v7, 2  ;;  %v61_v10 = vrot.slane %v60_v8, 2 }
   0x9   :  { %v55_v11 = vadd.f32 %v54_v9, %v53_v7  ;;  %v62_v12 = vadd.f32 %v61_v10, %v60_v8 }
   0xb   :  { %v56_v13 = vrot.slane %v55_v11, 1  ;;  %v63_v14 = vrot.slane %v62_v12, 1 }
   0xd   :  { %v57_v15 = vadd.f32 %v56_v13, %v55_v11  ;;  %v64_v16 = vadd.f32 %v63_v14, %v62_v12 }
   0xf   :  { %v65_v17 = vmax.f32 %v57_v15, 1.0  ;;  %v66_v18 = vmax.f32 %v64_v16, 1.0 }
  0x11   :  { %197 = vrcp.f32 %v65_v17 }
  0x12   :  { %199 = vrcp.f32 %v66_v18 }
  0x1b   :  { %v198_v19 = vpop.eup %197 }
  0x1c   :  { %71 = vperm.xlu1 %196, %v198_v19   ;;  %v200_v20 = vpop.eup %199 }
  0x20   :  { %76 = vperm.xlu1 %196, %v200_v20  }
  0x81   :  { %v26_v28 = vpop.permute.xlu0 %25 }
  0x82   :  { %v33_v30 = vmul.f32 %v176_v27, %v26_v28 }
  0x84   :  { %v36_v33 = vsel %vm35_vm2, %v33_v30, 0.0 }
  0x85   :  { %v31_v31 = vpop.permute.xlu0 %30  ;;  %v37_v35 = vrot.slane %v36_v33, 4 }
  0x86   :  { %v34_v32 = vmul.f32 %v177_v29, %v31_v31 }
  0x87   :  { %v38_v37 = vadd.f32 %v37_v35, %v36_v33 }
  0x88   :  { %v43_v34 = vsel %vm35_vm2, %v34_v32, 0.0 }
  0x89   :  { %v44_v36 = vrot.slane %v43_v34, 4  ;;  %v39_v39 = vrot.slane %v38_v37, 2 }
  0x8b   :  { %v45_v38 = vadd.f32 %v44_v36, %v43_v34  ;;  %v40_v41 = vadd.f32 %v39_v39, %v38_v37 }
  0x8d   :  { %v46_v40 = vrot.slane %v45_v38, 2  ;;  %v41_v43 = vrot.slane %v40_v41, 1 }
  0x8f   :  { %v47_v42 = vadd.f32 %v46_v40, %v45_v38  ;;  %v42_v46 = vadd.f32 %v41_v43, %v40_v41 }
  0x91   :  { %v48_v44 = vrot.slane %v47_v42, 1 }
  0x93   :  { %v49_v47 = vadd.f32 %v48_v44, %v47_v42 }
  0x9b   :  { %v72_v45 = vpop.permute.xlu1 %71 }
  0x9c   :  { %v79_v49 = vmul.f32 %v72_v45, %v42_v46 }
  0x9f   :  { %v77_v48 = vpop.permute.xlu1 %76 }
  0xa0   :  { %v80_v50 = vmul.f32 %v77_v48, %v49_v47 }
  0xa2   :  { %v93_v51 = vsel %vm92_vm3, %v80_v50, %v79_v49 }
  0xa3   :  { %186 = vmatmul.mubr.msk.f32.vlgmr.msra.gmra.mrb[0].mxu0 %vm35_vm2, %v93_v51 }
 0x176   :  { %v162_v53 = vpop.f32.mrb[0].mxu0 }
 0x177   :  { %v163_v54 = vadd.f32 %v172_v52, %v162_v53  ;;  %v187_v55 = vpop.f32.mrb[1].mxu0 }
 0x179   :  { %167 = vst.msk [vmem:[%s258_s4] sm:$0x3] %vm166_vm4, %v163_v54 }

// kernel: tile.43
= control target key start
LH: loop header
LB: loop body
LE: loop exit
PB: predicated region body
PF: predicated region fallthrough
CT: control target
= control target key end

     0   :  { %s22_s0 = inlined_call_operand.vmem [shape: f32[8], index: 0, kind: input, shape index: {}]   ;;  %s23_s1 = inlined_call_operand.vmem [shape: f32[8,8], index: 1, kind: output, shape index: {}]  }
   0x1   :  { %v4_v0 = vld [vmem:[%s22_s0] ss:$0 sm:$0xff] }
   0x2   :  { %5 = vst [vmem:[%s23_s1] sm:$0xff] %v4_v0 }

// kernel: tile.48
= control target key start
LH: loop header
LB: loop body
LE: loop exit
PB: predicated region body
PF: predicated region fallthrough
CT: control target
= control target key end

     0   :  { %s67_s10 = smov 56   ;;  %s68_s11 = smov 40   ;;  %vm3_vm0 = vcmask 64512   ;;  %vm9_vm1 = vcmask 523712   ;;  %vm15_vm2 = vcmask 458112   ;;  %vm21_vm3 = vcmask 392512   ;;  %s111_s0 = inlined_call_operand.vmem [shape: f32[8,8], index: 0, kind: input, shape index: {}]   ;;  %s112_s1 = inlined_call_operand.vmem [shape: f32[1,64], index: 1, kind: output, shape index: {}]  }
   0x1   :  { %v53_v0 = vld [vmem:[%s111_s0 + $0x7] sm:$0x1]   ;;  %v55_v1 = vld [vmem:[%s111_s0 + $0x5] sm:$0x1]   ;;  %v54_v2 = vld [vmem:[%s111_s0 + $0x6] sm:$0x1]  }
   0x2   :  { %7 = vrot.lane.b32.xlu0 %v53_v0, %s67_s10  ;;  %19 = vrot.lane.b32.xlu1 %v55_v1, %s68_s11  ;;  %v56_v3 = vld [vmem:[%s111_s0 + $0x4] sm:$0x1]   ;;  %v2_v4 = vld [vmem:[%s111_s0] sm:$0x1]   ;;  %s69_s18 = smov 48   ;;  %s70_s19 = smov 32  }
   0x3   :  { %4 = vst.msk [vmem:[#allocation0] sm:$0x1] %vm3_vm0, %v2_v4   ;;  %v57_v5 = vld [vmem:[%s111_s0 + $0x3] sm:$0x1]   ;;  %v58_v6 = vld [vmem:[%s111_s0 + $0x2] sm:$0x1]  }
   0x4   :  { %s71_s24 = smov 24   ;;  %s72_s25 = smov 16   ;;  %v59_v7 = vld [vmem:[%s111_s0 + $0x1] sm:$0x1]   ;;  %vm27_vm4 = vcmask 326912   ;;  %vm33_vm5 = vcmask 261312  }
   0x5   :  { %s73_s0 = smov 8   ;;  %vm39_vm6 = vcmask 195712   ;;  %vm45_vm7 = vcmask 130112  }
   0x6   :  { %13 = vrot.lane.b32.xlu0 %v54_v2, %s69_s18  ;;  %25 = vrot.lane.b32.xlu1 %v56_v3, %s70_s19 }
   0xa   :  { %31 = vrot.lane.b32.xlu0 %v57_v5, %s71_s24  ;;  %37 = vrot.lane.b32.xlu1 %v58_v6, %s72_s25 }
   0xe   :  { %43 = vrot.lane.b32.xlu0 %v59_v7, %s73_s0 }
  0x74   :  { %v8_v8 = vpop.permute.xlu0 %7   ;;  %v20_v9 = vpop.permute.xlu1 %19  }
  0x75   :  { %10 = vst.msk [vmem:[#allocation0] sm:$0x1] %vm9_vm1, %v8_v8  }
  0x78   :  { %v14_v10 = vpop.permute.xlu0 %13   ;;  %v26_v11 = vpop.permute.xlu1 %25  }
  0x79   :  { %16 = vst.msk [vmem:[#allocation0] sm:$0x1] %vm15_vm2, %v14_v10  }
  0x7a   :  { %22 = vst.msk [vmem:[#allocation0] sm:$0x1] %vm21_vm3, %v20_v9  }
  0x7b   :  { %28 = vst.msk [vmem:[#allocation0] sm:$0x1] %vm27_vm4, %v26_v11  }
  0x7c   :  { %v32_v12 = vpop.permute.xlu0 %31   ;;  %v38_v13 = vpop.permute.xlu1 %37  }
  0x7d   :  { %34 = vst.msk [vmem:[#allocation0] sm:$0x1] %vm33_vm5, %v32_v12  }
  0x7e   :  { %40 = vst.msk [vmem:[#allocation0] sm:$0x1] %vm39_vm6, %v38_v13  }
  0x80   :  { %v44_v14 = vpop.permute.xlu0 %43  }
  0x81   :  { %46 = vst.msk [vmem:[#allocation0] sm:$0x1] %vm45_vm7, %v44_v14  }
  0x88   :  { %v50_v15 = vld [vmem:[#allocation0] sm:$0x1] }
  0x89   :  { %52 = vst [vmem:[%s112_s1] sm:$0x1] %v50_v15 }

// kernel: vae_forward.20
= control target key start
LH: loop header
LB: loop body
LE: loop exit
PB: predicated region body
PF: predicated region fallthrough
CT: control target
= control target key end

     0   :  { %v129_v0 = vmov 0.0   ;;  %vm130_vm0 = vmmov 0   ;;  %v131_v2 = vmov 0   ;;  %vm30_vm1 = vcmask 130048   ;;  %s180_s1 = inlined_call_operand.vmem [shape: bf16[16,128], index: 1, kind: input, shape index: {}]   ;;  %s181_s0 = inlined_call_operand.vmem [shape: bf16[2,16], index: 0, kind: input, shape index: {}]   ;;  %s182_s4 = inlined_call_operand.vmem [shape: f32[2,1], index: 4, kind: input, shape index: {}]   ;;  %s183_s2 = inlined_call_operand.vmem [shape: f32[1,128], index: 2, kind: input, shape index: {}]   ;;  %s184_s3 = inlined_call_operand.vmem [shape: f32[1,128], index: 3, kind: input, shape index: {}]   ;;  %s185_s5 = inlined_call_operand.vmem [shape: bf16[2,128], index: 5, kind: output, shape index: {}]  }
   0x1   :  { %116 = vmatprep.subr.bf16.mxu0 %v129_v0  ;;  %v126_v1 = vld [vmem:[%s180_s1] sm:$0xff]   ;;  %118 = vmatprep.mubr.msk.bf16.mxu0 %vm130_vm0, %v129_v0 }
   0x2   :  { %125 = vset.pattern.permute.xlu0 %v131_v2  ;;  %v96_v3 = vld [vmem:[%s182_s4] sm:$0x3]  ;;  %117 = vmatpush3.bf16.msra.mxu0 %v126_v1 }
   0x3   :  { %v21_v4 = vld [vmem:[%s181_s0] sm:$0x1]  ;;  %99 = vperm.xlu0 %125, %v96_v3  }
   0x4   :  { %v111_v5 = vld [vmem:[%s183_s2] ss:$0 sm:$0xff] }
   0x5   :  { %119 = vmatmul.mubr.msk.bf16.vlgmr.msra.gmra.mrb[0].mxu0 %vm30_vm1, %v21_v4  ;;  %v112_v7 = vld [vmem:[%s184_s3] ss:$0 sm:$0xff] }
  0x82   :  { %v100_v16 = vpop.permute.xlu0 %99 }
  0xd8   :  { %v68_v6 = vpop.f32.mrb[0].mxu0 }
  0xd9   :  { %v81_v8 = vmul.f32 %v111_v5, %v68_v6  ;;  %v120_v9 = vpop.f32.mrb[1].mxu0 }
  0xda   :  { %v71_v10 = vpop.f32.mrb[2].mxu0 }
  0xdb   :  { %v89_v11 = vadd.f32 %v112_v7, %v81_v8  ;;  %v121_v12 = vpop.f32.mrb[3].mxu0 }
  0xdd   :  { %v91_v13 = vmin.f32 %v89_v11, 0.0  ;;  %vm90_vm2 = vcmp.gt.f32.partialorder %v89_v11, 0.0 }
  0xdf   :  { %v92_v14 = vmul.f32 1.442695, %v91_v13 }
  0xe1   :  { %127 = vpow2.f32 %v92_v14 }
  0xeb   :  { %v128_v15 = vpop.eup %127 }
  0xec   :  { %v113_v17 = vadd.f32 -1.0, %v128_v15 }
  0xee   :  { %v95_v18 = vsel %vm90_vm2, %v89_v11, %v113_v17 }
  0xef   :  { %v102_v19 = vmul.f32 %v100_v16, %v95_v18 }
  0xf1   :  { %v103_v20 = vpack.c.bf16 %v102_v19, %v102_v19 }
  0xf3   :  { %104 = vst [vmem:[%s185_s5] sm:$0x1] %v103_v20 }

// kernel: tile.53
= control target key start
LH: loop header
LB: loop body
LE: loop exit
PB: predicated region body
PF: predicated region fallthrough
CT: control target
= control target key end

     0   :  { %s22_s0 = inlined_call_operand.vmem [shape: f32[4], index: 0, kind: input, shape index: {}]   ;;  %s23_s1 = inlined_call_operand.vmem [shape: f32[8,4], index: 1, kind: output, shape index: {}]  }
   0x1   :  { %v4_v0 = vld [vmem:[%s22_s0] ss:$0 sm:$0xff] }
   0x2   :  { %5 = vst [vmem:[%s23_s1] sm:$0xff] %v4_v0 }

// kernel: vae_forward.22
= control target key start
LH: loop header
LB: loop body
LE: loop exit
PB: predicated region body
PF: predicated region fallthrough
CT: control target
= control target key end

     0   :  { %v169_v0 = vmov 0.0   ;;  %vm170_vm0 = vmmov 0   ;;  %v171_v3 = vmov 0   ;;  %vm36_vm1 = vcmask 130048   ;;  %s226_s1 = inlined_call_operand.vmem [shape: bf16[16,64], index: 1, kind: input, shape index: {}]   ;;  %s227_s0 = inlined_call_operand.vmem [shape: bf16[16,16], index: 0, kind: input, shape index: {}]   ;;  %s228_s4 = inlined_call_operand.vmem [shape: f32[16,1], index: 4, kind: input, shape index: {}]   ;;  %s229_s2 = inlined_call_operand.vmem [shape: f32[1,64], index: 2, kind: input, shape index: {}]   ;;  %s230_s3 = inlined_call_operand.vmem [shape: f32[1,64], index: 3, kind: input, shape index: {}]   ;;  %s231_s5 = inlined_call_operand.vmem [shape: bf16[16,64], index: 5, kind: output, shape index: {}]  }
   0x1   :  { %153 = vmatprep.subr.bf16.mxu0 %v169_v0  ;;  %v163_v1 = vld [vmem:[%s226_s1] sm:$0xff]   ;;  %155 = vmatprep.mubr.msk.bf16.mxu0 %vm170_vm0, %v169_v0  ;;  %v112_v5 = vld [vmem:[%s228_s4 + $0x8] sm:$0xff]  ;;  %vm133_vm4 = vcmask 519168  }
   0x2   :  { %v164_v2 = vld [vmem:[%s227_s0] sm:$0xff]   ;;  %162 = vset.pattern.permute.xlu0 %v171_v3  ;;  %154 = vmatpush3.bf16.msra.mxu0 %v163_v1 }
   0x3   :  { %v111_v4 = vld [vmem:[%s228_s4] sm:$0xff] }
   0x4   :  { %115 = vperm.xlu0 %162, %v111_v4   ;;  %v143_v6 = vld [vmem:[%s229_s2] ss:$0 sm:$0xff] }
   0x5   :  { %156 = vmatmul.mubr.msk.bf16.vlgmr.msra.gmra.mrb[0].mxu0 %vm36_vm1, %v164_v2  ;;  %v144_v8 = vld [vmem:[%s230_s3] ss:$0 sm:$0xff] }
   0x8   :  { %120 = vperm.xlu0 %162, %v112_v5  }
  0x83   :  { %v116_v20 = vpop.permute.xlu0 %115 }
  0x87   :  { %v121_v27 = vpop.permute.xlu0 %120 }
  0xd8   :  { %v74_v7 = vpop.f32.mrb[0].mxu0 }
  0xd9   :  { %v88_v9 = vmul.f32 %v143_v6, %v74_v7  ;;  %v157_v10 = vpop.f32.mrb[1].mxu0 }
  0xda   :  { %v77_v11 = vpop.f32.mrb[2].mxu0 }
  0xdb   :  { %v97_v12 = vadd.f32 %v144_v8, %v88_v9  ;;  %v89_v13 = vmul.f32 %v143_v6, %v77_v11  ;;  %v158_v14 = vpop.f32.mrb[3].mxu0 }
  0xdd   :  { %v101_v15 = vmin.f32 %v97_v12, 0.0  ;;  %v98_v16 = vadd.f32 %v144_v8, %v89_v13  ;;  %vm99_vm2 = vcmp.gt.f32.partialorder %v97_v12, 0.0 }
  0xdf   :  { %v103_v17 = vmul.f32 1.442695, %v101_v15  ;;  %v102_v18 = vmin.f32 %v98_v16, 0.0  ;;  %vm100_vm3 = vcmp.gt.f32.partialorder %v98_v16, 0.0 }
  0xe1   :  { %165 = vpow2.f32 %v103_v17  ;;  %v105_v19 = vmul.f32 1.442695, %v102_v18 }
  0xe3   :  { %167 = vpow2.f32 %v105_v19 }
  0xeb   :  { %v166_v21 = vpop.eup %165 }
  0xec   :  { %v145_v22 = vadd.f32 -1.0, %v166_v21 }
  0xed   :  { %v168_v23 = vpop.eup %167 }
  0xee   :  { %v109_v24 = vsel %vm99_vm2, %v97_v12, %v145_v22  ;;  %v146_v25 = vadd.f32 -1.0, %v168_v23 }
  0xef   :  { %v123_v26 = vmul.f32 %v116_v20, %v109_v24 }
  0xf0   :  { %v110_v28 = vsel %vm100_vm3, %v98_v16, %v146_v25 }
  0xf1   :  { %v149_v29 = vpack.c.bf16 %v123_v26, %v123_v26  ;;  %v124_v30 = vmul.f32 %v121_v27, %v110_v28 }
  0xf3   :  { %134 = vst.msk [vmem:[%s231_s5] sm:$0xf] %vm133_vm4, %v149_v29  ;;  %v150_v31 = vpack.c.bf16 %v124_v30, %v124_v30 }
  0xf5   :  { %135 = vst.msk [vmem:[%s231_s5 + $0x4] sm:$0xf] %vm133_vm4, %v150_v31 }

// kernel: tile.58
= control target key start
LH: loop header
LB: loop body
LE: loop exit
PB: predicated region body
PF: predicated region fallthrough
CT: control target
= control target key end

     0   :  { %s67_s10 = smov 28   ;;  %s68_s11 = smov 20   ;;  %vm3_vm0 = vcmask 31744   ;;  %vm9_vm1 = vcmask 261344   ;;  %vm15_vm2 = vcmask 228544   ;;  %vm21_vm3 = vcmask 195744   ;;  %s111_s0 = inlined_call_operand.vmem [shape: f32[8,4], index: 0, kind: input, shape index: {}]   ;;  %s112_s1 = inlined_call_operand.vmem [shape: f32[1,32], index: 1, kind: output, shape index: {}]  }
   0x1   :  { %v53_v0 = vld [vmem:[%s111_s0 + $0x7] sm:$0x1]   ;;  %v55_v1 = vld [vmem:[%s111_s0 + $0x5] sm:$0x1]   ;;  %v54_v2 = vld [vmem:[%s111_s0 + $0x6] sm:$0x1]  }
   0x2   :  { %7 = vrot.lane.b32.xlu0 %v53_v0, %s67_s10  ;;  %19 = vrot.lane.b32.xlu1 %v55_v1, %s68_s11  ;;  %v56_v3 = vld [vmem:[%s111_s0 + $0x4] sm:$0x1]   ;;  %v2_v4 = vld [vmem:[%s111_s0] sm:$0x1]   ;;  %s69_s18 = smov 24   ;;  %s70_s19 = smov 16  }
   0x3   :  { %4 = vst.msk [vmem:[#allocation0] sm:$0x1] %vm3_vm0, %v2_v4   ;;  %v57_v5 = vld [vmem:[%s111_s0 + $0x3] sm:$0x1]   ;;  %v58_v6 = vld [vmem:[%s111_s0 + $0x2] sm:$0x1]  }
   0x4   :  { %s71_s24 = smov 12   ;;  %s72_s25 = smov 8   ;;  %v59_v7 = vld [vmem:[%s111_s0 + $0x1] sm:$0x1]   ;;  %vm27_vm4 = vcmask 162944   ;;  %vm33_vm5 = vcmask 130144  }
   0x5   :  { %s73_s0 = smov 4   ;;  %vm39_vm6 = vcmask 97344   ;;  %vm45_vm7 = vcmask 64544  }
   0x6   :  { %13 = vrot.lane.b32.xlu0 %v54_v2, %s69_s18  ;;  %25 = vrot.lane.b32.xlu1 %v56_v3, %s70_s19 }
   0xa   :  { %31 = vrot.lane.b32.xlu0 %v57_v5, %s71_s24  ;;  %37 = vrot.lane.b32.xlu1 %v58_v6, %s72_s25 }
   0xe   :  { %43 = vrot.lane.b32.xlu0 %v59_v7, %s73_s0 }
  0x74   :  { %v8_v8 = vpop.permute.xlu0 %7   ;;  %v20_v9 = vpop.permute.xlu1 %19  }
  0x75   :  { %10 = vst.msk [vmem:[#allocation0] sm:$0x1] %vm9_vm1, %v8_v8  }
  0x78   :  { %v14_v10 = vpop.permute.xlu0 %13   ;;  %v26_v11 = vpop.permute.xlu1 %25  }
  0x79   :  { %16 = vst.msk [vmem:[#allocation0] sm:$0x1] %vm15_vm2, %v14_v10  }
  0x7a   :  { %22 = vst.msk [vmem:[#allocation0] sm:$0x1] %vm21_vm3, %v20_v9  }
  0x7b   :  { %28 = vst.msk [vmem:[#allocation0] sm:$0x1] %vm27_vm4, %v26_v11  }
  0x7c   :  { %v32_v12 = vpop.permute.xlu0 %31   ;;  %v38_v13 = vpop.permute.xlu1 %37  }
  0x7d   :  { %34 = vst.msk [vmem:[#allocation0] sm:$0x1] %vm33_vm5, %v32_v12  }
  0x7e   :  { %40 = vst.msk [vmem:[#allocation0] sm:$0x1] %vm39_vm6, %v38_v13  }
  0x80   :  { %v44_v14 = vpop.permute.xlu0 %43  }
  0x81   :  { %46 = vst.msk [vmem:[#allocation0] sm:$0x1] %vm45_vm7, %v44_v14  }
  0x88   :  { %v50_v15 = vld [vmem:[#allocation0] sm:$0x1] }
  0x89   :  { %52 = vst [vmem:[%s112_s1] sm:$0x1] %v50_v15 }

// kernel: vae_forward.24
= control target key start
LH: loop header
LB: loop body
LE: loop exit
PB: predicated region body
PF: predicated region fallthrough
CT: control target
= control target key end

     0   :  { %vm103_vm0 = vcmask 1043456   ;;  %vm78_vm1 = vcmask 64512   ;;  %v683_v1 = vmov 0   ;;  %vm522_vm4 = vcmask 257024   ;;  %s1019_s1 = inlined_call_operand.vmem [shape: bf16[8,32], index: 1, kind: input, shape index: {}]   ;;  %s1020_s0 = inlined_call_operand.vmem [shape: bf16[128,8], index: 0, kind: input, shape index: {}]   ;;  %s1021_s4 = inlined_call_operand.vmem [shape: f32[128,1], index: 4, kind: input, shape index: {}]   ;;  %s1022_s2 = inlined_call_operand.vmem [shape: f32[1,32], index: 2, kind: input, shape index: {}]   ;;  %s1023_s3 = inlined_call_operand.vmem [shape: f32[1,32], index: 3, kind: input, shape index: {}]   ;;  %s1024_s5 = inlined_call_operand.vmem [shape: bf16[128,32], index: 5, kind: output, shape index: {}]  }
   0x1   :  { %v37_v0 = vld [vmem:[%s1019_s1] sm:$0xf]  ;;  %642 = vset.pattern.permute.xlu1 %v683_v1  ;;  %641 = vset.pattern.permute.xlu0 %v683_v1  ;;  %v645_v5 = vld [vmem:[%s1020_s0 + $0x8] sm:$0xff]   ;;  %v647_v7 = vld [vmem:[%s1020_s0 + $0x10] sm:$0xff]  }
   0x2   :  { %638 = vmatprep.subr.msk.bf16.mxu0 %vm103_vm0, %v37_v0  ;;  %639 = vmatprep.subr.msk.bf16.mxu1 %vm103_vm0, %v37_v0  ;;  %v105_v2 = vsel %vm103_vm0, %v37_v0, 0  ;;  %v643_v3 = vld [vmem:[%s1020_s0] sm:$0xff]   ;;  %v646_v6 = vld [vmem:[%s1020_s0 + $0x28] sm:$0xff]   ;;  %v648_v8 = vld [vmem:[%s1020_s0 + $0x30] sm:$0xff]  }
   0x3   :  { %619 = vmatpush3.bf16.msra.mxu0 %v105_v2  ;;  %637 = vmatpush3.bf16.msra.mxu1 %v105_v2  ;;  %v644_v4 = vld [vmem:[%s1020_s0 + $0x20] sm:$0xff]   ;;  %v348_v9 = vld [vmem:[%s1021_s4 + $0x10] sm:$0xff]  ;;  %v649_v11 = vld [vmem:[%s1020_s0 + $0x18] sm:$0xff]  }
   0x4   :  { %620 = vmatprep.mubr.msk.bf16.mxu0 %vm78_vm1, %v643_v3  ;;  %628 = vmatprep.mubr.msk.bf16.mxu1 %vm78_vm1, %v644_v4  ;;  %v346_v10 = vld [vmem:[%s1021_s4] sm:$0xff]  ;;  %v650_v12 = vld [vmem:[%s1020_s0 + $0x38] sm:$0xff]   ;;  %v347_v14 = vld [vmem:[%s1021_s4 + $0x8] sm:$0xff] }
   0x5   :  { %374 = vperm.xlu1 %642, %v348_v9   ;;  %364 = vperm.xlu0 %641, %v346_v10   ;;  %v349_v13 = vld [vmem:[%s1021_s4 + $0x18] sm:$0xff]  ;;  %v351_v15 = vld [vmem:[%s1021_s4 + $0x28] sm:$0xff]  ;;  %v350_v16 = vld [vmem:[%s1021_s4 + $0x20] sm:$0xff] }
   0x6   :  { %621 = vmatmul.mubr.msk.bf16.vlgmr.msra.gmra.mrb[0].mxu0 %vm78_vm1, %v645_v5  ;;  %629 = vmatmul.mubr.msk.bf16.vlgmr.msra.gmra.mrb[0].mxu1 %vm78_vm1, %v646_v6  ;;  %v353_v17 = vld [vmem:[%s1021_s4 + $0x38] sm:$0xff]  ;;  %v352_v18 = vld [vmem:[%s1021_s4 + $0x30] sm:$0xff]  ;;  %v355_v19 = vld [vmem:[%s1021_s4 + $0x48] sm:$0xff] }
   0x7   :  { %624 = vmatprep.mubr.msk.bf16.mxu0 %vm78_vm1, %v647_v7  ;;  %632 = vmatprep.mubr.msk.bf16.mxu1 %vm78_vm1, %v648_v8  ;;  %v354_v20 = vld [vmem:[%s1021_s4 + $0x40] sm:$0xff]  ;;  %v357_v21 = vld [vmem:[%s1021_s4 + $0x58] sm:$0xff]  ;;  %v356_v22 = vld [vmem:[%s1021_s4 + $0x50] sm:$0xff] }
   0x8   :  { %v359_v23 = vld [vmem:[%s1021_s4 + $0x68] sm:$0xff]  ;;  %v358_v24 = vld [vmem:[%s1021_s4 + $0x60] sm:$0xff]  ;;  %v361_v25 = vld [vmem:[%s1021_s4 + $0x78] sm:$0xff] }
   0x9   :  { %379 = vperm.xlu1 %642, %v349_v13   ;;  %369 = vperm.xlu0 %641, %v347_v14   ;;  %v360_v26 = vld [vmem:[%s1021_s4 + $0x70] sm:$0xff]  ;;  %v806_v30 = vld [vmem:[%s1022_s2] ss:$0 sm:$0xff] }
   0xa   :  { %v815_v34 = vld [vmem:[%s1023_s3] ss:$0 sm:$0xff] }
   0xd   :  { %389 = vperm.xlu1 %642, %v351_v15   ;;  %384 = vperm.xlu0 %641, %v350_v16  }
   0xe   :  { %625 = vmatmul.mubr.msk.bf16.gmra.mrb[4].mxu0 %vm78_vm1, %v649_v11  ;;  %633 = vmatmul.mubr.msk.bf16.gmra.mrb[4].mxu1 %vm78_vm1, %v650_v12 }
  0x11   :  { %399 = vperm.xlu1 %642, %v353_v17   ;;  %394 = vperm.xlu0 %641, %v352_v18  }
  0x15   :  { %409 = vperm.xlu1 %642, %v355_v19   ;;  %404 = vperm.xlu0 %641, %v354_v20  }
  0x19   :  { %419 = vperm.xlu1 %642, %v357_v21   ;;  %414 = vperm.xlu0 %641, %v356_v22  }
  0x1d   :  { %429 = vperm.xlu1 %642, %v359_v23   ;;  %424 = vperm.xlu0 %641, %v358_v24  }
  0x21   :  { %439 = vperm.xlu1 %642, %v361_v25   ;;  %434 = vperm.xlu0 %641, %v360_v26  }
  0x84   :  { %v797_v27 = vpop.permute.xlu0 %364  ;;  %v799_v28 = vpop.permute.xlu1 %374 }
  0x88   :  { %v801_v29 = vpop.permute.xlu0 %369  ;;  %v808_v31 = vpop.permute.xlu1 %379 }
  0x8c   :  { %v810_v32 = vpop.permute.xlu0 %384  ;;  %v842_v57 = vpop.permute.xlu1 %389 }
  0x90   :  { %v845_v60 = vpop.permute.xlu0 %394  ;;  %v874_v24 = vpop.permute.xlu1 %399 }
  0xd9   :  { %v622_v33 = vpop.f32.mrb[0].mxu0  ;;  %v630_v36 = vpop.f32.mrb[0].mxu1 }
  0xda   :  { %v213_v35 = vmul.f32 %v622_v33, %v806_v30  ;;  %v141_v37 = vpop.f32.mrb[1].mxu0  ;;  %v221_v38 = vmul.f32 %v630_v36, %v806_v30  ;;  %v173_v40 = vpop.f32.mrb[1].mxu1 }
  0xdb   :  { %v211_v39 = vmul.f32 %v806_v30, %v141_v37  ;;  %v623_v41 = vpop.f32.mrb[2].mxu0  ;;  %v219_v43 = vmul.f32 %v806_v30, %v173_v40  ;;  %v631_v45 = vpop.f32.mrb[2].mxu1 }
  0xdc   :  { %v821_v42 = vadd.f32 %v815_v34, %v213_v35  ;;  %v214_v44 = vmul.f32 %v623_v41, %v806_v30  ;;  %v144_v46 = vpop.f32.mrb[3].mxu0  ;;  %v826_v47 = vadd.f32 %v815_v34, %v221_v38  ;;  %v222_v49 = vmul.f32 %v631_v45, %v806_v30  ;;  %v176_v50 = vpop.f32.mrb[3].mxu1 }
  0xdd   :  { %v829_v48 = vadd.f32 %v815_v34, %v211_v39  ;;  %v834_v52 = vadd.f32 %v815_v34, %v219_v43  ;;  %v212_v54 = vmul.f32 %v806_v30, %v144_v46  ;;  %v220_v4 = vmul.f32 %v806_v30, %v176_v50  ;;  %v405_v35 = vpop.permute.xlu0 %404 }
  0xde   :  { %v268_v51 = vmin.f32 %v821_v42, 0.0  ;;  %v837_v53 = vadd.f32 %v815_v34, %v214_v44  ;;  %v276_v55 = vmin.f32 %v826_v47, 0.0  ;;  %v849_v0 = vadd.f32 %v815_v34, %v222_v49 }
  0xdf   :  { %v266_v56 = vmin.f32 %v829_v48, 0.0  ;;  %v274_v59 = vmin.f32 %v834_v52, 0.0  ;;  %v852_v3 = vadd.f32 %v815_v34, %v212_v54  ;;  %v858_v12 = vadd.f32 %v815_v34, %v220_v4 }
  0xe0   :  { %v286_v58 = vmul.f32 1.442695, %v268_v51  ;;  %v302_v61 = vmul.f32 1.442695, %v276_v55  ;;  %v269_v63 = vmin.f32 %v837_v53, 0.0  ;;  %v277_v8 = vmin.f32 %v849_v0, 0.0 }
  0xe1   :  { %v282_v62 = vmul.f32 1.442695, %v266_v56  ;;  %v626_v1 = vpop.f32.mrb[4].mxu0  ;;  %v298_v2 = vmul.f32 1.442695, %v274_v59  ;;  %v634_v5 = vpop.f32.mrb[4].mxu1 }
  0xe2   :  { %651 = vpow2.f32 %v286_v58  ;;  %v157_v6 = vpop.f32.mrb[5].mxu0  ;;  %v288_v7 = vmul.f32 1.442695, %v269_v63  ;;  %v189_v9 = vpop.f32.mrb[5].mxu1  ;;  %v267_v11 = vmin.f32 %v852_v3, 0.0  ;;  %v217_v16 = vmul.f32 %v626_v1, %v806_v30 }
  0xe3   :  { %653 = vpow2.f32 %v302_v61  ;;  %v627_v10 = vpop.f32.mrb[6].mxu0  ;;  %v635_v13 = vpop.f32.mrb[6].mxu1  ;;  %v304_v15 = vmul.f32 1.442695, %v277_v8  ;;  %v225_v17 = vmul.f32 %v634_v5, %v806_v30  ;;  %vm252_vm2 = vcmp.gt.f32.partialorder %v821_v42, 0.0 }
  0xe4   :  { %655 = vpow2.f32 %v282_v62  ;;  %v160_v14 = vpop.f32.mrb[7].mxu0  ;;  %v862_v18 = vpop.f32.mrb[7].mxu1  ;;  %v284_v19 = vmul.f32 1.442695, %v267_v11  ;;  %v275_v20 = vmin.f32 %v858_v12, 0.0  ;;  %vm260_vm3 = vcmp.gt.f32.partialorder %v826_v47, 0.0 }
  0xe5   :  { %657 = vpow2.f32 %v298_v2  ;;  %v868_v21 = vadd.f32 %v815_v34, %v217_v16  ;;  %v871_v22 = vadd.f32 %v815_v34, %v225_v17  ;;  %v215_v23 = vmul.f32 %v806_v30, %v157_v6  ;;  %v410_v58 = vpop.permute.xlu1 %409  ;;  %v415_v1 = vpop.permute.xlu0 %414 }
  0xe6   :  { %659 = vpow2.f32 %v288_v7  ;;  %v300_v25 = vmul.f32 1.442695, %v275_v20  ;;  %v223_v26 = vmul.f32 %v806_v30, %v189_v9  ;;  %v218_v33 = vmul.f32 %v627_v10, %v806_v30 }
  0xe7   :  { %661 = vpow2.f32 %v304_v15  ;;  %vm250_vm5 = vcmp.gt.f32.partialorder %v829_v48, 0.0  ;;  %vm258_vm6 = vcmp.gt.f32.partialorder %v834_v52, 0.0  ;;  %v272_v36 = vmin.f32 %v868_v21, 0.0 }
  0xe8   :  { %663 = vpow2.f32 %v284_v19  ;;  %v280_v37 = vmin.f32 %v871_v22, 0.0  ;;  %v883_v38 = vadd.f32 %v815_v34, %v215_v23  ;;  %v886_v39 = vadd.f32 %v815_v34, %v223_v26 }
  0xe9   :  { %665 = vpow2.f32 %v300_v25  ;;  %v889_v40 = vadd.f32 %v815_v34, %v218_v33  ;;  %vm253_vm7 = vcmp.gt.f32.partialorder %v837_v53, 0.0  ;;  %v294_v41 = vmul.f32 1.442695, %v272_v36 }
  0xea   :  { %v310_v43 = vmul.f32 1.442695, %v280_v37  ;;  %v226_v44 = vmul.f32 %v635_v13, %v806_v30  ;;  %vm261_vm8 = vcmp.gt.f32.partialorder %v849_v0, 0.0  ;;  %vm251_vm9 = vcmp.gt.f32.partialorder %v852_v3, 0.0 }
  0xeb   :  { %v270_v46 = vmin.f32 %v883_v38, 0.0  ;;  %v278_v49 = vmin.f32 %v886_v39, 0.0  ;;  %667 = vpow2.f32 %v294_v41  ;;  %v273_v54 = vmin.f32 %v889_v40, 0.0 }
  0xec   :  { %v652_v45 = vpop.eup %651  ;;  %v216_v55 = vmul.f32 %v806_v30, %v160_v14  ;;  %669 = vpow2.f32 %v310_v43  ;;  %v903_v6 = vadd.f32 %v815_v34, %v226_v44  ;;  %vm259_vm10 = vcmp.gt.f32.partialorder %v858_v12, 0.0 }
  0xed   :  { %v654_v50 = vpop.eup %653  ;;  %v563_v51 = vadd.f32 -1.0, %v652_v45  ;;  %v290_v61 = vmul.f32 1.442695, %v270_v46  ;;  %v306_v62 = vmul.f32 1.442695, %v278_v49  ;;  %v224_v49 = vmul.f32 %v806_v30, %v862_v18 }
  0xee   :  { %v656_v56 = vpop.eup %655  ;;  %v571_v59 = vadd.f32 -1.0, %v654_v50  ;;  %v296_v5 = vmul.f32 1.442695, %v273_v54  ;;  %v281_v43 = vmin.f32 %v903_v6, 0.0  ;;  %v947_v46 = vadd.f32 %v815_v34, %v216_v55 }
  0xef   :  { %v658_v63 = vpop.eup %657  ;;  %v332_v2 = vsel %vm252_vm2, %v821_v42, %v563_v51  ;;  %v561_v4 = vadd.f32 -1.0, %v656_v56  ;;  %671 = vpow2.f32 %v290_v61  ;;  %vm256_vm11 = vcmp.gt.f32.partialorder %v868_v21, 0.0 }
  0xf0   :  { %v660_v7 = vpop.eup %659  ;;  %v444_v8 = vmul.f32 %v799_v28, %v332_v2  ;;  %v340_v9 = vsel %vm260_vm3, %v826_v47, %v571_v59  ;;  %v569_v10 = vadd.f32 -1.0, %v658_v63  ;;  %673 = vpow2.f32 %v306_v62 }
  0xf1   :  { %v662_v11 = vpop.eup %661  ;;  %v452_v13 = vmul.f32 %v415_v1, %v340_v9  ;;  %v330_v42 = vsel %vm250_vm5, %v829_v48, %v561_v4  ;;  %v564_v14 = vadd.f32 -1.0, %v660_v7  ;;  %v420_v48 = vpop.permute.xlu1 %419  ;;  %675 = vpow2.f32 %v296_v5 }
  0xf2   :  { %v664_v15 = vpop.eup %663  ;;  %v595_v16 = vpack.c.bf16 %v444_v8, %v444_v8  ;;  %v442_v17 = vmul.f32 %v797_v27, %v330_v42  ;;  %v338_v28 = vsel %vm258_vm6, %v834_v52, %v569_v10  ;;  %v572_v19 = vadd.f32 -1.0, %v662_v11 }
  0xf3   :  { %v603_v47 = vpack.c.bf16 %v452_v13, %v452_v13  ;;  %v450_v20 = vmul.f32 %v405_v35, %v338_v28  ;;  %v333_v23 = vsel %vm253_vm7, %v837_v53, %v564_v14  ;;  %v562_v25 = vadd.f32 -1.0, %v664_v15  ;;  %v666_v26 = vpop.eup %665  ;;  %v425_v53 = vpop.permute.xlu0 %424 }
  0xf4   :  { %525 = vst.msk [vmem:[%s1024_s5 + $0x8] sm:$0xf] %vm522_vm4, %v595_v16  ;;  %v593_v27 = vpack.c.bf16 %v442_v17, %v442_v17  ;;  %v445_v33 = vmul.f32 %v808_v31, %v333_v23  ;;  %v341_v52 = vsel %vm261_vm8, %v849_v0, %v572_v19  ;;  %v570_v41 = vadd.f32 -1.0, %v666_v26 }
  0xf5   :  { %533 = vst.msk [vmem:[%s1024_s5 + $0x28] sm:$0xf] %vm522_vm4, %v603_v47  ;;  %v601_v35 = vpack.c.bf16 %v450_v20, %v450_v20  ;;  %v453_v36 = vmul.f32 %v420_v48, %v341_v52  ;;  %v331_v37 = vsel %vm251_vm9, %v852_v3, %v562_v25  ;;  %v668_v44 = vpop.eup %667  ;;  %v312_v56 = vmul.f32 1.442695, %v281_v43 }
  0xf6   :  { %523 = vst.msk [vmem:[%s1024_s5] sm:$0xf] %vm522_vm4, %v593_v27  ;;  %v596_v31 = vpack.c.bf16 %v445_v33, %v445_v33  ;;  %v443_v0 = vmul.f32 %v801_v29, %v331_v37  ;;  %v339_v45 = vsel %vm259_vm10, %v858_v12, %v570_v41  ;;  %v670_v29 = vpop.eup %669  ;;  %v567_v54 = vadd.f32 -1.0, %v668_v44 }
  0xf7   :  { %531 = vst.msk [vmem:[%s1024_s5 + $0x20] sm:$0xf] %vm522_vm4, %v601_v35  ;;  %v604_v3 = vpack.c.bf16 %v453_v36, %v453_v36  ;;  %v451_v51 = vmul.f32 %v410_v58, %v339_v45  ;;  %v575_v12 = vadd.f32 -1.0, %v670_v29  ;;  %v271_v30 = vmin.f32 %v947_v46, 0.0  ;;  %v435_v62 = vpop.permute.xlu0 %434 }
  0xf8   :  { %526 = vst.msk [vmem:[%s1024_s5 + $0xc] sm:$0xf] %vm522_vm4, %v596_v31  ;;  %v594_v50 = vpack.c.bf16 %v443_v0, %v443_v0  ;;  %v247_v18 = vadd.f32 %v815_v34, %v224_v49  ;;  %v336_v59 = vsel %vm256_vm11, %v868_v21, %v567_v54  ;;  %vm264_vm12 = vcmp.gt.f32.partialorder %v871_v22, 0.0 }
  0xf9   :  { %534 = vst.msk [vmem:[%s1024_s5 + $0x2c] sm:$0xf] %vm522_vm4, %v604_v3  ;;  %v672_v55 = vpop.eup %671  ;;  %v602_v58 = vpack.c.bf16 %v451_v51, %v451_v51  ;;  %677 = vpow2.f32 %v312_v56  ;;  %v448_v63 = vmul.f32 %v845_v60, %v336_v59  ;;  %v344_v1 = vsel %vm264_vm12, %v871_v22, %v575_v12 }
  0xfa   :  { %524 = vst.msk [vmem:[%s1024_s5 + $0x4] sm:$0xf] %vm522_vm4, %v594_v50  ;;  %v674_v61 = vpop.eup %673  ;;  %v565_v2 = vadd.f32 -1.0, %v672_v55  ;;  %v292_v34 = vmul.f32 1.442695, %v271_v30  ;;  %v456_v4 = vmul.f32 %v435_v62, %v344_v1  ;;  %vm254_vm13 = vcmp.gt.f32.partialorder %v883_v38, 0.0 }
  0xfb   :  { %532 = vst.msk [vmem:[%s1024_s5 + $0x24] sm:$0xf] %vm522_vm4, %v602_v58  ;;  %v573_v21 = vadd.f32 -1.0, %v674_v61  ;;  %v279_v5 = vmin.f32 %v247_v18, 0.0  ;;  %v599_v7 = vpack.c.bf16 %v448_v63, %v448_v63  ;;  %vm262_vm14 = vcmp.gt.f32.partialorder %v886_v39, 0.0  ;;  %v676_v60 = vpop.eup %675 }
  0xfc   :  { %v334_v8 = vsel %vm254_vm13, %v883_v38, %v565_v2  ;;  %679 = vpow2.f32 %v292_v34  ;;  %v607_v22 = vpack.c.bf16 %v456_v4, %v456_v4  ;;  %v568_v42 = vadd.f32 -1.0, %v676_v60 }
  0xfd   :  { %v446_v9 = vmul.f32 %v810_v32, %v334_v8  ;;  %v342_v10 = vsel %vm262_vm14, %v886_v39, %v573_v21  ;;  %v308_v11 = vmul.f32 1.442695, %v279_v5  ;;  %529 = vst.msk [vmem:[%s1024_s5 + $0x18] sm:$0xf] %vm522_vm4, %v599_v7  ;;  %vm257_vm15 = vcmp.gt.f32.partialorder %v889_v40, 0.0  ;;  %v430_v32 = vpop.permute.xlu1 %429 }
  0xfe   :  { %v454_v13 = vmul.f32 %v425_v53, %v342_v10  ;;  %537 = vst.msk [vmem:[%s1024_s5 + $0x38] sm:$0xf] %vm522_vm4, %v607_v22  ;;  %v337_v39 = vsel %vm257_vm15, %v889_v40, %v568_v42  ;;  %vm265_vm0 = vcmp.gt.f32.partialorder %v903_v6, 0.0  ;;  %vm255_vm1 = vcmp.gt.f32.partialorder %v947_v46, 0.0 }
  0xff   :  { %v597_v38 = vpack.c.bf16 %v446_v9, %v446_v9  ;;  %681 = vpow2.f32 %v308_v11  ;;  %v449_v15 = vmul.f32 %v874_v24, %v337_v39  ;;  %vm263_vm2 = vcmp.gt.f32.partialorder %v247_v18, 0.0 }
 0x100   :  { %v605_v14 = vpack.c.bf16 %v454_v13, %v454_v13 }
 0x101   :  { %527 = vst.msk [vmem:[%s1024_s5 + $0x10] sm:$0xf] %vm522_vm4, %v597_v38  ;;  %v600_v17 = vpack.c.bf16 %v449_v15, %v449_v15  ;;  %v440_v19 = vpop.permute.xlu1 %439 }
 0x102   :  { %535 = vst.msk [vmem:[%s1024_s5 + $0x30] sm:$0xf] %vm522_vm4, %v605_v14 }
 0x103   :  { %v678_v16 = vpop.eup %677  ;;  %530 = vst.msk [vmem:[%s1024_s5 + $0x1c] sm:$0xf] %vm522_vm4, %v600_v17 }
 0x104   :  { %v576_v28 = vadd.f32 -1.0, %v678_v16 }
 0x106   :  { %v680_v40 = vpop.eup %679  ;;  %v345_v47 = vsel %vm265_vm0, %v903_v6, %v576_v28 }
 0x107   :  { %v457_v24 = vmul.f32 %v440_v19, %v345_v47  ;;  %v566_v20 = vadd.f32 -1.0, %v680_v40 }
 0x109   :  { %v682_v23 = vpop.eup %681  ;;  %v608_v25 = vpack.c.bf16 %v457_v24, %v457_v24  ;;  %v335_v26 = vsel %vm255_vm1, %v947_v46, %v566_v20 }
 0x10a   :  { %v447_v48 = vmul.f32 %v842_v57, %v335_v26  ;;  %v574_v27 = vadd.f32 -1.0, %v682_v23 }
 0x10b   :  { %538 = vst.msk [vmem:[%s1024_s5 + $0x3c] sm:$0xf] %vm522_vm4, %v608_v25 }
 0x10c   :  { %v598_v33 = vpack.c.bf16 %v447_v48, %v447_v48  ;;  %v343_v52 = vsel %vm263_vm2, %v247_v18, %v574_v27 }
 0x10d   :  { %v455_v6 = vmul.f32 %v430_v32, %v343_v52 }
 0x10e   :  { %528 = vst.msk [vmem:[%s1024_s5 + $0x14] sm:$0xf] %vm522_vm4, %v598_v33 }
 0x10f   :  { %v606_v53 = vpack.c.bf16 %v455_v6, %v455_v6 }
 0x111   :  { %536 = vst.msk [vmem:[%s1024_s5 + $0x34] sm:$0xf] %vm522_vm4, %v606_v53 }

// kernel: vae_forward.23
= control target key start
LH: loop header
LB: loop body
LE: loop exit
PB: predicated region body
PF: predicated region fallthrough
CT: control target
= control target key end

     0   :  { %v1031_v0 = vmov 0   ;;  %vm227_vm0 = vcmask 719872   ;;  %vm252_vm1 = vcmask 1043456   ;;  %vm671_vm2 = vcmask 60416   ;;  %s1673_s1 = inlined_call_operand.vmem [shape: bf16[216,8], index: 1, kind: input, shape index: {}]   ;;  %s1674_s0 = inlined_call_operand.vmem [shape: bf16[128,216], index: 0, kind: input, shape index: {}]   ;;  %s1675_s4 = inlined_call_operand.vmem [shape: f32[128,1], index: 4, kind: input, shape index: {}]   ;;  %s1676_s6 = inlined_call_operand.<no memory space> [shape: f32[1,1], index: 6, kind: input, shape index: {}]   ;;  %s1677_s2 = inlined_call_operand.vmem [shape: f32[1,8], index: 2, kind: input, shape index: {}]   ;;  %s1678_s3 = inlined_call_operand.vmem [shape: f32[1,8], index: 3, kind: input, shape index: {}]   ;;  %s1679_s5 = inlined_call_operand.vmem [shape: f32[1,8], index: 5, kind: input, shape index: {}]   ;;  %s1680_s7 = inlined_call_operand.vmem [shape: bf16[128,8], index: 7, kind: output, shape index: {0}]   ;;  %s1681_s8 = inlined_call_operand.vmem [shape: f32[128,1], index: 8, kind: output, shape index: {1}]  }
   0x1   :  { %256 = vmatprep.subr.bf16.mxu0 %v1031_v0  ;;  %930 = vmatprep.subr.bf16.mxu1 %v1031_v0  ;;  %v961_v1 = vld [vmem:[%s1673_s1] sm:$0xff]   ;;  %v962_v2 = vld [vmem:[%s1673_s1 + $0x8] sm:$0xff]   ;;  %v963_v3 = vld [vmem:[%s1673_s1 + $0x10] sm:$0xff]   ;;  %v14_v48 = vstv %s1676_s6  ;;  %vm711_vm4 = vcmask 64512  }
   0x2   :  { %960 = vset.pattern.permute.xlu1 %v1031_v0  ;;  %959 = vset.pattern.permute.xlu0 %v1031_v0  ;;  %v964_v4 = vld [vmem:[%s1673_s1 + $0x18] sm:$0xff]   ;;  %v965_v5 = vld [vmem:[%s1673_s1 + $0x20] sm:$0xff]   ;;  %v966_v8 = vld [vmem:[%s1673_s1 + $0x28] sm:$0xff]   ;;  %15 = vst [vmem:[#allocation2] sm:$0x1] %v14_v48 }
   0x3   :  { %257 = vmatpush1.bf16.msra.mxu0 %v961_v1  ;;  %944 = vmatpush1.bf16.msra.mxu1 %v961_v1  ;;  %v977_v6 = vld [vmem:[%s1674_s0 + $0x4] ss:$8 sps:$4 sm:$0xff]   ;;  %v967_v9 = vld [vmem:[%s1673_s1 + $0x30] sm:$0xff]   ;;  %v968_v12 = vld [vmem:[%s1673_s1 + $0x38] sm:$0xff]  }
   0x4   :  { %258 = vmatprep.subr.bf16.mxu0 %v1031_v0  ;;  %931 = vmatprep.subr.bf16.mxu1 %v1031_v0  ;;  %v980_v7 = vld [vmem:[%s1674_s0 + $0x44] ss:$8 sps:$4 sm:$0xff]   ;;  %v1125_v10 = vld [vmem:[%s1675_s4 + $0x10] sm:$0xff]  ;;  %v1139_v13 = vld [vmem:[%s1675_s4 + $0x18] sm:$0xff] }
   0x5   :  { %870 = vmatprep.mubr.msk.bf16.mxu0 %vm227_vm0, %v977_v6  ;;  %874 = vmatprep.mubr.msk.bf16.mxu1 %vm227_vm0, %v980_v7  ;;  %v1131_v11 = vld [vmem:[%s1675_s4] sm:$0xff]  ;;  %v1148_v14 = vld [vmem:[%s1675_s4 + $0x8] sm:$0xff]  ;;  %v1173_v19 = vld [vmem:[%s1675_s4 + $0x38] sm:$0xff] }
   0x6   :  { %523 = vperm.xlu1 %960, %v1125_v10   ;;  %513 = vperm.xlu0 %959, %v1131_v11   ;;  %v969_v15 = vld [vmem:[%s1673_s1 + $0x40] sm:$0xff]   ;;  %v1156_v16 = vld [vmem:[%s1675_s4 + $0x28] sm:$0xff]  ;;  %v1182_v20 = vld [vmem:[%s1675_s4 + $0x30] sm:$0xff] }
   0x7   :  { %259 = vmatpush1.bf16.msra.mxu0 %v962_v2  ;;  %945 = vmatpush1.bf16.msra.mxu1 %v962_v2  ;;  %v1165_v17 = vld [vmem:[%s1675_s4 + $0x20] sm:$0xff]  ;;  %v970_v18 = vld [vmem:[%s1673_s1 + $0x48] sm:$0xff]   ;;  %v971_v21 = vld [vmem:[%s1673_s1 + $0x50] sm:$0xff]  }
   0x8   :  { %260 = vmatprep.subr.bf16.mxu0 %v1031_v0  ;;  %932 = vmatprep.subr.bf16.mxu1 %v1031_v0  ;;  %v1190_v22 = vld [vmem:[%s1675_s4 + $0x48] sm:$0xff]  ;;  %v1199_v23 = vld [vmem:[%s1675_s4 + $0x40] sm:$0xff]  ;;  %v972_v24 = vld [vmem:[%s1673_s1 + $0x58] sm:$0xff]  }
   0x9   :  { %v1207_v25 = vld [vmem:[%s1675_s4 + $0x58] sm:$0xff]  ;;  %v1216_v26 = vld [vmem:[%s1675_s4 + $0x50] sm:$0xff]  ;;  %v973_v27 = vld [vmem:[%s1673_s1 + $0x60] sm:$0xff]  }
   0xa   :  { %528 = vperm.xlu1 %960, %v1139_v13   ;;  %518 = vperm.xlu0 %959, %v1148_v14   ;;  %v1224_v28 = vld [vmem:[%s1675_s4 + $0x68] sm:$0xff]  ;;  %v1236_v30 = vld [vmem:[%s1675_s4 + $0x60] sm:$0xff]  ;;  %v1241_v31 = vld [vmem:[%s1675_s4 + $0x78] sm:$0xff] }
   0xb   :  { %261 = vmatpush1.bf16.msra.mxu0 %v963_v3  ;;  %946 = vmatpush1.bf16.msra.mxu1 %v963_v3  ;;  %v974_v29 = vld [vmem:[%s1673_s1 + $0x68] ss:$0 sps:$4 sm:$0xff]   ;;  %v1256_v35 = vld [vmem:[%s1675_s4 + $0x70] sm:$0xff]  ;;  %v987_v40 = vld [vmem:[%s1674_s0 + $0x24] ss:$8 sps:$4 sm:$0xff]  }
   0xc   :  { %262 = vmatprep.subr.bf16.mxu0 %v1031_v0  ;;  %933 = vmatprep.subr.bf16.mxu1 %v1031_v0  ;;  %v254_v32 = vsel %vm252_vm1, %v974_v29, 0  ;;  %v975_v33 = vld [vmem:[%s1674_s0] ss:$8 sps:$4 sm:$0xff]   ;;  %v981_v36 = vld [vmem:[%s1674_s0 + $0x14] ss:$8 sps:$4 sm:$0xff]  }
   0xd   :  { %v978_v34 = vld [vmem:[%s1674_s0 + $0x40] ss:$8 sps:$4 sm:$0xff]   ;;  %v983_v37 = vld [vmem:[%s1674_s0 + $0x54] ss:$8 sps:$4 sm:$0xff]   ;;  %v985_v38 = vld [vmem:[%s1674_s0 + $0x10] ss:$8 sps:$4 sm:$0xff]  }
   0xe   :  { %538 = vperm.xlu1 %960, %v1156_v16   ;;  %533 = vperm.xlu0 %959, %v1165_v17   ;;  %v986_v39 = vld [vmem:[%s1674_s0 + $0x50] ss:$8 sps:$4 sm:$0xff]   ;;  %v989_v41 = vld [vmem:[%s1674_s0 + $0x64] ss:$8 sps:$4 sm:$0xff]   ;;  %v991_v42 = vld [vmem:[%s1674_s0 + $0x20] ss:$8 sps:$4 sm:$0xff]  }
   0xf   :  { %263 = vmatpush1.bf16.msra.mxu0 %v964_v4  ;;  %947 = vmatpush1.bf16.msra.mxu1 %v964_v4  ;;  %v992_v43 = vld [vmem:[%s1674_s0 + $0x60] ss:$8 sps:$4 sm:$0xff]   ;;  %v993_v44 = vld [vmem:[%s1674_s0 + $0x34] ss:$8 sps:$4 sm:$0xff]   ;;  %v997_v46 = vld [vmem:[%s1674_s0 + $0x30] ss:$8 sps:$4 sm:$0xff]  }
  0x10   :  { %264 = vmatprep.subr.bf16.mxu0 %v1031_v0  ;;  %934 = vmatprep.subr.bf16.mxu1 %v1031_v0  ;;  %v995_v45 = vld [vmem:[%s1674_s0 + $0x74] ss:$8 sps:$4 sm:$0xff]   ;;  %v998_v47 = vld [vmem:[%s1674_s0 + $0x70] ss:$8 sps:$4 sm:$0xff]   ;;  %v1309_v50 = vld [vmem:[%s1677_s2] ss:$0 sm:$0xff] }
  0x11   :  { %v1316_v53 = vld [vmem:[%s1678_s3] ss:$0 sm:$0xff] }
  0x12   :  { %548 = vperm.xlu1 %960, %v1173_v19   ;;  %543 = vperm.xlu0 %959, %v1182_v20  }
  0x13   :  { %265 = vmatpush1.bf16.msra.mxu0 %v965_v5  ;;  %948 = vmatpush1.bf16.msra.mxu1 %v965_v5 }
  0x14   :  { %266 = vmatprep.subr.bf16.mxu0 %v1031_v0  ;;  %935 = vmatprep.subr.bf16.mxu1 %v1031_v0 }
  0x16   :  { %558 = vperm.xlu1 %960, %v1190_v22   ;;  %553 = vperm.xlu0 %959, %v1199_v23  }
  0x17   :  { %267 = vmatpush1.bf16.msra.mxu0 %v966_v8  ;;  %949 = vmatpush1.bf16.msra.mxu1 %v966_v8 }
  0x18   :  { %268 = vmatprep.subr.bf16.mxu0 %v1031_v0  ;;  %936 = vmatprep.subr.bf16.mxu1 %v1031_v0 }
  0x1a   :  { %568 = vperm.xlu1 %960, %v1207_v25   ;;  %563 = vperm.xlu0 %959, %v1216_v26  }
  0x1b   :  { %269 = vmatpush1.bf16.msra.mxu0 %v967_v9  ;;  %950 = vmatpush1.bf16.msra.mxu1 %v967_v9 }
  0x1c   :  { %270 = vmatprep.subr.bf16.mxu0 %v1031_v0  ;;  %937 = vmatprep.subr.bf16.mxu1 %v1031_v0 }
  0x1e   :  { %578 = vperm.xlu1 %960, %v1224_v28   ;;  %573 = vperm.xlu0 %959, %v1236_v30  }
  0x1f   :  { %271 = vmatpush1.bf16.msra.mxu0 %v968_v12  ;;  %951 = vmatpush1.bf16.msra.mxu1 %v968_v12 }
  0x20   :  { %272 = vmatprep.subr.bf16.mxu0 %v1031_v0  ;;  %938 = vmatprep.subr.bf16.mxu1 %v1031_v0 }
  0x22   :  { %588 = vperm.xlu1 %960, %v1241_v31   ;;  %583 = vperm.xlu0 %959, %v1256_v35  }
  0x23   :  { %273 = vmatpush1.bf16.msra.mxu0 %v969_v15  ;;  %952 = vmatpush1.bf16.msra.mxu1 %v969_v15 }
  0x24   :  { %274 = vmatprep.subr.bf16.mxu0 %v1031_v0  ;;  %939 = vmatprep.subr.bf16.mxu1 %v1031_v0 }
  0x27   :  { %275 = vmatpush1.bf16.msra.mxu0 %v970_v18  ;;  %953 = vmatpush1.bf16.msra.mxu1 %v970_v18 }
  0x28   :  { %276 = vmatprep.subr.bf16.mxu0 %v1031_v0  ;;  %940 = vmatprep.subr.bf16.mxu1 %v1031_v0 }
  0x2b   :  { %277 = vmatpush1.bf16.msra.mxu0 %v971_v21  ;;  %954 = vmatpush1.bf16.msra.mxu1 %v971_v21 }
  0x2c   :  { %278 = vmatprep.subr.bf16.mxu0 %v1031_v0  ;;  %941 = vmatprep.subr.bf16.mxu1 %v1031_v0 }
  0x2f   :  { %279 = vmatpush1.bf16.msra.mxu0 %v972_v24  ;;  %955 = vmatpush1.bf16.msra.mxu1 %v972_v24 }
  0x30   :  { %280 = vmatprep.subr.bf16.mxu0 %v1031_v0  ;;  %942 = vmatprep.subr.bf16.mxu1 %v1031_v0 }
  0x33   :  { %281 = vmatpush1.bf16.msra.mxu0 %v973_v27  ;;  %956 = vmatpush1.bf16.msra.mxu1 %v973_v27 }
  0x34   :  { %282 = vmatprep.subr.bf16.mxu0 %v1031_v0  ;;  %943 = vmatprep.subr.bf16.mxu1 %v1031_v0 }
  0x37   :  { %283 = vmatpush1.bf16.msra.mxu0 %v254_v32  ;;  %957 = vmatpush1.bf16.msra.mxu1 %v254_v32 }
  0x3a   :  { %289 = vmatmul.mubr.bf16.vlgmr.msra.gmra.mrb[0].mxu0 %v975_v33  ;;  %321 = vmatmul.mubr.bf16.vlgmr.msra.gmra.mrb[0].mxu1 %v978_v34 }
  0x3b   :  { %871 = vmatprep.mubr.msk.bf16.mxu0 %vm227_vm0, %v981_v36  ;;  %875 = vmatprep.mubr.msk.bf16.mxu1 %vm227_vm0, %v983_v37 }
  0x42   :  { %297 = vmatmul.mubr.bf16.gmra.mrb[4].mxu0 %v985_v38  ;;  %329 = vmatmul.mubr.bf16.gmra.mrb[4].mxu1 %v986_v39 }
  0x43   :  { %872 = vmatprep.mubr.msk.bf16.mxu0 %vm227_vm0, %v987_v40  ;;  %876 = vmatprep.mubr.msk.bf16.mxu1 %vm227_vm0, %v989_v41 }
  0x4a   :  { %305 = vmatmul.mubr.bf16.gmra.mrb[8].mxu0 %v991_v42  ;;  %337 = vmatmul.mubr.bf16.gmra.mrb[8].mxu1 %v992_v43 }
  0x4b   :  { %873 = vmatprep.mubr.msk.bf16.mxu0 %vm227_vm0, %v993_v44  ;;  %877 = vmatprep.mubr.msk.bf16.mxu1 %vm227_vm0, %v995_v45 }
  0x52   :  { %313 = vmatmul.mubr.bf16.gmra.mrb[12].mxu0 %v997_v46  ;;  %345 = vmatmul.mubr.bf16.gmra.mrb[12].mxu1 %v998_v47 }
  0x85   :  { %v1304_v49 = vpop.permute.xlu0 %513  ;;  %v1336_v7 = vpop.permute.xlu1 %523 }
  0x89   :  { %v1311_v51 = vpop.permute.xlu0 %518  ;;  %v1360_v48 = vpop.permute.xlu1 %528 }
  0x8d   :  { %v1338_v8 = vpop.permute.xlu0 %533 }
 0x10d   :  { %v290_v52 = vpop.f32.mrb[0].mxu0  ;;  %v322_v54 = vpop.f32.mrb[0].mxu1 }
 0x10e   :  { %v360_v55 = vmul.f32 %v1309_v50, %v290_v52  ;;  %v368_v56 = vmul.f32 %v1309_v50, %v322_v54  ;;  %v292_v57 = vpop.f32.mrb[1].mxu0  ;;  %v324_v58 = vpop.f32.mrb[1].mxu1 }
 0x10f   :  { %v293_v59 = vpop.f32.mrb[2].mxu0  ;;  %v325_v60 = vpop.f32.mrb[2].mxu1 }
 0x110   :  { %v1321_v61 = vadd.f32 %v1316_v53, %v360_v55  ;;  %v1324_v62 = vadd.f32 %v1316_v53, %v368_v56  ;;  %v361_v63 = vmul.f32 %v1309_v50, %v293_v59  ;;  %v369_v0 = vmul.f32 %v1309_v50, %v325_v60  ;;  %v295_v1 = vpop.f32.mrb[3].mxu0  ;;  %v327_v2 = vpop.f32.mrb[3].mxu1 }
 0x111   :  { %v1362_v54 = vpop.permute.xlu0 %543 }
 0x112   :  { %v415_v3 = vmin.f32 %v1321_v61, 0.0  ;;  %v423_v4 = vmin.f32 %v1324_v62, 0.0  ;;  %v1331_v5 = vadd.f32 %v1316_v53, %v361_v63  ;;  %v1334_v6 = vadd.f32 %v1316_v53, %v369_v0 }
 0x113   :  { %vm407_vm3 = vcmp.gt.f32.partialorder %v1324_v62, 0.0  ;;  %vm399_vm5 = vcmp.gt.f32.partialorder %v1321_v61, 0.0 }
 0x114   :  { %v431_v9 = vmul.f32 1.442695, %v415_v3  ;;  %v447_v12 = vmul.f32 1.442695, %v423_v4  ;;  %v416_v15 = vmin.f32 %v1331_v5, 0.0  ;;  %v424_v33 = vmin.f32 %v1334_v6, 0.0 }
 0x115   :  { %v298_v18 = vpop.f32.mrb[4].mxu0  ;;  %v330_v21 = vpop.f32.mrb[4].mxu1  ;;  %vm400_vm6 = vcmp.gt.f32.partialorder %v1331_v5, 0.0  ;;  %vm408_vm7 = vcmp.gt.f32.partialorder %v1334_v6, 0.0 }
 0x116   :  { %999 = vpow2.f32 %v431_v9  ;;  %v362_v24 = vmul.f32 %v1309_v50, %v298_v18  ;;  %v370_v27 = vmul.f32 %v1309_v50, %v330_v21  ;;  %v300_v29 = vpop.f32.mrb[5].mxu0  ;;  %v332_v32 = vpop.f32.mrb[5].mxu1  ;;  %v433_v43 = vmul.f32 1.442695, %v416_v15 }
 0x117   :  { %1001 = vpow2.f32 %v447_v12  ;;  %v301_v34 = vpop.f32.mrb[6].mxu0  ;;  %v333_v36 = vpop.f32.mrb[6].mxu1  ;;  %v449_v52 = vmul.f32 1.442695, %v424_v33 }
 0x118   :  { %v1345_v37 = vadd.f32 %v1316_v53, %v362_v24  ;;  %v1348_v38 = vadd.f32 %v1316_v53, %v370_v27  ;;  %v363_v39 = vmul.f32 %v1309_v50, %v301_v34  ;;  %v371_v40 = vmul.f32 %v1309_v50, %v333_v36  ;;  %v303_v41 = vpop.f32.mrb[7].mxu0  ;;  %v335_v42 = vpop.f32.mrb[7].mxu1 }
 0x119   :  { %1003 = vpow2.f32 %v433_v43  ;;  %v1385_v43 = vpop.permute.xlu1 %538 }
 0x11a   :  { %v417_v44 = vmin.f32 %v1345_v37, 0.0  ;;  %v425_v45 = vmin.f32 %v1348_v38, 0.0  ;;  %v1355_v46 = vadd.f32 %v1316_v53, %v363_v39  ;;  %v1358_v47 = vadd.f32 %v1316_v53, %v371_v40 }
 0x11b   :  { %1005 = vpow2.f32 %v449_v52  ;;  %vm401_vm8 = vcmp.gt.f32.partialorder %v1345_v37, 0.0  ;;  %vm409_vm9 = vcmp.gt.f32.partialorder %v1348_v38, 0.0 }
 0x11c   :  { %v451_v55 = vmul.f32 1.442695, %v425_v45  ;;  %v418_v56 = vmin.f32 %v1355_v46, 0.0  ;;  %v426_v58 = vmin.f32 %v1358_v47, 0.0  ;;  %v435_v0 = vmul.f32 1.442695, %v417_v44  ;;  %v554_v44 = vpop.permute.xlu0 %553 }
 0x11d   :  { %v306_v57 = vpop.f32.mrb[8].mxu0  ;;  %v338_v60 = vpop.f32.mrb[8].mxu1  ;;  %vm402_vm10 = vcmp.gt.f32.partialorder %v1355_v46, 0.0  ;;  %vm410_vm11 = vcmp.gt.f32.partialorder %v1358_v47, 0.0 }
 0x11e   :  { %v364_v59 = vmul.f32 %v1309_v50, %v306_v57  ;;  %v308_v63 = vpop.f32.mrb[9].mxu0  ;;  %v372_v1 = vmul.f32 %v1309_v50, %v338_v60  ;;  %v340_v2 = vpop.f32.mrb[9].mxu1  ;;  %v437_v9 = vmul.f32 1.442695, %v418_v56  ;;  %1007 = vpow2.f32 %v451_v55 }
 0x11f   :  { %v309_v3 = vpop.f32.mrb[10].mxu0  ;;  %v341_v18 = vpop.f32.mrb[10].mxu1  ;;  %v453_v34 = vmul.f32 1.442695, %v426_v58  ;;  %1009 = vpow2.f32 %v435_v0 }
 0x120   :  { %v1000_v4 = vpop.eup %999  ;;  %v1369_v12 = vadd.f32 %v1316_v53, %v364_v59  ;;  %v365_v15 = vmul.f32 %v1309_v50, %v309_v3  ;;  %v311_v21 = vpop.f32.mrb[11].mxu0  ;;  %v1374_v27 = vadd.f32 %v1316_v53, %v372_v1  ;;  %v373_v29 = vmul.f32 %v1309_v50, %v341_v18  ;;  %v1398_v1 = vld [vmem:[%s1679_s5] ss:$0 sm:$0xff] }
 0x121   :  { %v1002_v24 = vpop.eup %1001  ;;  %v343_v32 = vpop.f32.mrb[11].mxu1  ;;  %v880_v39 = vadd.f32 -1.0, %v1000_v4  ;;  %1011 = vpow2.f32 %v437_v9 }
 0x122   :  { %v888_v33 = vadd.f32 -1.0, %v1002_v24  ;;  %v419_v36 = vmin.f32 %v1369_v12, 0.0  ;;  %v427_v40 = vmin.f32 %v1374_v27, 0.0  ;;  %v1380_v41 = vadd.f32 %v1316_v53, %v365_v15 }
 0x123   :  { %v1383_v42 = vadd.f32 %v1316_v53, %v373_v29  ;;  %1013 = vpow2.f32 %v453_v34  ;;  %v479_v2 = vsel %vm399_vm5, %v1321_v61, %v880_v39  ;;  %v1004_v3 = vpop.eup %1003  ;;  %vm403_vm12 = vcmp.gt.f32.partialorder %v1369_v12, 0.0 }
 0x124   :  { %v487_v45 = vsel %vm407_vm3, %v1324_v62, %v888_v33  ;;  %v439_v52 = vmul.f32 1.442695, %v419_v36  ;;  %v455_v56 = vmul.f32 1.442695, %v427_v40  ;;  %v420_v57 = vmin.f32 %v1380_v41, 0.0 }
 0x125   :  { %v599_v55 = vmul.f32 %v554_v44, %v487_v45  ;;  %v314_v58 = vpop.f32.mrb[12].mxu0  ;;  %v346_v59 = vpop.f32.mrb[12].mxu1  ;;  %v428_v60 = vmin.f32 %v1383_v42, 0.0  ;;  %v591_v40 = vmul.f32 %v1304_v49, %v479_v2  ;;  %vm411_vm13 = vcmp.gt.f32.partialorder %v1374_v27, 0.0 }
 0x126   :  { %v366_v63 = vmul.f32 %v1309_v50, %v314_v58  ;;  %v316_v0 = vpop.f32.mrb[13].mxu0  ;;  %v348_v62 = vpop.f32.mrb[13].mxu1  ;;  %1015 = vpow2.f32 %v439_v52  ;;  %v441_v9 = vmul.f32 1.442695, %v420_v57  ;;  %v374_v15 = vmul.f32 %v1309_v50, %v346_v59 }
 0x127   :  { %v922_v4 = vpack.c.bf16 %v599_v55, %v599_v55  ;;  %v317_v18 = vpop.f32.mrb[14].mxu0  ;;  %v349_v21 = vpop.f32.mrb[14].mxu1  ;;  %v457_v24 = vmul.f32 1.442695, %v428_v60  ;;  %1017 = vpow2.f32 %v455_v56  ;;  %v703_v39 = vmul.f32 %v1398_v1, %v599_v55 }
 0x128   :  { %v1404_v29 = vadd.f32 %v1316_v53, %v366_v63  ;;  %v367_v32 = vmul.f32 %v1309_v50, %v317_v18  ;;  %v375_v33 = vmul.f32 %v1309_v50, %v349_v21  ;;  %v319_v34 = vpop.f32.mrb[15].mxu0  ;;  %v351_v61 = vpop.f32.mrb[15].mxu1  ;;  %v1414_v36 = vadd.f32 %v1316_v53, %v374_v15 }
 0x129   :  { %680 = vst.msk [vmem:[%s1680_s7 + $0x20] sm:$0xf] %vm671_vm2, %v922_v4  ;;  %v1006_v44 = vpop.eup %1005  ;;  %v1418_v45 = vpop.permute.xlu1 %548  ;;  %1019 = vpow2.f32 %v441_v9  ;;  %v881_v57 = vadd.f32 -1.0, %v1004_v3  ;;  %v736_v55 = vsel %vm711_vm4, %v703_v39, 0.0  ;;  %v695_v63 = vmul.f32 %v1398_v1, %v591_v40 }
 0x12a   :  { %v421_v50 = vmin.f32 %v1404_v29, 0.0  ;;  %v1422_v52 = vadd.f32 %v1316_v53, %v367_v32  ;;  %v1008_v58 = vpop.eup %1007  ;;  %1021 = vpow2.f32 %v457_v24  ;;  %v429_v56 = vmin.f32 %v1414_v36, 0.0  ;;  %737 = vadd.xlane.f32.xlu1 %v736_v55 }
 0x12b   :  { %v1426_v59 = vadd.f32 %v1316_v53, %v375_v33  ;;  %v1010_v0 = vpop.eup %1009  ;;  %v914_v3 = vpack.c.bf16 %v591_v40, %v591_v40  ;;  %v712_v9 = vsel %vm711_vm4, %v695_v63, 0.0  ;;  %v889_v15 = vadd.f32 -1.0, %v1006_v44  ;;  %v564_v44 = vpop.permute.xlu0 %563 }
 0x12c   :  { %v443_v49 = vmul.f32 1.442695, %v421_v50  ;;  %v422_v60 = vmin.f32 %v1422_v52, 0.0  ;;  %v459_v62 = vmul.f32 1.442695, %v429_v56  ;;  %v1012_v4 = vpop.eup %1011  ;;  %713 = vadd.xlane.f32.xlu0 %v712_v9  ;;  %v480_v21 = vsel %vm400_vm6, %v1331_v5, %v881_v57 }
 0x12d   :  { %v430_v2 = vmin.f32 %v1426_v59, 0.0  ;;  %672 = vst.msk [vmem:[%s1680_s7] sm:$0xf] %vm671_vm2, %v914_v3  ;;  %v890_v24 = vadd.f32 -1.0, %v1008_v58  ;;  %v1014_v32 = vpop.eup %1013  ;;  %v559_v33 = vpop.permute.xlu1 %558  ;;  %vm404_vm14 = vcmp.gt.f32.partialorder %v1380_v41, 0.0  ;;  %v488_v34 = vsel %vm408_vm7, %v1334_v6, %v889_v15 }
 0x12e   :  { %1023 = vpow2.f32 %v443_v49  ;;  %v445_v53 = vmul.f32 1.442695, %v422_v60  ;;  %v592_v61 = vmul.f32 %v1311_v51, %v480_v21  ;;  %v882_v39 = vadd.f32 -1.0, %v1010_v0 }
 0x12f   :  { %1025 = vpow2.f32 %v459_v62  ;;  %v461_v18 = vmul.f32 1.442695, %v430_v2  ;;  %v600_v50 = vmul.f32 %v559_v33, %v488_v34  ;;  %v489_v5 = vsel %vm409_vm9, %v1348_v38, %v890_v24 }
 0x130   :  { %1027 = vpow2.f32 %v445_v53  ;;  %v1016_v40 = vpop.eup %1015  ;;  %v883_v57 = vadd.f32 -1.0, %v1012_v4  ;;  %v696_v58 = vmul.f32 %v1398_v1, %v592_v61  ;;  %v915_v56 = vpack.c.bf16 %v592_v61, %v592_v61 }
 0x131   :  { %1029 = vpow2.f32 %v461_v18  ;;  %v601_v55 = vmul.f32 %v564_v44, %v489_v5  ;;  %v481_v6 = vsel %vm401_vm8, %v1345_v37, %v882_v39  ;;  %v1018_v49 = vpop.eup %1017  ;;  %v923_v51 = vpack.c.bf16 %v600_v50, %v600_v50  ;;  %v569_v15 = vpop.permute.xlu1 %568 }
 0x132   :  { %v704_v60 = vmul.f32 %v1398_v1, %v600_v50  ;;  %v593_v63 = vmul.f32 %v1336_v7, %v481_v6  ;;  %v482_v0 = vsel %vm402_vm10, %v1355_v46, %v883_v57  ;;  %v715_v62 = vsel %vm711_vm4, %v696_v58, 0.0  ;;  %673 = vst.msk [vmem:[%s1680_s7 + $0x4] sm:$0xf] %vm671_vm2, %v915_v56  ;;  %v574_v57 = vpop.permute.xlu0 %573 }
 0x133   :  { %v1020_v38 = vpop.eup %1019  ;;  %v924_v2 = vpack.c.bf16 %v601_v55, %v601_v55  ;;  %v705_v37 = vmul.f32 %v1398_v1, %v601_v55  ;;  %v594_v3 = vmul.f32 %v1360_v48, %v482_v0  ;;  %681 = vst.msk [vmem:[%s1680_s7 + $0x24] sm:$0xf] %vm671_vm2, %v923_v51  ;;  %716 = vadd.xlane.f32.xlu1 %v715_v62  ;;  %v891_v9 = vadd.f32 -1.0, %v1014_v32 }
 0x134   :  { %v1022_v4 = vpop.eup %1021  ;;  %v739_v7 = vsel %vm711_vm4, %v704_v60, 0.0  ;;  %v697_v46 = vmul.f32 %v1398_v1, %v593_v63  ;;  %v916_v53 = vpack.c.bf16 %v593_v63, %v593_v63  ;;  %vm412_vm15 = vcmp.gt.f32.partialorder %v1383_v42, 0.0 }
 0x135   :  { %740 = vadd.xlane.f32.xlu0 %v739_v7  ;;  %682 = vst.msk [vmem:[%s1680_s7 + $0x28] sm:$0xf] %vm671_vm2, %v924_v2  ;;  %v742_v48 = vsel %vm711_vm4, %v705_v37, 0.0  ;;  %v917_v18 = vpack.c.bf16 %v594_v3, %v594_v3  ;;  %v884_v21 = vadd.f32 -1.0, %v1016_v40  ;;  %v490_v32 = vsel %vm410_vm11, %v1358_v47, %v891_v9 }
 0x136   :  { %v718_v24 = vsel %vm711_vm4, %v697_v46, 0.0  ;;  %674 = vst.msk [vmem:[%s1680_s7 + $0x8] sm:$0xf] %vm671_vm2, %v916_v53  ;;  %v892_v33 = vadd.f32 -1.0, %v1018_v49  ;;  %v885_v34 = vadd.f32 -1.0, %v1020_v38  ;;  %v698_v39 = vmul.f32 %v1398_v1, %v594_v3  ;;  %v584_v9 = vpop.permute.xlu0 %583 }
 0x137   :  { %675 = vst.msk [vmem:[%s1680_s7 + $0xc] sm:$0xf] %vm671_vm2, %v917_v18  ;;  %v602_v40 = vmul.f32 %v569_v15, %v490_v32  ;;  %v483_v44 = vsel %vm403_vm12, %v1369_v12, %v884_v21  ;;  %v893_v50 = vadd.f32 -1.0, %v1022_v4  ;;  %743 = vadd.xlane.f32.xlu1 %v742_v48  ;;  %vm405_vm0 = vcmp.gt.f32.partialorder %v1404_v29, 0.0 }
 0x138   :  { %v1024_v61 = vpop.eup %1023  ;;  %v595_v47 = vmul.f32 %v1338_v8, %v483_v44  ;;  %v491_v58 = vsel %vm411_vm13, %v1374_v27, %v892_v33  ;;  %v484_v56 = vsel %vm404_vm14, %v1380_v41, %v885_v34  ;;  %v579_v41 = vpop.permute.xlu1 %578  ;;  %v721_v38 = vsel %vm711_vm4, %v698_v39, 0.0 }
 0x139   :  { %v1026_v5 = vpop.eup %1025  ;;  %v886_v55 = vadd.f32 -1.0, %v1024_v61  ;;  %719 = vadd.xlane.f32.xlu0 %v718_v24  ;;  %v925_v12 = vpack.c.bf16 %v602_v40, %v602_v40  ;;  %v603_v49 = vmul.f32 %v574_v57, %v491_v58  ;;  %v596_v51 = vmul.f32 %v1385_v43, %v484_v56 }
 0x13a   :  { %v1028_v6 = vpop.eup %1027  ;;  %v699_v8 = vmul.f32 %v1398_v1, %v595_v47  ;;  %v918_v63 = vpack.c.bf16 %v595_v47, %v595_v47  ;;  %v492_v27 = vsel %vm412_vm15, %v1383_v42, %v893_v50  ;;  %v706_v43 = vmul.f32 %v1398_v1, %v602_v40 }
 0x13b   :  { %v1030_v60 = vpop.eup %1029  ;;  %v485_v0 = vsel %vm405_vm0, %v1404_v29, %v886_v55  ;;  %683 = vst.msk [vmem:[%s1680_s7 + $0x2c] sm:$0xf] %vm671_vm2, %v925_v12  ;;  %v926_v62 = vpack.c.bf16 %v603_v49, %v603_v49  ;;  %v707_v2 = vmul.f32 %v1398_v1, %v603_v49  ;;  %v919_v42 = vpack.c.bf16 %v596_v51, %v596_v51  ;;  %v1575_v12 = vld [vmem:[#allocation2] ss:$0 sm:$0xff] }
 0x13c   :  { %v724_v37 = vsel %vm711_vm4, %v699_v8, 0.0  ;;  %676 = vst.msk [vmem:[%s1680_s7 + $0x10] sm:$0xf] %vm671_vm2, %v918_v63  ;;  %v604_v29 = vmul.f32 %v579_v41, %v492_v27  ;;  %v597_v3 = vmul.f32 %v1362_v54, %v485_v0  ;;  %vm413_vm1 = vcmp.gt.f32.partialorder %v1414_v36, 0.0  ;;  %v589_v34 = vpop.permute.xlu1 %588 }
 0x13d   :  { %vm406_vm3 = vcmp.gt.f32.partialorder %v1422_v52, 0.0  ;;  %722 = vadd.xlane.f32.xlu0 %v721_v38  ;;  %725 = vadd.xlane.f32.xlu1 %v724_v37  ;;  %684 = vst.msk [vmem:[%s1680_s7 + $0x30] sm:$0xf] %vm671_vm2, %v926_v62  ;;  %v894_v4 = vadd.f32 -1.0, %v1026_v5  ;;  %v887_v7 = vadd.f32 -1.0, %v1028_v6  ;;  %vm414_vm5 = vcmp.gt.f32.partialorder %v1426_v59, 0.0 }
 0x13e   :  { %677 = vst.msk [vmem:[%s1680_s7 + $0x14] sm:$0xf] %vm671_vm2, %v919_v42  ;;  %v927_v54 = vpack.c.bf16 %v604_v29, %v604_v29  ;;  %v701_v46 = vmul.f32 %v1398_v1, %v597_v3  ;;  %v920_v53 = vpack.c.bf16 %v597_v3, %v597_v3  ;;  %v745_v15 = vsel %vm711_vm4, %v706_v43, 0.0 }
 0x13f   :  { %v493_v48 = vsel %vm413_vm1, %v1414_v36, %v894_v4  ;;  %v486_v18 = vsel %vm406_vm3, %v1422_v52, %v887_v7  ;;  %v895_v21 = vadd.f32 -1.0, %v1030_v60  ;;  %v748_v24 = vsel %vm711_vm4, %v707_v2, 0.0 }
 0x140   :  { %v700_v32 = vmul.f32 %v1398_v1, %v596_v51  ;;  %685 = vst.msk [vmem:[%s1680_s7 + $0x34] sm:$0xf] %vm671_vm2, %v927_v54  ;;  %678 = vst.msk [vmem:[%s1680_s7 + $0x18] sm:$0xf] %vm671_vm2, %v920_v53  ;;  %v605_v33 = vmul.f32 %v584_v9, %v493_v48  ;;  %v598_v36 = vmul.f32 %v1418_v45, %v486_v18  ;;  %v730_v61 = vsel %vm711_vm4, %v701_v46, 0.0 }
 0x141   :  { %746 = vadd.xlane.f32.xlu0 %v745_v15  ;;  %749 = vadd.xlane.f32.xlu1 %v748_v24  ;;  %v494_v52 = vsel %vm414_vm5, %v1426_v59, %v895_v21  ;;  %v708_v5 = vmul.f32 %v1398_v1, %v604_v29 }
 0x142   :  { %v928_v39 = vpack.c.bf16 %v605_v33, %v605_v33  ;;  %v921_v40 = vpack.c.bf16 %v598_v36, %v598_v36  ;;  %v606_v44 = vmul.f32 %v589_v34, %v494_v52  ;;  %v727_v50 = vsel %vm711_vm4, %v700_v32, 0.0 }
 0x143   :  { %v709_v45 = vmul.f32 %v1398_v1, %v605_v33  ;;  %v751_v57 = vsel %vm711_vm4, %v708_v5, 0.0  ;;  %v702_v58 = vmul.f32 %v1398_v1, %v598_v36 }
 0x144   :  { %686 = vst.msk [vmem:[%s1680_s7 + $0x38] sm:$0xf] %vm671_vm2, %v928_v39  ;;  %679 = vst.msk [vmem:[%s1680_s7 + $0x1c] sm:$0xf] %vm671_vm2, %v921_v40  ;;  %v929_v59 = vpack.c.bf16 %v606_v44, %v606_v44  ;;  %v710_v55 = vmul.f32 %v1398_v1, %v606_v44 }
 0x145   :  { %728 = vadd.xlane.f32.xlu0 %v727_v50  ;;  %731 = vadd.xlane.f32.xlu1 %v730_v61  ;;  %v754_v47 = vsel %vm711_vm4, %v709_v45, 0.0  ;;  %v733_v56 = vsel %vm711_vm4, %v702_v58, 0.0 }
 0x146   :  { %687 = vst.msk [vmem:[%s1680_s7 + $0x3c] sm:$0xf] %vm671_vm2, %v929_v59  ;;  %v757_v6 = vsel %vm711_vm4, %v710_v55, 0.0  ;;  %vm815_vm2 = vcmask 7168  }
 0x149   :  { %752 = vadd.xlane.f32.xlu0 %v751_v57  ;;  %755 = vadd.xlane.f32.xlu1 %v754_v47 }
 0x14d   :  { %734 = vadd.xlane.f32.xlu0 %v733_v56 }
 0x151   :  { %758 = vadd.xlane.f32.xlu0 %v757_v6 }
 0x1b7   :  { %v738_v49 = vpop.xlane.xlu1 %737 }
 0x1b8   :  { %v775_v51 = vadd.f32 %v1575_v12, %v738_v49 }
 0x1b9   :  { %v714_v8 = vpop.xlane.xlu0 %713 }
 0x1ba   :  { %v807_v60 = vmul.f32 %v775_v51, %v1199_v23  ;;  %v767_v63 = vadd.f32 %v1575_v12, %v714_v8 }
 0x1bc   :  { %824 = vst.msk [vmem:[%s1681_s8 + $0x40] sm:$0xff] %vm815_vm2, %v807_v60  ;;  %v799_v1 = vmul.f32 %v767_v63, %v1131_v11 }
 0x1be   :  { %816 = vst.msk [vmem:[%s1681_s8] sm:$0xff] %vm815_vm2, %v799_v1 }
 0x1c0   :  { %v717_v27 = vpop.xlane.xlu1 %716 }
 0x1c1   :  { %v768_v41 = vadd.f32 %v1575_v12, %v717_v27 }
 0x1c2   :  { %v741_v0 = vpop.xlane.xlu0 %740 }
 0x1c3   :  { %v776_v23 = vadd.f32 %v1575_v12, %v741_v0  ;;  %v800_v38 = vmul.f32 %v768_v41, %v1148_v14 }
 0x1c4   :  { %v744_v62 = vpop.xlane.xlu1 %743 }
 0x1c5   :  { %v808_v43 = vmul.f32 %v776_v23, %v1190_v22  ;;  %817 = vst.msk [vmem:[%s1681_s8 + $0x8] sm:$0xff] %vm815_vm2, %v800_v38  ;;  %v777_v11 = vadd.f32 %v1575_v12, %v744_v62 }
 0x1c6   :  { %v720_v2 = vpop.xlane.xlu0 %719 }
 0x1c7   :  { %825 = vst.msk [vmem:[%s1681_s8 + $0x48] sm:$0xff] %vm815_vm2, %v808_v43  ;;  %v769_v37 = vadd.f32 %v1575_v12, %v720_v2  ;;  %v809_v14 = vmul.f32 %v777_v11, %v1216_v26 }
 0x1c9   :  { %v801_v22 = vmul.f32 %v769_v37, %v1125_v10  ;;  %826 = vst.msk [vmem:[%s1681_s8 + $0x50] sm:$0xff] %vm815_vm2, %v809_v14 }
 0x1ca   :  { %v723_v42 = vpop.xlane.xlu0 %722  ;;  %v726_v29 = vpop.xlane.xlu1 %725 }
 0x1cb   :  { %818 = vst.msk [vmem:[%s1681_s8 + $0x10] sm:$0xff] %vm815_vm2, %v801_v22  ;;  %v770_v3 = vadd.f32 %v1575_v12, %v723_v42  ;;  %v771_v4 = vadd.f32 %v1575_v12, %v726_v29 }
 0x1cd   :  { %v802_v26 = vmul.f32 %v770_v3, %v1139_v13  ;;  %v803_v10 = vmul.f32 %v771_v4, %v1165_v17 }
 0x1ce   :  { %v747_v7 = vpop.xlane.xlu0 %746  ;;  %v750_v54 = vpop.xlane.xlu1 %749 }
 0x1cf   :  { %819 = vst.msk [vmem:[%s1681_s8 + $0x18] sm:$0xff] %vm815_vm2, %v802_v26  ;;  %v778_v46 = vadd.f32 %v1575_v12, %v747_v7  ;;  %820 = vst.msk [vmem:[%s1681_s8 + $0x20] sm:$0xff] %vm815_vm2, %v803_v10  ;;  %v779_v53 = vadd.f32 %v1575_v12, %v750_v54 }
 0x1d1   :  { %v810_v13 = vmul.f32 %v778_v46, %v1207_v25  ;;  %v811_v17 = vmul.f32 %v779_v53, %v1236_v30 }
 0x1d2   :  { %v729_v9 = vpop.xlane.xlu0 %728  ;;  %v732_v15 = vpop.xlane.xlu1 %731 }
 0x1d3   :  { %827 = vst.msk [vmem:[%s1681_s8 + $0x58] sm:$0xff] %vm815_vm2, %v810_v13  ;;  %828 = vst.msk [vmem:[%s1681_s8 + $0x60] sm:$0xff] %vm815_vm2, %v811_v17  ;;  %v772_v48 = vadd.f32 %v1575_v12, %v729_v9  ;;  %v773_v18 = vadd.f32 %v1575_v12, %v732_v15 }
 0x1d5   :  { %v804_v25 = vmul.f32 %v772_v48, %v1156_v16  ;;  %v805_v30 = vmul.f32 %v773_v18, %v1182_v20 }
 0x1d6   :  { %v753_v21 = vpop.xlane.xlu0 %752  ;;  %v756_v24 = vpop.xlane.xlu1 %755 }
 0x1d7   :  { %821 = vst.msk [vmem:[%s1681_s8 + $0x28] sm:$0xff] %vm815_vm2, %v804_v25  ;;  %v780_v32 = vadd.f32 %v1575_v12, %v753_v21  ;;  %822 = vst.msk [vmem:[%s1681_s8 + $0x30] sm:$0xff] %vm815_vm2, %v805_v30  ;;  %v781_v33 = vadd.f32 %v1575_v12, %v756_v24 }
 0x1d9   :  { %v812_v16 = vmul.f32 %v780_v32, %v1224_v28  ;;  %v813_v20 = vmul.f32 %v781_v33, %v1256_v35 }
 0x1da   :  { %v735_v36 = vpop.xlane.xlu0 %734 }
 0x1db   :  { %829 = vst.msk [vmem:[%s1681_s8 + $0x68] sm:$0xff] %vm815_vm2, %v812_v16  ;;  %830 = vst.msk [vmem:[%s1681_s8 + $0x70] sm:$0xff] %vm815_vm2, %v813_v20  ;;  %v774_v52 = vadd.f32 %v1575_v12, %v735_v36 }
 0x1dd   :  { %v806_v34 = vmul.f32 %v774_v52, %v1173_v19 }
 0x1de   :  { %v759_v61 = vpop.xlane.xlu0 %758 }
 0x1df   :  { %823 = vst.msk [vmem:[%s1681_s8 + $0x38] sm:$0xff] %vm815_vm2, %v806_v34  ;;  %v782_v28 = vadd.f32 %v1575_v12, %v759_v61 }
 0x1e1   :  { %v814_v35 = vmul.f32 %v782_v28, %v1241_v31 }
 0x1e3   :  { %831 = vst.msk [vmem:[%s1681_s8 + $0x78] sm:$0xff] %vm815_vm2, %v814_v35 }

// kernel: vae_forward.25
= control target key start
LH: loop header
LB: loop body
LE: loop exit
PB: predicated region body
PF: predicated region fallthrough
CT: control target
= control target key end

     0   :  { %s3595_s29 = smov 0   ;;  %s5540_s0 = inlined_call_operand.vmem [shape: bf16[1024,108], index: 0, kind: input, shape index: {}]   ;;  %s5541_s1 = inlined_call_operand.vmem [shape: bf16[108,4], index: 1, kind: input, shape index: {}]   ;;  %s5542_s2 = inlined_call_operand.vmem [shape: f32[1,4], index: 2, kind: input, shape index: {}]   ;;  %s5543_s3 = inlined_call_operand.vmem [shape: f32[1,4], index: 3, kind: input, shape index: {}]   ;;  %s5544_s4 = inlined_call_operand.vmem [shape: f32[1024,1], index: 4, kind: input, shape index: {}]   ;;  %s5545_s5 = inlined_call_operand.vmem [shape: f32[1,4], index: 5, kind: input, shape index: {}]   ;;  %s5546_s6 = inlined_call_operand.<no memory space> [shape: f32[1,1], index: 6, kind: input, shape index: {}]   ;;  %s5547_s7 = inlined_call_operand.vmem [shape: bf16[1024,4], index: 7, kind: output, shape index: {0}]   ;;  %s5548_s8 = inlined_call_operand.vmem [shape: f32[1024,1], index: 8, kind: output, shape index: {1}]  }
   0x1   :  { %v14_v0 = vstv %s5546_s6 }
   0x2   :  { %15 = vst [vmem:[#allocation2] sm:$0x1] %v14_v0 }
   0x3 LB: > { %s2942_s30 = sadd.s32 4294967295, %s3544_s29   ;;  %p2946_p0 = scmp.ge.s32.totalorder %s3544_s29, 1  ;;  %s3544_s29 = sphi %s3595_s29, %s21_s29  }
   0x4   : > { %p279_p1 = scmp.lt.s32.totalorder %s3544_s29, 3 }
   0x6   : > { %p280_p2 = pnand %p2946_p0, %p279_p1 }
   0x8   : > { %283 = sbr.rel (%p280_p2) target bundleno = 638 (0x27e), region = 48 }
   0xf   : > { %v3368_v1 = vld [vmem:[%s5541_s1] sm:$0xff]   ;;  %v3546_v2 = vmov 0   ;;  %v3369_v3 = vld [vmem:[%s5541_s1 + $0x8] sm:$0xff]   ;;  %s2947_s12 = sshll.u32 %s2942_s30, 6  ;;  %v3370_v4 = vld [vmem:[%s5541_s1 + $0x10] sm:$0xff]   ;;  %vm627_vm0 = vcmask 883712  }
  0x10   : > { %3367 = vset.pattern.permute.xlu1 %v3546_v2  ;;  %3366 = vset.pattern.permute.xlu0 %v3546_v2  ;;  %p324_p3 = scmp.lt.s32.totalorder %s2947_s12, 127  ;;  %v3371_v7 = vld [vmem:[%s5541_s1 + $0x18] sm:$0xff]   ;;  %v3372_v10 = vld [vmem:[%s5541_s1 + $0x20] sm:$0xff]   ;;  %v3373_v15 = vld [vmem:[%s5541_s1 + $0x28] sm:$0xff]   ;;  %vm724_vm1 = vcmask 1045504   ;;  %vm2247_vm3 = vcmask 27648  }
  0x11   : > { %3263 = vmatprep.subr.bf16.mxu0 %v3368_v1  ;;  %3341 = vmatprep.subr.bf16.mxu1 %v3368_v1  ;;  %v3374_v18 = vld [vmem:[%s5541_s1 + $0x30] sm:$0x3f]   ;;  %vm2383_vm4 = vcmask 31744  }
  0x12   : > { %3264 = vmatpush3.bf16.msra.mxu0 %v3368_v1  ;;  %3348 = vmatpush3.bf16.msra.mxu1 %v3368_v1  ;;  %s5834_s12 = smov (!%p324_p3, %s2947_s12), 127  ;;  %v726_v21 = vsel %vm724_vm1, %v3374_v18, 0 }
  0x13   : > { %3265 = vmatprep.subr.bf16.mxu0 %v3369_v3  ;;  %3342 = vmatprep.subr.bf16.mxu1 %v3369_v3  ;;  %s2950_s15 = sshll.u32 %s5834_s12, 3  ;;  %s2948_s16 = sshll.u32 %s5834_s12, 2 }
  0x14   : > { %s3621_s19 = scalar_lea.vmem %s5544_s4, %s2950_s15  ;;  %s3633_s24 = scalar_lea.vmem %s5540_s0, %s2948_s16 }
  0x15   : > { %v1545_v5 = vld [vmem:[%s3621_s19 + $0x10] sm:$0xff]  ;;  %v1543_v6 = vld [vmem:[%s3621_s19] sm:$0xff]  ;;  %v1546_v8 = vld [vmem:[%s3621_s19 + $0x18] sm:$0xff]  ;;  %s4109_s21 = scalar_lea.vmem %s5547_s7, %s2948_s16  ;;  %s5244_s30 = scalar_lea.vmem %s5548_s8, %s2950_s15 }
  0x16   : > { %3266 = vmatpush3.bf16.msra.mxu0 %v3369_v3  ;;  %3349 = vmatpush3.bf16.msra.mxu1 %v3369_v3  ;;  %v1544_v9 = vld [vmem:[%s3621_s19 + $0x8] sm:$0xff]  ;;  %v3375_v12 = vld [vmem:[%s3633_s24] sm:$0xff]   ;;  %v1550_v16 = vld [vmem:[%s3621_s19 + $0x38] sm:$0xff] }
  0x17   : > { %3267 = vmatprep.subr.bf16.mxu0 %v3370_v4  ;;  %3343 = vmatprep.subr.bf16.mxu1 %v3370_v4  ;;  %v1548_v11 = vld [vmem:[%s3621_s19 + $0x28] sm:$0xff]  ;;  %v1547_v13 = vld [vmem:[%s3621_s19 + $0x20] sm:$0xff]  ;;  %v1549_v17 = vld [vmem:[%s3621_s19 + $0x30] sm:$0xff] }
  0x18   : > { %1619 = vperm.xlu1 %3367, %v1545_v5   ;;  %1609 = vperm.xlu0 %3366, %v1543_v6   ;;  %v3376_v14 = vld [vmem:[%s3633_s24 + $0x80] sm:$0xff]   ;;  %v1552_v19 = vld [vmem:[%s3621_s19 + $0x48] sm:$0xff]  ;;  %v1554_v22 = vld [vmem:[%s3621_s19 + $0x58] sm:$0xff] }
  0x19   : > { %3277 = vmatprep.mubr.msk.bf16.mxu0 %vm627_vm0, %v3375_v12  ;;  %3309 = vmatprep.mubr.msk.bf16.mxu1 %vm627_vm0, %v3376_v14  ;;  %v1551_v20 = vld [vmem:[%s3621_s19 + $0x40] sm:$0xff]  ;;  %v1553_v23 = vld [vmem:[%s3621_s19 + $0x50] sm:$0xff]  ;;  %v3377_v24 = vld [vmem:[%s3633_s24 + $0x8] sm:$0xff]  }
  0x1a   : > { %3268 = vmatpush3.bf16.msra.mxu0 %v3370_v4  ;;  %3350 = vmatpush3.bf16.msra.mxu1 %v3370_v4  ;;  %v3378_v25 = vld [vmem:[%s3633_s24 + $0x88] sm:$0xff]   ;;  %v3379_v26 = vld [vmem:[%s3633_s24 + $0x10] sm:$0xff]   ;;  %v1555_v29 = vld [vmem:[%s3621_s19 + $0x60] sm:$0xff] }
  0x1b   : > { %3269 = vmatprep.subr.bf16.mxu0 %v3371_v7  ;;  %3344 = vmatprep.subr.bf16.mxu1 %v3371_v7  ;;  %v3380_v27 = vld [vmem:[%s3633_s24 + $0x90] sm:$0xff]   ;;  %v1556_v28 = vld [vmem:[%s3621_s19 + $0x68] sm:$0xff]  ;;  %v1558_v30 = vld [vmem:[%s3621_s19 + $0x78] sm:$0xff] }
  0x1c   : > { %1624 = vperm.xlu1 %3367, %v1546_v8   ;;  %1614 = vperm.xlu0 %3366, %v1544_v9   ;;  %v1557_v31 = vld [vmem:[%s3621_s19 + $0x70] sm:$0xff]  ;;  %v3381_v32 = vld [vmem:[%s3633_s24 + $0x18] sm:$0xff]   ;;  %v3383_v34 = vld [vmem:[%s3633_s24 + $0x20] sm:$0xff]  }
  0x1d   : > { %v3382_v33 = vld [vmem:[%s3633_s24 + $0x98] sm:$0xff]   ;;  %v3384_v35 = vld [vmem:[%s3633_s24 + $0xa0] sm:$0xff]   ;;  %v1560_v36 = vld [vmem:[%s3621_s19 + $0x88] sm:$0xff] }
  0x1e   : > { %3270 = vmatpush3.bf16.msra.mxu0 %v3371_v7  ;;  %3351 = vmatpush3.bf16.msra.mxu1 %v3371_v7  ;;  %v1559_v37 = vld [vmem:[%s3621_s19 + $0x80] sm:$0xff]  ;;  %v1562_v38 = vld [vmem:[%s3621_s19 + $0x98] sm:$0xff]  ;;  %v1561_v39 = vld [vmem:[%s3621_s19 + $0x90] sm:$0xff] }
  0x1f   : > { %3271 = vmatprep.subr.bf16.mxu0 %v3372_v10  ;;  %3345 = vmatprep.subr.bf16.mxu1 %v3372_v10  ;;  %v3385_v40 = vld [vmem:[%s3633_s24 + $0x28] sm:$0xff]   ;;  %v3387_v42 = vld [vmem:[%s3633_s24 + $0x30] sm:$0xff]   ;;  %v1563_v45 = vld [vmem:[%s3621_s19 + $0xa0] sm:$0xff] }
  0x20   : > { %1634 = vperm.xlu1 %3367, %v1548_v11   ;;  %1629 = vperm.xlu0 %3366, %v1547_v13   ;;  %v3386_v41 = vld [vmem:[%s3633_s24 + $0xa8] sm:$0xff]   ;;  %v3388_v43 = vld [vmem:[%s3633_s24 + $0xb0] sm:$0xff]   ;;  %v1566_v46 = vld [vmem:[%s3621_s19 + $0xb8] sm:$0xff] }
  0x21   : > { %v1564_v44 = vld [vmem:[%s3621_s19 + $0xa8] sm:$0xff]  ;;  %v1565_v47 = vld [vmem:[%s3621_s19 + $0xb0] sm:$0xff]  ;;  %v3389_v48 = vld [vmem:[%s3633_s24 + $0x38] sm:$0xff]  }
  0x22   : > { %3272 = vmatpush3.bf16.msra.mxu0 %v3372_v10  ;;  %3352 = vmatpush3.bf16.msra.mxu1 %v3372_v10  ;;  %v3390_v49 = vld [vmem:[%s3633_s24 + $0xb8] sm:$0xff]   ;;  %v3391_v50 = vld [vmem:[%s3633_s24 + $0x40] sm:$0xff]   ;;  %v1568_v52 = vld [vmem:[%s3621_s19 + $0xc8] sm:$0xff] }
  0x23   : > { %3273 = vmatprep.subr.bf16.mxu0 %v3373_v15  ;;  %3346 = vmatprep.subr.bf16.mxu1 %v3373_v15  ;;  %v3392_v51 = vld [vmem:[%s3633_s24 + $0xc0] sm:$0xff]   ;;  %v1570_v54 = vld [vmem:[%s3621_s19 + $0xd8] sm:$0xff]  ;;  %v1569_v55 = vld [vmem:[%s3621_s19 + $0xd0] sm:$0xff] }
  0x24   : > { %1644 = vperm.xlu1 %3367, %v1550_v16   ;;  %1639 = vperm.xlu0 %3366, %v1549_v17   ;;  %v1567_v53 = vld [vmem:[%s3621_s19 + $0xc0] sm:$0xff]  ;;  %v3393_v56 = vld [vmem:[%s3633_s24 + $0x48] sm:$0xff]   ;;  %v3395_v58 = vld [vmem:[%s3633_s24 + $0x50] sm:$0xff]  }
  0x25   : > { %v3394_v57 = vld [vmem:[%s3633_s24 + $0xc8] sm:$0xff]   ;;  %v3396_v59 = vld [vmem:[%s3633_s24 + $0xd0] sm:$0xff]   ;;  %v1571_v61 = vld [vmem:[%s3621_s19 + $0xe0] sm:$0xff] }
  0x26   : > { %3274 = vmatpush3.bf16.msra.mxu0 %v3373_v15  ;;  %3353 = vmatpush3.bf16.msra.mxu1 %v3373_v15  ;;  %v1572_v60 = vld [vmem:[%s3621_s19 + $0xe8] sm:$0xff]  ;;  %v1574_v62 = vld [vmem:[%s3621_s19 + $0xf8] sm:$0xff]  ;;  %v1573_v63 = vld [vmem:[%s3621_s19 + $0xf0] sm:$0xff] }
  0x27   : > { %3355 = vmatprep.subr.msk.bf16.mxu0 %vm724_vm1, %v3374_v18  ;;  %3356 = vmatprep.subr.msk.bf16.mxu1 %vm724_vm1, %v3374_v18  ;;  %v3397_v0 = vld [vmem:[%s3633_s24 + $0x58] sm:$0xff]   ;;  %v3399_v2 = vld [vmem:[%s3633_s24 + $0x60] sm:$0xff]   ;;  %v1576_v4 = vld [vmem:[%s3621_s19 + $0x108] sm:$0xff] }
  0x28   : > { %1654 = vperm.xlu1 %3367, %v1552_v19   ;;  %1649 = vperm.xlu0 %3366, %v1551_v20   ;;  %v3398_v1 = vld [vmem:[%s3633_s24 + $0xd8] sm:$0xff]   ;;  %v3400_v3 = vld [vmem:[%s3633_s24 + $0xe0] sm:$0xff]   ;;  %v1577_v7 = vld [vmem:[%s3621_s19 + $0x110] sm:$0xff] }
  0x29   : > { %v1575_v5 = vld [vmem:[%s3621_s19 + $0x100] sm:$0xff]  ;;  %v1578_v6 = vld [vmem:[%s3621_s19 + $0x118] sm:$0xff]  ;;  %v3401_v8 = vld [vmem:[%s3633_s24 + $0x68] sm:$0xff]  }
  0x2a   : > { %3276 = vmatpush3.bf16.msra.mxu0 %v726_v21  ;;  %3354 = vmatpush3.bf16.msra.mxu1 %v726_v21  ;;  %v3402_v9 = vld [vmem:[%s3633_s24 + $0xe8] sm:$0xff]   ;;  %v3403_v10 = vld [vmem:[%s3633_s24 + $0x70] sm:$0xff]   ;;  %v1579_v13 = vld [vmem:[%s3621_s19 + $0x120] sm:$0xff] }
  0x2b   : > { %v3404_v11 = vld [vmem:[%s3633_s24 + $0xf0] sm:$0xff]   ;;  %v1580_v12 = vld [vmem:[%s3621_s19 + $0x128] sm:$0xff]  ;;  %v1582_v14 = vld [vmem:[%s3621_s19 + $0x138] sm:$0xff] }
  0x2c   : > { %1664 = vperm.xlu1 %3367, %v1554_v22   ;;  %1659 = vperm.xlu0 %3366, %v1553_v23   ;;  %v1581_v15 = vld [vmem:[%s3621_s19 + $0x130] sm:$0xff]  ;;  %v3405_v16 = vld [vmem:[%s3633_s24 + $0x78] sm:$0xff]   ;;  %v1584_v18 = vld [vmem:[%s3621_s19 + $0x148] sm:$0xff] }
  0x2d   : > { %3278 = vmatmul.mubr.msk.bf16.vlgmr.msra.gmra.mrb[0].mxu0 %vm627_vm0, %v3377_v24  ;;  %3310 = vmatmul.mubr.msk.bf16.vlgmr.msra.gmra.mrb[0].mxu1 %vm627_vm0, %v3378_v25  ;;  %v3406_v17 = vld [vmem:[%s3633_s24 + $0xf8] sm:$0xff]   ;;  %v1583_v19 = vld [vmem:[%s3621_s19 + $0x140] sm:$0xff]  ;;  %v1585_v21 = vld [vmem:[%s3621_s19 + $0x150] sm:$0xff] }
  0x2e   : > { %3281 = vmatprep.mubr.msk.bf16.mxu0 %vm627_vm0, %v3379_v26  ;;  %3313 = vmatprep.mubr.msk.bf16.mxu1 %vm627_vm0, %v3380_v27  ;;  %v1586_v20 = vld [vmem:[%s3621_s19 + $0x158] sm:$0xff]  ;;  %v1588_v22 = vld [vmem:[%s3621_s19 + $0x168] sm:$0xff]  ;;  %v1587_v23 = vld [vmem:[%s3621_s19 + $0x160] sm:$0xff] }
  0x2f   : > { %v1590_v24 = vld [vmem:[%s3621_s19 + $0x178] sm:$0xff]  ;;  %v1589_v25 = vld [vmem:[%s3621_s19 + $0x170] sm:$0xff]  ;;  %v1592_v26 = vld [vmem:[%s3621_s19 + $0x188] sm:$0xff] }
  0x30   : > { %1674 = vperm.xlu1 %3367, %v1556_v28   ;;  %1669 = vperm.xlu0 %3366, %v1555_v29   ;;  %v1591_v27 = vld [vmem:[%s3621_s19 + $0x180] sm:$0xff]  ;;  %v1594_v28 = vld [vmem:[%s3621_s19 + $0x198] sm:$0xff]  ;;  %v1593_v29 = vld [vmem:[%s3621_s19 + $0x190] sm:$0xff] }
  0x34   : > { %1684 = vperm.xlu1 %3367, %v1558_v30   ;;  %1679 = vperm.xlu0 %3366, %v1557_v31   ;;  %v1596_v30 = vld [vmem:[%s3621_s19 + $0x1a8] sm:$0xff]  ;;  %v1595_v31 = vld [vmem:[%s3621_s19 + $0x1a0] sm:$0xff] }
  0x35   : > { %3282 = vmatmul.mubr.msk.bf16.gmra.mrb[4].mxu0 %vm627_vm0, %v3381_v32  ;;  %3314 = vmatmul.mubr.msk.bf16.gmra.mrb[4].mxu1 %vm627_vm0, %v3382_v33  ;;  %v1598_v32 = vld [vmem:[%s3621_s19 + $0x1b8] sm:$0xff]  ;;  %v1597_v33 = vld [vmem:[%s3621_s19 + $0x1b0] sm:$0xff] }
  0x36   : > { %3285 = vmatprep.mubr.msk.bf16.mxu0 %vm627_vm0, %v3383_v34  ;;  %3317 = vmatprep.mubr.msk.bf16.mxu1 %vm627_vm0, %v3384_v35  ;;  %v1600_v34 = vld [vmem:[%s3621_s19 + $0x1c8] sm:$0xff]  ;;  %v1599_v35 = vld [vmem:[%s3621_s19 + $0x1c0] sm:$0xff] }
  0x38   : > { %1694 = vperm.xlu1 %3367, %v1560_v36   ;;  %1689 = vperm.xlu0 %3366, %v1559_v37   ;;  %v1602_v36 = vld [vmem:[%s3621_s19 + $0x1d8] sm:$0xff]  ;;  %v1601_v37 = vld [vmem:[%s3621_s19 + $0x1d0] sm:$0xff] }
  0x3c   : > { %1704 = vperm.xlu1 %3367, %v1562_v38   ;;  %1699 = vperm.xlu0 %3366, %v1561_v39   ;;  %v1604_v38 = vld [vmem:[%s3621_s19 + $0x1e8] sm:$0xff]  ;;  %v1603_v39 = vld [vmem:[%s3621_s19 + $0x1e0] sm:$0xff] }
  0x3d   : > { %3286 = vmatmul.mubr.msk.bf16.gmra.mrb[8].mxu0 %vm627_vm0, %v3385_v40  ;;  %3318 = vmatmul.mubr.msk.bf16.gmra.mrb[8].mxu1 %vm627_vm0, %v3386_v41  ;;  %v1606_v40 = vld [vmem:[%s3621_s19 + $0x1f8] sm:$0xff]  ;;  %v1605_v41 = vld [vmem:[%s3621_s19 + $0x1f0] sm:$0xff] }
  0x3e   : > { %3289 = vmatprep.mubr.msk.bf16.mxu0 %vm627_vm0, %v3387_v42  ;;  %3321 = vmatprep.mubr.msk.bf16.mxu1 %vm627_vm0, %v3388_v43 }
  0x40   : > { %1714 = vperm.xlu1 %3367, %v1564_v44   ;;  %1709 = vperm.xlu0 %3366, %v1563_v45  }
  0x44   : > { %1724 = vperm.xlu1 %3367, %v1566_v46   ;;  %1719 = vperm.xlu0 %3366, %v1565_v47  }
  0x45   : > { %3290 = vmatmul.mubr.msk.bf16.gmra.mrb[12].mxu0 %vm627_vm0, %v3389_v48  ;;  %3322 = vmatmul.mubr.msk.bf16.gmra.mrb[12].mxu1 %vm627_vm0, %v3390_v49 }
  0x46   : > { %3293 = vmatprep.mubr.msk.bf16.mxu0 %vm627_vm0, %v3391_v50  ;;  %3325 = vmatprep.mubr.msk.bf16.mxu1 %vm627_vm0, %v3392_v51 }
  0x48   : > { %1734 = vperm.xlu1 %3367, %v1568_v52   ;;  %1729 = vperm.xlu0 %3366, %v1567_v53  }
  0x4c   : > { %1744 = vperm.xlu1 %3367, %v1570_v54   ;;  %1739 = vperm.xlu0 %3366, %v1569_v55  }
  0x4d   : > { %3294 = vmatmul.mubr.msk.bf16.gmra.mrb[16].mxu0 %vm627_vm0, %v3393_v56  ;;  %3326 = vmatmul.mubr.msk.bf16.gmra.mrb[16].mxu1 %vm627_vm0, %v3394_v57 }
  0x4e   : > { %3297 = vmatprep.mubr.msk.bf16.mxu0 %vm627_vm0, %v3395_v58  ;;  %3329 = vmatprep.mubr.msk.bf16.mxu1 %vm627_vm0, %v3396_v59 }
  0x50   : > { %1754 = vperm.xlu1 %3367, %v1572_v60   ;;  %1749 = vperm.xlu0 %3366, %v1571_v61  }
  0x54   : > { %1764 = vperm.xlu1 %3367, %v1574_v62   ;;  %1759 = vperm.xlu0 %3366, %v1573_v63  }
  0x55   : > { %3298 = vmatmul.mubr.msk.bf16.gmra.mrb[20].mxu0 %vm627_vm0, %v3397_v0  ;;  %3330 = vmatmul.mubr.msk.bf16.gmra.mrb[20].mxu1 %vm627_vm0, %v3398_v1 }
  0x56   : > { %3301 = vmatprep.mubr.msk.bf16.mxu0 %vm627_vm0, %v3399_v2  ;;  %3333 = vmatprep.mubr.msk.bf16.mxu1 %vm627_vm0, %v3400_v3 }
  0x58   : > { %1774 = vperm.xlu1 %3367, %v1576_v4   ;;  %1769 = vperm.xlu0 %3366, %v1575_v5  }
  0x5c   : > { %1784 = vperm.xlu1 %3367, %v1578_v6   ;;  %1779 = vperm.xlu0 %3366, %v1577_v7   ;;  %v3815_v7 = vld [vmem:[%s5542_s2] ss:$0 sm:$0xff] }
  0x5d   : > { %3302 = vmatmul.mubr.msk.bf16.gmra.mrb[24].mxu0 %vm627_vm0, %v3401_v8  ;;  %3334 = vmatmul.mubr.msk.bf16.gmra.mrb[24].mxu1 %vm627_vm0, %v3402_v9 }
  0x5e   : > { %3305 = vmatprep.mubr.msk.bf16.mxu0 %vm627_vm0, %v3403_v10  ;;  %3337 = vmatprep.mubr.msk.bf16.mxu1 %vm627_vm0, %v3404_v11 }
  0x60   : > { %1794 = vperm.xlu1 %3367, %v1580_v12   ;;  %1789 = vperm.xlu0 %3366, %v1579_v13   ;;  %v3825_v13 = vld [vmem:[%s5543_s3] ss:$0 sm:$0xff] }
  0x64   : > { %1804 = vperm.xlu1 %3367, %v1582_v14   ;;  %1799 = vperm.xlu0 %3366, %v1581_v15  }
  0x65   : > { %3306 = vmatmul.mubr.msk.bf16.gmra.mrb[28].mxu0 %vm627_vm0, %v3405_v16  ;;  %3338 = vmatmul.mubr.msk.bf16.gmra.mrb[28].mxu1 %vm627_vm0, %v3406_v17 }
  0x68   : > { %1814 = vperm.xlu1 %3367, %v1584_v18   ;;  %1809 = vperm.xlu0 %3366, %v1583_v19  }
  0x6c   : > { %1824 = vperm.xlu1 %3367, %v1586_v20   ;;  %1819 = vperm.xlu0 %3366, %v1585_v21  }
  0x70   : > { %1834 = vperm.xlu1 %3367, %v1588_v22   ;;  %1829 = vperm.xlu0 %3366, %v1587_v23  }
  0x74   : > { %1844 = vperm.xlu1 %3367, %v1590_v24   ;;  %1839 = vperm.xlu0 %3366, %v1589_v25  }
  0x78   : > { %1854 = vperm.xlu1 %3367, %v1592_v26   ;;  %1849 = vperm.xlu0 %3366, %v1591_v27  }
  0x7c   : > { %1864 = vperm.xlu1 %3367, %v1594_v28   ;;  %1859 = vperm.xlu0 %3366, %v1593_v29  }
  0x80   : > { %1874 = vperm.xlu1 %3367, %v1596_v30   ;;  %1869 = vperm.xlu0 %3366, %v1595_v31  }
  0x84   : > { %1884 = vperm.xlu1 %3367, %v1598_v32   ;;  %1879 = vperm.xlu0 %3366, %v1597_v33  }
  0x88   : > { %1894 = vperm.xlu1 %3367, %v1600_v34   ;;  %1889 = vperm.xlu0 %3366, %v1599_v35  }
  0x8c   : > { %1904 = vperm.xlu1 %3367, %v1602_v36   ;;  %1899 = vperm.xlu0 %3366, %v1601_v37  }
  0x90   : > { %1914 = vperm.xlu1 %3367, %v1604_v38   ;;  %1909 = vperm.xlu0 %3366, %v1603_v39  }
  0x94   : > { %1924 = vperm.xlu1 %3367, %v1606_v40   ;;  %1919 = vperm.xlu0 %3366, %v1605_v41  }
  0x97   : > { %v3770_v42 = vpop.permute.xlu0 %1609  ;;  %v3776_v45 = vpop.permute.xlu1 %1619 }
  0x9b   : > { %v3772_v43 = vpop.permute.xlu0 %1614  ;;  %v3780_v47 = vpop.permute.xlu1 %1624 }
  0x9f   : > { %v3774_v44 = vpop.permute.xlu0 %1629  ;;  %v3784_v49 = vpop.permute.xlu1 %1634 }
  0xa0   : > { %5631 = vst [vmem:[#allocation3_spill] sm:$0xff] %v3774_v44  ;;  %5633 = vst [vmem:[#allocation5_spill] sm:$0xff] %v3784_v49 }
  0xa3   : > { %v3778_v46 = vpop.permute.xlu0 %1639  ;;  %v3788_v51 = vpop.permute.xlu1 %1644 }
  0xa4   : > { %5635 = vst [vmem:[#allocation7_spill] sm:$0xff] %v3788_v51 }
  0xa7   : > { %v3782_v48 = vpop.permute.xlu0 %1649  ;;  %v3792_v53 = vpop.permute.xlu1 %1654 }
  0xa8   : > { %5632 = vst [vmem:[#allocation4_spill] sm:$0xff] %v3782_v48  ;;  %5637 = vst [vmem:[#allocation9_spill] sm:$0xff] %v3792_v53 }
  0xab   : > { %v3786_v50 = vpop.permute.xlu0 %1659  ;;  %v3796_v55 = vpop.permute.xlu1 %1664 }
  0xac   : > { %5634 = vst [vmem:[#allocation6_spill] sm:$0xff] %v3786_v50  ;;  %5639 = vst [vmem:[#allocation11_spill] sm:$0xff] %v3796_v55 }
  0xaf   : > { %v3790_v52 = vpop.permute.xlu0 %1669  ;;  %v3800_v57 = vpop.permute.xlu1 %1674 }
  0xb0   : > { %5636 = vst [vmem:[#allocation8_spill] sm:$0xff] %v3790_v52  ;;  %5641 = vst [vmem:[#allocation13_spill] sm:$0xff] %v3800_v57 }
  0xb3   : > { %v3794_v54 = vpop.permute.xlu0 %1679  ;;  %v3804_v59 = vpop.permute.xlu1 %1684 }
  0xb4   : > { %5638 = vst [vmem:[#allocation10_spill] sm:$0xff] %v3794_v54  ;;  %5643 = vst [vmem:[#allocation15_spill] sm:$0xff] %v3804_v59 }
  0xb7   : > { %v3798_v56 = vpop.permute.xlu0 %1689  ;;  %v3808_v61 = vpop.permute.xlu1 %1694 }
  0xb8   : > { %5640 = vst [vmem:[#allocation12_spill] sm:$0xff] %v3798_v56  ;;  %5645 = vst [vmem:[#allocation17_spill] sm:$0xff] %v3808_v61 }
  0xbb   : > { %v3802_v58 = vpop.permute.xlu0 %1699  ;;  %v3817_v8 = vpop.permute.xlu1 %1704 }
  0xbc   : > { %5642 = vst [vmem:[#allocation14_spill] sm:$0xff] %v3802_v58  ;;  %5647 = vst [vmem:[#allocation19_spill] sm:$0xff] %v3817_v8 }
  0xbf   : > { %v3806_v60 = vpop.permute.xlu0 %1709  ;;  %v3841_v28 = vpop.permute.xlu1 %1714 }
  0xc0   : > { %5644 = vst [vmem:[#allocation16_spill] sm:$0xff] %v3806_v60  ;;  %5649 = vst [vmem:[#allocation21_spill] sm:$0xff] %v3841_v28 }
  0xc3   : > { %v3810_v62 = vpop.permute.xlu0 %1719 }
  0xc4   : > { %5646 = vst [vmem:[#allocation18_spill] sm:$0xff] %v3810_v62 }
  0xc7   : > { %v3819_v9 = vpop.permute.xlu0 %1729 }
  0xc8   : > { %5648 = vst [vmem:[#allocation20_spill] sm:$0xff] %v3819_v9 }
  0xcb   : > { %v3843_v29 = vpop.permute.xlu0 %1739 }
  0xcc   : > { %5650 = vst [vmem:[#allocation22_spill] sm:$0xff] %v3843_v29 }
  0xcf   : > { %v3883_v9 = vpop.permute.xlu0 %1749 }
  0xd0   : > { %5652 = vst [vmem:[#allocation24_spill] sm:$0xff] %v3883_v9 }
 0x100   : > { %v3279_v63 = vpop.f32.mrb[0].mxu0  ;;  %v3311_v0 = vpop.f32.mrb[0].mxu1 }
 0x101   : > { %v762_v1 = vpop.f32.mrb[1].mxu0  ;;  %v890_v2 = vpop.f32.mrb[1].mxu1  ;;  %v1026_v10 = vmul.f32 %v3279_v63, %v3815_v7  ;;  %v1058_v14 = vmul.f32 %v3311_v0, %v3815_v7 }
 0x102   : > { %v3280_v3 = vpop.f32.mrb[2].mxu0  ;;  %v3312_v4 = vpop.f32.mrb[2].mxu1  ;;  %v1024_v17 = vmul.f32 %v3815_v7, %v762_v1  ;;  %v1056_v20 = vmul.f32 %v3815_v7, %v890_v2 }
 0x103   : > { %v765_v5 = vpop.f32.mrb[3].mxu0  ;;  %v893_v6 = vpop.f32.mrb[3].mxu1  ;;  %v3831_v21 = vadd.f32 %v3825_v13, %v1026_v10  ;;  %v1027_v22 = vmul.f32 %v3280_v3, %v3815_v7  ;;  %v3835_v25 = vadd.f32 %v3825_v13, %v1058_v14  ;;  %v1059_v26 = vmul.f32 %v3312_v4, %v3815_v7 }
 0x104   : > { %v3839_v27 = vadd.f32 %v3825_v13, %v1024_v17  ;;  %v3846_v30 = vadd.f32 %v3825_v13, %v1056_v20  ;;  %v1025_v37 = vmul.f32 %v3815_v7, %v765_v5  ;;  %v1057_v41 = vmul.f32 %v3815_v7, %v893_v6 }
 0x105   : > { %v1225_v31 = vmin.f32 %v3831_v21, 0.0  ;;  %v3850_v32 = vadd.f32 %v3825_v13, %v1027_v22  ;;  %v1257_v35 = vmin.f32 %v3835_v25, 0.0  ;;  %v3854_v36 = vadd.f32 %v3825_v13, %v1059_v26 }
 0x106   : > { %v1223_v40 = vmin.f32 %v3839_v27, 0.0  ;;  %v1255_v1 = vmin.f32 %v3846_v30, 0.0  ;;  %v3875_v20 = vadd.f32 %v3825_v13, %v1025_v37  ;;  %v3878_v26 = vadd.f32 %v3825_v13, %v1057_v41 }
 0x107   : > { %v1291_v3 = vmul.f32 1.442695, %v1225_v31  ;;  %v1226_v4 = vmin.f32 %v3850_v32, 0.0  ;;  %v1355_v17 = vmul.f32 1.442695, %v1257_v35  ;;  %v1258_v6 = vmin.f32 %v3854_v36, 0.0  ;;  %v3881_v31 = vpop.permute.xlu1 %1724 }
 0x108   : > { %v3283_v11 = vpop.f32.mrb[4].mxu0  ;;  %v3315_v12 = vpop.f32.mrb[4].mxu1  ;;  %v1287_v22 = vmul.f32 1.442695, %v1223_v40  ;;  %5651 = vst [vmem:[#allocation23_spill] sm:$0xff] %v3881_v31  ;;  %vm1161_vm2 = vcmp.gt.f32.partialorder %v3831_v21, 0.0 }
 0x109   : > { %v778_v15 = vpop.f32.mrb[5].mxu0  ;;  %v906_v16 = vpop.f32.mrb[5].mxu1  ;;  %v1030_v2 = vmul.f32 %v3283_v11, %v3815_v7  ;;  %v1062_v5 = vmul.f32 %v3315_v12, %v3815_v7  ;;  %v1351_v12 = vmul.f32 1.442695, %v1255_v1  ;;  %3407 = vpow2.f32 %v1291_v3 }
 0x10a   : > { %v3284_v18 = vpop.f32.mrb[6].mxu0  ;;  %v3316_v19 = vpop.f32.mrb[6].mxu1  ;;  %v1028_v11 = vmul.f32 %v3815_v7, %v778_v15  ;;  %v1060_v35 = vmul.f32 %v3815_v7, %v906_v16  ;;  %v1293_v28 = vmul.f32 1.442695, %v1226_v4  ;;  %3409 = vpow2.f32 %v1355_v17 }
 0x10b   : > { %v781_v23 = vpop.f32.mrb[7].mxu0  ;;  %v909_v24 = vpop.f32.mrb[7].mxu1  ;;  %v3886_v29 = vadd.f32 %v3825_v13, %v1030_v2  ;;  %v3890_v37 = vadd.f32 %v3825_v13, %v1062_v5  ;;  %v1031_v40 = vmul.f32 %v3284_v18, %v3815_v7  ;;  %v1357_v31 = vmul.f32 1.442695, %v1258_v6 }
 0x10c   : > { %v1224_v1 = vmin.f32 %v3875_v20, 0.0  ;;  %v1063_v2 = vmul.f32 %v3316_v19, %v3815_v7  ;;  %3411 = vpow2.f32 %v1287_v22  ;;  %v1256_v3 = vmin.f32 %v3878_v26, 0.0  ;;  %v3935_v57 = vpop.permute.xlu1 %1734 }
 0x10d   : > { %v3905_v4 = vadd.f32 %v3825_v13, %v1028_v11  ;;  %v1029_v18 = vmul.f32 %v3815_v7, %v781_v23  ;;  %3413 = vpow2.f32 %v1351_v12  ;;  %v1229_v6 = vmin.f32 %v3886_v29, 0.0  ;;  %5657 = vst [vmem:[#allocation29_spill] sm:$0xff] %v3935_v57 }
 0x10e   : > { %v3914_v19 = vadd.f32 %v3825_v13, %v1060_v35  ;;  %v1061_v60 = vmul.f32 %v3815_v7, %v909_v24  ;;  %3415 = vpow2.f32 %v1293_v28  ;;  %v1261_v11 = vmin.f32 %v3890_v37, 0.0 }
 0x10f   : > { %v3923_v23 = vadd.f32 %v3825_v13, %v1031_v40  ;;  %3417 = vpow2.f32 %v1357_v31  ;;  %v1289_v12 = vmul.f32 1.442695, %v1224_v1  ;;  %v3927_v8 = vadd.f32 %v3825_v13, %v1063_v2  ;;  %v3937_v40 = vpop.permute.xlu0 %1759 }
 0x110   : > { %v3287_v33 = vpop.f32.mrb[8].mxu0  ;;  %v3319_v34 = vpop.f32.mrb[8].mxu1  ;;  %5653 = vst [vmem:[#allocation25_spill] sm:$0xff] %v3914_v19  ;;  %v1353_v24 = vmul.f32 1.442695, %v1256_v3  ;;  %v1227_v56 = vmin.f32 %v3905_v4, 0.0  ;;  %v3932_v58 = vadd.f32 %v3825_v13, %v1029_v18  ;;  %v3941_v1 = vadd.f32 %v3825_v13, %v1061_v60 }
 0x111   : > { %v794_v38 = vpop.f32.mrb[9].mxu0  ;;  %v3857_v39 = vpop.f32.mrb[9].mxu1  ;;  %5654 = vst [vmem:[#allocation26_spill] sm:$0xff] %v3923_v23  ;;  %v1034_v61 = vmul.f32 %v3287_v33, %v3815_v7  ;;  %5655 = vst [vmem:[#allocation27_spill] sm:$0xff] %v3927_v8  ;;  %v1066_v35 = vmul.f32 %v3319_v34, %v3815_v7  ;;  %v1299_v33 = vmul.f32 1.442695, %v1229_v6  ;;  %3419 = vpow2.f32 %v1289_v12 }
 0x112   : > { %v3861_v63 = vpop.f32.mrb[10].mxu0  ;;  %v3863_v0 = vpop.f32.mrb[10].mxu1  ;;  %5656 = vst [vmem:[#allocation28_spill] sm:$0xff] %v3932_v58  ;;  %v1032_v28 = vmul.f32 %v3815_v7, %v794_v38  ;;  %5658 = vst [vmem:[#allocation30_spill] sm:$0xff] %v3937_v40  ;;  %v1259_v31 = vmin.f32 %v3914_v19, 0.0  ;;  %v1064_v34 = vmul.f32 %v3815_v7, %v3857_v39  ;;  %v1230_v3 = vmin.f32 %v3923_v23, 0.0 }
 0x113   : > { %v3869_v10 = vpop.f32.mrb[11].mxu0  ;;  %v3871_v14 = vpop.f32.mrb[11].mxu1  ;;  %5659 = vst [vmem:[#allocation31_spill] sm:$0xff] %v3941_v1  ;;  %v1363_v2 = vmul.f32 1.442695, %v1261_v11  ;;  %v3947_v18 = vadd.f32 %v3825_v13, %v1034_v61  ;;  %v1035_v38 = vmul.f32 %v3861_v63, %v3815_v7  ;;  %v1262_v60 = vmin.f32 %v3927_v8, 0.0 }
 0x114   : > { %v3957_v40 = vadd.f32 %v3825_v13, %v1066_v35  ;;  %v1067_v39 = vmul.f32 %v3863_v0, %v3815_v7  ;;  %v3965_v59 = vpop.eup %3407  ;;  %3421 = vpow2.f32 %v1353_v24  ;;  %v1295_v63 = vmul.f32 1.442695, %v1227_v56  ;;  %v4006_v51 = vpop.permute.xlu0 %1769 }
 0x115   : > { %5660 = vst [vmem:[#allocation32_spill] sm:$0xff] %v3947_v18  ;;  %v1228_v52 = vmin.f32 %v3932_v58, 0.0  ;;  %v3969_v12 = vadd.f32 %v3825_v13, %v1032_v28  ;;  %v3975_v53 = vpop.eup %3409  ;;  %3423 = vpow2.f32 %v1299_v33  ;;  %v1359_v0 = vmul.f32 1.442695, %v1259_v31 }
 0x116   : > { %5661 = vst [vmem:[#allocation33_spill] sm:$0xff] %v3957_v40  ;;  %v1260_v55 = vmin.f32 %v3941_v1, 0.0  ;;  %v3979_v48 = vadd.f32 %v3825_v13, %v1064_v34  ;;  %v3985_v50 = vpop.eup %3411  ;;  %3425 = vpow2.f32 %v1363_v2  ;;  %v1301_v28 = vmul.f32 1.442695, %v1230_v3 }
 0x117   : > { %5662 = vst [vmem:[#allocation34_spill] sm:$0xff] %v3969_v12  ;;  %v1233_v49 = vmin.f32 %v3947_v18, 0.0  ;;  %v3989_v58 = vadd.f32 %v3825_v13, %v1035_v38  ;;  %v3991_v33 = vpop.eup %3413  ;;  %v1365_v31 = vmul.f32 1.442695, %v1262_v60  ;;  %v1265_v1 = vmin.f32 %v3957_v40, 0.0  ;;  %v4004_v38 = vpop.permute.xlu1 %1744 }
 0x118   : > { %v3893_v41 = vpop.f32.mrb[12].mxu0  ;;  %v3895_v15 = vpop.f32.mrb[12].mxu1  ;;  %5663 = vst [vmem:[#allocation35_spill] sm:$0xff] %v3979_v48  ;;  %v3995_v34 = vadd.f32 %v3825_v13, %v1067_v39  ;;  %v1033_v8 = vmul.f32 %v3815_v7, %v3869_v10  ;;  %3427 = vpow2.f32 %v1295_v63  ;;  %v1297_v2 = vmul.f32 1.442695, %v1228_v52  ;;  %5666 = vst [vmem:[#allocation38_spill] sm:$0xff] %v4004_v38 }
 0x119   : > { %v3899_v9 = vpop.f32.mrb[13].mxu0  ;;  %v3901_v16 = vpop.f32.mrb[13].mxu1  ;;  %5664 = vst [vmem:[#allocation36_spill] sm:$0xff] %v3989_v58  ;;  %v1231_v3 = vmin.f32 %v3969_v12, 0.0  ;;  %3429 = vpow2.f32 %v1359_v0  ;;  %v1361_v60 = vmul.f32 1.442695, %v1260_v55  ;;  %v1065_v63 = vmul.f32 %v3815_v7, %v3871_v14 }
 0x11a   : > { %v3908_v5 = vpop.f32.mrb[14].mxu0  ;;  %v3910_v17 = vpop.f32.mrb[14].mxu1  ;;  %5665 = vst [vmem:[#allocation37_spill] sm:$0xff] %v3995_v34  ;;  %v1263_v39 = vmin.f32 %v3979_v48, 0.0  ;;  %3431 = vpow2.f32 %v1301_v28  ;;  %v1307_v40 = vmul.f32 1.442695, %v1233_v49  ;;  %v4018_v0 = vadd.f32 %v3825_v13, %v1033_v8 }
 0x11b   : > { %v3917_v22 = vpop.f32.mrb[15].mxu0  ;;  %v3919_v62 = vpop.f32.mrb[15].mxu1  ;;  %v1234_v10 = vmin.f32 %v3989_v58, 0.0  ;;  %3433 = vpow2.f32 %v1365_v31  ;;  %v1371_v44 = vmul.f32 1.442695, %v1265_v1  ;;  %v1266_v38 = vmin.f32 %v3995_v34, 0.0 }
 0x11c   : > { %v3999_v19 = vpop.eup %3415  ;;  %5667 = vst [vmem:[#allocation39_spill] sm:$0xff] %v4018_v0  ;;  %3435 = vpow2.f32 %v1297_v2  ;;  %v1303_v49 = vmul.f32 1.442695, %v1231_v3  ;;  %v1038_v14 = vmul.f32 %v3893_v41, %v3815_v7  ;;  %v1367_v8 = vmul.f32 1.442695, %v1263_v39 }
 0x11d   : > { %v4002_v18 = vpop.eup %3417  ;;  %3437 = vpow2.f32 %v1361_v60  ;;  %vm1193_vm5 = vcmp.gt.f32.partialorder %v3835_v25, 0.0  ;;  %v1309_v41 = vmul.f32 1.442695, %v1234_v10  ;;  %v4041_v3 = vadd.f32 %v3825_v13, %v1065_v63  ;;  %v4056_v63 = vpop.permute.xlu1 %1754 }
 0x11e   : > { %v4030_v31 = vpop.eup %3419  ;;  %3439 = vpow2.f32 %v1307_v40  ;;  %v1373_v60 = vmul.f32 1.442695, %v1266_v38  ;;  %v1232_v39 = vmin.f32 %v4018_v0, 0.0  ;;  %vm1159_vm6 = vcmp.gt.f32.partialorder %v3839_v27, 0.0  ;;  %5673 = vst [vmem:[#allocation45_spill] sm:$0xff] %v4056_v63  ;;  %v1780_v0 = vpop.permute.xlu0 %1779 }
 0x11f   : > { %v4037_v2 = vpop.eup %3421  ;;  %5671 = vst [vmem:[#allocation43_spill] sm:$0xff] %v4041_v3  ;;  %3441 = vpow2.f32 %v1371_v44  ;;  %v4052_v40 = vadd.f32 %v3825_v13, %v1038_v14  ;;  %v1036_v10 = vmul.f32 %v3815_v7, %v3899_v9  ;;  %vm1191_vm7 = vcmp.gt.f32.partialorder %v3846_v30, 0.0 }
 0x120   : > { %v3951_v57 = vpop.f32.mrb[16].mxu1  ;;  %v3953_v6 = vpop.f32.mrb[16].mxu0  ;;  %3443 = vpow2.f32 %v1303_v49  ;;  %v1068_v44 = vmul.f32 %v3815_v7, %v3901_v16  ;;  %v1264_v49 = vmin.f32 %v4041_v3, 0.0  ;;  %v1039_v14 = vmul.f32 %v3908_v5, %v3815_v7  ;;  %v4083_v5 = vld [vmem:[%s5545_s5] ss:$0 sm:$0xff] }
 0x121   : > { %v3961_v11 = vpop.f32.mrb[17].mxu0  ;;  %v3963_v61 = vpop.f32.mrb[17].mxu1  ;;  %5672 = vst [vmem:[#allocation44_spill] sm:$0xff] %v4052_v40  ;;  %3445 = vpow2.f32 %v1367_v8  ;;  %v3030_v9 = vadd.f32 -1.0, %v3965_v59  ;;  %v4072_v16 = vmul.f32 1.442695, %v1232_v39 }
 0x122   : > { %v3971_v54 = vpop.f32.mrb[18].mxu0  ;;  %v3973_v35 = vpop.f32.mrb[18].mxu1  ;;  %3447 = vpow2.f32 %v1309_v41  ;;  %vm1162_vm8 = vcmp.gt.f32.partialorder %v3850_v32, 0.0  ;;  %vm1194_vm9 = vcmp.gt.f32.partialorder %v3854_v36, 0.0  ;;  %vm1160_vm10 = vcmp.gt.f32.partialorder %v3875_v20, 0.0 }
 0x123   : > { %v3981_v24 = vpop.f32.mrb[19].mxu0  ;;  %v3983_v56 = vpop.f32.mrb[19].mxu1  ;;  %3449 = vpow2.f32 %v1373_v60  ;;  %v1237_v60 = vmin.f32 %v4052_v40, 0.0  ;;  %vm1165_vm11 = vcmp.gt.f32.partialorder %v3886_v29, 0.0  ;;  %vm1192_vm12 = vcmp.gt.f32.partialorder %v3878_v26, 0.0 }
 0x124   : > { %v4043_v23 = vpop.eup %3423  ;;  %3451 = vpow2.f32 %v4072_v16  ;;  %vm1197_vm13 = vcmp.gt.f32.partialorder %v3890_v37, 0.0  ;;  %vm1163_vm14 = vcmp.gt.f32.partialorder %v3905_v4, 0.0 }
 0x128   : > { %v4012_v52 = vpop.f32.mrb[20].mxu1  ;;  %v4014_v12 = vpop.f32.mrb[20].mxu0 }
 0x129   : > { %v4020_v55 = vpop.f32.mrb[21].mxu0  ;;  %v4022_v28 = vpop.f32.mrb[21].mxu1 }
 0x12a   : > { %v4026_v48 = vpop.f32.mrb[22].mxu0  ;;  %v4028_v58 = vpop.f32.mrb[22].mxu1 }
 0x12b   : > { %5668 = vst [vmem:[#allocation40_spill] sm:$0xff] %v4028_v58  ;;  %v4033_v1 = vpop.f32.mrb[23].mxu0  ;;  %v4035_v34 = vpop.f32.mrb[23].mxu1 }
 0x12c   : > { %5669 = vst [vmem:[#allocation41_spill] sm:$0xff] %v4033_v1  ;;  %5670 = vst [vmem:[#allocation42_spill] sm:$0xff] %v4035_v34  ;;  %v1070_v1 = vmul.f32 %v3895_v15, %v3815_v7  ;;  %v4048_v58 = vpop.eup %3425  ;;  %v3062_v15 = vadd.f32 -1.0, %v3975_v53 }
 0x12d   : > { %v4062_v38 = vpop.eup %3427 }
 0x12e   : > { %v4070_v34 = vpop.eup %3429  ;;  %v4075_v53 = vadd.f32 %v3825_v13, %v1070_v1  ;;  %v1513_v8 = vsel %vm1193_vm5, %v3835_v25, %v3062_v15  ;;  %v4093_v1 = vadd.f32 %v3825_v13, %v1036_v10  ;;  %v1481_v25 = vsel %vm1161_vm2, %v3831_v21, %v3030_v9 }
 0x12f   : > { %5675 = vst [vmem:[#allocation47_spill] sm:$0xff] %v4070_v34  ;;  %v4089_v3 = vpop.eup %3431  ;;  %v1961_v39 = vmul.f32 %v1780_v0, %v1513_v8  ;;  %v4112_v10 = vadd.f32 %v3825_v13, %v1068_v44  ;;  %v1071_v0 = vmul.f32 %v3910_v17, %v3815_v7  ;;  %v1929_v21 = vmul.f32 %v3776_v45, %v1481_v25 }
 0x130   : > { %v4068_v63 = vpop.f32.mrb[24].mxu1  ;;  %5676 = vst [vmem:[#allocation48_spill] sm:$0xff] %v4075_v53  ;;  %v4085_v59 = vpop.f32.mrb[24].mxu0  ;;  %5678 = vst [vmem:[#allocation50_spill] sm:$0xff] %v4093_v1  ;;  %v3060_v9 = vadd.f32 -1.0, %v3991_v33  ;;  %v1037_v33 = vmul.f32 %v3815_v7, %v3917_v22 }
 0x131   : > { %5674 = vst [vmem:[#allocation46_spill] sm:$0xff] %v4068_v63  ;;  %v4087_v41 = vpop.f32.mrb[25].mxu1  ;;  %v4098_v15 = vpop.f32.mrb[25].mxu0  ;;  %5682 = vst [vmem:[#allocation54_spill] sm:$0xff] %v4112_v10  ;;  %v2353_v44 = vmul.f32 %v4083_v5, %v1961_v39  ;;  %v2321_v25 = vmul.f32 %v4083_v5, %v1929_v21 }
 0x132   : > { %5677 = vst [vmem:[#allocation49_spill] sm:$0xff] %v4087_v41  ;;  %5679 = vst [vmem:[#allocation51_spill] sm:$0xff] %v4098_v15  ;;  %v4100_v34 = vpop.f32.mrb[26].mxu1  ;;  %v4102_v63 = vpop.eup %3433  ;;  %v3194_v41 = vpack.c.bf16 %v1961_v39, %v1961_v39  ;;  %v3028_v15 = vadd.f32 -1.0, %v3985_v50  ;;  %v1069_v50 = vmul.f32 %v3815_v7, %v3919_v62 }
 0x133   : > { %5680 = vst [vmem:[#allocation52_spill] sm:$0xff] %v4100_v34  ;;  %5681 = vst [vmem:[#allocation53_spill] sm:$0xff] %v4102_v63  ;;  %v4118_v8 = vpop.f32.mrb[26].mxu0  ;;  %v4120_v40 = vpop.f32.mrb[27].mxu1  ;;  %v4125_v34 = vadd.f32 %v3825_v13, %v1039_v14  ;;  %v1511_v14 = vsel %vm1191_vm7, %v3846_v30, %v3060_v9  ;;  %v2486_v39 = vsel %vm2383_vm4, %v2353_v44, 0.0  ;;  %v1269_v9 = vmin.f32 %v4075_v53, 0.0 }
 0x134   : > { %5683 = vst [vmem:[#allocation55_spill] sm:$0xff] %v4120_v40  ;;  %v4122_v63 = vpop.eup %3435  ;;  %v4129_v17 = vpop.f32.mrb[27].mxu0  ;;  %v3162_v40 = vpack.c.bf16 %v1929_v21, %v1929_v21  ;;  %2282 = vst.msk [vmem:[%s4109_s21 + $0x88] sm:$0xf] %vm2247_vm3, %v3194_v41  ;;  %v1479_v22 = vsel %vm1159_vm6, %v3839_v27, %v3028_v15  ;;  %v1369_v30 = vmul.f32 1.442695, %v1264_v49  ;;  %2487 = vadd.xlane.f32.xlu1 %v2486_v39 }
 0x135   : > { %5684 = vst [vmem:[#allocation56_spill] sm:$0xff] %v4122_v63  ;;  %5685 = vst [vmem:[#allocation57_spill] sm:$0xff] %v4125_v34  ;;  %v4131_v45 = vpop.eup %3437  ;;  %v2390_v62 = vsel %vm2383_vm4, %v2321_v25, 0.0  ;;  %v1927_v41 = vmul.f32 %v3770_v42, %v1479_v22  ;;  %v4171_v42 = vadd.f32 %v3825_v13, %v1071_v0  ;;  %v4182_v53 = vadd.f32 %v3825_v13, %v1037_v33 }
 0x136   : > { %5686 = vst [vmem:[#allocation58_spill] sm:$0xff] %v4129_v17  ;;  %5687 = vst [vmem:[#allocation59_spill] sm:$0xff] %v4131_v45  ;;  %v4139_v63 = vpop.eup %3439  ;;  %v1959_v45 = vmul.f32 %v4006_v51, %v1511_v14  ;;  %v4152_v17 = vpop.permute.xlu1 %1764  ;;  %v1315_v51 = vmul.f32 1.442695, %v1237_v60  ;;  %v1235_v14 = vmin.f32 %v4093_v1, 0.0  ;;  %2391 = vadd.xlane.f32.xlu0 %v2390_v62  ;;  %v1238_v1 = vmin.f32 %v4125_v34, 0.0 }
 0x137   : > { %v4150_v21 = vpop.eup %3441  ;;  %5689 = vst [vmem:[#allocation61_spill] sm:$0xff] %v4152_v17  ;;  %2250 = vst.msk [vmem:[%s4109_s21 + $0x8] sm:$0xf] %vm2247_vm3, %v3162_v40  ;;  %v1267_v40 = vmin.f32 %v4112_v10, 0.0  ;;  %v2319_v60 = vmul.f32 %v4083_v5, %v1927_v41  ;;  %v3160_v25 = vpack.c.bf16 %v1927_v41, %v1927_v41  ;;  %v4185_v10 = vadd.f32 %v3825_v13, %v1069_v50 }
 0x138   : > { %5688 = vst [vmem:[#allocation60_spill] sm:$0xff] %v4150_v21  ;;  %v4159_v44 = vpop.eup %3443  ;;  %v2351_v27 = vmul.f32 %v4083_v5, %v1959_v45  ;;  %v3192_v15 = vpack.c.bf16 %v1959_v45, %v1959_v45  ;;  %v4163_v49 = vpop.f32.mrb[28].mxu1  ;;  %3453 = vpow2.f32 %v1369_v30  ;;  %v1317_v21 = vmul.f32 1.442695, %v1238_v1 }
 0x139   : > { %5690 = vst [vmem:[#allocation62_spill] sm:$0xff] %v4159_v44  ;;  %v4165_v17 = vpop.f32.mrb[28].mxu0  ;;  %v4167_v39 = vpop.eup %3445  ;;  %v2384_v33 = vsel %vm2383_vm4, %v2319_v60, 0.0  ;;  %2248 = vst.msk [vmem:[%s4109_s21] sm:$0xf] %vm2247_vm3, %v3160_v25  ;;  %3455 = vpow2.f32 %v1315_v51  ;;  %v1270_v16 = vmin.f32 %v4171_v42, 0.0  ;;  %v1072_v30 = vmul.f32 %v3815_v7, %v3963_v61 }
 0x13a   : > { %5691 = vst [vmem:[#allocation63_spill] sm:$0xff] %v4167_v39  ;;  %v4174_v22 = vpop.f32.mrb[29].mxu0  ;;  %v4176_v62 = vpop.f32.mrb[29].mxu1  ;;  %v2480_v0 = vsel %vm2383_vm4, %v2351_v27, 0.0  ;;  %2280 = vst.msk [vmem:[%s4109_s21 + $0x80] sm:$0xf] %vm2247_vm3, %v3192_v15  ;;  %2385 = vadd.xlane.f32.xlu0 %v2384_v33  ;;  %v1040_v15 = vmul.f32 %v3815_v7, %v3961_v11  ;;  %v1043_v1 = vmul.f32 %v3971_v54, %v3815_v7 }
 0x13b   : > { %v4178_v45 = vpop.eup %3447  ;;  %v4190_v41 = vpop.f32.mrb[30].mxu0  ;;  %2481 = vadd.xlane.f32.xlu1 %v2480_v0  ;;  %v1311_v27 = vmul.f32 1.442695, %v1235_v14  ;;  %v1268_v60 = vmin.f32 %v4185_v10, 0.0  ;;  %v3031_v51 = vadd.f32 -1.0, %v3999_v19  ;;  %v4226_v0 = vadd.f32 %v3825_v13, %v1072_v30 }
 0x13c   : > { %5692 = vst [vmem:[#allocation64_spill] sm:$0xff] %v4178_v45  ;;  %v4192_v39 = vpop.f32.mrb[30].mxu1  ;;  %v4194_v44 = vpop.eup %3449  ;;  %v1379_v45 = vmul.f32 1.442695, %v1269_v9  ;;  %v1236_v9 = vmin.f32 %v4182_v53, 0.0  ;;  %v4214_v11 = vadd.f32 %v3825_v13, %v1040_v15  ;;  %v1041_v54 = vmul.f32 %v3815_v7, %v3981_v24 }
 0x13d   : > { %5693 = vst [vmem:[#allocation65_spill] sm:$0xff] %v4194_v44  ;;  %v4200_v50 = vpop.f32.mrb[31].mxu0  ;;  %v4202_v34 = vpop.f32.mrb[31].mxu1  ;;  %v1375_v44 = vmul.f32 1.442695, %v1267_v40  ;;  %v1075_v40 = vmul.f32 %v3973_v35, %v3815_v7  ;;  %v1482_v19 = vsel %vm1162_vm8, %v3850_v32, %v3031_v51  ;;  %v3029_v33 = vadd.f32 -1.0, %v4030_v31 }
 0x13e   : > { %3457 = vpow2.f32 %v1379_v45  ;;  %v4219_v14 = vpop.permute.xlu1 %1774  ;;  %v1381_v61 = vmul.f32 1.442695, %v1270_v16  ;;  %v1313_v25 = vmul.f32 1.442695, %v1236_v9  ;;  %v1377_v45 = vmul.f32 1.442695, %v1268_v60  ;;  %v4241_v15 = vpop.eup %3451 }
 0x13f   : > { %3459 = vpow2.f32 %v1311_v27  ;;  %v4236_v35 = vadd.f32 %v3825_v13, %v1043_v1  ;;  %v1930_v27 = vmul.f32 %v3780_v47, %v1482_v19  ;;  %v4244_v24 = vadd.f32 %v3825_v13, %v1075_v40 }
 0x140   : > { %3461 = vpow2.f32 %v1375_v44  ;;  %v1239_v44 = vmin.f32 %v4214_v11, 0.0  ;;  %v1480_v32 = vsel %vm1160_vm10, %v3875_v20, %v3029_v33  ;;  %v3063_v31 = vadd.f32 -1.0, %v4002_v18 }
 0x141   : > { %3463 = vpow2.f32 %v1317_v21  ;;  %v1073_v21 = vmul.f32 %v3815_v7, %v3983_v56  ;;  %v3034_v16 = vadd.f32 -1.0, %v4043_v23  ;;  %v2322_v56 = vmul.f32 %v4083_v5, %v1930_v27 }
 0x142   : > { %v4251_v9 = vpop.eup %3453  ;;  %v3163_v60 = vpack.c.bf16 %v1930_v27, %v1930_v27  ;;  %v1928_v47 = vmul.f32 %v3772_v43, %v1480_v32  ;;  %v1078_v30 = vmul.f32 %v4012_v52, %v3815_v7  ;;  %v1785_v51 = vpop.permute.xlu1 %1784  ;;  %v1271_v40 = vmin.f32 %v4226_v0, 0.0 }
 0x143   : > { %v4257_v1 = vpop.eup %3455  ;;  %v4261_v20 = vadd.f32 %v3825_v13, %v1041_v54  ;;  %v1514_v23 = vsel %vm1194_vm9, %v3854_v36, %v3063_v31  ;;  %v1485_v43 = vsel %vm1165_vm11, %v3886_v29, %v3034_v16  ;;  %v2393_v18 = vsel %vm2383_vm4, %v2322_v56, 0.0 }
 0x144   : > { %2251 = vst.msk [vmem:[%s4109_s21 + $0xc] sm:$0xf] %vm2247_vm3, %v3163_v60  ;;  %v2320_v52 = vmul.f32 %v4083_v5, %v1928_v47  ;;  %v3161_v19 = vpack.c.bf16 %v1928_v47, %v1928_v47  ;;  %v1962_v33 = vmul.f32 %v1785_v51, %v1514_v23  ;;  %v1242_v54 = vmin.f32 %v4236_v35, 0.0  ;;  %2394 = vadd.xlane.f32.xlu0 %v2393_v18 }
 0x145   : > { %5694 = vst [vmem:[#allocation66_spill] sm:$0xff] %v4261_v20  ;;  %v1274_v32 = vmin.f32 %v4244_v24, 0.0  ;;  %v4278_v36 = vadd.f32 %v3825_v13, %v1073_v21  ;;  %v1933_v29 = vmul.f32 %v3778_v46, %v1485_v43  ;;  %v4287_v56 = vadd.f32 %v3825_v13, %v1078_v30 }
 0x146   : > { %v2387_v16 = vsel %vm2383_vm4, %v2320_v52, 0.0  ;;  %2249 = vst.msk [vmem:[%s4109_s21 + $0x4] sm:$0xf] %vm2247_vm3, %v3161_v19  ;;  %v3195_v60 = vpack.c.bf16 %v1962_v33, %v1962_v33  ;;  %v2354_v47 = vmul.f32 %v4083_v5, %v1962_v33  ;;  %v1319_v21 = vmul.f32 1.442695, %v1239_v44 }
 0x147   : > { %5695 = vst [vmem:[#allocation67_spill] sm:$0xff] %v4278_v36  ;;  %5696 = vst [vmem:[#allocation68_spill] sm:$0xff] %v4287_v56  ;;  %v1240_v23 = vmin.f32 %v4261_v20, 0.0  ;;  %2388 = vadd.xlane.f32.xlu1 %v2387_v16  ;;  %v2325_v46 = vmul.f32 %v4083_v5, %v1933_v29  ;;  %v3166_v43 = vpack.c.bf16 %v1933_v29, %v1933_v29  ;;  %3465 = vpow2.f32 %v1381_v61  ;;  %v5731_v20 = vld [vmem:[#allocation53_spill] sm:$0xff] }
 0x148   : > { %v4273_v27 = vpop.eup %3457  ;;  %v1383_v52 = vmul.f32 1.442695, %v1271_v40  ;;  %2283 = vst.msk [vmem:[%s4109_s21 + $0x8c] sm:$0xf] %vm2247_vm3, %v3195_v60  ;;  %v2489_v30 = vsel %vm2383_vm4, %v2354_v47, 0.0  ;;  %v1046_v19 = vmul.f32 %v4014_v12, %v3815_v7  ;;  %3467 = vpow2.f32 %v1313_v25  ;;  %v4314_v47 = vpop.permute.xlu0 %1789 }
 0x149   : > { %v4281_v31 = vpop.eup %3459  ;;  %v1325_v33 = vmul.f32 1.442695, %v1242_v54  ;;  %v1272_v44 = vmin.f32 %v4278_v36, 0.0  ;;  %2490 = vadd.xlane.f32.xlu0 %v2489_v30  ;;  %2254 = vst.msk [vmem:[%s4109_s21 + $0x18] sm:$0xf] %vm2247_vm3, %v3166_v43  ;;  %v1044_v29 = vmul.f32 %v3815_v7, %v4020_v55  ;;  %3469 = vpow2.f32 %v1377_v45 }
 0x14a   : > { %v4290_v51 = vpop.eup %3461  ;;  %v1389_v61 = vmul.f32 1.442695, %v1274_v32  ;;  %v1277_v40 = vmin.f32 %v4287_v56, 0.0  ;;  %v2402_v16 = vsel %vm2383_vm4, %v2325_v46, 0.0  ;;  %3471 = vpow2.f32 %v1319_v21 }
 0x14b   : > { %5697 = vst [vmem:[#allocation69_spill] sm:$0xff] %v4290_v51  ;;  %v4294_v18 = vpop.eup %3463  ;;  %v1321_v60 = vmul.f32 1.442695, %v1240_v23  ;;  %2403 = vadd.xlane.f32.xlu1 %v2402_v16  ;;  %3473 = vpow2.f32 %v1383_v52  ;;  %v4309_v12 = vadd.f32 %v3825_v13, %v1046_v19  ;;  %v1385_v25 = vmul.f32 1.442695, %v1272_v44  ;;  %v5700_v52 = vld [vmem:[#allocation40_spill] sm:$0xff] }
 0x14c   : > { %3475 = vpow2.f32 %v1325_v33  ;;  %v4312_v54 = vadd.f32 %v3825_v13, %v1044_v29  ;;  %v1074_v55 = vmul.f32 %v3951_v57, %v3815_v7  ;;  %v1042_v45 = vmul.f32 %v3953_v6, %v3815_v7  ;;  %v5705_v44 = vld [vmem:[#allocation41_spill] sm:$0xff] }
 0x14d   : > { %5698 = vst [vmem:[#allocation70_spill] sm:$0xff] %v4309_v12  ;;  %3477 = vpow2.f32 %v1389_v61  ;;  %v1395_v32 = vmul.f32 1.442695, %v1277_v40  ;;  %v1076_v21 = vmul.f32 %v3815_v7, %v4022_v28  ;;  %v1245_v23 = vmin.f32 %v4309_v12, 0.0  ;;  %v5702_v28 = vld [vmem:[#allocation26_spill] sm:$0xff] }
 0x14e   : > { %5699 = vst [vmem:[#allocation71_spill] sm:$0xff] %v4312_v54  ;;  %3479 = vpow2.f32 %v1321_v60  ;;  %v1047_v46 = vmul.f32 %v4026_v48, %v3815_v7  ;;  %v3061_v57 = vadd.f32 -1.0, %v4037_v2  ;;  %v3066_v43 = vadd.f32 -1.0, %v4048_v58  ;;  %v1800_v60 = vpop.permute.xlu0 %1799 }
 0x14f   : > { %3481 = vpow2.f32 %v1385_v25  ;;  %v1243_v6 = vmin.f32 %v4312_v54, 0.0  ;;  %v1079_v30 = vmul.f32 %v5700_v52, %v3815_v7  ;;  %vm1166_vm15 = vcmp.gt.f32.partialorder %v5702_v28, 0.0  ;;  %v5710_v54 = vld [vmem:[#allocation46_spill] sm:$0xff] }
 0x150   : > { %v4337_v33 = vadd.f32 %v3825_v13, %v1074_v55  ;;  %v4340_v48 = vadd.f32 %v3825_v13, %v1042_v45  ;;  %3483 = vpow2.f32 %v1395_v32  ;;  %v4345_v2 = vadd.f32 %v3825_v13, %v1076_v21  ;;  %v5708_v45 = vld [vmem:[#allocation42_spill] sm:$0xff] }
 0x151   : > { %v4333_v19 = vpop.eup %3465  ;;  %v1045_v29 = vmul.f32 %v3815_v7, %v5705_v44  ;;  %v1512_v61 = vsel %vm1192_vm12, %v3878_v26, %v3061_v57  ;;  %v1517_v40 = vsel %vm1197_vm13, %v3890_v37, %v3066_v43  ;;  %v1331_v25 = vmul.f32 1.442695, %v1245_v23 }
 0x152   : > { %5701 = vst [vmem:[#allocation40_spill] sm:$0xff] %v4333_v19  ;;  %v4342_v58 = vpop.eup %3467  ;;  %5704 = vst [vmem:[#allocation72_spill] sm:$0xff] %v4345_v2  ;;  %v4358_v55 = vadd.f32 %v3825_v13, %v1047_v46  ;;  %v1077_v32 = vmul.f32 %v3815_v7, %v5708_v45  ;;  %v1960_v21 = vmul.f32 %v4219_v14, %v1512_v61  ;;  %v1327_v44 = vmul.f32 1.442695, %v1243_v6 }
 0x153   : > { %5703 = vst [vmem:[#allocation26_spill] sm:$0xff] %v4342_v58  ;;  %v4355_v16 = vpop.eup %3469  ;;  %v4366_v26 = vadd.f32 %v3825_v13, %v1079_v30  ;;  %v1965_v37 = vmul.f32 %v1800_v60, %v1517_v40  ;;  %v3032_v57 = vadd.f32 -1.0, %v4062_v38  ;;  %v1082_v45 = vmul.f32 %v5710_v54, %v3815_v7 }
 0x154   : > { %5706 = vst [vmem:[#allocation41_spill] sm:$0xff] %v4355_v16  ;;  %5707 = vst [vmem:[#allocation73_spill] sm:$0xff] %v4358_v55  ;;  %v4363_v52 = vpop.eup %3471  ;;  %v3193_v23 = vpack.c.bf16 %v1960_v21, %v1960_v21  ;;  %v2352_v46 = vmul.f32 %v4083_v5, %v1960_v21  ;;  %v3035_v14 = vadd.f32 -1.0, %v4089_v3  ;;  %v1275_v6 = vmin.f32 %v4345_v2, 0.0 }
 0x155   : > { %5709 = vst [vmem:[#allocation42_spill] sm:$0xff] %v4366_v26  ;;  %v4369_v43 = vpop.eup %3473  ;;  %v4379_v30 = vadd.f32 %v3825_v13, %v1045_v29  ;;  %v3198_v40 = vpack.c.bf16 %v1965_v37, %v1965_v37  ;;  %v2357_v38 = vmul.f32 %v4083_v5, %v1965_v37  ;;  %v4385_v21 = vadd.f32 %v3825_v13, %v1077_v32 }
 0x156   : > { %v4375_v61 = vpop.eup %3475  ;;  %2281 = vst.msk [vmem:[%s4109_s21 + $0x84] sm:$0xf] %vm2247_vm3, %v3193_v23  ;;  %v2483_v54 = vsel %vm2383_vm4, %v2352_v46, 0.0  ;;  %v1483_v3 = vsel %vm1163_vm14, %v3905_v4, %v3032_v57  ;;  %v1486_v29 = vsel %vm1166_vm15, %v5702_v28, %v3035_v14  ;;  %v1246_v37 = vmin.f32 %v4358_v55, 0.0  ;;  %v5713_v23 = vld [vmem:[#allocation3_spill] sm:$0xff]  ;;  %v5722_v55 = vld [vmem:[#allocation25_spill] sm:$0xff] }
 0x157   : > { %5711 = vst [vmem:[#allocation46_spill] sm:$0xff] %v4379_v30  ;;  %v4382_v60 = vpop.eup %3477  ;;  %5712 = vst [vmem:[#allocation74_spill] sm:$0xff] %v4385_v21  ;;  %2484 = vadd.xlane.f32.xlu0 %v2483_v54  ;;  %v2498_v32 = vsel %vm2383_vm4, %v2357_v38, 0.0  ;;  %v1931_v56 = vmul.f32 %v5713_v23, %v1483_v3  ;;  %v5714_v46 = vld [vmem:[#allocation7_spill] sm:$0xff]  ;;  %v1278_v12 = vmin.f32 %v4366_v26, 0.0  ;;  %v4406_v4 = vadd.f32 %v3825_v13, %v1082_v45 }
 0x158   : > { %v4396_v2 = vpop.eup %3479  ;;  %2286 = vst.msk [vmem:[%s4109_s21 + $0x98] sm:$0xf] %vm2247_vm3, %v3198_v40  ;;  %v1934_v36 = vmul.f32 %v5714_v46, %v1486_v29  ;;  %2499 = vadd.xlane.f32.xlu1 %v2498_v32  ;;  %v1050_v28 = vmul.f32 %v4085_v59, %v3815_v7  ;;  %v5716_v57 = vld [vmem:[#allocation51_spill] sm:$0xff]  ;;  %v1391_v32 = vmul.f32 1.442695, %v1275_v6  ;;  %v1244_v45 = vmin.f32 %v4379_v30, 0.0 }
 0x159   : > { %5715 = vst [vmem:[#allocation3_spill] sm:$0xff] %v4406_v4  ;;  %v1048_v14 = vmul.f32 %v3815_v7, %v5716_v57  ;;  %v4412_v40 = vpop.eup %3481  ;;  %v2323_v38 = vmul.f32 %v4083_v5, %v1931_v56  ;;  %v3164_v54 = vpack.c.bf16 %v1931_v56, %v1931_v56  ;;  %v1276_v46 = vmin.f32 %v4385_v21, 0.0  ;;  %v5719_v56 = vld [vmem:[#allocation49_spill] sm:$0xff] }
 0x15a   : > { %v2326_v3 = vmul.f32 %v4083_v5, %v1934_v36  ;;  %v3167_v29 = vpack.c.bf16 %v1934_v36, %v1934_v36  ;;  %v4416_v23 = vpop.eup %3483  ;;  %v4421_v59 = vadd.f32 %v3825_v13, %v1050_v28  ;;  %v1080_v6 = vmul.f32 %v3815_v7, %v5719_v56  ;;  %v4449_v56 = vpop.permute.xlu1 %1794 }
 0x15b   : > { %v2396_v57 = vsel %vm2383_vm4, %v2323_v38, 0.0  ;;  %2252 = vst.msk [vmem:[%s4109_s21 + $0x10] sm:$0xf] %vm2247_vm3, %v3164_v54  ;;  %v4430_v36 = vadd.f32 %v3825_v13, %v1048_v14  ;;  %3485 = vpow2.f32 %v1331_v25  ;;  %v1333_v30 = vmul.f32 1.442695, %v1246_v37  ;;  %v5721_v14 = vld [vmem:[#allocation52_spill] sm:$0xff] }
 0x15c   : > { %5717 = vst [vmem:[#allocation7_spill] sm:$0xff] %v4421_v59  ;;  %v2405_v26 = vsel %vm2383_vm4, %v2326_v3, 0.0  ;;  %2255 = vst.msk [vmem:[%s4109_s21 + $0x1c] sm:$0xf] %vm2247_vm3, %v3167_v29  ;;  %v1397_v21 = vmul.f32 1.442695, %v1278_v12  ;;  %2397 = vadd.xlane.f32.xlu1 %v2396_v57  ;;  %v4437_v54 = vadd.f32 %v3825_v13, %v1080_v6  ;;  %v1051_v3 = vmul.f32 %v4118_v8, %v3815_v7 }
 0x15d   : > { %5718 = vst [vmem:[#allocation51_spill] sm:$0xff] %v4430_v36  ;;  %v1281_v28 = vmin.f32 %v4406_v4, 0.0  ;;  %2406 = vadd.xlane.f32.xlu0 %v2405_v26  ;;  %v1249_v38 = vmin.f32 %v4421_v59, 0.0  ;;  %v1083_v29 = vmul.f32 %v5721_v14, %v3815_v7  ;;  %vm1195_vm0 = vcmp.gt.f32.partialorder %v5722_v55, 0.0  ;;  %v5723_v25 = vld [vmem:[#allocation27_spill] sm:$0xff]  ;;  %v5728_v59 = vld [vmem:[#allocation32_spill] sm:$0xff] }
 0x15e   : > { %5720 = vst [vmem:[#allocation49_spill] sm:$0xff] %v4437_v54  ;;  %vm1198_vm1 = vcmp.gt.f32.partialorder %v5723_v25, 0.0  ;;  %3487 = vpow2.f32 %v1327_v44  ;;  %v1329_v12 = vmul.f32 1.442695, %v1244_v45  ;;  %v1393_v37 = vmul.f32 1.442695, %v1276_v46 }
 0x15f   : > { %3489 = vpow2.f32 %v1391_v32  ;;  %v1247_v26 = vmin.f32 %v4430_v36, 0.0  ;;  %v4447_v57 = vadd.f32 %v3825_v13, %v1051_v3  ;;  %v1273_v8 = vmin.f32 %v4337_v33, 0.0  ;;  %v5726_v45 = vld [vmem:[#allocation28_spill] sm:$0xff]  ;;  %v5727_v3 = vld [vmem:[#allocation58_spill] sm:$0xff] }
 0x160   : > { %3491 = vpow2.f32 %v1333_v30  ;;  %v1403_v6 = vmul.f32 1.442695, %v1281_v28  ;;  %v4453_v14 = vadd.f32 %v3825_v13, %v1083_v29  ;;  %v1241_v4 = vmin.f32 %v4340_v48, 0.0  ;;  %v5729_v28 = vld [vmem:[#allocation47_spill] sm:$0xff] }
 0x161   : > { %5724 = vst [vmem:[#allocation52_spill] sm:$0xff] %v4447_v57  ;;  %3493 = vpow2.f32 %v1397_v21  ;;  %v1339_v44 = vmul.f32 1.442695, %v1249_v38  ;;  %v1279_v32 = vmin.f32 %v4437_v54, 0.0  ;;  %vm1164_vm2 = vcmp.gt.f32.partialorder %v5726_v45, 0.0  ;;  %v5730_v38 = vld [vmem:[#allocation55_spill] sm:$0xff] }
 0x162   : > { %5725 = vst [vmem:[#allocation25_spill] sm:$0xff] %v4453_v14  ;;  %3495 = vpow2.f32 %v1329_v12  ;;  %v1250_v46 = vmin.f32 %v4447_v57, 0.0  ;;  %v1049_v36 = vmul.f32 %v3815_v7, %v5727_v3  ;;  %vm1169_vm5 = vcmp.gt.f32.partialorder %v5728_v59, 0.0  ;;  %v1805_v3 = vpop.permute.xlu1 %1804 }
 0x163   : > { %3497 = vpow2.f32 %v1393_v37  ;;  %v1335_v30 = vmul.f32 1.442695, %v1247_v26  ;;  %v3064_v29 = vadd.f32 -1.0, %v5729_v28  ;;  %v1282_v21 = vmin.f32 %v4453_v14, 0.0 }
 0x164   : > { %3499 = vpow2.f32 %v1403_v6  ;;  %v1081_v54 = vmul.f32 %v3815_v7, %v5730_v38  ;;  %v3067_v16 = vadd.f32 -1.0, %v5731_v20  ;;  %v1387_v12 = vmul.f32 1.442695, %v1273_v8  ;;  %v5737_v38 = vld [vmem:[#allocation6_spill] sm:$0xff] }
 0x165   : > { %v1323_v58 = vmul.f32 1.442695, %v1241_v4  ;;  %3501 = vpow2.f32 %v1339_v44  ;;  %v1399_v57 = vmul.f32 1.442695, %v1279_v32  ;;  %v4467_v19 = vpop.eup %3485  ;;  %v1341_v51 = vmul.f32 1.442695, %v1250_v46 }
 0x166   : > { %v4470_v37 = vadd.f32 %v3825_v13, %v1049_v36  ;;  %v1515_v26 = vsel %vm1195_vm0, %v5722_v55, %v3064_v29  ;;  %v1518_v6 = vsel %vm1198_vm1, %v5723_v25, %v3067_v16  ;;  %3503 = vpow2.f32 %v1335_v30  ;;  %v5734_v46 = vld [vmem:[#allocation56_spill] sm:$0xff] }
 0x167   : > { %v1963_v20 = vmul.f32 %v4314_v47, %v1515_v26  ;;  %v1966_v4 = vmul.f32 %v1805_v3, %v1518_v6  ;;  %v1086_v8 = vmul.f32 %v4163_v49, %v3815_v7  ;;  %v1405_v36 = vmul.f32 1.442695, %v1282_v21 }
 0x168   : > { %5732 = vst [vmem:[#allocation27_spill] sm:$0xff] %v4470_v37  ;;  %v4481_v44 = vpop.eup %3487  ;;  %v4484_v32 = vadd.f32 %v3825_v13, %v1081_v54  ;;  %v3033_v55 = vadd.f32 -1.0, %v5734_v46  ;;  %v3038_v28 = vadd.f32 -1.0, %v4139_v63  ;;  %3505 = vpow2.f32 %v1399_v57 }
 0x169   : > { %v3490_v16 = vpop.eup %3489  ;;  %v3196_v25 = vpack.c.bf16 %v1963_v20, %v1963_v20  ;;  %v2355_v47 = vmul.f32 %v4083_v5, %v1963_v20  ;;  %v3199_v30 = vpack.c.bf16 %v1966_v4, %v1966_v4  ;;  %3507 = vpow2.f32 %v1341_v51  ;;  %v4504_v51 = vld [vmem:[%s5543_s3] ss:$0 sm:$0xff] }
 0x16a   : > { %5733 = vst [vmem:[#allocation28_spill] sm:$0xff] %v4484_v32  ;;  %v3492_v29 = vpop.eup %3491  ;;  %v2358_v7 = vmul.f32 %v4083_v5, %v1966_v4  ;;  %v1484_v13 = vsel %vm1164_vm2, %v5726_v45, %v3033_v55  ;;  %v1489_v49 = vsel %vm1169_vm5, %v5728_v59, %v3038_v28  ;;  %v4507_v57 = vadd.f32 %v4504_v51, %v1086_v8  ;;  %v5736_v45 = vld [vmem:[#allocation5_spill] sm:$0xff] }
 0x16b   : > { %v3494_v54 = vpop.eup %3493  ;;  %2284 = vst.msk [vmem:[%s4109_s21 + $0x90] sm:$0xf] %vm2247_vm3, %v3196_v25  ;;  %v2492_v63 = vsel %vm2383_vm4, %v2355_v47, 0.0  ;;  %2287 = vst.msk [vmem:[%s4109_s21 + $0x9c] sm:$0xf] %vm2247_vm3, %v3199_v30  ;;  %v1932_v21 = vmul.f32 %v5736_v45, %v1484_v13  ;;  %v1937_v3 = vmul.f32 %v5737_v38, %v1489_v49  ;;  %3509 = vpow2.f32 %v1405_v36  ;;  %v5738_v47 = vld [vmem:[#allocation33_spill] sm:$0xff]  ;;  %v4534_v45 = vpop.permute.xlu0 %1809 }
 0x16c   : > { %5735 = vst [vmem:[#allocation58_spill] sm:$0xff] %v4507_v57  ;;  %v3496_v59 = vpop.eup %3495  ;;  %v1248_v26 = vmin.f32 %v4470_v37, 0.0  ;;  %v1280_v6 = vmin.f32 %v4484_v32, 0.0  ;;  %2493 = vadd.xlane.f32.xlu1 %v2492_v63  ;;  %v2501_v20 = vsel %vm2383_vm4, %v2358_v7, 0.0  ;;  %vm1201_vm6 = vcmp.gt.f32.partialorder %v5738_v47, 0.0  ;;  %v5739_v13 = vld [vmem:[#allocation31_spill] sm:$0xff] }
 0x16d   : > { %v3498_v4 = vpop.eup %3497  ;;  %2502 = vadd.xlane.f32.xlu0 %v2501_v20  ;;  %v2324_v46 = vmul.f32 %v4083_v5, %v1932_v21  ;;  %v3165_v8 = vpack.c.bf16 %v1932_v21, %v1932_v21  ;;  %v2329_v55 = vmul.f32 %v4083_v5, %v1937_v3  ;;  %v3170_v28 = vpack.c.bf16 %v1937_v3, %v1937_v3  ;;  %v4520_v36 = vld [vmem:[%s5542_s2] ss:$0 sm:$0xff]  ;;  %v5751_v37 = vld [vmem:[#allocation60_spill] sm:$0xff] }
 0x16e   : > { %v3500_v25 = vpop.eup %3499  ;;  %3511 = vpow2.f32 %v1387_v12  ;;  %v1054_v30 = vmul.f32 %v4520_v36, %v4165_v17  ;;  %vm1196_vm7 = vcmp.gt.f32.partialorder %v5739_v13, 0.0  ;;  %v4526_v49 = vadd.f32 -1.0, %v4363_v52  ;;  %v5740_v3 = vld [vmem:[#allocation34_spill] sm:$0xff] }
 0x16f   : > { %v3502_v7 = vpop.eup %3501  ;;  %3513 = vpow2.f32 %v1323_v58  ;;  %v1285_v63 = vmin.f32 %v4507_v57, 0.0  ;;  %2253 = vst.msk [vmem:[%s4109_s21 + $0x14] sm:$0xf] %vm2247_vm3, %v3165_v8  ;;  %v2414_v12 = vsel %vm2383_vm4, %v2329_v55, 0.0  ;;  %2258 = vst.msk [vmem:[%s4109_s21 + $0x28] sm:$0xf] %vm2247_vm3, %v3170_v28 }
 0x170   : > { %v4537_v21 = vadd.f32 -1.0, %v4369_v43  ;;  %v4540_v17 = vadd.f32 -1.0, %v4375_v61  ;;  %v1337_v58 = vmul.f32 1.442695, %v1248_v26  ;;  %v2399_v52 = vsel %vm2383_vm4, %v2324_v46, 0.0  ;;  %2415 = vadd.xlane.f32.xlu1 %v2414_v12  ;;  %v3504_v38 = vpop.eup %3503  ;;  %v5741_v61 = vld [vmem:[#allocation36_spill] sm:$0xff] }
 0x171   : > { %vm1167_vm8 = vcmp.gt.f32.partialorder %v5740_v3, 0.0  ;;  %v4545_v20 = vadd.f32 -1.0, %v4382_v60  ;;  %v4548_v8 = vadd.f32 -1.0, %v4396_v2  ;;  %v4551_v55 = vadd.f32 -1.0, %v4412_v40  ;;  %2400 = vadd.xlane.f32.xlu0 %v2399_v52 }
 0x172   : > { %v1401_v43 = vmul.f32 1.442695, %v1280_v6  ;;  %vm1170_vm9 = vcmp.gt.f32.partialorder %v5741_v61, 0.0  ;;  %v4555_v26 = vadd.f32 -1.0, %v4416_v23  ;;  %v4558_v46 = vadd.f32 -1.0, %v4467_v19  ;;  %v3506_v2 = vpop.eup %3505 }
 0x173   : > { %v4561_v28 = vadd.f32 -1.0, %v4481_v44  ;;  %v4564_v60 = vadd.f32 %v4504_v51, %v1054_v30  ;;  %v4566_v12 = vadd.f32 -1.0, %v3490_v16  ;;  %v4568_v40 = vadd.f32 -1.0, %v3492_v29  ;;  %v3508_v23 = vpop.eup %3507  ;;  %v5746_v30 = vld [vmem:[#allocation35_spill] sm:$0xff] }
 0x174   : > { %v1411_v6 = vmul.f32 1.442695, %v1285_v63  ;;  %v1052_v52 = vmul.f32 %v4520_v36, %v4174_v22  ;;  %v4572_v57 = vadd.f32 -1.0, %v3494_v54  ;;  %v4574_v19 = vadd.f32 -1.0, %v3496_v59  ;;  %v1820_v63 = vpop.permute.xlu0 %1819  ;;  %v5749_v54 = vld [vmem:[#allocation37_spill] sm:$0xff] }
 0x175   : > { %5742 = vst [vmem:[#allocation32_spill] sm:$0xff] %v4564_v60  ;;  %5743 = vst [vmem:[#allocation47_spill] sm:$0xff] %v4566_v12  ;;  %3515 = vpow2.f32 %v1337_v58  ;;  %v1084_v44 = vmul.f32 %v4520_v36, %v4176_v62  ;;  %vm1199_vm10 = vcmp.gt.f32.partialorder %v5746_v30, 0.0  ;;  %v4579_v32 = vadd.f32 -1.0, %v3498_v4  ;;  %v3510_v22 = vpop.eup %3509  ;;  %v5750_v62 = vld [vmem:[#allocation59_spill] sm:$0xff] }
 0x176   : > { %5744 = vst [vmem:[#allocation55_spill] sm:$0xff] %v4572_v57  ;;  %5745 = vst [vmem:[#allocation53_spill] sm:$0xff] %v4574_v19  ;;  %v4581_v16 = vadd.f32 -1.0, %v3500_v25  ;;  %3517 = vpow2.f32 %v1401_v43  ;;  %v1055_v29 = vmul.f32 %v4520_v36, %v4190_v41  ;;  %vm1202_vm11 = vcmp.gt.f32.partialorder %v5749_v54, 0.0  ;;  %v5752_v25 = vld [vmem:[#allocation39_spill] sm:$0xff] }
 0x177   : > { %5747 = vst [vmem:[#allocation56_spill] sm:$0xff] %v4579_v32  ;;  %v1253_v59 = vmin.f32 %v4564_v60, 0.0  ;;  %v1087_v58 = vmul.f32 %v4520_v36, %v4192_v39  ;;  %v3065_v19 = vadd.f32 -1.0, %v5750_v62  ;;  %v3070_v4 = vadd.f32 -1.0, %v5751_v37  ;;  %v4591_v32 = vpop.permute.xlu1 %1814  ;;  %v5769_v12 = vld [vmem:[#allocation63_spill] sm:$0xff] }
 0x178   : > { %5748 = vst [vmem:[#allocation5_spill] sm:$0xff] %v4581_v16  ;;  %vm1168_vm12 = vcmp.gt.f32.partialorder %v5752_v25, 0.0  ;;  %v4594_v43 = vadd.f32 -1.0, %v3502_v7  ;;  %v4596_v41 = vadd.f32 -1.0, %v3504_v38  ;;  %3519 = vpow2.f32 %v1411_v6  ;;  %v4601_v60 = vpop.eup %3511 }
 0x179   : > { %v4599_v16 = vadd.f32 %v4504_v51, %v1052_v52  ;;  %v4603_v14 = vadd.f32 -1.0, %v3506_v2  ;;  %v4606_v39 = vadd.f32 %v4504_v51, %v1084_v44  ;;  %v1516_v37 = vsel %vm1196_vm7, %v5739_v13, %v3065_v19  ;;  %v4614_v38 = vpop.eup %3513  ;;  %v5761_v19 = vld [vmem:[#allocation62_spill] sm:$0xff] }
 0x17a   : > { %5753 = vst [vmem:[#allocation6_spill] sm:$0xff] %v4594_v43  ;;  %5754 = vst [vmem:[#allocation33_spill] sm:$0xff] %v4596_v41  ;;  %v1521_v7 = vsel %vm1201_vm6, %v5738_v47, %v3070_v4  ;;  %v4616_v6 = vadd.f32 -1.0, %v3508_v23  ;;  %v4618_v52 = vadd.f32 -1.0, %v3510_v22  ;;  %v4621_v2 = vadd.f32 %v4504_v51, %v1055_v29  ;;  %v5762_v43 = vld [vmem:[#allocation44_spill] sm:$0xff] }
 0x17b   : > { %5755 = vst [vmem:[#allocation31_spill] sm:$0xff] %v4599_v16  ;;  %5756 = vst [vmem:[#allocation34_spill] sm:$0xff] %v4603_v14  ;;  %v1964_v44 = vmul.f32 %v4449_v56, %v1516_v37  ;;  %v1347_v62 = vmul.f32 1.442695, %v1253_v59  ;;  %v4625_v14 = vadd.f32 %v4504_v51, %v1087_v58  ;;  %v1969_v13 = vmul.f32 %v1820_v63, %v1521_v7  ;;  %v5763_v4 = vld [vmem:[#allocation64_spill] sm:$0xff]  ;;  %v5764_v56 = vld [vmem:[#allocation43_spill] sm:$0xff]  ;;  %v1825_v7 = vpop.permute.xlu1 %1824 }
 0x17c   : > { %5757 = vst [vmem:[#allocation36_spill] sm:$0xff] %v4606_v39  ;;  %5758 = vst [vmem:[#allocation35_spill] sm:$0xff] %v4616_v6  ;;  %v3036_v41 = vadd.f32 -1.0, %v5761_v19  ;;  %vm1173_vm13 = vcmp.gt.f32.partialorder %v5762_v43, 0.0  ;;  %v1251_v47 = vmin.f32 %v4599_v16, 0.0  ;;  %v3039_v29 = vadd.f32 -1.0, %v5763_v4 }
 0x17d   : > { %5759 = vst [vmem:[#allocation37_spill] sm:$0xff] %v4618_v52  ;;  %5760 = vst [vmem:[#allocation59_spill] sm:$0xff] %v4621_v2  ;;  %v3197_v23 = vpack.c.bf16 %v1964_v44, %v1964_v44  ;;  %v2356_v22 = vmul.f32 %v4083_v5, %v1964_v44  ;;  %v4632_v52 = vpop.permute.xlu0 %1829  ;;  %vm1200_vm14 = vcmp.gt.f32.partialorder %v5764_v56, 0.0  ;;  %v1283_v59 = vmin.f32 %v4606_v39, 0.0  ;;  %v5765_v19 = vld [vmem:[#allocation48_spill] sm:$0xff]  ;;  %v5766_v44 = vld [vmem:[#allocation50_spill] sm:$0xff] }
 0x17e   : > { %v3202_v63 = vpack.c.bf16 %v1969_v13, %v1969_v13  ;;  %v2361_v58 = vmul.f32 %v4083_v5, %v1969_v13  ;;  %v1487_v37 = vsel %vm1167_vm8, %v5740_v3, %v3036_v41  ;;  %vm1205_vm15 = vcmp.gt.f32.partialorder %v5765_v19, 0.0  ;;  %v5767_v16 = vld [vmem:[#allocation4_spill] sm:$0xff]  ;;  %v5768_v41 = vld [vmem:[#allocation11_spill] sm:$0xff] }
 0x17f   : > { %vm1171_vm0 = vcmp.gt.f32.partialorder %v5766_v44, 0.0  ;;  %v1254_v4 = vmin.f32 %v4621_v2, 0.0  ;;  %2285 = vst.msk [vmem:[%s4109_s21 + $0x94] sm:$0xf] %vm2247_vm3, %v3197_v23  ;;  %v2495_v6 = vsel %vm2383_vm4, %v2356_v22, 0.0  ;;  %v1935_v39 = vmul.f32 %v5767_v16, %v1487_v37  ;;  %v4650_v57 = vpop.eup %3515  ;;  %v5771_v16 = vld [vmem:[#allocation57_spill] sm:$0xff] }
 0x180   : > { %v1490_v13 = vsel %vm1170_vm9, %v5741_v61, %v3039_v29  ;;  %3521 = vpow2.f32 %v1347_v62  ;;  %2496 = vadd.xlane.f32.xlu0 %v2495_v6  ;;  %2290 = vst.msk [vmem:[%s4109_s21 + $0xa8] sm:$0xf] %vm2247_vm3, %v3202_v63  ;;  %v2510_v3 = vsel %vm2383_vm4, %v2361_v58, 0.0  ;;  %v3068_v23 = vadd.f32 -1.0, %v5769_v12  ;;  %v4657_v22 = vpop.eup %3517  ;;  %v5772_v6 = vld [vmem:[#allocation65_spill] sm:$0xff] }
 0x181   : > { %v1938_v2 = vmul.f32 %v5768_v41, %v1490_v13  ;;  %5770 = vst [vmem:[#allocation60_spill] sm:$0xff] %v4657_v22  ;;  %vm1174_vm1 = vcmp.gt.f32.partialorder %v5771_v16, 0.0  ;;  %v1343_v37 = vmul.f32 1.442695, %v1251_v47  ;;  %2511 = vadd.xlane.f32.xlu1 %v2510_v3  ;;  %v2327_v61 = vmul.f32 %v4083_v5, %v1935_v39  ;;  %v1840_v3 = vpop.permute.xlu0 %1839 }
 0x182   : > { %v3168_v62 = vpack.c.bf16 %v1935_v39, %v1935_v39  ;;  %v3071_v29 = vadd.f32 -1.0, %v5772_v6  ;;  %v1519_v13 = vsel %vm1199_vm10, %v5746_v30, %v3068_v23  ;;  %v3037_v12 = vadd.f32 -1.0, %v4241_v15  ;;  %v4667_v41 = vpop.eup %3519 }
 0x183   : > { %v2330_v63 = vmul.f32 %v4083_v5, %v1938_v2  ;;  %v3171_v58 = vpack.c.bf16 %v1938_v2, %v1938_v2  ;;  %v4669_v22 = vmul.f32 1.442695, %v1283_v59  ;;  %v4671_v47 = vmul.f32 1.442695, %v1254_v4  ;;  %v4686_v4 = vpop.permute.xlu1 %1834 }
 0x184   : > { %2256 = vst.msk [vmem:[%s4109_s21 + $0x20] sm:$0xf] %vm2247_vm3, %v3168_v62  ;;  %v1967_v39 = vmul.f32 %v4534_v45, %v1519_v13  ;;  %v1522_v2 = vsel %vm1202_vm11, %v5749_v54, %v3071_v29  ;;  %v2408_v6 = vsel %vm2383_vm4, %v2327_v61, 0.0  ;;  %v1488_v59 = vsel %vm1168_vm12, %v5752_v25, %v3037_v12  ;;  %v5773_v45 = vld [vmem:[#allocation54_spill] sm:$0xff]  ;;  %v5774_v62 = vld [vmem:[#allocation9_spill] sm:$0xff] }
 0x185   : > { %v2417_v30 = vsel %vm2383_vm4, %v2330_v63, 0.0  ;;  %2259 = vst.msk [vmem:[%s4109_s21 + $0x2c] sm:$0xf] %vm2247_vm3, %v3171_v58  ;;  %v1970_v15 = vmul.f32 %v1825_v7, %v1522_v2  ;;  %vm1203_vm2 = vcmp.gt.f32.partialorder %v5773_v45, 0.0  ;;  %v1286_v23 = vmin.f32 %v4625_v14, 0.0  ;;  %2409 = vadd.xlane.f32.xlu1 %v2408_v6 }
 0x186   : > { %2418 = vadd.xlane.f32.xlu0 %v2417_v30  ;;  %v3200_v54 = vpack.c.bf16 %v1967_v39, %v1967_v39  ;;  %v2359_v61 = vmul.f32 %v4083_v5, %v1967_v39  ;;  %v1936_v29 = vmul.f32 %v5774_v62, %v1488_v59  ;;  %vm1206_vm5 = vcmp.gt.f32.partialorder %v4171_v42, 0.0 }
 0x187   : > { %v1053_v25 = vmul.f32 %v4520_v36, %v4200_v50  ;;  %v3203_v7 = vpack.c.bf16 %v1970_v15, %v1970_v15  ;;  %v2362_v63 = vmul.f32 %v4083_v5, %v1970_v15  ;;  %v3042_v58 = vadd.f32 -1.0, %v4257_v1 }
 0x188   : > { %vm1172_vm6 = vcmp.gt.f32.partialorder %v4182_v53, 0.0  ;;  %vm1177_vm7 = vcmp.gt.f32.partialorder %v4340_v48, 0.0  ;;  %2288 = vst.msk [vmem:[%s4109_s21 + $0xa0] sm:$0xf] %vm2247_vm3, %v3200_v54  ;;  %v2504_v13 = vsel %vm2383_vm4, %v2359_v61, 0.0  ;;  %v2328_v12 = vmul.f32 %v4083_v5, %v1936_v29 }
 0x189   : > { %v3169_v39 = vpack.c.bf16 %v1936_v29, %v1936_v29  ;;  %v3069_v2 = vadd.f32 -1.0, %v4251_v9  ;;  %2291 = vst.msk [vmem:[%s4109_s21 + $0xac] sm:$0xf] %vm2247_vm3, %v3203_v7  ;;  %v2513_v50 = vsel %vm2383_vm4, %v2362_v63, 0.0  ;;  %v1493_v1 = vsel %vm1173_vm13, %v5762_v43, %v3042_v58  ;;  %2505 = vadd.xlane.f32.xlu1 %v2504_v13  ;;  %v5775_v9 = vld [vmem:[#allocation10_spill] sm:$0xff] }
 0x18a   : > { %v3074_v6 = vadd.f32 -1.0, %v4273_v27  ;;  %v3040_v30 = vadd.f32 -1.0, %v4281_v31  ;;  %vm1204_vm8 = vcmp.gt.f32.partialorder %v4185_v10, 0.0  ;;  %vm1209_vm9 = vcmp.gt.f32.partialorder %v4337_v33, 0.0  ;;  %2514 = vadd.xlane.f32.xlu0 %v2513_v50  ;;  %v4721_v27 = vpop.eup %3521  ;;  %v4723_v31 = vpop.permute.xlu0 %1849  ;;  %v4751_v13 = vld [vmem:[%s5545_s5] ss:$0 sm:$0xff] }
 0x18b   : > { %3523 = vpow2.f32 %v1343_v37  ;;  %2257 = vst.msk [vmem:[%s4109_s21 + $0x24] sm:$0xf] %vm2247_vm3, %v3169_v39  ;;  %v1941_v15 = vmul.f32 %v5775_v9, %v1493_v1  ;;  %v1520_v59 = vsel %vm1200_vm14, %v5764_v56, %v3069_v2  ;;  %v3043_v43 = vadd.f32 -1.0, %v4294_v18  ;;  %v1845_v18 = vpop.permute.xlu1 %1844  ;;  %v5778_v1 = vld [vmem:[#allocation69_spill] sm:$0xff] }
 0x18c   : > { %v4727_v54 = vmul.f32 %v4520_v36, %v4202_v34  ;;  %v1968_v37 = vmul.f32 %v4591_v32, %v1520_v59  ;;  %v1525_v61 = vsel %vm1205_vm15, %v5765_v19, %v3074_v6  ;;  %v1491_v56 = vsel %vm1171_vm0, %v5766_v44, %v3040_v30  ;;  %v5776_v36 = vld [vmem:[#allocation8_spill] sm:$0xff] }
 0x18d   : > { %v2411_v62 = vsel %vm2383_vm4, %v2328_v12, 0.0  ;;  %v2333_v29 = vmul.f32 %v4083_v5, %v1941_v15  ;;  %v3174_v7 = vpack.c.bf16 %v1941_v15, %v1941_v15  ;;  %v1973_v63 = vmul.f32 %v1840_v3, %v1525_v61  ;;  %v5777_v12 = vld [vmem:[#allocation15_spill] sm:$0xff]  ;;  %v5779_v59 = vld [vmem:[#allocation40_spill] sm:$0xff] }
 0x18e   : > { %vm1175_vm10 = vcmp.gt.f32.partialorder %v4214_v11, 0.0  ;;  %vm1178_vm11 = vcmp.gt.f32.partialorder %v4236_v35, 0.0  ;;  %v3201_v34 = vpack.c.bf16 %v1968_v37, %v1968_v37  ;;  %v2360_v32 = vmul.f32 %v4083_v5, %v1968_v37  ;;  %2412 = vadd.xlane.f32.xlu0 %v2411_v62 }
 0x18f   : > { %v1939_v19 = vmul.f32 %v5776_v36, %v1491_v56  ;;  %v1494_v44 = vsel %vm1174_vm1, %v5771_v16, %v3043_v43  ;;  %v2426_v58 = vsel %vm2383_vm4, %v2333_v29, 0.0  ;;  %2262 = vst.msk [vmem:[%s4109_s21 + $0x38] sm:$0xf] %vm2247_vm3, %v3174_v7  ;;  %v3206_v3 = vpack.c.bf16 %v1973_v63, %v1973_v63  ;;  %v5780_v56 = vld [vmem:[#allocation26_spill] sm:$0xff]  ;;  %v4777_v7 = vpop.permute.xlu1 %1854  ;;  %v5781_v36 = vld [vmem:[#allocation41_spill] sm:$0xff] }
 0x190   : > { %v2365_v5 = vmul.f32 %v4751_v13, %v1973_v63  ;;  %v1942_v39 = vmul.f32 %v5777_v12, %v1494_v44  ;;  %vm1207_vm12 = vcmp.gt.f32.partialorder %v4226_v0, 0.0  ;;  %vm1210_vm13 = vcmp.gt.f32.partialorder %v4244_v24, 0.0  ;;  %2427 = vadd.xlane.f32.xlu1 %v2426_v58  ;;  %2289 = vst.msk [vmem:[%s4109_s21 + $0xa4] sm:$0xf] %vm2247_vm3, %v3201_v34  ;;  %v5783_v44 = vld [vmem:[#allocation70_spill] sm:$0xff] }
 0x191   : > { %v4758_v16 = vadd.f32 %v4504_v51, %v1053_v25  ;;  %v2507_v2 = vsel %vm2383_vm4, %v2360_v32, 0.0  ;;  %v3172_v50 = vpack.c.bf16 %v1939_v19, %v1939_v19  ;;  %v3072_v6 = vadd.f32 -1.0, %v5778_v1  ;;  %2294 = vst.msk [vmem:[%s4109_s21 + $0xb8] sm:$0xf] %vm2247_vm3, %v3206_v3  ;;  %v1860_v25 = vpop.permute.xlu0 %1859  ;;  %v5786_v1 = vld [vmem:[#allocation67_spill] sm:$0xff] }
 0x192   : > { %v2331_v30 = vmul.f32 %v4751_v13, %v1939_v19  ;;  %v2334_v9 = vmul.f32 %v4751_v13, %v1942_v39  ;;  %v3175_v15 = vpack.c.bf16 %v1942_v39, %v1942_v39  ;;  %v3075_v43 = vadd.f32 -1.0, %v5779_v59  ;;  %2508 = vadd.xlane.f32.xlu0 %v2507_v2  ;;  %v5784_v39 = vld [vmem:[#allocation13_spill] sm:$0xff] }
 0x193   : > { %v2522_v37 = vsel %vm2383_vm4, %v2365_v5, 0.0  ;;  %2260 = vst.msk [vmem:[%s4109_s21 + $0x30] sm:$0xf] %vm2247_vm3, %v3172_v50  ;;  %v1523_v61 = vsel %vm1203_vm2, %v5773_v45, %v3072_v6  ;;  %v3041_v62 = vadd.f32 -1.0, %v5780_v56  ;;  %v3046_v29 = vadd.f32 -1.0, %v4614_v38  ;;  %v5782_v45 = vld [vmem:[#allocation66_spill] sm:$0xff] }
 0x194   : > { %v2429_v63 = vsel %vm2383_vm4, %v2334_v9, 0.0  ;;  %2263 = vst.msk [vmem:[%s4109_s21 + $0x3c] sm:$0xf] %vm2247_vm3, %v3175_v15  ;;  %v1971_v34 = vmul.f32 %v4632_v52, %v1523_v61  ;;  %v1526_v32 = vsel %vm1206_vm5, %v4171_v42, %v3075_v43  ;;  %v3073_v19 = vadd.f32 -1.0, %v5781_v36  ;;  %2523 = vadd.xlane.f32.xlu1 %v2522_v37  ;;  %v5785_v50 = vld [vmem:[#allocation14_spill] sm:$0xff]  ;;  %v5787_v6 = vld [vmem:[#allocation68_spill] sm:$0xff] }
 0x195   : > { %vm1176_vm14 = vcmp.gt.f32.partialorder %v5782_v45, 0.0  ;;  %vm1181_vm15 = vcmp.gt.f32.partialorder %v5783_v44, 0.0  ;;  %v1974_v38 = vmul.f32 %v1845_v18, %v1526_v32  ;;  %v1492_v58 = vsel %vm1172_vm6, %v4182_v53, %v3041_v62  ;;  %v4796_v5 = vpop.eup %3523  ;;  %v5788_v53 = vld [vmem:[#allocation71_spill] sm:$0xff]  ;;  %v4820_v56 = vpop.permute.xlu0 %1869  ;;  %v5790_v62 = vld [vmem:[#allocation72_spill] sm:$0xff] }
 0x196   : > { %v1497_v52 = vsel %vm1177_vm7, %v4340_v48, %v3046_v29  ;;  %v3078_v3 = vadd.f32 -1.0, %v4601_v60  ;;  %v3204_v42 = vpack.c.bf16 %v1971_v34, %v1971_v34  ;;  %v2363_v12 = vmul.f32 %v4751_v13, %v1971_v34  ;;  %v5789_v48 = vld [vmem:[#allocation73_spill] sm:$0xff]  ;;  %2430 = vadd.xlane.f32.xlu0 %v2429_v63 }
 0x197   : > { %v1940_v2 = vmul.f32 %v5784_v39, %v1492_v58  ;;  %v1945_v18 = vmul.f32 %v5785_v50, %v1497_v52  ;;  %vm1208_vm0 = vcmp.gt.f32.partialorder %v5786_v1, 0.0  ;;  %vm1213_vm1 = vcmp.gt.f32.partialorder %v5787_v6, 0.0  ;;  %v5793_v52 = vld [vmem:[#allocation19_spill] sm:$0xff]  ;;  %v5794_v39 = vld [vmem:[#allocation46_spill] sm:$0xff] }
 0x198   : > { %vm1179_vm2 = vcmp.gt.f32.partialorder %v5788_v53, 0.0  ;;  %vm1182_vm5 = vcmp.gt.f32.partialorder %v5789_v48, 0.0  ;;  %v3207_v60 = vpack.c.bf16 %v1974_v38, %v1974_v38  ;;  %v2366_v9 = vmul.f32 %v4751_v13, %v1974_v38  ;;  %2292 = vst.msk [vmem:[%s4109_s21 + $0xb0] sm:$0xf] %vm2247_vm3, %v3204_v42  ;;  %v5792_v38 = vld [vmem:[#allocation12_spill] sm:$0xff] }
 0x199   : > { %v1524_v15 = vsel %vm1204_vm8, %v4185_v10, %v3073_v19  ;;  %v1529_v59 = vsel %vm1209_vm9, %v4337_v33, %v3078_v3  ;;  %3525 = vpow2.f32 %v4669_v22  ;;  %v4815_v43 = vadd.f32 %v4504_v51, %v4727_v54  ;;  %v1865_v54 = vpop.permute.xlu1 %1864 }
 0x19a   : > { %v2420_v37 = vsel %vm2383_vm4, %v2331_v30, 0.0  ;;  %v3173_v61 = vpack.c.bf16 %v1940_v2, %v1940_v2  ;;  %v1252_v10 = vmin.f32 %v4758_v16, 0.0  ;;  %2295 = vst.msk [vmem:[%s4109_s21 + $0xbc] sm:$0xf] %vm2247_vm3, %v3207_v60  ;;  %v3178_v33 = vpack.c.bf16 %v1945_v18, %v1945_v18  ;;  %v5791_v30 = vld [vmem:[#allocation42_spill] sm:$0xff] }
 0x19b   : > { %2421 = vadd.xlane.f32.xlu1 %v2420_v37  ;;  %v1972_v22 = vmul.f32 %v4686_v4, %v1524_v15  ;;  %v1977_v51 = vmul.f32 %v1860_v25, %v1529_v59  ;;  %vm1211_vm6 = vcmp.gt.f32.partialorder %v5790_v62, 0.0  ;;  %vm1214_vm7 = vcmp.gt.f32.partialorder %v5791_v30, 0.0  ;;  %v5797_v15 = vld [vmem:[#allocation3_spill] sm:$0xff] }
 0x19c   : > { %v2516_v29 = vsel %vm2383_vm4, %v2363_v12, 0.0  ;;  %v2332_v63 = vmul.f32 %v4751_v13, %v1940_v2  ;;  %2261 = vst.msk [vmem:[%s4109_s21 + $0x34] sm:$0xf] %vm2247_vm3, %v3173_v61  ;;  %v1495_v34 = vsel %vm1175_vm10, %v4214_v11, %v4526_v49  ;;  %v1498_v4 = vsel %vm1178_vm11, %v4236_v35, %v4540_v17  ;;  %2266 = vst.msk [vmem:[%s4109_s21 + $0x48] sm:$0xf] %vm2247_vm3, %v3178_v33  ;;  %v1880_v2 = vpop.permute.xlu0 %1879 }
 0x19d   : > { %v2525_v25 = vsel %vm2383_vm4, %v2366_v9, 0.0  ;;  %v2337_v32 = vmul.f32 %v4751_v13, %v1945_v18  ;;  %v3205_v36 = vpack.c.bf16 %v1972_v22, %v1972_v22  ;;  %v3210_v19 = vpack.c.bf16 %v1977_v51, %v1977_v51  ;;  %v4872_v9 = vpop.permute.xlu1 %1874 }
 0x19e   : > { %2526 = vadd.xlane.f32.xlu0 %v2525_v25  ;;  %v1943_v58 = vmul.f32 %v5792_v38, %v1495_v34  ;;  %v1946_v3 = vmul.f32 %v5793_v52, %v1498_v4  ;;  %v1527_v11 = vsel %vm1207_vm12, %v4226_v0, %v4537_v21  ;;  %v1530_v35 = vsel %vm1210_vm13, %v4244_v24, %v4545_v20  ;;  %v5795_v0 = vld [vmem:[#allocation7_spill] sm:$0xff]  ;;  %v5801_v4 = vld [vmem:[#allocation52_spill] sm:$0xff] }
 0x19f   : > { %2517 = vadd.xlane.f32.xlu1 %v2516_v29  ;;  %2293 = vst.msk [vmem:[%s4109_s21 + $0xb4] sm:$0xf] %vm2247_vm3, %v3205_v36  ;;  %v2364_v49 = vmul.f32 %v4751_v13, %v1972_v22  ;;  %2298 = vst.msk [vmem:[%s4109_s21 + $0xc8] sm:$0xf] %vm2247_vm3, %v3210_v19  ;;  %v2369_v17 = vmul.f32 %v4751_v13, %v1977_v51  ;;  %v4861_v42 = vmul.f32 %v4723_v31, %v1527_v11  ;;  %v5798_v22 = vld [vmem:[#allocation17_spill] sm:$0xff]  ;;  %v5803_v25 = vld [vmem:[#allocation23_spill] sm:$0xff] }
 0x1a0   : > { %v1978_v12 = vmul.f32 %v1865_v54, %v1530_v35  ;;  %vm1180_vm8 = vcmp.gt.f32.partialorder %v5794_v39, 0.0  ;;  %vm1185_vm9 = vcmp.gt.f32.partialorder %v5795_v0, 0.0  ;;  %3527 = vpow2.f32 %v4671_v47  ;;  %v5796_v47 = vld [vmem:[#allocation74_spill] sm:$0xff]  ;;  %v4934_v36 = vpop.permute.xlu0 %1889  ;;  %v5805_v52 = vld [vmem:[#allocation55_spill] sm:$0xff]  ;;  %v5806_v35 = vld [vmem:[#allocation49_spill] sm:$0xff] }
 0x1a1   : > { %v1413_v24 = vmul.f32 1.442695, %v1286_v23  ;;  %v3176_v21 = vpack.c.bf16 %v1943_v58, %v1943_v58  ;;  %v3179_v20 = vpack.c.bf16 %v1946_v3, %v1946_v3  ;;  %v1284_v50 = vmin.f32 %v4815_v43, 0.0  ;;  %v5799_v54 = vld [vmem:[#allocation18_spill] sm:$0xff]  ;;  %v1885_v11 = vpop.permute.xlu1 %1884 }
 0x1a2   : > { %v2423_v31 = vsel %vm2383_vm4, %v2332_v63, 0.0  ;;  %v3208_v18 = vpack.c.bf16 %v4861_v42, %v4861_v42  ;;  %v3211_v60 = vpack.c.bf16 %v1978_v12, %v1978_v12  ;;  %vm1212_vm10 = vcmp.gt.f32.partialorder %v5796_v47, 0.0 }
 0x1a3   : > { %vm1217_vm11 = vcmp.gt.f32.partialorder %v5797_v15, 0.0  ;;  %v1345_v23 = vmul.f32 1.442695, %v1252_v10  ;;  %2424 = vadd.xlane.f32.xlu0 %v2423_v31  ;;  %v2438_v59 = vsel %vm2383_vm4, %v2337_v32, 0.0  ;;  %2264 = vst.msk [vmem:[%s4109_s21 + $0x40] sm:$0xf] %vm2247_vm3, %v3176_v21  ;;  %v1496_v37 = vsel %vm1176_vm14, %v5782_v45, %v4548_v8  ;;  %v4899_v8 = vpop.eup %3525 }
 0x1a4   : > { %2267 = vst.msk [vmem:[%s4109_s21 + $0x4c] sm:$0xf] %vm2247_vm3, %v3179_v20  ;;  %v1501_v61 = vsel %vm1181_vm15, %v5783_v44, %v4558_v46  ;;  %2439 = vadd.xlane.f32.xlu1 %v2438_v59  ;;  %v2519_v10 = vsel %vm2383_vm4, %v2364_v49, 0.0  ;;  %v2534_v33 = vsel %vm2383_vm4, %v2369_v17, 0.0  ;;  %2296 = vst.msk [vmem:[%s4109_s21 + $0xc0] sm:$0xf] %vm2247_vm3, %v3208_v18  ;;  %v1944_v51 = vmul.f32 %v5798_v22, %v1496_v37 }
 0x1a5   : > { %2299 = vst.msk [vmem:[%s4109_s21 + $0xcc] sm:$0xf] %vm2247_vm3, %v3211_v60  ;;  %v4897_v29 = vmul.f32 %v5799_v54, %v1501_v61  ;;  %v1528_v46 = vsel %vm1208_vm0, %v5786_v1, %v4551_v55  ;;  %v1533_v45 = vsel %vm1213_vm1, %v5787_v6, %v4555_v26  ;;  %v1499_v44 = vsel %vm1179_vm2, %v5788_v53, %v4561_v28  ;;  %v5800_v6 = vld [vmem:[#allocation51_spill] sm:$0xff]  ;;  %v5809_v17 = vld [vmem:[#allocation32_spill] sm:$0xff] }
 0x1a6   : > { %v1502_v63 = vsel %vm1182_vm5, %v5789_v48, %v4568_v40  ;;  %v2335_v34 = vmul.f32 %v4751_v13, %v1943_v58  ;;  %v2338_v55 = vmul.f32 %v4751_v13, %v1946_v3  ;;  %v3177_v1 = vpack.c.bf16 %v1944_v51, %v1944_v51  ;;  %v5802_v40 = vld [vmem:[#allocation16_spill] sm:$0xff]  ;;  %v5808_v49 = vld [vmem:[#allocation27_spill] sm:$0xff] }
 0x1a7   : > { %v3182_v26 = vpack.c.bf16 %v4897_v29, %v4897_v29  ;;  %vm1183_vm12 = vcmp.gt.f32.partialorder %v5800_v6, 0.0  ;;  %vm1186_vm13 = vcmp.gt.f32.partialorder %v5801_v4, 0.0  ;;  %2520 = vadd.xlane.f32.xlu0 %v2519_v10  ;;  %v4924_v28 = vmul.f32 %v4777_v7, %v1528_v46  ;;  %v5804_v7 = vld [vmem:[#allocation47_spill] sm:$0xff]  ;;  %v5811_v59 = vld [vmem:[#allocation60_spill] sm:$0xff]  ;;  %v5814_v10 = vld [vmem:[#allocation6_spill] sm:$0xff] }
 0x1a8   : > { %v4926_v53 = vmul.f32 %v1880_v2, %v1533_v45  ;;  %v4929_v48 = vmul.f32 %v5802_v40, %v1499_v44  ;;  %v4932_v32 = vmul.f32 %v5803_v25, %v1502_v63  ;;  %v4937_v19 = vadd.f32 -1.0, %v4650_v57  ;;  %2535 = vadd.xlane.f32.xlu1 %v2534_v33  ;;  %2265 = vst.msk [vmem:[%s4109_s21 + $0x44] sm:$0xf] %vm2247_vm3, %v3177_v1  ;;  %v5807_v57 = vld [vmem:[#allocation25_spill] sm:$0xff]  ;;  %v5812_v61 = vld [vmem:[#allocation31_spill] sm:$0xff]  ;;  %v1900_v44 = vpop.permute.xlu0 %1899  ;;  %v5817_v1 = vld [vmem:[#allocation56_spill] sm:$0xff]  ;;  %v5014_v40 = vpop.permute.xlu1 %1894 }
 0x1a9   : > { %v1409_v38 = vmul.f32 1.442695, %v1284_v50  ;;  %2270 = vst.msk [vmem:[%s4109_s21 + $0x58] sm:$0xf] %vm2247_vm3, %v3182_v26  ;;  %v1531_v58 = vsel %vm1211_vm6, %v5790_v62, %v5804_v7  ;;  %v1534_v3 = vsel %vm1214_vm7, %v5791_v30, %v5805_v52  ;;  %vm1215_vm14 = vcmp.gt.f32.partialorder %v5806_v35, 0.0  ;;  %v5815_v63 = vld [vmem:[#allocation21_spill] sm:$0xff] }
 0x1aa   : > { %vm1218_vm15 = vcmp.gt.f32.partialorder %v5807_v57, 0.0  ;;  %vm1184_vm0 = vcmp.gt.f32.partialorder %v5808_v49, 0.0  ;;  %vm1189_vm1 = vcmp.gt.f32.partialorder %v5809_v17, 0.0  ;;  %3529 = vpow2.f32 %v1413_v24  ;;  %v3528_v24 = vpop.eup %3527  ;;  %v5818_v26 = vld [vmem:[#allocation5_spill] sm:$0xff]  ;;  %v5819_v52 = vld [vmem:[#allocation36_spill] sm:$0xff] }
 0x1ab   : > { %v2370_v21 = vmul.f32 %v4751_v13, %v1978_v12  ;;  %v3209_v62 = vpack.c.bf16 %v4924_v28, %v4924_v28  ;;  %v3214_v30 = vpack.c.bf16 %v4926_v53, %v4926_v53  ;;  %3531 = vpow2.f32 %v1345_v23  ;;  %v5810_v23 = vld [vmem:[#allocation28_spill] sm:$0xff] }
 0x1ac   : > { %v2441_v20 = vsel %vm2383_vm4, %v2338_v55, 0.0  ;;  %v3180_v2 = vpack.c.bf16 %v4929_v48, %v4929_v48  ;;  %v3183_v50 = vpack.c.bf16 %v4932_v32, %v4932_v32  ;;  %v2432_v12 = vsel %vm2383_vm4, %v2335_v34, 0.0 }
 0x1ad   : > { %2442 = vadd.xlane.f32.xlu0 %v2441_v20  ;;  %v2367_v31 = vmul.f32 %v4751_v13, %v4861_v42  ;;  %2297 = vst.msk [vmem:[%s4109_s21 + $0xc4] sm:$0xf] %vm2247_vm3, %v3209_v62  ;;  %2302 = vst.msk [vmem:[%s4109_s21 + $0xd8] sm:$0xf] %vm2247_vm3, %v3214_v30  ;;  %v4973_v18 = vmul.f32 %v4820_v56, %v1531_v58  ;;  %v4975_v60 = vmul.f32 %v1885_v11, %v1534_v3  ;;  %v5813_v42 = vld [vmem:[#allocation53_spill] sm:$0xff]  ;;  %v5820_v3 = vld [vmem:[#allocation59_spill] sm:$0xff] }
 0x1ae   : > { %vm1216_vm2 = vcmp.gt.f32.partialorder %v5810_v23, 0.0  ;;  %v4979_v37 = vadd.f32 -1.0, %v5811_v59  ;;  %vm1187_vm5 = vcmp.gt.f32.partialorder %v5812_v61, 0.0  ;;  %3533 = vpow2.f32 %v1409_v38  ;;  %2433 = vadd.xlane.f32.xlu1 %v2432_v12  ;;  %2268 = vst.msk [vmem:[%s4109_s21 + $0x50] sm:$0xf] %vm2247_vm3, %v3180_v2  ;;  %v5821_v62 = vld [vmem:[#allocation58_spill] sm:$0xff] }
 0x1af   : > { %2271 = vst.msk [vmem:[%s4109_s21 + $0x5c] sm:$0xf] %vm2247_vm3, %v3183_v50  ;;  %v1500_v56 = vsel %vm1180_vm8, %v5794_v39, %v5813_v42  ;;  %v1505_v33 = vsel %vm1185_vm9, %v5795_v0, %v5814_v10  ;;  %v2537_v22 = vsel %vm2383_vm4, %v2370_v21, 0.0  ;;  %v2336_v54 = vmul.f32 %v4751_v13, %v1944_v51  ;;  %v5816_v39 = vld [vmem:[#allocation22_spill] sm:$0xff]  ;;  %v5823_v2 = vld [vmem:[#allocation35_spill] sm:$0xff]  ;;  %v5824_v59 = vld [vmem:[#allocation20_spill] sm:$0xff] }
 0x1b0   : > { %v3212_v46 = vpack.c.bf16 %v4973_v18, %v4973_v18  ;;  %v3215_v45 = vpack.c.bf16 %v4975_v60, %v4975_v60  ;;  %v5001_v34 = vmul.f32 %v5815_v63, %v1500_v56  ;;  %v5004_v55 = vmul.f32 %v5816_v39, %v1505_v33 }
 0x1b1   : > { %v1532_v0 = vsel %vm1212_vm10, %v5796_v47, %v5817_v1  ;;  %v1537_v51 = vsel %vm1217_vm11, %v5797_v15, %v5818_v26  ;;  %v2528_v25 = vsel %vm2383_vm4, %v2367_v31, 0.0  ;;  %2538 = vadd.xlane.f32.xlu0 %v2537_v22  ;;  %v2341_v38 = vmul.f32 %v4751_v13, %v4897_v29  ;;  %v5827_v22 = vld [vmem:[#allocation37_spill] sm:$0xff] }
 0x1b2   : > { %2300 = vst.msk [vmem:[%s4109_s21 + $0xd0] sm:$0xf] %vm2247_vm3, %v3212_v46  ;;  %2303 = vst.msk [vmem:[%s4109_s21 + $0xdc] sm:$0xf] %vm2247_vm3, %v3215_v45  ;;  %v5024_v7 = vmul.f32 %v4872_v9, %v1532_v0  ;;  %v5026_v47 = vmul.f32 %v1900_v44, %v1537_v51  ;;  %v3058_v15 = vadd.f32 -1.0, %v4721_v27  ;;  %v3056_v58 = vadd.f32 -1.0, %v4796_v5  ;;  %2529 = vadd.xlane.f32.xlu1 %v2528_v25  ;;  %v1905_v45 = vpop.permute.xlu1 %1904 }
 0x1b3   : > { %vm1219_vm6 = vcmp.gt.f32.partialorder %v5819_v52, 0.0  ;;  %vm1190_vm7 = vcmp.gt.f32.partialorder %v5820_v3, 0.0  ;;  %v3181_v29 = vpack.c.bf16 %v5001_v34, %v5001_v34  ;;  %v3186_v9 = vpack.c.bf16 %v5004_v55, %v5004_v55  ;;  %v5829_v0 = vld [vmem:[#allocation30_spill] sm:$0xff] }
 0x1b4   : > { %v5037_v11 = vadd.f32 -1.0, %v4899_v8  ;;  %v2368_v27 = vmul.f32 %v4751_v13, %v4924_v28  ;;  %v3213_v5 = vpack.c.bf16 %v5024_v7, %v5024_v7  ;;  %v3218_v21 = vpack.c.bf16 %v5026_v47, %v5026_v47  ;;  %v5822_v8 = vld [vmem:[#allocation33_spill] sm:$0xff]  ;;  %v3530_v12 = vpop.eup %3529 }
 0x1b5   : > { %vm1221_vm8 = vcmp.gt.f32.partialorder %v5821_v62, 0.0  ;;  %v3059_v30 = vadd.f32 -1.0, %v3528_v24  ;;  %v2435_v20 = vsel %vm2383_vm4, %v2336_v54, 0.0  ;;  %2269 = vst.msk [vmem:[%s4109_s21 + $0x54] sm:$0xf] %vm2247_vm3, %v3181_v29  ;;  %v1503_v28 = vsel %vm1183_vm12, %v5800_v6, %v5822_v8  ;;  %v5825_v6 = vld [vmem:[#allocation38_spill] sm:$0xff]  ;;  %v3532_v10 = vpop.eup %3531 }
 0x1b6   : > { %2274 = vst.msk [vmem:[%s4109_s21 + $0x68] sm:$0xf] %vm2247_vm3, %v3186_v9  ;;  %v1506_v50 = vsel %vm1186_vm13, %v5801_v4, %v5823_v2  ;;  %2436 = vadd.xlane.f32.xlu0 %v2435_v20  ;;  %v2450_v24 = vsel %vm2383_vm4, %v2341_v38, 0.0  ;;  %v2373_v31 = vmul.f32 %v4751_v13, %v4926_v53  ;;  %2301 = vst.msk [vmem:[%s4109_s21 + $0xd4] sm:$0xf] %vm2247_vm3, %v3213_v5  ;;  %v5826_v4 = vld [vmem:[#allocation34_spill] sm:$0xff] }
 0x1b7   : > { %2306 = vst.msk [vmem:[%s4109_s21 + $0xe8] sm:$0xf] %vm2247_vm3, %v3218_v21  ;;  %v5067_v42 = vmul.f32 %v5824_v59, %v1503_v28  ;;  %v5070_v56 = vmul.f32 %v5825_v6, %v1506_v50  ;;  %2451 = vadd.xlane.f32.xlu1 %v2450_v24  ;;  %v1535_v33 = vsel %vm1215_vm14, %v5806_v35, %v5826_v4  ;;  %v2531_v44 = vsel %vm2383_vm4, %v2368_v27, 0.0  ;;  %v5830_v27 = vld [vmem:[#allocation24_spill] sm:$0xff]  ;;  %v1915_v21 = vpop.permute.xlu1 %1914  ;;  %v5831_v59 = vld [vmem:[#allocation61_spill] sm:$0xff] }
 0x1b8   : > { %v1538_v53 = vsel %vm1218_vm15, %v5807_v57, %v5827_v22  ;;  %v1504_v54 = vsel %vm1184_vm0, %v5808_v49, %v4937_v19  ;;  %v1509_v46 = vsel %vm1189_vm1, %v5809_v17, %v3058_v15  ;;  %v2342_v35 = vmul.f32 %v4751_v13, %v4932_v32  ;;  %v3534_v39 = vpop.eup %3533  ;;  %v5828_v17 = vld [vmem:[#allocation29_spill] sm:$0xff]  ;;  %v1910_v32 = vpop.permute.xlu0 %1909 }
 0x1b9   : > { %v3184_v57 = vpack.c.bf16 %v5067_v42, %v5067_v42  ;;  %v3187_v63 = vpack.c.bf16 %v5070_v56, %v5070_v56  ;;  %vm1222_vm9 = vcmp.gt.f32.partialorder %v4625_v14, 0.0  ;;  %v5096_v19 = vmul.f32 %v4934_v36, %v1535_v33 }
 0x1ba   : > { %v5098_v49 = vmul.f32 %v1905_v45, %v1538_v53  ;;  %v5101_v1 = vmul.f32 %v5828_v17, %v1504_v54  ;;  %v5104_v26 = vmul.f32 %v5829_v0, %v1509_v46  ;;  %2532 = vadd.xlane.f32.xlu0 %v2531_v44  ;;  %v2546_v51 = vsel %vm2383_vm4, %v2373_v31, 0.0 }
 0x1bb   : > { %v2339_v25 = vmul.f32 %v4751_v13, %v4929_v48  ;;  %2272 = vst.msk [vmem:[%s4109_s21 + $0x60] sm:$0xf] %vm2247_vm3, %v3184_v57  ;;  %2275 = vst.msk [vmem:[%s4109_s21 + $0x6c] sm:$0xf] %vm2247_vm3, %v3187_v63  ;;  %v1536_v36 = vsel %vm1216_vm2, %v5810_v23, %v4979_v37  ;;  %v1507_v38 = vsel %vm1187_vm5, %v5812_v61, %v3056_v58  ;;  %v3090_v15 = vadd.f32 -1.0, %v4667_v41  ;;  %v1925_v54 = vpop.permute.xlu1 %1924 }
 0x1bc   : > { %vm1188_vm10 = vcmp.gt.f32.partialorder %v4758_v16, 0.0  ;;  %2547 = vadd.xlane.f32.xlu1 %v2546_v51  ;;  %v3216_v48 = vpack.c.bf16 %v5096_v19, %v5096_v19  ;;  %v3219_v29 = vpack.c.bf16 %v5098_v49, %v5098_v49  ;;  %v3057_v9 = vadd.f32 -1.0, %v3532_v10  ;;  %v1920_v24 = vpop.permute.xlu0 %1919  ;;  %v5832_v10 = vld [vmem:[#allocation45_spill] sm:$0xff] }
 0x1bd   : > { %vm1220_vm11 = vcmp.gt.f32.partialorder %v4815_v43, 0.0  ;;  %v3185_v23 = vpack.c.bf16 %v5101_v1, %v5101_v1  ;;  %v3190_v41 = vpack.c.bf16 %v5104_v26, %v5104_v26  ;;  %v2453_v37 = vsel %vm2383_vm4, %v2342_v35, 0.0 }
 0x1be   : > { %v2374_v61 = vmul.f32 %v4751_v13, %v4975_v60  ;;  %2304 = vst.msk [vmem:[%s4109_s21 + $0xe0] sm:$0xf] %vm2247_vm3, %v3216_v48  ;;  %2307 = vst.msk [vmem:[%s4109_s21 + $0xec] sm:$0xf] %vm2247_vm3, %v3219_v29  ;;  %v5139_v58 = vmul.f32 %v5014_v40, %v1536_v36  ;;  %v5142_v5 = vmul.f32 %v5830_v27, %v1507_v38  ;;  %v2444_v20 = vsel %vm2383_vm4, %v2339_v25, 0.0  ;;  %v2649_v38 = vld [vmem:[%s3621_s19 + $0x10] sm:$0xff] }
 0x1bf   : > { %2454 = vadd.xlane.f32.xlu0 %v2453_v37  ;;  %v2371_v8 = vmul.f32 %v4751_v13, %v4973_v18  ;;  %2273 = vst.msk [vmem:[%s4109_s21 + $0x64] sm:$0xf] %vm2247_vm3, %v3185_v23  ;;  %2278 = vst.msk [vmem:[%s4109_s21 + $0x78] sm:$0xf] %vm2247_vm3, %v3190_v41  ;;  %v1539_v60 = vsel %vm1219_vm6, %v5819_v52, %v5037_v11  ;;  %v1510_v40 = vsel %vm1190_vm7, %v5820_v3, %v3059_v30  ;;  %v2679_v23 = vld [vmem:[%s3621_s19 + $0x100] sm:$0xff] }
 0x1c0   : > { %v3091_v28 = vadd.f32 -1.0, %v3530_v12  ;;  %v3089_v2 = vadd.f32 -1.0, %v3534_v39  ;;  %2445 = vadd.xlane.f32.xlu1 %v2444_v20  ;;  %v3217_v18 = vpack.c.bf16 %v5139_v58, %v5139_v58  ;;  %v3188_v50 = vpack.c.bf16 %v5142_v5, %v5142_v5  ;;  %v5224_v39 = vld [vmem:[#allocation2] ss:$0 sm:$0xff] }
 0x1c1   : > { %v5162_v31 = vmul.f32 %v1910_v32, %v1539_v60  ;;  %v5165_v6 = vmul.f32 %v5831_v59, %v1510_v40  ;;  %v1541_v52 = vsel %vm1221_vm8, %v5821_v62, %v3090_v15  ;;  %v1508_v3 = vsel %vm1188_vm10, %v4758_v16, %v3057_v9  ;;  %v2488_v32 = vpop.xlane.xlu1 %2487 }
 0x1c2   : > { %v2549_v11 = vsel %vm2383_vm4, %v2374_v61, 0.0  ;;  %v2340_v30 = vmul.f32 %v4751_v13, %v5001_v34  ;;  %2305 = vst.msk [vmem:[%s4109_s21 + $0xe4] sm:$0xf] %vm2247_vm3, %v3217_v18  ;;  %2276 = vst.msk [vmem:[%s4109_s21 + $0x70] sm:$0xf] %vm2247_vm3, %v3188_v50  ;;  %v5180_v12 = vmul.f32 %v1920_v24, %v1541_v52  ;;  %v5183_v4 = vmul.f32 %v5832_v10, %v1508_v3  ;;  %v2650_v3 = vld [vmem:[%s3621_s19 + $0x18] sm:$0xff] }
 0x1c3   : > { %v2540_v62 = vsel %vm2383_vm4, %v2371_v8, 0.0  ;;  %2550 = vadd.xlane.f32.xlu0 %v2549_v11  ;;  %v2345_v16 = vmul.f32 %v4751_v13, %v5004_v55  ;;  %v3220_v34 = vpack.c.bf16 %v5162_v31, %v5162_v31  ;;  %v3191_v33 = vpack.c.bf16 %v5165_v6, %v5165_v6  ;;  %v2392_v15 = vpop.xlane.xlu0 %2391 }
 0x1c4   : > { %2541 = vadd.xlane.f32.xlu1 %v2540_v62  ;;  %v3222_v22 = vpack.c.bf16 %v5180_v12, %v5180_v12  ;;  %v3189_v53 = vpack.c.bf16 %v5183_v4, %v5183_v4  ;;  %v1540_v55 = vsel %vm1220_vm11, %v4815_v43, %v3089_v2  ;;  %v1542_v46 = vsel %vm1222_vm9, %v4625_v14, %v3091_v28 }
 0x1c5   : > { %2308 = vst.msk [vmem:[%s4109_s21 + $0xf0] sm:$0xf] %vm2247_vm3, %v3220_v34  ;;  %2279 = vst.msk [vmem:[%s4109_s21 + $0x7c] sm:$0xf] %vm2247_vm3, %v3191_v33  ;;  %v2447_v45 = vsel %vm2383_vm4, %v2340_v30, 0.0  ;;  %v2372_v44 = vmul.f32 %v4751_v13, %v5024_v7  ;;  %v5213_v35 = vmul.f32 %v1915_v21, %v1540_v55  ;;  %v5215_v57 = vmul.f32 %v1925_v54, %v1542_v46  ;;  %v2647_v21 = vld [vmem:[%s3621_s19] sm:$0xff] }
 0x1c6   : > { %2310 = vst.msk [vmem:[%s4109_s21 + $0xf8] sm:$0xf] %vm2247_vm3, %v3222_v22  ;;  %2277 = vst.msk [vmem:[%s4109_s21 + $0x74] sm:$0xf] %vm2247_vm3, %v3189_v53  ;;  %v2462_v43 = vsel %vm2383_vm4, %v2345_v16, 0.0  ;;  %v2377_v14 = vmul.f32 %v4751_v13, %v5026_v47  ;;  %v2346_v0 = vmul.f32 %v4751_v13, %v5070_v56  ;;  %v2681_v47 = vld [vmem:[%s3621_s19 + $0x110] sm:$0xff]  ;;  %v2343_v25 = vmul.f32 %v4751_v13, %v5067_v42 }
 0x1c7   : > { %2448 = vadd.xlane.f32.xlu0 %v2447_v45  ;;  %v3221_v7 = vpack.c.bf16 %v5213_v35, %v5213_v35  ;;  %v3223_v63 = vpack.c.bf16 %v5215_v57, %v5215_v57  ;;  %v2543_v17 = vsel %vm2383_vm4, %v2372_v44, 0.0  ;;  %v2617_v36 = vadd.f32 %v5224_v39, %v2488_v32  ;;  %v2386_v20 = vpop.xlane.xlu0 %2385  ;;  %v2682_v22 = vld [vmem:[%s3621_s19 + $0x118] sm:$0xff]  ;;  %v2653_v45 = vld [vmem:[%s3621_s19 + $0x30] sm:$0xff] }
 0x1c8   : > { %2463 = vadd.xlane.f32.xlu1 %v2462_v43  ;;  %v2558_v51 = vsel %vm2383_vm4, %v2377_v14, 0.0  ;;  %v2585_v56 = vadd.f32 %v5224_v39, %v2392_v15  ;;  %v2465_v42 = vsel %vm2383_vm4, %v2346_v0, 0.0  ;;  %v2378_v29 = vmul.f32 %v4751_v13, %v5098_v49  ;;  %v2482_v41 = vpop.xlane.xlu1 %2481  ;;  %v2680_v0 = vld [vmem:[%s3621_s19 + $0x108] sm:$0xff] }
 0x1c9   : > { %2309 = vst.msk [vmem:[%s4109_s21 + $0xf4] sm:$0xf] %vm2247_vm3, %v3221_v7  ;;  %2311 = vst.msk [vmem:[%s4109_s21 + $0xfc] sm:$0xf] %vm2247_vm3, %v3223_v63  ;;  %vm2775_vm3 = vcmask 7168   ;;  %v2745_v48 = vmul.f32 %v2681_v47, %v2617_v36  ;;  %v2456_v37 = vsel %vm2383_vm4, %v2343_v25, 0.0  ;;  %v2375_v61 = vmul.f32 %v4751_v13, %v5096_v19 }
 0x1ca   : > { %v2713_v9 = vmul.f32 %v2649_v38, %v2585_v56  ;;  %v2615_v27 = vadd.f32 %v5224_v39, %v2482_v41  ;;  %v2583_v49 = vadd.f32 %v5224_v39, %v2386_v20  ;;  %v2561_v60 = vsel %vm2383_vm4, %v2378_v29, 0.0  ;;  %v2651_v38 = vld [vmem:[%s3621_s19 + $0x20] sm:$0xff]  ;;  %v2654_v56 = vld [vmem:[%s3621_s19 + $0x38] sm:$0xff] }
 0x1cb   : > { %2544 = vadd.xlane.f32.xlu0 %v2543_v17  ;;  %2810 = vst.msk [vmem:[%s5244_s30 + $0x110] sm:$0xff] %vm2775_vm3, %v2745_v48  ;;  %v2344_v40 = vmul.f32 %v4751_v13, %v5101_v1  ;;  %v2552_v19 = vsel %vm2383_vm4, %v2375_v61, 0.0  ;;  %v2349_v2 = vmul.f32 %v4751_v13, %v5104_v26  ;;  %v2376_v50 = vmul.f32 %v4751_v13, %v5139_v58  ;;  %v2683_v41 = vld [vmem:[%s3621_s19 + $0x120] sm:$0xff] }
 0x1cc   : > { %2559 = vadd.xlane.f32.xlu1 %v2558_v51  ;;  %2778 = vst.msk [vmem:[%s5244_s30 + $0x10] sm:$0xff] %vm2775_vm3, %v2713_v9  ;;  %v2743_v8 = vmul.f32 %v2679_v23, %v2615_v27  ;;  %v2711_v28 = vmul.f32 %v2647_v21, %v2583_v49  ;;  %v2347_v24 = vmul.f32 %v4751_v13, %v5142_v5  ;;  %v2685_v51 = vld [vmem:[%s3621_s19 + $0x130] sm:$0xff]  ;;  %v2686_v27 = vld [vmem:[%s3621_s19 + $0x138] sm:$0xff] }
 0x1cd   : > { %v2459_v18 = vsel %vm2383_vm4, %v2344_v40, 0.0  ;;  %v2474_v1 = vsel %vm2383_vm4, %v2349_v2, 0.0  ;;  %v2555_v26 = vsel %vm2383_vm4, %v2376_v50, 0.0  ;;  %v2350_v59 = vmul.f32 %v4751_v13, %v5165_v6  ;;  %v2648_v6 = vld [vmem:[%s3621_s19 + $0x8] sm:$0xff] }
 0x1ce   : > { %2808 = vst.msk [vmem:[%s5244_s30 + $0x100] sm:$0xff] %vm2775_vm3, %v2743_v8  ;;  %2776 = vst.msk [vmem:[%s5244_s30] sm:$0xff] %vm2775_vm3, %v2711_v28  ;;  %v2468_v52 = vsel %vm2383_vm4, %v2347_v24, 0.0  ;;  %v2379_v58 = vmul.f32 %v4751_v13, %v5162_v31  ;;  %v2348_v10 = vmul.f32 %v4751_v13, %v5183_v4  ;;  %v2381_v31 = vmul.f32 %v4751_v13, %v5180_v12  ;;  %v2652_v28 = vld [vmem:[%s3621_s19 + $0x28] sm:$0xff] }
 0x1cf   : > { %2466 = vadd.xlane.f32.xlu0 %v2465_v42  ;;  %v2477_v5 = vsel %vm2383_vm4, %v2350_v59, 0.0  ;;  %v2380_v46 = vmul.f32 %v4751_v13, %v5213_v35  ;;  %v2382_v63 = vmul.f32 %v4751_v13, %v5215_v57  ;;  %v2684_v24 = vld [vmem:[%s3621_s19 + $0x128] sm:$0xff] }
 0x1d0   : > { %2457 = vadd.xlane.f32.xlu1 %v2456_v37  ;;  %v2564_v16 = vsel %vm2383_vm4, %v2379_v58, 0.0  ;;  %v2471_v55 = vsel %vm2383_vm4, %v2348_v10, 0.0  ;;  %v2570_v44 = vsel %vm2383_vm4, %v2381_v31, 0.0 }
 0x1d1   : > { %v2395_v11 = vpop.xlane.xlu0 %2394  ;;  %v2567_v35 = vsel %vm2383_vm4, %v2380_v46, 0.0  ;;  %v2573_v17 = vsel %vm2383_vm4, %v2382_v63, 0.0 }
 0x1d2   : > { %v2586_v30 = vadd.f32 %v5224_v39, %v2395_v11 }
 0x1d3   : > { %2562 = vadd.xlane.f32.xlu0 %v2561_v60  ;;  %v2657_v60 = vld [vmem:[%s3621_s19 + $0x50] sm:$0xff] }
 0x1d4   : > { %2553 = vadd.xlane.f32.xlu1 %v2552_v19  ;;  %v2389_v62 = vpop.xlane.xlu1 %2388  ;;  %v2714_v34 = vmul.f32 %v2650_v3, %v2586_v30 }
 0x1d5   : > { %v2584_v33 = vadd.f32 %v5224_v39, %v2389_v62 }
 0x1d6   : > { %v2491_v53 = vpop.xlane.xlu0 %2490  ;;  %2779 = vst.msk [vmem:[%s5244_s30 + $0x18] sm:$0xff] %vm2775_vm3, %v2714_v34 }
 0x1d7   : > { %2460 = vadd.xlane.f32.xlu0 %v2459_v18  ;;  %v2712_v4 = vmul.f32 %v2648_v6, %v2584_v33  ;;  %v2618_v54 = vadd.f32 %v5224_v39, %v2491_v53  ;;  %v2658_v6 = vld [vmem:[%s3621_s19 + $0x58] sm:$0xff] }
 0x1d8   : > { %2475 = vadd.xlane.f32.xlu1 %v2474_v1  ;;  %v2404_v12 = vpop.xlane.xlu1 %2403 }
 0x1d9   : > { %2777 = vst.msk [vmem:[%s5244_s30 + $0x8] sm:$0xff] %vm2775_vm3, %v2712_v4  ;;  %v2746_v43 = vmul.f32 %v2682_v22, %v2618_v54  ;;  %v2589_v14 = vadd.f32 %v5224_v39, %v2404_v12  ;;  %v2687_v22 = vld [vmem:[%s3621_s19 + $0x140] sm:$0xff]  ;;  %v2690_v4 = vld [vmem:[%s3621_s19 + $0x158] sm:$0xff] }
 0x1db   : > { %2556 = vadd.xlane.f32.xlu0 %v2555_v26  ;;  %2811 = vst.msk [vmem:[%s5244_s30 + $0x118] sm:$0xff] %vm2775_vm3, %v2746_v43  ;;  %v2717_v7 = vmul.f32 %v2653_v45, %v2589_v14 }
 0x1dc   : > { %2469 = vadd.xlane.f32.xlu1 %v2468_v52  ;;  %v2689_v52 = vld [vmem:[%s3621_s19 + $0x150] sm:$0xff] }
 0x1dd   : > { %2782 = vst.msk [vmem:[%s5244_s30 + $0x30] sm:$0xff] %vm2775_vm3, %v2717_v7  ;;  %v2661_v7 = vld [vmem:[%s3621_s19 + $0x70] sm:$0xff] }
 0x1df   : > { %2478 = vadd.xlane.f32.xlu0 %v2477_v5  ;;  %v2655_v5 = vld [vmem:[%s3621_s19 + $0x40] sm:$0xff] }
 0x1e0   : > { %2565 = vadd.xlane.f32.xlu1 %v2564_v16 }
 0x1e3   : > { %2472 = vadd.xlane.f32.xlu0 %v2471_v55 }
 0x1e4   : > { %2571 = vadd.xlane.f32.xlu1 %v2570_v44  ;;  %v2485_v47 = vpop.xlane.xlu0 %2484  ;;  %v2656_v44 = vld [vmem:[%s3621_s19 + $0x48] sm:$0xff] }
 0x1e5   : > { %v2616_v32 = vadd.f32 %v5224_v39, %v2485_v47  ;;  %v2500_v25 = vpop.xlane.xlu1 %2499  ;;  %v2688_v47 = vld [vmem:[%s3621_s19 + $0x148] sm:$0xff] }
 0x1e6   : > { %v2621_v36 = vadd.f32 %v5224_v39, %v2500_v25  ;;  %v2693_v25 = vld [vmem:[%s3621_s19 + $0x170] sm:$0xff] }
 0x1e7   : > { %2568 = vadd.xlane.f32.xlu0 %v2567_v35  ;;  %v2744_v13 = vmul.f32 %v2680_v0, %v2616_v32 }
 0x1e8   : > { %v2749_v57 = vmul.f32 %v2685_v51, %v2621_v36 }
 0x1e9   : > { %2809 = vst.msk [vmem:[%s5244_s30 + $0x108] sm:$0xff] %vm2775_vm3, %v2744_v13  ;;  %v2398_v15 = vpop.xlane.xlu1 %2397 }
 0x1ea   : > { %v2407_v48 = vpop.xlane.xlu0 %2406  ;;  %2814 = vst.msk [vmem:[%s5244_s30 + $0x130] sm:$0xff] %vm2775_vm3, %v2749_v57  ;;  %v2587_v42 = vadd.f32 %v5224_v39, %v2398_v15  ;;  %v2662_v15 = vld [vmem:[%s3621_s19 + $0x78] sm:$0xff] }
 0x1eb   : > { %2574 = vadd.xlane.f32.xlu0 %v2573_v17  ;;  %v2590_v29 = vadd.f32 %v5224_v39, %v2407_v48  ;;  %v2659_v48 = vld [vmem:[%s3621_s19 + $0x60] sm:$0xff] }
 0x1ec   : > { %v2715_v9 = vmul.f32 %v2651_v38, %v2587_v42 }
 0x1ed   : > { %v2718_v23 = vmul.f32 %v2654_v56, %v2590_v29 }
 0x1ee   : > { %2780 = vst.msk [vmem:[%s5244_s30 + $0x20] sm:$0xff] %vm2775_vm3, %v2715_v9 }
 0x1ef   : > { %2783 = vst.msk [vmem:[%s5244_s30 + $0x38] sm:$0xff] %vm2775_vm3, %v2718_v23 }
 0x1f9   : > { %v2494_v37 = vpop.xlane.xlu1 %2493 }
 0x1fa   : > { %v2619_v61 = vadd.f32 %v5224_v39, %v2494_v37  ;;  %v2503_v21 = vpop.xlane.xlu0 %2502  ;;  %v2694_v37 = vld [vmem:[%s3621_s19 + $0x178] sm:$0xff] }
 0x1fb   : > { %v2622_v20 = vadd.f32 %v5224_v39, %v2503_v21 }
 0x1fc   : > { %v2747_v49 = vmul.f32 %v2683_v41, %v2619_v61 }
 0x1fd   : > { %v2750_v8 = vmul.f32 %v2686_v27, %v2622_v20  ;;  %v2416_v40 = vpop.xlane.xlu1 %2415  ;;  %v2691_v27 = vld [vmem:[%s3621_s19 + $0x160] sm:$0xff] }
 0x1fe   : > { %2812 = vst.msk [vmem:[%s5244_s30 + $0x120] sm:$0xff] %vm2775_vm3, %v2747_v49  ;;  %v2401_v19 = vpop.xlane.xlu0 %2400  ;;  %v2593_v2 = vadd.f32 %v5224_v39, %v2416_v40  ;;  %v2660_v40 = vld [vmem:[%s3621_s19 + $0x68] sm:$0xff] }
 0x1ff   : > { %2815 = vst.msk [vmem:[%s5244_s30 + $0x138] sm:$0xff] %vm2775_vm3, %v2750_v8  ;;  %v2588_v18 = vadd.f32 %v5224_v39, %v2401_v19 }
 0x200   : > { %v2721_v50 = vmul.f32 %v2657_v60, %v2593_v2  ;;  %v2665_v2 = vld [vmem:[%s3621_s19 + $0x90] sm:$0xff] }
 0x201   : > { %v2716_v1 = vmul.f32 %v2652_v28, %v2588_v18 }
 0x202   : > { %2786 = vst.msk [vmem:[%s5244_s30 + $0x50] sm:$0xff] %vm2775_vm3, %v2721_v50 }
 0x203   : > { %2781 = vst.msk [vmem:[%s5244_s30 + $0x28] sm:$0xff] %vm2775_vm3, %v2716_v1 }
 0x20d   : > { %v2497_v26 = vpop.xlane.xlu0 %2496 }
 0x20e   : > { %v2620_v59 = vadd.f32 %v5224_v39, %v2497_v26  ;;  %v2512_v58 = vpop.xlane.xlu1 %2511  ;;  %v2692_v26 = vld [vmem:[%s3621_s19 + $0x168] sm:$0xff] }
 0x20f   : > { %v2625_v3 = vadd.f32 %v5224_v39, %v2512_v58  ;;  %v2697_v58 = vld [vmem:[%s3621_s19 + $0x190] sm:$0xff] }
 0x210   : > { %v2748_v11 = vmul.f32 %v2684_v24, %v2620_v59 }
 0x211   : > { %v2753_v30 = vmul.f32 %v2689_v52, %v2625_v3 }
 0x212   : > { %2813 = vst.msk [vmem:[%s5244_s30 + $0x128] sm:$0xff] %vm2775_vm3, %v2748_v11  ;;  %v2410_v10 = vpop.xlane.xlu1 %2409 }
 0x213   : > { %v2419_v62 = vpop.xlane.xlu0 %2418  ;;  %2818 = vst.msk [vmem:[%s5244_s30 + $0x150] sm:$0xff] %vm2775_vm3, %v2753_v30  ;;  %v2591_v16 = vadd.f32 %v5224_v39, %v2410_v10  ;;  %v2666_v10 = vld [vmem:[%s3621_s19 + $0x98] sm:$0xff] }
 0x214   : > { %v2594_v31 = vadd.f32 %v5224_v39, %v2419_v62  ;;  %v2663_v62 = vld [vmem:[%s3621_s19 + $0x80] sm:$0xff] }
 0x215   : > { %v2719_v34 = vmul.f32 %v2655_v5, %v2591_v16 }
 0x216   : > { %v2722_v33 = vmul.f32 %v2658_v6, %v2594_v31  ;;  %v2506_v53 = vpop.xlane.xlu1 %2505 }
 0x217   : > { %v2515_v54 = vpop.xlane.xlu0 %2514  ;;  %2784 = vst.msk [vmem:[%s5244_s30 + $0x40] sm:$0xff] %vm2775_vm3, %v2719_v34  ;;  %v2623_v55 = vadd.f32 %v5224_v39, %v2506_v53  ;;  %v2698_v53 = vld [vmem:[%s3621_s19 + $0x198] sm:$0xff] }
 0x218   : > { %2787 = vst.msk [vmem:[%s5244_s30 + $0x58] sm:$0xff] %vm2775_vm3, %v2722_v33  ;;  %v2626_v46 = vadd.f32 %v5224_v39, %v2515_v54  ;;  %v2695_v54 = vld [vmem:[%s3621_s19 + $0x180] sm:$0xff] }
 0x219   : > { %v2751_v45 = vmul.f32 %v2687_v22, %v2623_v55 }
 0x21a   : > { %v2754_v12 = vmul.f32 %v2690_v4, %v2626_v46 }
 0x21b   : > { %v2413_v43 = vpop.xlane.xlu0 %2412  ;;  %2816 = vst.msk [vmem:[%s5244_s30 + $0x140] sm:$0xff] %vm2775_vm3, %v2751_v45 }
 0x21c   : > { %2819 = vst.msk [vmem:[%s5244_s30 + $0x158] sm:$0xff] %vm2775_vm3, %v2754_v12  ;;  %v2592_v14 = vadd.f32 %v5224_v39, %v2413_v43  ;;  %v2664_v43 = vld [vmem:[%s3621_s19 + $0x88] sm:$0xff] }
 0x21d   : > { %v2428_v35 = vpop.xlane.xlu1 %2427 }
 0x21e   : > { %v2597_v63 = vadd.f32 %v5224_v39, %v2428_v35  ;;  %v2720_v17 = vmul.f32 %v2656_v44, %v2592_v14  ;;  %v2669_v35 = vld [vmem:[%s3621_s19 + $0xb0] sm:$0xff] }
 0x21f   : > { %v2509_v32 = vpop.xlane.xlu0 %2508 }
 0x220   : > { %v2725_v0 = vmul.f32 %v2661_v7, %v2597_v63  ;;  %2785 = vst.msk [vmem:[%s5244_s30 + $0x48] sm:$0xff] %vm2775_vm3, %v2720_v17  ;;  %v2624_v51 = vadd.f32 %v5224_v39, %v2509_v32  ;;  %v2696_v32 = vld [vmem:[%s3621_s19 + $0x188] sm:$0xff] }
 0x221   : > { %v2524_v36 = vpop.xlane.xlu1 %2523 }
 0x222   : > { %2790 = vst.msk [vmem:[%s5244_s30 + $0x70] sm:$0xff] %vm2775_vm3, %v2725_v0  ;;  %v2629_v13 = vadd.f32 %v5224_v39, %v2524_v36  ;;  %v2752_v57 = vmul.f32 %v2688_v47, %v2624_v51  ;;  %v2701_v36 = vld [vmem:[%s3621_s19 + $0x1b0] sm:$0xff] }
 0x223   : > { %v2431_v56 = vpop.xlane.xlu0 %2430 }
 0x224   : > { %v2757_v38 = vmul.f32 %v2693_v25, %v2629_v13  ;;  %2817 = vst.msk [vmem:[%s5244_s30 + $0x148] sm:$0xff] %vm2775_vm3, %v2752_v57  ;;  %v2598_v29 = vadd.f32 %v5224_v39, %v2431_v56  ;;  %v2670_v56 = vld [vmem:[%s3621_s19 + $0xb8] sm:$0xff] }
 0x226   : > { %2822 = vst.msk [vmem:[%s5244_s30 + $0x170] sm:$0xff] %vm2775_vm3, %v2757_v38  ;;  %v2726_v23 = vmul.f32 %v2662_v15, %v2598_v29 }
 0x228   : > { %v2422_v42 = vpop.xlane.xlu1 %2421  ;;  %2791 = vst.msk [vmem:[%s5244_s30 + $0x78] sm:$0xff] %vm2775_vm3, %v2726_v23 }
 0x229   : > { %v2595_v9 = vadd.f32 %v5224_v39, %v2422_v42  ;;  %v2667_v42 = vld [vmem:[%s3621_s19 + $0xa0] sm:$0xff] }
 0x22b   : > { %v2723_v41 = vmul.f32 %v2659_v48, %v2595_v9  ;;  %v2527_v61 = vpop.xlane.xlu0 %2526 }
 0x22c   : > { %v2518_v21 = vpop.xlane.xlu1 %2517  ;;  %v2630_v20 = vadd.f32 %v5224_v39, %v2527_v61  ;;  %v2702_v61 = vld [vmem:[%s3621_s19 + $0x1b8] sm:$0xff] }
 0x22d   : > { %2788 = vst.msk [vmem:[%s5244_s30 + $0x60] sm:$0xff] %vm2775_vm3, %v2723_v41  ;;  %v2627_v49 = vadd.f32 %v5224_v39, %v2518_v21  ;;  %v2699_v21 = vld [vmem:[%s3621_s19 + $0x1a0] sm:$0xff] }
 0x22e   : > { %v2758_v8 = vmul.f32 %v2694_v37, %v2630_v20 }
 0x22f   : > { %v2755_v60 = vmul.f32 %v2691_v27, %v2627_v49 }
 0x230   : > { %v2425_v28 = vpop.xlane.xlu0 %2424  ;;  %2823 = vst.msk [vmem:[%s5244_s30 + $0x178] sm:$0xff] %vm2775_vm3, %v2758_v8 }
 0x231   : > { %v2596_v19 = vadd.f32 %v5224_v39, %v2425_v28  ;;  %v2440_v18 = vpop.xlane.xlu1 %2439  ;;  %2820 = vst.msk [vmem:[%s5244_s30 + $0x160] sm:$0xff] %vm2775_vm3, %v2755_v60  ;;  %v2668_v28 = vld [vmem:[%s3621_s19 + $0xa8] sm:$0xff] }
 0x232   : > { %v2601_v50 = vadd.f32 %v5224_v39, %v2440_v18  ;;  %v2673_v18 = vld [vmem:[%s3621_s19 + $0xd0] sm:$0xff] }
 0x233   : > { %v2724_v1 = vmul.f32 %v2660_v40, %v2596_v19 }
 0x234   : > { %v2729_v24 = vmul.f32 %v2665_v2, %v2601_v50  ;;  %v2521_v59 = vpop.xlane.xlu0 %2520 }
 0x235   : > { %2789 = vst.msk [vmem:[%s5244_s30 + $0x68] sm:$0xff] %vm2775_vm3, %v2724_v1  ;;  %v2628_v52 = vadd.f32 %v5224_v39, %v2521_v59  ;;  %v2536_v3 = vpop.xlane.xlu1 %2535  ;;  %v2700_v59 = vld [vmem:[%s3621_s19 + $0x1a8] sm:$0xff] }
 0x236   : > { %2794 = vst.msk [vmem:[%s5244_s30 + $0x90] sm:$0xff] %vm2775_vm3, %v2729_v24  ;;  %v2633_v11 = vadd.f32 %v5224_v39, %v2536_v3  ;;  %v2705_v3 = vld [vmem:[%s3621_s19 + $0x1d0] sm:$0xff] }
 0x237   : > { %v2756_v30 = vmul.f32 %v2692_v26, %v2628_v52 }
 0x238   : > { %v2761_v5 = vmul.f32 %v2697_v58, %v2633_v11 }
 0x239   : > { %2821 = vst.msk [vmem:[%s5244_s30 + $0x168] sm:$0xff] %vm2775_vm3, %v2756_v30 }
 0x23a   : > { %v2443_v6 = vpop.xlane.xlu0 %2442  ;;  %2826 = vst.msk [vmem:[%s5244_s30 + $0x190] sm:$0xff] %vm2775_vm3, %v2761_v5 }
 0x23b   : > { %v2434_v16 = vpop.xlane.xlu1 %2433  ;;  %v2602_v31 = vadd.f32 %v5224_v39, %v2443_v6  ;;  %v2674_v6 = vld [vmem:[%s3621_s19 + $0xd8] sm:$0xff] }
 0x23c   : > { %v2599_v34 = vadd.f32 %v5224_v39, %v2434_v16  ;;  %v2671_v16 = vld [vmem:[%s3621_s19 + $0xc0] sm:$0xff] }
 0x23d   : > { %v2730_v33 = vmul.f32 %v2666_v10, %v2602_v31 }
 0x23e   : > { %v2727_v22 = vmul.f32 %v2663_v62, %v2599_v34  ;;  %v2539_v4 = vpop.xlane.xlu0 %2538 }
 0x23f   : > { %2795 = vst.msk [vmem:[%s5244_s30 + $0x98] sm:$0xff] %vm2775_vm3, %v2730_v33  ;;  %v2530_v55 = vpop.xlane.xlu1 %2529  ;;  %v2634_v46 = vadd.f32 %v5224_v39, %v2539_v4  ;;  %v2706_v4 = vld [vmem:[%s3621_s19 + $0x1d8] sm:$0xff] }
 0x240   : > { %2792 = vst.msk [vmem:[%s5244_s30 + $0x80] sm:$0xff] %vm2775_vm3, %v2727_v22  ;;  %v2631_v45 = vadd.f32 %v5224_v39, %v2530_v55  ;;  %v2703_v55 = vld [vmem:[%s3621_s19 + $0x1c0] sm:$0xff] }
 0x241   : > { %v2762_v12 = vmul.f32 %v2698_v53, %v2634_v46 }
 0x242   : > { %v2759_v44 = vmul.f32 %v2695_v54, %v2631_v45 }
 0x243   : > { %v2437_v14 = vpop.xlane.xlu0 %2436  ;;  %2827 = vst.msk [vmem:[%s5244_s30 + $0x198] sm:$0xff] %vm2775_vm3, %v2762_v12 }
 0x244   : > { %v2600_v7 = vadd.f32 %v5224_v39, %v2437_v14  ;;  %v2452_v63 = vpop.xlane.xlu1 %2451  ;;  %2824 = vst.msk [vmem:[%s5244_s30 + $0x180] sm:$0xff] %vm2775_vm3, %v2759_v44  ;;  %v2672_v14 = vld [vmem:[%s3621_s19 + $0xc8] sm:$0xff] }
 0x245   : > { %v2605_v17 = vadd.f32 %v5224_v39, %v2452_v63  ;;  %v2677_v63 = vld [vmem:[%s3621_s19 + $0xf0] sm:$0xff] }
 0x246   : > { %v2728_v0 = vmul.f32 %v2664_v43, %v2600_v7 }
 0x247   : > { %v2733_v47 = vmul.f32 %v2669_v35, %v2605_v17  ;;  %v2533_v51 = vpop.xlane.xlu0 %2532 }
 0x248   : > { %2793 = vst.msk [vmem:[%s5244_s30 + $0x88] sm:$0xff] %vm2775_vm3, %v2728_v0  ;;  %v2632_v25 = vadd.f32 %v5224_v39, %v2533_v51  ;;  %v2704_v51 = vld [vmem:[%s3621_s19 + $0x1c8] sm:$0xff] }
 0x249   : > { %v2548_v13 = vpop.xlane.xlu1 %2547  ;;  %2798 = vst.msk [vmem:[%s5244_s30 + $0xb0] sm:$0xff] %vm2775_vm3, %v2733_v47 }
 0x24a   : > { %v2637_v57 = vadd.f32 %v5224_v39, %v2548_v13  ;;  %v2760_v38 = vmul.f32 %v2696_v32, %v2632_v25  ;;  %v2675_v13 = vld [vmem:[%s3621_s19 + $0xe0] sm:$0xff] }
 0x24c   : > { %v2765_v15 = vmul.f32 %v2701_v36, %v2637_v57  ;;  %v2455_v48 = vpop.xlane.xlu0 %2454  ;;  %2825 = vst.msk [vmem:[%s5244_s30 + $0x188] sm:$0xff] %vm2775_vm3, %v2760_v38 }
 0x24d   : > { %v2446_v29 = vpop.xlane.xlu1 %2445  ;;  %v2606_v9 = vadd.f32 %v5224_v39, %v2455_v48  ;;  %v2678_v48 = vld [vmem:[%s3621_s19 + $0xf8] sm:$0xff] }
 0x24e   : > { %2830 = vst.msk [vmem:[%s5244_s30 + $0x1b0] sm:$0xff] %vm2775_vm3, %v2765_v15  ;;  %v2603_v23 = vadd.f32 %v5224_v39, %v2446_v29  ;;  %v2707_v29 = vld [vmem:[%s3621_s19 + $0x1e0] sm:$0xff] }
 0x24f   : > { %v2734_v41 = vmul.f32 %v2670_v56, %v2606_v9 }
 0x250   : > { %v2731_v37 = vmul.f32 %v2667_v42, %v2603_v23  ;;  %v2551_v27 = vpop.xlane.xlu0 %2550 }
 0x251   : > { %2799 = vst.msk [vmem:[%s5244_s30 + $0xb8] sm:$0xff] %vm2775_vm3, %v2734_v41  ;;  %v2542_v20 = vpop.xlane.xlu1 %2541  ;;  %v2638_v49 = vadd.f32 %v5224_v39, %v2551_v27  ;;  %v2676_v27 = vld [vmem:[%s3621_s19 + $0xe8] sm:$0xff] }
 0x252   : > { %2796 = vst.msk [vmem:[%s5244_s30 + $0xa0] sm:$0xff] %vm2775_vm3, %v2731_v37  ;;  %v2635_v8 = vadd.f32 %v5224_v39, %v2542_v20  ;;  %v2709_v20 = vld [vmem:[%s3621_s19 + $0x1f0] sm:$0xff] }
 0x253   : > { %v2766_v60 = vmul.f32 %v2702_v61, %v2638_v49 }
 0x254   : > { %v2763_v40 = vmul.f32 %v2699_v21, %v2635_v8  ;;  %v2449_v19 = vpop.xlane.xlu0 %2448 }
 0x255   : > { %2831 = vst.msk [vmem:[%s5244_s30 + $0x1b8] sm:$0xff] %vm2775_vm3, %v2766_v60  ;;  %v2604_v2 = vadd.f32 %v5224_v39, %v2449_v19  ;;  %v2464_v50 = vpop.xlane.xlu1 %2463  ;;  %v2708_v19 = vld [vmem:[%s3621_s19 + $0x1e8] sm:$0xff] }
 0x256   : > { %2828 = vst.msk [vmem:[%s5244_s30 + $0x1a0] sm:$0xff] %vm2775_vm3, %v2763_v40  ;;  %v2609_v1 = vadd.f32 %v5224_v39, %v2464_v50 }
 0x257   : > { %v2732_v24 = vmul.f32 %v2668_v28, %v2604_v2 }
 0x258   : > { %v2737_v26 = vmul.f32 %v2673_v18, %v2609_v1  ;;  %v2545_v52 = vpop.xlane.xlu0 %2544  ;;  %v2710_v1 = vld [vmem:[%s3621_s19 + $0x1f8] sm:$0xff] }
 0x259   : > { %2797 = vst.msk [vmem:[%s5244_s30 + $0xa8] sm:$0xff] %vm2775_vm3, %v2732_v24  ;;  %v2636_v58 = vadd.f32 %v5224_v39, %v2545_v52  ;;  %v2560_v11 = vpop.xlane.xlu1 %2559 }
 0x25a   : > { %2802 = vst.msk [vmem:[%s5244_s30 + $0xd0] sm:$0xff] %vm2775_vm3, %v2737_v26  ;;  %v2641_v30 = vadd.f32 %v5224_v39, %v2560_v11 }
 0x25b   : > { %v2764_v5 = vmul.f32 %v2700_v59, %v2636_v58 }
 0x25c   : > { %v2769_v10 = vmul.f32 %v2705_v3, %v2641_v30  ;;  %v2467_v62 = vpop.xlane.xlu0 %2466 }
 0x25d   : > { %2829 = vst.msk [vmem:[%s5244_s30 + $0x1a8] sm:$0xff] %vm2775_vm3, %v2764_v5  ;;  %v2458_v31 = vpop.xlane.xlu1 %2457  ;;  %v2610_v34 = vadd.f32 %v5224_v39, %v2467_v62 }
 0x25e   : > { %2834 = vst.msk [vmem:[%s5244_s30 + $0x1d0] sm:$0xff] %vm2775_vm3, %v2769_v10  ;;  %v2607_v33 = vadd.f32 %v5224_v39, %v2458_v31 }
 0x25f   : > { %v2738_v22 = vmul.f32 %v2674_v6, %v2610_v34 }
 0x260   : > { %v2735_v53 = vmul.f32 %v2671_v16, %v2607_v33  ;;  %v2563_v54 = vpop.xlane.xlu0 %2562 }
 0x261   : > { %2803 = vst.msk [vmem:[%s5244_s30 + $0xd8] sm:$0xff] %vm2775_vm3, %v2738_v22  ;;  %v2554_v46 = vpop.xlane.xlu1 %2553  ;;  %v2642_v45 = vadd.f32 %v5224_v39, %v2563_v54 }
 0x262   : > { %2800 = vst.msk [vmem:[%s5244_s30 + $0xc0] sm:$0xff] %vm2775_vm3, %v2735_v53  ;;  %v2639_v12 = vadd.f32 %v5224_v39, %v2554_v46 }
 0x263   : > { %v2770_v44 = vmul.f32 %v2706_v4, %v2642_v45 }
 0x264   : > { %v2767_v43 = vmul.f32 %v2703_v55, %v2639_v12  ;;  %v2461_v7 = vpop.xlane.xlu0 %2460 }
 0x265   : > { %2835 = vst.msk [vmem:[%s5244_s30 + $0x1d8] sm:$0xff] %vm2775_vm3, %v2770_v44  ;;  %v2608_v35 = vadd.f32 %v5224_v39, %v2461_v7  ;;  %v2476_v17 = vpop.xlane.xlu1 %2475 }
 0x266   : > { %2832 = vst.msk [vmem:[%s5244_s30 + $0x1c0] sm:$0xff] %vm2775_vm3, %v2767_v43  ;;  %v2613_v0 = vadd.f32 %v5224_v39, %v2476_v17 }
 0x267   : > { %v2736_v47 = vmul.f32 %v2672_v14, %v2608_v35 }
 0x268   : > { %v2741_v32 = vmul.f32 %v2677_v63, %v2613_v0  ;;  %v2557_v25 = vpop.xlane.xlu0 %2556 }
 0x269   : > { %2801 = vst.msk [vmem:[%s5244_s30 + $0xc8] sm:$0xff] %vm2775_vm3, %v2736_v47  ;;  %v2640_v36 = vadd.f32 %v5224_v39, %v2557_v25  ;;  %v2470_v57 = vpop.xlane.xlu1 %2469 }
 0x26a   : > { %2806 = vst.msk [vmem:[%s5244_s30 + $0xf0] sm:$0xff] %vm2775_vm3, %v2741_v32  ;;  %v2611_v38 = vadd.f32 %v5224_v39, %v2470_v57 }
 0x26b   : > { %v2768_v15 = vmul.f32 %v2704_v51, %v2640_v36 }
 0x26c   : > { %v2739_v56 = vmul.f32 %v2675_v13, %v2611_v38  ;;  %v2479_v42 = vpop.xlane.xlu0 %2478 }
 0x26d   : > { %2833 = vst.msk [vmem:[%s5244_s30 + $0x1c8] sm:$0xff] %vm2775_vm3, %v2768_v15  ;;  %v2566_v9 = vpop.xlane.xlu1 %2565  ;;  %v2614_v23 = vadd.f32 %v5224_v39, %v2479_v42 }
 0x26e   : > { %2804 = vst.msk [vmem:[%s5244_s30 + $0xe0] sm:$0xff] %vm2775_vm3, %v2739_v56  ;;  %v2643_v41 = vadd.f32 %v5224_v39, %v2566_v9 }
 0x26f   : > { %v2742_v37 = vmul.f32 %v2678_v48, %v2614_v23 }
 0x270   : > { %v2771_v61 = vmul.f32 %v2707_v29, %v2643_v41  ;;  %v2473_v21 = vpop.xlane.xlu0 %2472 }
 0x271   : > { %2807 = vst.msk [vmem:[%s5244_s30 + $0xf8] sm:$0xff] %vm2775_vm3, %v2742_v37  ;;  %v2572_v49 = vpop.xlane.xlu1 %2571  ;;  %v2612_v8 = vadd.f32 %v5224_v39, %v2473_v21 }
 0x272   : > { %2836 = vst.msk [vmem:[%s5244_s30 + $0x1e0] sm:$0xff] %vm2775_vm3, %v2771_v61  ;;  %v2645_v60 = vadd.f32 %v5224_v39, %v2572_v49 }
 0x273   : > { %v2740_v40 = vmul.f32 %v2676_v27, %v2612_v8 }
 0x274   : > { %v2773_v28 = vmul.f32 %v2709_v20, %v2645_v60  ;;  %v2569_v2 = vpop.xlane.xlu0 %2568 }
 0x275   : > { %2805 = vst.msk [vmem:[%s5244_s30 + $0xe8] sm:$0xff] %vm2775_vm3, %v2740_v40  ;;  %v2644_v18 = vadd.f32 %v5224_v39, %v2569_v2 }
 0x276   : > { %2838 = vst.msk [vmem:[%s5244_s30 + $0x1f0] sm:$0xff] %vm2775_vm3, %v2773_v28 }
 0x277   : > { %v2772_v50 = vmul.f32 %v2708_v19, %v2644_v18 }
 0x278   : > { %v2575_v24 = vpop.xlane.xlu0 %2574 }
 0x279   : > { %2837 = vst.msk [vmem:[%s5244_s30 + $0x1e8] sm:$0xff] %vm2775_vm3, %v2772_v50  ;;  %v2646_v26 = vadd.f32 %v5224_v39, %v2575_v24 }
 0x27b   : > { %v2774_v59 = vmul.f32 %v2710_v1, %v2646_v26 }
 0x27d   : > { %2839 = vst.msk [vmem:[%s5244_s30 + $0x1f8] sm:$0xff] %vm2775_vm3, %v2774_v59 }
 0x27e PF: > { %s21_s29 = sadd.s32 1, %s3544_s29  }
 0x27f   : > { %p18_p4 = scmp.ge.s32.totalorder %s21_s29, 4  }
 0x281   :  { %20 = sbr.rel (!%p18_p4) target bundleno = 3 (0x3), region = 93 }

</bundles_post_ra>
